<compile_context>
chip_gen: v7x
topology: tpu7x:2x2x1
jax: 0.10.0
libtpu: 0.0.40
codegen_flags: <defaults>
</compile_context>

<pallas_src>
import functools

import numpy as np

import jax
import jax.numpy as jnp
from jax.experimental import pallas as pl
from jax.experimental.pallas import tpu as pltpu


# ----------------------------------------------------------------------------
# In-kernel building blocks
# ----------------------------------------------------------------------------
def _conv_stage(pad_src, col_ref, w_ref, s_ref, b_ref, *, wp, relu):
    """Conv2d(3x3, padding=1) + folded BatchNorm (+ ReLU) as ONE MXU matmul.

    Activations are 2-D (rows, channels); a row is a flattened (batch, i, j)
    position of the zero-padded plane, so rows = N*(H+2)*(W+2) and `wp` = W+2
    is the padded row stride.

    pad_src : Ref (M, Cin)       zero-padded input activation (f32)
    col_ref : Ref (M, 9*Cin)     im2col scratch (VMEM, f32)
    w_ref   : Ref (9*Cin, Cout)  bf16 weights, tap-major ((kh,kw) outer, Cin inner)
    s_ref   : Ref (1, Cout)      folded BN scale (f32)
    b_ref   : Ref (1, Cout)      folded conv-bias + BN shift (f32)

    Returns y: (M, Cout) f32.  Row b = n*(H+2)*(W+2) + i*(W+2) + j holds the
    conv output for pixel (i, j) when i < H and j < W; remaining "junk" rows
    are finite garbage that the following constant pool/mean matrix ignores
    (zero columns).
    """
    m, cin = pad_src.shape
    # Zero-init so junk rows stay finite (0 * NaN would otherwise leak NaNs
    # through the pooling matmul).
    col_ref[...] = jnp.zeros(col_ref.shape, jnp.float32)
    k = 0
    for kh in range(3):          # static unroll: 9 shifted row-slice copies
        for kw in range(3):
            off = kh * wp + kw
            col_ref[0:m - off, k * cin:(k + 1) * cin] = pad_src[off:m, :]
            k += 1
    # Single K = 9*Cin matmul: bf16 operands, f32 accumulation.
    y = jnp.dot(col_ref[...].astype(jnp.bfloat16), w_ref[...],
                preferred_element_type=jnp.float32)
    y = y * s_ref[...] + b_ref[...]
    if relu:
        y = jnp.maximum(y, 0.0)
    return y


def _conv_branch(pad1_ref, col1, pad2, col2, pad3, col3,
                 w1, s1, b1, w2, s2, b2, w3, s3, b3,
                 p1_ref, p2_ref, fmean_ref, w_img):
    """One conv_x / conv_y branch: 3x (conv+BN[+ReLU]), 2 pools, spatial mean."""
    # stage 1 on the (H+2)x(W+2) padded plane
    y1 = _conv_stage(pad1_ref, col1, w1, s1, b1, wp=w_img + 2, relu=True)
    # AvgPool2d(2,2) + zero-padding of the next stage, as one constant matmul.
    pad2[...] = jnp.dot(p1_ref[...], y1, preferred_element_type=jnp.float32)
    # stage 2 on the (H/2+2)x(W/2+2) padded plane
    y2 = _conv_stage(pad2, col2, w2, s2, b2, wp=w_img // 2 + 2, relu=True)
    pad3[...] = jnp.dot(p2_ref[...], y2, preferred_element_type=jnp.float32)
    # stage 3 on the (H/4+2)x(W/4+2) padded plane (BN, no ReLU)
    y3 = _conv_stage(pad3, col3, w3, s3, b3, wp=w_img // 4 + 2, relu=False)
    # AvgPool2d(2, stride=1) on the final 2x2 map + Flatten == spatial mean,
    # again as a constant matmul -> (N, Cout3).
    return jnp.dot(fmean_ref[...], y3, preferred_element_type=jnp.float32)


def _mine_conv_kernel(
        xpad_ref, ypad_ref,
        wx1, sx1, bx1, wx2, sx2, bx2, wx3, sx3, bx3,
        wy1, sy1, by1, wy2, sy2, by2, wy3, sy3, by3,
        p1_ref, p2_ref, fmean_ref,
        fw1_ref, fb1_ref, fw2_ref, fb2_ref,
        o_ref,
        colx1, padx2, colx2, padx3, colx3,
        coly1, pady2, coly2, pady3, coly3,
        *, w_img):
    fx = _conv_branch(xpad_ref, colx1, padx2, colx2, padx3, colx3,
                      wx1, sx1, bx1, wx2, sx2, bx2, wx3, sx3, bx3,
                      p1_ref, p2_ref, fmean_ref, w_img)
    fy = _conv_branch(ypad_ref, coly1, pady2, coly2, pady3, coly3,
                      wy1, sy1, by1, wy2, sy2, by2, wy3, sy3, by3,
                      p1_ref, p2_ref, fmean_ref, w_img)
    feat = fx + fy                                           # (N, IC), f32
    hid = jnp.dot(feat, fw1_ref[...],
                  preferred_element_type=jnp.float32) + fb1_ref[...]
    out = jnp.dot(hid, fw2_ref[...],
                  preferred_element_type=jnp.float32) + fb2_ref[...]
    o_ref[...] = out


# ----------------------------------------------------------------------------
# Glue: constant pooling / padding / mean operators (built once, tiny)
# ----------------------------------------------------------------------------
def _pool_pad_matrix(n, h_in, w_in):
    """AvgPool2d(2,2) of a conv output on the (h_in+2)x(w_in+2) padded row
    space, combined with zero-padding the pooled map into the next stage's
    (h_in//2+2)x(w_in//2+2) padded row space.  Applied as  next = P @ y."""
    hp_in, wp_in = h_in + 2, w_in + 2
    h_out, w_out = h_in // 2, w_in // 2
    hp_out, wp_out = h_out + 2, w_out + 2
    mat = np.zeros((n * hp_out * wp_out, n * hp_in * wp_in), np.float32)
    for b in range(n):
        for i2 in range(h_out):
            for j2 in range(w_out):
                row = b * hp_out * wp_out + (i2 + 1) * wp_out + (j2 + 1)
                for di in range(2):
                    for dj in range(2):
                        col = (b * hp_in * wp_in
                               + (2 * i2 + di) * wp_in + (2 * j2 + dj))
                        mat[row, col] = 0.25
    return mat


def _final_mean_matrix(n, h_in, w_in):
    """AvgPool2d(2, stride=1) on the final h_in x w_in (== 2x2) map + Flatten
    == spatial mean; selects the valid rows of the padded row space."""
    hp, wp = h_in + 2, w_in + 2
    mat = np.zeros((n, n * hp * wp), np.float32)
    for b in range(n):
        for i in range(h_in):
            for j in range(w_in):
                mat[b, b * hp * wp + i * wp + j] = 1.0 / (h_in * w_in)
    return mat


# ----------------------------------------------------------------------------
# Wrapper
# ----------------------------------------------------------------------------
def mine_conv_forward(x_nchw, y_nchw, params_x, params_y, fc_params):
    """Forward pass of Mine_Conv: fc(conv_x(x) + conv_y(y)), one pallas_call."""
    n, cx, h, w = x_nchw.shape
    cy = y_nchw.shape[1]
    # The fc head (Linear(IC, IC)) implies the last conv map is 2x2 -> 8x8 input.
    assert h % 4 == 0 and w % 4 == 0 and (h // 4, w // 4) == (2, 2)

    # ---- pure layout plumbing: NCHW -> zero-padded (rows x channels) --------
    def to_padded_rows(v_nchw):
        v = jnp.transpose(v_nchw, (0, 2, 3, 1)).astype(jnp.float32)   # NHWC
        v = jnp.pad(v, ((0, 0), (1, 1), (1, 1), (0, 0)))              # zero pad
        return v.reshape(n * (h + 2) * (w + 2), -1)

    xpad = to_padded_rows(x_nchw)
    ypad = to_padded_rows(y_nchw)

    # Constant pooling / padding / spatial-mean matrices (shared by branches).
    p1 = jnp.asarray(_pool_pad_matrix(n, h, w))
    p2 = jnp.asarray(_pool_pad_matrix(n, h // 2, w // 2))
    fmean = jnp.asarray(_final_mean_matrix(n, h // 4, w // 4))

    def flat(params):
        out = []
        for (w2d, s, b) in params:
            out += [w2d.astype(jnp.bfloat16), s, b]    # bf16 MXU operands
        return out

    fw1, fb1, fw2, fb2 = fc_params
    inputs = ([xpad, ypad] + flat(params_x) + flat(params_y)
              + [p1, p2, fmean, fw1, fb1, fw2, fb2])

    m1 = n * (h + 2) * (w + 2)
    m2 = n * (h // 2 + 2) * (w // 2 + 2)
    m3 = n * (h // 4 + 2) * (w // 4 + 2)

    def branch_scratch(cin, params):
        c1 = params[0][0].shape[1]
        c2 = params[1][0].shape[1]
        return [
            pltpu.VMEM((m1, 9 * cin), jnp.float32),   # im2col, stage 1
            pltpu.VMEM((m2, c1), jnp.float32),        # padded activation, stage 2
            pltpu.VMEM((m2, 9 * c1), jnp.float32),    # im2col, stage 2
            pltpu.VMEM((m3, c2), jnp.float32),        # padded activation, stage 3
            pltpu.VMEM((m3, 9 * c2), jnp.float32),    # im2col, stage 3
        ]

    scratch = branch_scratch(cx, params_x) + branch_scratch(cy, params_y)

    return pl.pallas_call(
        functools.partial(_mine_conv_kernel, w_img=w),
        out_shape=jax.ShapeDtypeStruct((n, 1), jnp.float32),
        scratch_shapes=scratch,
    )(*inputs)


# ----------------------------------------------------------------------------
# Parameter setup (deterministic, synthetic) + pure-JAX reference
# ----------------------------------------------------------------------------
def _fold_bn(conv_b, gamma, beta, mean, var, eps=1e-5):
    s = gamma / jnp.sqrt(var + eps)
    bias = (conv_b - mean) * s + beta
    return s[None, :], bias[None, :]          # (1, Cout) each


def make_conv_branch_params(key, c_in, inter_channels):
    c1 = max(c_in // 2, inter_channels)
    c2 = max(c_in // 4, inter_channels)
    c3 = inter_channels
    dims = [(c_in, c1), (c1, c2), (c2, c3)]
    params = []
    for (ci, co) in dims:
        key, kw, kb, kg, kbe, km, kv = jax.random.split(key, 7)
        w9 = 0.1 * jax.random.normal(kw, (9, ci, co), jnp.float32)
        cb = 0.05 * jax.random.normal(kb, (co,), jnp.float32)
        gamma = 1.0 + 0.1 * jax.random.normal(kg, (co,), jnp.float32)
        beta = 0.1 * jax.random.normal(kbe, (co,), jnp.float32)
        mean = 0.1 * jax.random.normal(km, (co,), jnp.float32)
        var = 1.0 + 0.1 * jax.random.uniform(kv, (co,), jnp.float32)
        scale, bias = _fold_bn(cb, gamma, beta, mean, var)
        # (kh, kw, cin)-major weight matrix for the single K = 9*Cin matmul.
        params.append((w9.reshape(9 * ci, co), scale, bias))
    return params


def reference_forward(x_nchw, y_nchw, params_x, params_y, fc_params):
    """Pure-JAX (f32) reference of the same eval-mode forward pass."""
    def conv_bn(v, w2d, s, b, relu):
        nb, hh, ww, c = v.shape
        vp = jnp.pad(v, ((0, 0), (1, 1), (1, 1), (0, 0)))
        cols = jnp.concatenate(
            [vp[:, kh:kh + hh, kw:kw + ww, :]
             for kh in range(3) for kw in range(3)],
            axis=-1).reshape(nb * hh * ww, 9 * c)
        y = cols @ w2d * s + b
        if relu:
            y = jnp.maximum(y, 0.0)
        return y.reshape(nb, hh, ww, -1)

    def pool2(v):
        nb, hh, ww, c = v.shape
        return v.reshape(nb, hh // 2, 2, ww // 2, 2, c).mean(axis=(2, 4))

    def branch(v_nchw, params):
        v = jnp.transpose(v_nchw, (0, 2, 3, 1)).astype(jnp.float32)
        (w1, s1, b1), (w2, s2, b2), (w3, s3, b3) = params
        v = pool2(conv_bn(v, w1, s1, b1, True))
        v = pool2(conv_bn(v, w2, s2, b2, True))
        v = conv_bn(v, w3, s3, b3, False)
        return v.mean(axis=(1, 2))     # AvgPool2d(2,1) on the 2x2 map + Flatten

    fw1, fb1, fw2, fb2 = fc_params
    f = branch(x_nchw, params_x) + branch(y_nchw, params_y)
    return (f @ fw1 + fb1) @ fw2 + fb2


# ----------------------------------------------------------------------------
if __name__ == "__main__":
    key = jax.random.PRNGKey(0)
    k_x, k_y, k_px, k_py, k_f1, k_f2, k_fb1, k_fb2 = jax.random.split(key, 8)

    # Shapes implied by the module: batch=2, in_channels=4, inter_channels=8,
    # spatial 8x8 so that /2, /2, AvgPool2d(2,1) -> 1x1 and Flatten gives IC.
    N, CX, CY, IC, H, W = 2, 4, 4, 8, 8, 8

    x = jax.random.normal(k_x, (N, CX, H, W), jnp.float32)   # NCHW like PyTorch
    y = jax.random.normal(k_y, (N, CY, H, W), jnp.float32)

    params_x = make_conv_branch_params(k_px, CX, IC)
    params_y = make_conv_branch_params(k_py, CY, IC)
    fc_params = (
        0.1 * jax.random.normal(k_f1, (IC, IC), jnp.float32),
        0.05 * jax.random.normal(k_fb1, (1, IC), jnp.float32),
        0.1 * jax.random.normal(k_f2, (IC, 1), jnp.float32),
        0.05 * jax.random.normal(k_fb2, (1, 1), jnp.float32),
    )

    out = jax.block_until_ready(
        mine_conv_forward(x, y, params_x, params_y, fc_params))
    assert out.shape == (N, 1), out.shape

    ref = reference_forward(x, y, params_x, params_y, fc_params)
    assert jnp.allclose(out, ref, rtol=5e-2, atol=5e-2), (out, ref)

    print("KERNEL_OK")
</pallas_src>

<mosaic_0001>
module attributes {stable_mosaic.version = 11 : i64} {
  func.func @_mine_conv_kernel(%arg0: memref<200x4xf32, #tpu.memory_space<vmem>>, %arg1: memref<200x4xf32, #tpu.memory_space<vmem>>, %arg2: memref<36x8xbf16, #tpu.memory_space<vmem>>, %arg3: memref<1x8xf32, #tpu.memory_space<vmem>>, %arg4: memref<1x8xf32, #tpu.memory_space<vmem>>, %arg5: memref<72x8xbf16, #tpu.memory_space<vmem>>, %arg6: memref<1x8xf32, #tpu.memory_space<vmem>>, %arg7: memref<1x8xf32, #tpu.memory_space<vmem>>, %arg8: memref<72x8xbf16, #tpu.memory_space<vmem>>, %arg9: memref<1x8xf32, #tpu.memory_space<vmem>>, %arg10: memref<1x8xf32, #tpu.memory_space<vmem>>, %arg11: memref<36x8xbf16, #tpu.memory_space<vmem>>, %arg12: memref<1x8xf32, #tpu.memory_space<vmem>>, %arg13: memref<1x8xf32, #tpu.memory_space<vmem>>, %arg14: memref<72x8xbf16, #tpu.memory_space<vmem>>, %arg15: memref<1x8xf32, #tpu.memory_space<vmem>>, %arg16: memref<1x8xf32, #tpu.memory_space<vmem>>, %arg17: memref<72x8xbf16, #tpu.memory_space<vmem>>, %arg18: memref<1x8xf32, #tpu.memory_space<vmem>>, %arg19: memref<1x8xf32, #tpu.memory_space<vmem>>, %arg20: memref<72x200xf32, #tpu.memory_space<vmem>>, %arg21: memref<32x72xf32, #tpu.memory_space<vmem>>, %arg22: memref<2x32xf32, #tpu.memory_space<vmem>>, %arg23: memref<8x8xf32, #tpu.memory_space<vmem>>, %arg24: memref<1x8xf32, #tpu.memory_space<vmem>>, %arg25: memref<8x1xf32, #tpu.memory_space<vmem>>, %arg26: memref<1x1xf32, #tpu.memory_space<vmem>>, %arg27: memref<2x1xf32, #tpu.memory_space<vmem>>, %arg28: memref<200x36xf32, #tpu.memory_space<vmem>>, %arg29: memref<72x8xf32, #tpu.memory_space<vmem>>, %arg30: memref<72x72xf32, #tpu.memory_space<vmem>>, %arg31: memref<32x8xf32, #tpu.memory_space<vmem>>, %arg32: memref<32x72xf32, #tpu.memory_space<vmem>>, %arg33: memref<200x36xf32, #tpu.memory_space<vmem>>, %arg34: memref<72x8xf32, #tpu.memory_space<vmem>>, %arg35: memref<72x72xf32, #tpu.memory_space<vmem>>, %arg36: memref<32x8xf32, #tpu.memory_space<vmem>>, %arg37: memref<32x72xf32, #tpu.memory_space<vmem>>) attributes {dimension_semantics = [], scalar_prefetch = 0 : i64, scratch_operands = 10 : i64, tpu.core_type = #tpu.core_type<tc>} {
    %cst = arith.constant 0.000000e+00 : f32
    %0 = vector.broadcast %cst : f32 to vector<200x36xf32>
    %c0 = arith.constant 0 : index
    %c0_0 = arith.constant 0 : index
    %1 = vector.load %arg28[%c0, %c0_0] : memref<200x36xf32, #tpu.memory_space<vmem>>, vector<200x36xf32>
    tpu.vector_store %arg28[%c0, %c0_0], %0 {strides = array<i32>} : memref<200x36xf32, #tpu.memory_space<vmem>>, vector<200x36xf32>,
    %c0_1 = arith.constant 0 : index
    %c0_2 = arith.constant 0 : index
    %2 = vector.load %arg0[%c0_1, %c0_2] : memref<200x4xf32, #tpu.memory_space<vmem>>, vector<200x4xf32>
    %c0_3 = arith.constant 0 : index
    %c0_4 = arith.constant 0 : index
    %3 = vector.load %arg28[%c0_3, %c0_4] : memref<200x36xf32, #tpu.memory_space<vmem>>, vector<200x4xf32>
    tpu.vector_store %arg28[%c0_3, %c0_4], %2 {strides = array<i32>} : memref<200x36xf32, #tpu.memory_space<vmem>>, vector<200x4xf32>,
    %c1 = arith.constant 1 : index
    %c0_5 = arith.constant 0 : index
    %4 = vector.load %arg0[%c1, %c0_5] : memref<200x4xf32, #tpu.memory_space<vmem>>, vector<199x4xf32>
    %c0_6 = arith.constant 0 : index
    %c4 = arith.constant 4 : index
    %5 = vector.load %arg28[%c0_6, %c4] : memref<200x36xf32, #tpu.memory_space<vmem>>, vector<199x4xf32>
    tpu.vector_store %arg28[%c0_6, %c4], %4 {strides = array<i32>} : memref<200x36xf32, #tpu.memory_space<vmem>>, vector<199x4xf32>,
    %c2 = arith.constant 2 : index
    %c0_7 = arith.constant 0 : index
    %6 = vector.load %arg0[%c2, %c0_7] : memref<200x4xf32, #tpu.memory_space<vmem>>, vector<198x4xf32>
    %c0_8 = arith.constant 0 : index
    %c8 = arith.constant 8 : index
    %7 = vector.load %arg28[%c0_8, %c8] : memref<200x36xf32, #tpu.memory_space<vmem>>, vector<198x4xf32>
    tpu.vector_store %arg28[%c0_8, %c8], %6 {strides = array<i32>} : memref<200x36xf32, #tpu.memory_space<vmem>>, vector<198x4xf32>,
    %c10 = arith.constant 10 : index
    %c0_9 = arith.constant 0 : index
    %8 = vector.load %arg0[%c10, %c0_9] : memref<200x4xf32, #tpu.memory_space<vmem>>, vector<190x4xf32>
    %c0_10 = arith.constant 0 : index
    %c12 = arith.constant 12 : index
    %9 = vector.load %arg28[%c0_10, %c12] : memref<200x36xf32, #tpu.memory_space<vmem>>, vector<190x4xf32>
    tpu.vector_store %arg28[%c0_10, %c12], %8 {strides = array<i32>} : memref<200x36xf32, #tpu.memory_space<vmem>>, vector<190x4xf32>,
    %c11 = arith.constant 11 : index
    %c0_11 = arith.constant 0 : index
    %10 = vector.load %arg0[%c11, %c0_11] : memref<200x4xf32, #tpu.memory_space<vmem>>, vector<189x4xf32>
    %c0_12 = arith.constant 0 : index
    %c16 = arith.constant 16 : index
    %11 = vector.load %arg28[%c0_12, %c16] : memref<200x36xf32, #tpu.memory_space<vmem>>, vector<189x4xf32>
    tpu.vector_store %arg28[%c0_12, %c16], %10 {strides = array<i32>} : memref<200x36xf32, #tpu.memory_space<vmem>>, vector<189x4xf32>,
    %c12_13 = arith.constant 12 : index
    %c0_14 = arith.constant 0 : index
    %12 = vector.load %arg0[%c12_13, %c0_14] : memref<200x4xf32, #tpu.memory_space<vmem>>, vector<188x4xf32>
    %c0_15 = arith.constant 0 : index
    %c20 = arith.constant 20 : index
    %13 = vector.load %arg28[%c0_15, %c20] : memref<200x36xf32, #tpu.memory_space<vmem>>, vector<188x4xf32>
    tpu.vector_store %arg28[%c0_15, %c20], %12 {strides = array<i32>} : memref<200x36xf32, #tpu.memory_space<vmem>>, vector<188x4xf32>,
    %c20_16 = arith.constant 20 : index
    %c0_17 = arith.constant 0 : index
    %14 = vector.load %arg0[%c20_16, %c0_17] : memref<200x4xf32, #tpu.memory_space<vmem>>, vector<180x4xf32>
    %c0_18 = arith.constant 0 : index
    %c24 = arith.constant 24 : index
    %15 = vector.load %arg28[%c0_18, %c24] : memref<200x36xf32, #tpu.memory_space<vmem>>, vector<180x4xf32>
    tpu.vector_store %arg28[%c0_18, %c24], %14 {strides = array<i32>} : memref<200x36xf32, #tpu.memory_space<vmem>>, vector<180x4xf32>,
    %c21 = arith.constant 21 : index
    %c0_19 = arith.constant 0 : index
    %16 = vector.load %arg0[%c21, %c0_19] : memref<200x4xf32, #tpu.memory_space<vmem>>, vector<179x4xf32>
    %c0_20 = arith.constant 0 : index
    %c28 = arith.constant 28 : index
    %17 = vector.load %arg28[%c0_20, %c28] : memref<200x36xf32, #tpu.memory_space<vmem>>, vector<179x4xf32>
    tpu.vector_store %arg28[%c0_20, %c28], %16 {strides = array<i32>} : memref<200x36xf32, #tpu.memory_space<vmem>>, vector<179x4xf32>,
    %c22 = arith.constant 22 : index
    %c0_21 = arith.constant 0 : index
    %18 = vector.load %arg0[%c22, %c0_21] : memref<200x4xf32, #tpu.memory_space<vmem>>, vector<178x4xf32>
    %c0_22 = arith.constant 0 : index
    %c32 = arith.constant 32 : index
    %19 = vector.load %arg28[%c0_22, %c32] : memref<200x36xf32, #tpu.memory_space<vmem>>, vector<178x4xf32>
    tpu.vector_store %arg28[%c0_22, %c32], %18 {strides = array<i32>} : memref<200x36xf32, #tpu.memory_space<vmem>>, vector<178x4xf32>,
    %c0_23 = arith.constant 0 : index
    %c0_24 = arith.constant 0 : index
    %20 = vector.load %arg28[%c0_23, %c0_24] : memref<200x36xf32, #tpu.memory_space<vmem>>, vector<200x36xf32>
    %21 = arith.truncf %20 : vector<200x36xf32> to vector<200x36xbf16>
    %c0_25 = arith.constant 0 : index
    %c0_26 = arith.constant 0 : index
    %22 = vector.load %arg2[%c0_25, %c0_26] : memref<36x8xbf16, #tpu.memory_space<vmem>>, vector<36x8xbf16>
    %cst_27 = arith.constant dense<0.000000e+00> : vector<200x8xf32>
    %23 = tpu.matmul %21, %22, %cst_27 {dimension_numbers = #tpu.dot_dimension_numbers<[1], [0], [0], [1], [0, 0, 1, 1], [], []>} : vector<200x36xbf16>, vector<36x8xbf16>, vector<200x8xf32> -> vector<200x8xf32>
    %c0_28 = arith.constant 0 : index
    %c0_29 = arith.constant 0 : index
    %24 = vector.load %arg3[%c0_28, %c0_29] : memref<1x8xf32, #tpu.memory_space<vmem>>, vector<1x8xf32>
    %25 = vector.broadcast %24 : vector<1x8xf32> to vector<200x8xf32>
    %26 = arith.mulf %23, %25 : vector<200x8xf32>
    %c0_30 = arith.constant 0 : index
    %c0_31 = arith.constant 0 : index
    %27 = vector.load %arg4[%c0_30, %c0_31] : memref<1x8xf32, #tpu.memory_space<vmem>>, vector<1x8xf32>
    %28 = vector.broadcast %27 : vector<1x8xf32> to vector<200x8xf32>
    %29 = arith.addf %26, %28 : vector<200x8xf32>
    %cst_32 = arith.constant 0.000000e+00 : f32
    %30 = vector.broadcast %cst_32 : f32 to vector<200x8xf32>
    %31 = arith.maximumf %29, %30 : vector<200x8xf32>
    %c0_33 = arith.constant 0 : index
    %c0_34 = arith.constant 0 : index
    %32 = vector.load %arg20[%c0_33, %c0_34] : memref<72x200xf32, #tpu.memory_space<vmem>>, vector<72x200xf32>
    %cst_35 = arith.constant dense<0.000000e+00> : vector<72x8xf32>
    %33 = tpu.matmul %32, %31, %cst_35 {dimension_numbers = #tpu.dot_dimension_numbers<[1], [0], [0], [1], [0, 0, 1, 1], [], []>} : vector<72x200xf32>, vector<200x8xf32>, vector<72x8xf32> -> vector<72x8xf32>
    %c0_36 = arith.constant 0 : index
    %c0_37 = arith.constant 0 : index
    %34 = vector.load %arg29[%c0_36, %c0_37] : memref<72x8xf32, #tpu.memory_space<vmem>>, vector<72x8xf32>
    tpu.vector_store %arg29[%c0_36, %c0_37], %33 {strides = array<i32>} : memref<72x8xf32, #tpu.memory_space<vmem>>, vector<72x8xf32>,
    %cst_38 = arith.constant 0.000000e+00 : f32
    %35 = vector.broadcast %cst_38 : f32 to vector<72x72xf32>
    %c0_39 = arith.constant 0 : index
    %c0_40 = arith.constant 0 : index
    %36 = vector.load %arg30[%c0_39, %c0_40] : memref<72x72xf32, #tpu.memory_space<vmem>>, vector<72x72xf32>
    tpu.vector_store %arg30[%c0_39, %c0_40], %35 {strides = array<i32>} : memref<72x72xf32, #tpu.memory_space<vmem>>, vector<72x72xf32>,
    %c0_41 = arith.constant 0 : index
    %c0_42 = arith.constant 0 : index
    %37 = vector.load %arg29[%c0_41, %c0_42] : memref<72x8xf32, #tpu.memory_space<vmem>>, vector<72x8xf32>
    %c0_43 = arith.constant 0 : index
    %c0_44 = arith.constant 0 : index
    %38 = vector.load %arg30[%c0_43, %c0_44] : memref<72x72xf32, #tpu.memory_space<vmem>>, vector<72x8xf32>
    tpu.vector_store %arg30[%c0_43, %c0_44], %37 {strides = array<i32>} : memref<72x72xf32, #tpu.memory_space<vmem>>, vector<72x8xf32>,
    %c1_45 = arith.constant 1 : index
    %c0_46 = arith.constant 0 : index
    %39 = vector.load %arg29[%c1_45, %c0_46] : memref<72x8xf32, #tpu.memory_space<vmem>>, vector<71x8xf32>
    %c0_47 = arith.constant 0 : index
    %c8_48 = arith.constant 8 : index
    %40 = vector.load %arg30[%c0_47, %c8_48] : memref<72x72xf32, #tpu.memory_space<vmem>>, vector<71x8xf32>
    tpu.vector_store %arg30[%c0_47, %c8_48], %39 {strides = array<i32>} : memref<72x72xf32, #tpu.memory_space<vmem>>, vector<71x8xf32>,
    %c2_49 = arith.constant 2 : index
    %c0_50 = arith.constant 0 : index
    %41 = vector.load %arg29[%c2_49, %c0_50] : memref<72x8xf32, #tpu.memory_space<vmem>>, vector<70x8xf32>
    %c0_51 = arith.constant 0 : index
    %c16_52 = arith.constant 16 : index
    %42 = vector.load %arg30[%c0_51, %c16_52] : memref<72x72xf32, #tpu.memory_space<vmem>>, vector<70x8xf32>
    tpu.vector_store %arg30[%c0_51, %c16_52], %41 {strides = array<i32>} : memref<72x72xf32, #tpu.memory_space<vmem>>, vector<70x8xf32>,
    %c6 = arith.constant 6 : index
    %c0_53 = arith.constant 0 : index
    %43 = vector.load %arg29[%c6, %c0_53] : memref<72x8xf32, #tpu.memory_space<vmem>>, vector<66x8xf32>
    %c0_54 = arith.constant 0 : index
    %c24_55 = arith.constant 24 : index
    %44 = vector.load %arg30[%c0_54, %c24_55] : memref<72x72xf32, #tpu.memory_space<vmem>>, vector<66x8xf32>
    tpu.vector_store %arg30[%c0_54, %c24_55], %43 {strides = array<i32>} : memref<72x72xf32, #tpu.memory_space<vmem>>, vector<66x8xf32>,
    %c7 = arith.constant 7 : index
    %c0_56 = arith.constant 0 : index
    %45 = vector.load %arg29[%c7, %c0_56] : memref<72x8xf32, #tpu.memory_space<vmem>>, vector<65x8xf32>
    %c0_57 = arith.constant 0 : index
    %c32_58 = arith.constant 32 : index
    %46 = vector.load %arg30[%c0_57, %c32_58] : memref<72x72xf32, #tpu.memory_space<vmem>>, vector<65x8xf32>
    tpu.vector_store %arg30[%c0_57, %c32_58], %45 {strides = array<i32>} : memref<72x72xf32, #tpu.memory_space<vmem>>, vector<65x8xf32>,
    %c8_59 = arith.constant 8 : index
    %c0_60 = arith.constant 0 : index
    %47 = vector.load %arg29[%c8_59, %c0_60] : memref<72x8xf32, #tpu.memory_space<vmem>>, vector<64x8xf32>
    %c0_61 = arith.constant 0 : index
    %c40 = arith.constant 40 : index
    %48 = vector.load %arg30[%c0_61, %c40] : memref<72x72xf32, #tpu.memory_space<vmem>>, vector<64x8xf32>
    tpu.vector_store %arg30[%c0_61, %c40], %47 {strides = array<i32>} : memref<72x72xf32, #tpu.memory_space<vmem>>, vector<64x8xf32>,
    %c12_62 = arith.constant 12 : index
    %c0_63 = arith.constant 0 : index
    %49 = vector.load %arg29[%c12_62, %c0_63] : memref<72x8xf32, #tpu.memory_space<vmem>>, vector<60x8xf32>
    %c0_64 = arith.constant 0 : index
    %c48 = arith.constant 48 : index
    %50 = vector.load %arg30[%c0_64, %c48] : memref<72x72xf32, #tpu.memory_space<vmem>>, vector<60x8xf32>
    tpu.vector_store %arg30[%c0_64, %c48], %49 {strides = array<i32>} : memref<72x72xf32, #tpu.memory_space<vmem>>, vector<60x8xf32>,
    %c13 = arith.constant 13 : index
    %c0_65 = arith.constant 0 : index
    %51 = vector.load %arg29[%c13, %c0_65] : memref<72x8xf32, #tpu.memory_space<vmem>>, vector<59x8xf32>
    %c0_66 = arith.constant 0 : index
    %c56 = arith.constant 56 : index
    %52 = vector.load %arg30[%c0_66, %c56] : memref<72x72xf32, #tpu.memory_space<vmem>>, vector<59x8xf32>
    tpu.vector_store %arg30[%c0_66, %c56], %51 {strides = array<i32>} : memref<72x72xf32, #tpu.memory_space<vmem>>, vector<59x8xf32>,
    %c14 = arith.constant 14 : index
    %c0_67 = arith.constant 0 : index
    %53 = vector.load %arg29[%c14, %c0_67] : memref<72x8xf32, #tpu.memory_space<vmem>>, vector<58x8xf32>
    %c0_68 = arith.constant 0 : index
    %c64 = arith.constant 64 : index
    %54 = vector.load %arg30[%c0_68, %c64] : memref<72x72xf32, #tpu.memory_space<vmem>>, vector<58x8xf32>
    tpu.vector_store %arg30[%c0_68, %c64], %53 {strides = array<i32>} : memref<72x72xf32, #tpu.memory_space<vmem>>, vector<58x8xf32>,
    %c0_69 = arith.constant 0 : index
    %c0_70 = arith.constant 0 : index
    %55 = vector.load %arg30[%c0_69, %c0_70] : memref<72x72xf32, #tpu.memory_space<vmem>>, vector<72x72xf32>
    %56 = arith.truncf %55 : vector<72x72xf32> to vector<72x72xbf16>
    %c0_71 = arith.constant 0 : index
    %c0_72 = arith.constant 0 : index
    %57 = vector.load %arg5[%c0_71, %c0_72] : memref<72x8xbf16, #tpu.memory_space<vmem>>, vector<72x8xbf16>
    %cst_73 = arith.constant dense<0.000000e+00> : vector<72x8xf32>
    %58 = tpu.matmul %56, %57, %cst_73 {dimension_numbers = #tpu.dot_dimension_numbers<[1], [0], [0], [1], [0, 0, 1, 1], [], []>} : vector<72x72xbf16>, vector<72x8xbf16>, vector<72x8xf32> -> vector<72x8xf32>
    %c0_74 = arith.constant 0 : index
    %c0_75 = arith.constant 0 : index
    %59 = vector.load %arg6[%c0_74, %c0_75] : memref<1x8xf32, #tpu.memory_space<vmem>>, vector<1x8xf32>
    %60 = vector.broadcast %59 : vector<1x8xf32> to vector<72x8xf32>
    %61 = arith.mulf %58, %60 : vector<72x8xf32>
    %c0_76 = arith.constant 0 : index
    %c0_77 = arith.constant 0 : index
    %62 = vector.load %arg7[%c0_76, %c0_77] : memref<1x8xf32, #tpu.memory_space<vmem>>, vector<1x8xf32>
    %63 = vector.broadcast %62 : vector<1x8xf32> to vector<72x8xf32>
    %64 = arith.addf %61, %63 : vector<72x8xf32>
    %cst_78 = arith.constant 0.000000e+00 : f32
    %65 = vector.broadcast %cst_78 : f32 to vector<72x8xf32>
    %66 = arith.maximumf %64, %65 : vector<72x8xf32>
    %c0_79 = arith.constant 0 : index
    %c0_80 = arith.constant 0 : index
    %67 = vector.load %arg21[%c0_79, %c0_80] : memref<32x72xf32, #tpu.memory_space<vmem>>, vector<32x72xf32>
    %cst_81 = arith.constant dense<0.000000e+00> : vector<32x8xf32>
    %68 = tpu.matmul %67, %66, %cst_81 {dimension_numbers = #tpu.dot_dimension_numbers<[1], [0], [0], [1], [0, 0, 1, 1], [], []>} : vector<32x72xf32>, vector<72x8xf32>, vector<32x8xf32> -> vector<32x8xf32>
    %c0_82 = arith.constant 0 : index
    %c0_83 = arith.constant 0 : index
    %69 = vector.load %arg31[%c0_82, %c0_83] : memref<32x8xf32, #tpu.memory_space<vmem>>, vector<32x8xf32>
    tpu.vector_store %arg31[%c0_82, %c0_83], %68 {strides = array<i32>} : memref<32x8xf32, #tpu.memory_space<vmem>>, vector<32x8xf32>,
    %cst_84 = arith.constant 0.000000e+00 : f32
    %70 = vector.broadcast %cst_84 : f32 to vector<32x72xf32>
    %c0_85 = arith.constant 0 : index
    %c0_86 = arith.constant 0 : index
    %71 = vector.load %arg32[%c0_85, %c0_86] : memref<32x72xf32, #tpu.memory_space<vmem>>, vector<32x72xf32>
    tpu.vector_store %arg32[%c0_85, %c0_86], %70 {strides = array<i32>} : memref<32x72xf32, #tpu.memory_space<vmem>>, vector<32x72xf32>,
    %c0_87 = arith.constant 0 : index
    %c0_88 = arith.constant 0 : index
    %72 = vector.load %arg31[%c0_87, %c0_88] : memref<32x8xf32, #tpu.memory_space<vmem>>, vector<32x8xf32>
    %c0_89 = arith.constant 0 : index
    %c0_90 = arith.constant 0 : index
    %73 = vector.load %arg32[%c0_89, %c0_90] : memref<32x72xf32, #tpu.memory_space<vmem>>, vector<32x8xf32>
    tpu.vector_store %arg32[%c0_89, %c0_90], %72 {strides = array<i32>} : memref<32x72xf32, #tpu.memory_space<vmem>>, vector<32x8xf32>,
    %c1_91 = arith.constant 1 : index
    %c0_92 = arith.constant 0 : index
    %74 = vector.load %arg31[%c1_91, %c0_92] : memref<32x8xf32, #tpu.memory_space<vmem>>, vector<31x8xf32>
    %c0_93 = arith.constant 0 : index
    %c8_94 = arith.constant 8 : index
    %75 = vector.load %arg32[%c0_93, %c8_94] : memref<32x72xf32, #tpu.memory_space<vmem>>, vector<31x8xf32>
    tpu.vector_store %arg32[%c0_93, %c8_94], %74 {strides = array<i32>} : memref<32x72xf32, #tpu.memory_space<vmem>>, vector<31x8xf32>,
    %c2_95 = arith.constant 2 : index
    %c0_96 = arith.constant 0 : index
    %76 = vector.load %arg31[%c2_95, %c0_96] : memref<32x8xf32, #tpu.memory_space<vmem>>, vector<30x8xf32>
    %c0_97 = arith.constant 0 : index
    %c16_98 = arith.constant 16 : index
    %77 = vector.load %arg32[%c0_97, %c16_98] : memref<32x72xf32, #tpu.memory_space<vmem>>, vector<30x8xf32>
    tpu.vector_store %arg32[%c0_97, %c16_98], %76 {strides = array<i32>} : memref<32x72xf32, #tpu.memory_space<vmem>>, vector<30x8xf32>,
    %c4_99 = arith.constant 4 : index
    %c0_100 = arith.constant 0 : index
    %78 = vector.load %arg31[%c4_99, %c0_100] : memref<32x8xf32, #tpu.memory_space<vmem>>, vector<28x8xf32>
    %c0_101 = arith.constant 0 : index
    %c24_102 = arith.constant 24 : index
    %79 = vector.load %arg32[%c0_101, %c24_102] : memref<32x72xf32, #tpu.memory_space<vmem>>, vector<28x8xf32>
    tpu.vector_store %arg32[%c0_101, %c24_102], %78 {strides = array<i32>} : memref<32x72xf32, #tpu.memory_space<vmem>>, vector<28x8xf32>,
    %c5 = arith.constant 5 : index
    %c0_103 = arith.constant 0 : index
    %80 = vector.load %arg31[%c5, %c0_103] : memref<32x8xf32, #tpu.memory_space<vmem>>, vector<27x8xf32>
    %c0_104 = arith.constant 0 : index
    %c32_105 = arith.constant 32 : index
    %81 = vector.load %arg32[%c0_104, %c32_105] : memref<32x72xf32, #tpu.memory_space<vmem>>, vector<27x8xf32>
    tpu.vector_store %arg32[%c0_104, %c32_105], %80 {strides = array<i32>} : memref<32x72xf32, #tpu.memory_space<vmem>>, vector<27x8xf32>,
    %c6_106 = arith.constant 6 : index
    %c0_107 = arith.constant 0 : index
    %82 = vector.load %arg31[%c6_106, %c0_107] : memref<32x8xf32, #tpu.memory_space<vmem>>, vector<26x8xf32>
    %c0_108 = arith.constant 0 : index
    %c40_109 = arith.constant 40 : index
    %83 = vector.load %arg32[%c0_108, %c40_109] : memref<32x72xf32, #tpu.memory_space<vmem>>, vector<26x8xf32>
    tpu.vector_store %arg32[%c0_108, %c40_109], %82 {strides = array<i32>} : memref<32x72xf32, #tpu.memory_space<vmem>>, vector<26x8xf32>,
    %c8_110 = arith.constant 8 : index
    %c0_111 = arith.constant 0 : index
    %84 = vector.load %arg31[%c8_110, %c0_111] : memref<32x8xf32, #tpu.memory_space<vmem>>, vector<24x8xf32>
    %c0_112 = arith.constant 0 : index
    %c48_113 = arith.constant 48 : index
    %85 = vector.load %arg32[%c0_112, %c48_113] : memref<32x72xf32, #tpu.memory_space<vmem>>, vector<24x8xf32>
    tpu.vector_store %arg32[%c0_112, %c48_113], %84 {strides = array<i32>} : memref<32x72xf32, #tpu.memory_space<vmem>>, vector<24x8xf32>,
    %c9 = arith.constant 9 : index
    %c0_114 = arith.constant 0 : index
    %86 = vector.load %arg31[%c9, %c0_114] : memref<32x8xf32, #tpu.memory_space<vmem>>, vector<23x8xf32>
    %c0_115 = arith.constant 0 : index
    %c56_116 = arith.constant 56 : index
    %87 = vector.load %arg32[%c0_115, %c56_116] : memref<32x72xf32, #tpu.memory_space<vmem>>, vector<23x8xf32>
    tpu.vector_store %arg32[%c0_115, %c56_116], %86 {strides = array<i32>} : memref<32x72xf32, #tpu.memory_space<vmem>>, vector<23x8xf32>,
    %c10_117 = arith.constant 10 : index
    %c0_118 = arith.constant 0 : index
    %88 = vector.load %arg31[%c10_117, %c0_118] : memref<32x8xf32, #tpu.memory_space<vmem>>, vector<22x8xf32>
    %c0_119 = arith.constant 0 : index
    %c64_120 = arith.constant 64 : index
    %89 = vector.load %arg32[%c0_119, %c64_120] : memref<32x72xf32, #tpu.memory_space<vmem>>, vector<22x8xf32>
    tpu.vector_store %arg32[%c0_119, %c64_120], %88 {strides = array<i32>} : memref<32x72xf32, #tpu.memory_space<vmem>>, vector<22x8xf32>,
    %c0_121 = arith.constant 0 : index
    %c0_122 = arith.constant 0 : index
    %90 = vector.load %arg32[%c0_121, %c0_122] : memref<32x72xf32, #tpu.memory_space<vmem>>, vector<32x72xf32>
    %91 = arith.truncf %90 : vector<32x72xf32> to vector<32x72xbf16>
    %c0_123 = arith.constant 0 : index
    %c0_124 = arith.constant 0 : index
    %92 = vector.load %arg8[%c0_123, %c0_124] : memref<72x8xbf16, #tpu.memory_space<vmem>>, vector<72x8xbf16>
    %cst_125 = arith.constant dense<0.000000e+00> : vector<32x8xf32>
    %93 = tpu.matmul %91, %92, %cst_125 {dimension_numbers = #tpu.dot_dimension_numbers<[1], [0], [0], [1], [0, 0, 1, 1], [], []>} : vector<32x72xbf16>, vector<72x8xbf16>, vector<32x8xf32> -> vector<32x8xf32>
    %c0_126 = arith.constant 0 : index
    %c0_127 = arith.constant 0 : index
    %94 = vector.load %arg9[%c0_126, %c0_127] : memref<1x8xf32, #tpu.memory_space<vmem>>, vector<1x8xf32>
    %95 = vector.broadcast %94 : vector<1x8xf32> to vector<32x8xf32>
    %96 = arith.mulf %93, %95 : vector<32x8xf32>
    %c0_128 = arith.constant 0 : index
    %c0_129 = arith.constant 0 : index
    %97 = vector.load %arg10[%c0_128, %c0_129] : memref<1x8xf32, #tpu.memory_space<vmem>>, vector<1x8xf32>
    %98 = vector.broadcast %97 : vector<1x8xf32> to vector<32x8xf32>
    %99 = arith.addf %96, %98 : vector<32x8xf32>
    %c0_130 = arith.constant 0 : index
    %c0_131 = arith.constant 0 : index
    %100 = vector.load %arg22[%c0_130, %c0_131] : memref<2x32xf32, #tpu.memory_space<vmem>>, vector<2x32xf32>
    %cst_132 = arith.constant dense<0.000000e+00> : vector<2x8xf32>
    %101 = tpu.matmul %100, %99, %cst_132 {dimension_numbers = #tpu.dot_dimension_numbers<[1], [0], [0], [1], [0, 0, 1, 1], [], []>} : vector<2x32xf32>, vector<32x8xf32>, vector<2x8xf32> -> vector<2x8xf32>
    %cst_133 = arith.constant 0.000000e+00 : f32
    %102 = vector.broadcast %cst_133 : f32 to vector<200x36xf32>
    %c0_134 = arith.constant 0 : index
    %c0_135 = arith.constant 0 : index
    %103 = vector.load %arg33[%c0_134, %c0_135] : memref<200x36xf32, #tpu.memory_space<vmem>>, vector<200x36xf32>
    tpu.vector_store %arg33[%c0_134, %c0_135], %102 {strides = array<i32>} : memref<200x36xf32, #tpu.memory_space<vmem>>, vector<200x36xf32>,
    %c0_136 = arith.constant 0 : index
    %c0_137 = arith.constant 0 : index
    %104 = vector.load %arg1[%c0_136, %c0_137] : memref<200x4xf32, #tpu.memory_space<vmem>>, vector<200x4xf32>
    %c0_138 = arith.constant 0 : index
    %c0_139 = arith.constant 0 : index
    %105 = vector.load %arg33[%c0_138, %c0_139] : memref<200x36xf32, #tpu.memory_space<vmem>>, vector<200x4xf32>
    tpu.vector_store %arg33[%c0_138, %c0_139], %104 {strides = array<i32>} : memref<200x36xf32, #tpu.memory_space<vmem>>, vector<200x4xf32>,
    %c1_140 = arith.constant 1 : index
    %c0_141 = arith.constant 0 : index
    %106 = vector.load %arg1[%c1_140, %c0_141] : memref<200x4xf32, #tpu.memory_space<vmem>>, vector<199x4xf32>
    %c0_142 = arith.constant 0 : index
    %c4_143 = arith.constant 4 : index
    %107 = vector.load %arg33[%c0_142, %c4_143] : memref<200x36xf32, #tpu.memory_space<vmem>>, vector<199x4xf32>
    tpu.vector_store %arg33[%c0_142, %c4_143], %106 {strides = array<i32>} : memref<200x36xf32, #tpu.memory_space<vmem>>, vector<199x4xf32>,
    %c2_144 = arith.constant 2 : index
    %c0_145 = arith.constant 0 : index
    %108 = vector.load %arg1[%c2_144, %c0_145] : memref<200x4xf32, #tpu.memory_space<vmem>>, vector<198x4xf32>
    %c0_146 = arith.constant 0 : index
    %c8_147 = arith.constant 8 : index
    %109 = vector.load %arg33[%c0_146, %c8_147] : memref<200x36xf32, #tpu.memory_space<vmem>>, vector<198x4xf32>
    tpu.vector_store %arg33[%c0_146, %c8_147], %108 {strides = array<i32>} : memref<200x36xf32, #tpu.memory_space<vmem>>, vector<198x4xf32>,
    %c10_148 = arith.constant 10 : index
    %c0_149 = arith.constant 0 : index
    %110 = vector.load %arg1[%c10_148, %c0_149] : memref<200x4xf32, #tpu.memory_space<vmem>>, vector<190x4xf32>
    %c0_150 = arith.constant 0 : index
    %c12_151 = arith.constant 12 : index
    %111 = vector.load %arg33[%c0_150, %c12_151] : memref<200x36xf32, #tpu.memory_space<vmem>>, vector<190x4xf32>
    tpu.vector_store %arg33[%c0_150, %c12_151], %110 {strides = array<i32>} : memref<200x36xf32, #tpu.memory_space<vmem>>, vector<190x4xf32>,
    %c11_152 = arith.constant 11 : index
    %c0_153 = arith.constant 0 : index
    %112 = vector.load %arg1[%c11_152, %c0_153] : memref<200x4xf32, #tpu.memory_space<vmem>>, vector<189x4xf32>
    %c0_154 = arith.constant 0 : index
    %c16_155 = arith.constant 16 : index
    %113 = vector.load %arg33[%c0_154, %c16_155] : memref<200x36xf32, #tpu.memory_space<vmem>>, vector<189x4xf32>
    tpu.vector_store %arg33[%c0_154, %c16_155], %112 {strides = array<i32>} : memref<200x36xf32, #tpu.memory_space<vmem>>, vector<189x4xf32>,
    %c12_156 = arith.constant 12 : index
    %c0_157 = arith.constant 0 : index
    %114 = vector.load %arg1[%c12_156, %c0_157] : memref<200x4xf32, #tpu.memory_space<vmem>>, vector<188x4xf32>
    %c0_158 = arith.constant 0 : index
    %c20_159 = arith.constant 20 : index
    %115 = vector.load %arg33[%c0_158, %c20_159] : memref<200x36xf32, #tpu.memory_space<vmem>>, vector<188x4xf32>
    tpu.vector_store %arg33[%c0_158, %c20_159], %114 {strides = array<i32>} : memref<200x36xf32, #tpu.memory_space<vmem>>, vector<188x4xf32>,
    %c20_160 = arith.constant 20 : index
    %c0_161 = arith.constant 0 : index
    %116 = vector.load %arg1[%c20_160, %c0_161] : memref<200x4xf32, #tpu.memory_space<vmem>>, vector<180x4xf32>
    %c0_162 = arith.constant 0 : index
    %c24_163 = arith.constant 24 : index
    %117 = vector.load %arg33[%c0_162, %c24_163] : memref<200x36xf32, #tpu.memory_space<vmem>>, vector<180x4xf32>
    tpu.vector_store %arg33[%c0_162, %c24_163], %116 {strides = array<i32>} : memref<200x36xf32, #tpu.memory_space<vmem>>, vector<180x4xf32>,
    %c21_164 = arith.constant 21 : index
    %c0_165 = arith.constant 0 : index
    %118 = vector.load %arg1[%c21_164, %c0_165] : memref<200x4xf32, #tpu.memory_space<vmem>>, vector<179x4xf32>
    %c0_166 = arith.constant 0 : index
    %c28_167 = arith.constant 28 : index
    %119 = vector.load %arg33[%c0_166, %c28_167] : memref<200x36xf32, #tpu.memory_space<vmem>>, vector<179x4xf32>
    tpu.vector_store %arg33[%c0_166, %c28_167], %118 {strides = array<i32>} : memref<200x36xf32, #tpu.memory_space<vmem>>, vector<179x4xf32>,
    %c22_168 = arith.constant 22 : index
    %c0_169 = arith.constant 0 : index
    %120 = vector.load %arg1[%c22_168, %c0_169] : memref<200x4xf32, #tpu.memory_space<vmem>>, vector<178x4xf32>
    %c0_170 = arith.constant 0 : index
    %c32_171 = arith.constant 32 : index
    %121 = vector.load %arg33[%c0_170, %c32_171] : memref<200x36xf32, #tpu.memory_space<vmem>>, vector<178x4xf32>
    tpu.vector_store %arg33[%c0_170, %c32_171], %120 {strides = array<i32>} : memref<200x36xf32, #tpu.memory_space<vmem>>, vector<178x4xf32>,
    %c0_172 = arith.constant 0 : index
    %c0_173 = arith.constant 0 : index
    %122 = vector.load %arg33[%c0_172, %c0_173] : memref<200x36xf32, #tpu.memory_space<vmem>>, vector<200x36xf32>
    %123 = arith.truncf %122 : vector<200x36xf32> to vector<200x36xbf16>
    %c0_174 = arith.constant 0 : index
    %c0_175 = arith.constant 0 : index
    %124 = vector.load %arg11[%c0_174, %c0_175] : memref<36x8xbf16, #tpu.memory_space<vmem>>, vector<36x8xbf16>
    %cst_176 = arith.constant dense<0.000000e+00> : vector<200x8xf32>
    %125 = tpu.matmul %123, %124, %cst_176 {dimension_numbers = #tpu.dot_dimension_numbers<[1], [0], [0], [1], [0, 0, 1, 1], [], []>} : vector<200x36xbf16>, vector<36x8xbf16>, vector<200x8xf32> -> vector<200x8xf32>
    %c0_177 = arith.constant 0 : index
    %c0_178 = arith.constant 0 : index
    %126 = vector.load %arg12[%c0_177, %c0_178] : memref<1x8xf32, #tpu.memory_space<vmem>>, vector<1x8xf32>
    %127 = vector.broadcast %126 : vector<1x8xf32> to vector<200x8xf32>
    %128 = arith.mulf %125, %127 : vector<200x8xf32>
    %c0_179 = arith.constant 0 : index
    %c0_180 = arith.constant 0 : index
    %129 = vector.load %arg13[%c0_179, %c0_180] : memref<1x8xf32, #tpu.memory_space<vmem>>, vector<1x8xf32>
    %130 = vector.broadcast %129 : vector<1x8xf32> to vector<200x8xf32>
    %131 = arith.addf %128, %130 : vector<200x8xf32>
    %cst_181 = arith.constant 0.000000e+00 : f32
    %132 = vector.broadcast %cst_181 : f32 to vector<200x8xf32>
    %133 = arith.maximumf %131, %132 : vector<200x8xf32>
    %c0_182 = arith.constant 0 : index
    %c0_183 = arith.constant 0 : index
    %134 = vector.load %arg20[%c0_182, %c0_183] : memref<72x200xf32, #tpu.memory_space<vmem>>, vector<72x200xf32>
    %cst_184 = arith.constant dense<0.000000e+00> : vector<72x8xf32>
    %135 = tpu.matmul %134, %133, %cst_184 {dimension_numbers = #tpu.dot_dimension_numbers<[1], [0], [0], [1], [0, 0, 1, 1], [], []>} : vector<72x200xf32>, vector<200x8xf32>, vector<72x8xf32> -> vector<72x8xf32>
    %c0_185 = arith.constant 0 : index
    %c0_186 = arith.constant 0 : index
    %136 = vector.load %arg34[%c0_185, %c0_186] : memref<72x8xf32, #tpu.memory_space<vmem>>, vector<72x8xf32>
    tpu.vector_store %arg34[%c0_185, %c0_186], %135 {strides = array<i32>} : memref<72x8xf32, #tpu.memory_space<vmem>>, vector<72x8xf32>,
    %cst_187 = arith.constant 0.000000e+00 : f32
    %137 = vector.broadcast %cst_187 : f32 to vector<72x72xf32>
    %c0_188 = arith.constant 0 : index
    %c0_189 = arith.constant 0 : index
    %138 = vector.load %arg35[%c0_188, %c0_189] : memref<72x72xf32, #tpu.memory_space<vmem>>, vector<72x72xf32>
    tpu.vector_store %arg35[%c0_188, %c0_189], %137 {strides = array<i32>} : memref<72x72xf32, #tpu.memory_space<vmem>>, vector<72x72xf32>,
    %c0_190 = arith.constant 0 : index
    %c0_191 = arith.constant 0 : index
    %139 = vector.load %arg34[%c0_190, %c0_191] : memref<72x8xf32, #tpu.memory_space<vmem>>, vector<72x8xf32>
    %c0_192 = arith.constant 0 : index
    %c0_193 = arith.constant 0 : index
    %140 = vector.load %arg35[%c0_192, %c0_193] : memref<72x72xf32, #tpu.memory_space<vmem>>, vector<72x8xf32>
    tpu.vector_store %arg35[%c0_192, %c0_193], %139 {strides = array<i32>} : memref<72x72xf32, #tpu.memory_space<vmem>>, vector<72x8xf32>,
    %c1_194 = arith.constant 1 : index
    %c0_195 = arith.constant 0 : index
    %141 = vector.load %arg34[%c1_194, %c0_195] : memref<72x8xf32, #tpu.memory_space<vmem>>, vector<71x8xf32>
    %c0_196 = arith.constant 0 : index
    %c8_197 = arith.constant 8 : index
    %142 = vector.load %arg35[%c0_196, %c8_197] : memref<72x72xf32, #tpu.memory_space<vmem>>, vector<71x8xf32>
    tpu.vector_store %arg35[%c0_196, %c8_197], %141 {strides = array<i32>} : memref<72x72xf32, #tpu.memory_space<vmem>>, vector<71x8xf32>,
    %c2_198 = arith.constant 2 : index
    %c0_199 = arith.constant 0 : index
    %143 = vector.load %arg34[%c2_198, %c0_199] : memref<72x8xf32, #tpu.memory_space<vmem>>, vector<70x8xf32>
    %c0_200 = arith.constant 0 : index
    %c16_201 = arith.constant 16 : index
    %144 = vector.load %arg35[%c0_200, %c16_201] : memref<72x72xf32, #tpu.memory_space<vmem>>, vector<70x8xf32>
    tpu.vector_store %arg35[%c0_200, %c16_201], %143 {strides = array<i32>} : memref<72x72xf32, #tpu.memory_space<vmem>>, vector<70x8xf32>,
    %c6_202 = arith.constant 6 : index
    %c0_203 = arith.constant 0 : index
    %145 = vector.load %arg34[%c6_202, %c0_203] : memref<72x8xf32, #tpu.memory_space<vmem>>, vector<66x8xf32>
    %c0_204 = arith.constant 0 : index
    %c24_205 = arith.constant 24 : index
    %146 = vector.load %arg35[%c0_204, %c24_205] : memref<72x72xf32, #tpu.memory_space<vmem>>, vector<66x8xf32>
    tpu.vector_store %arg35[%c0_204, %c24_205], %145 {strides = array<i32>} : memref<72x72xf32, #tpu.memory_space<vmem>>, vector<66x8xf32>,
    %c7_206 = arith.constant 7 : index
    %c0_207 = arith.constant 0 : index
    %147 = vector.load %arg34[%c7_206, %c0_207] : memref<72x8xf32, #tpu.memory_space<vmem>>, vector<65x8xf32>
    %c0_208 = arith.constant 0 : index
    %c32_209 = arith.constant 32 : index
    %148 = vector.load %arg35[%c0_208, %c32_209] : memref<72x72xf32, #tpu.memory_space<vmem>>, vector<65x8xf32>
    tpu.vector_store %arg35[%c0_208, %c32_209], %147 {strides = array<i32>} : memref<72x72xf32, #tpu.memory_space<vmem>>, vector<65x8xf32>,
    %c8_210 = arith.constant 8 : index
    %c0_211 = arith.constant 0 : index
    %149 = vector.load %arg34[%c8_210, %c0_211] : memref<72x8xf32, #tpu.memory_space<vmem>>, vector<64x8xf32>
    %c0_212 = arith.constant 0 : index
    %c40_213 = arith.constant 40 : index
    %150 = vector.load %arg35[%c0_212, %c40_213] : memref<72x72xf32, #tpu.memory_space<vmem>>, vector<64x8xf32>
    tpu.vector_store %arg35[%c0_212, %c40_213], %149 {strides = array<i32>} : memref<72x72xf32, #tpu.memory_space<vmem>>, vector<64x8xf32>,
    %c12_214 = arith.constant 12 : index
    %c0_215 = arith.constant 0 : index
    %151 = vector.load %arg34[%c12_214, %c0_215] : memref<72x8xf32, #tpu.memory_space<vmem>>, vector<60x8xf32>
    %c0_216 = arith.constant 0 : index
    %c48_217 = arith.constant 48 : index
    %152 = vector.load %arg35[%c0_216, %c48_217] : memref<72x72xf32, #tpu.memory_space<vmem>>, vector<60x8xf32>
    tpu.vector_store %arg35[%c0_216, %c48_217], %151 {strides = array<i32>} : memref<72x72xf32, #tpu.memory_space<vmem>>, vector<60x8xf32>,
    %c13_218 = arith.constant 13 : index
    %c0_219 = arith.constant 0 : index
    %153 = vector.load %arg34[%c13_218, %c0_219] : memref<72x8xf32, #tpu.memory_space<vmem>>, vector<59x8xf32>
    %c0_220 = arith.constant 0 : index
    %c56_221 = arith.constant 56 : index
    %154 = vector.load %arg35[%c0_220, %c56_221] : memref<72x72xf32, #tpu.memory_space<vmem>>, vector<59x8xf32>
    tpu.vector_store %arg35[%c0_220, %c56_221], %153 {strides = array<i32>} : memref<72x72xf32, #tpu.memory_space<vmem>>, vector<59x8xf32>,
    %c14_222 = arith.constant 14 : index
    %c0_223 = arith.constant 0 : index
    %155 = vector.load %arg34[%c14_222, %c0_223] : memref<72x8xf32, #tpu.memory_space<vmem>>, vector<58x8xf32>
    %c0_224 = arith.constant 0 : index
    %c64_225 = arith.constant 64 : index
    %156 = vector.load %arg35[%c0_224, %c64_225] : memref<72x72xf32, #tpu.memory_space<vmem>>, vector<58x8xf32>
    tpu.vector_store %arg35[%c0_224, %c64_225], %155 {strides = array<i32>} : memref<72x72xf32, #tpu.memory_space<vmem>>, vector<58x8xf32>,
    %c0_226 = arith.constant 0 : index
    %c0_227 = arith.constant 0 : index
    %157 = vector.load %arg35[%c0_226, %c0_227] : memref<72x72xf32, #tpu.memory_space<vmem>>, vector<72x72xf32>
    %158 = arith.truncf %157 : vector<72x72xf32> to vector<72x72xbf16>
    %c0_228 = arith.constant 0 : index
    %c0_229 = arith.constant 0 : index
    %159 = vector.load %arg14[%c0_228, %c0_229] : memref<72x8xbf16, #tpu.memory_space<vmem>>, vector<72x8xbf16>
    %cst_230 = arith.constant dense<0.000000e+00> : vector<72x8xf32>
    %160 = tpu.matmul %158, %159, %cst_230 {dimension_numbers = #tpu.dot_dimension_numbers<[1], [0], [0], [1], [0, 0, 1, 1], [], []>} : vector<72x72xbf16>, vector<72x8xbf16>, vector<72x8xf32> -> vector<72x8xf32>
    %c0_231 = arith.constant 0 : index
    %c0_232 = arith.constant 0 : index
    %161 = vector.load %arg15[%c0_231, %c0_232] : memref<1x8xf32, #tpu.memory_space<vmem>>, vector<1x8xf32>
    %162 = vector.broadcast %161 : vector<1x8xf32> to vector<72x8xf32>
    %163 = arith.mulf %160, %162 : vector<72x8xf32>
    %c0_233 = arith.constant 0 : index
    %c0_234 = arith.constant 0 : index
    %164 = vector.load %arg16[%c0_233, %c0_234] : memref<1x8xf32, #tpu.memory_space<vmem>>, vector<1x8xf32>
    %165 = vector.broadcast %164 : vector<1x8xf32> to vector<72x8xf32>
    %166 = arith.addf %163, %165 : vector<72x8xf32>
    %cst_235 = arith.constant 0.000000e+00 : f32
    %167 = vector.broadcast %cst_235 : f32 to vector<72x8xf32>
    %168 = arith.maximumf %166, %167 : vector<72x8xf32>
    %c0_236 = arith.constant 0 : index
    %c0_237 = arith.constant 0 : index
    %169 = vector.load %arg21[%c0_236, %c0_237] : memref<32x72xf32, #tpu.memory_space<vmem>>, vector<32x72xf32>
    %cst_238 = arith.constant dense<0.000000e+00> : vector<32x8xf32>
    %170 = tpu.matmul %169, %168, %cst_238 {dimension_numbers = #tpu.dot_dimension_numbers<[1], [0], [0], [1], [0, 0, 1, 1], [], []>} : vector<32x72xf32>, vector<72x8xf32>, vector<32x8xf32> -> vector<32x8xf32>
    %c0_239 = arith.constant 0 : index
    %c0_240 = arith.constant 0 : index
    %171 = vector.load %arg36[%c0_239, %c0_240] : memref<32x8xf32, #tpu.memory_space<vmem>>, vector<32x8xf32>
    tpu.vector_store %arg36[%c0_239, %c0_240], %170 {strides = array<i32>} : memref<32x8xf32, #tpu.memory_space<vmem>>, vector<32x8xf32>,
    %cst_241 = arith.constant 0.000000e+00 : f32
    %172 = vector.broadcast %cst_241 : f32 to vector<32x72xf32>
    %c0_242 = arith.constant 0 : index
    %c0_243 = arith.constant 0 : index
    %173 = vector.load %arg37[%c0_242, %c0_243] : memref<32x72xf32, #tpu.memory_space<vmem>>, vector<32x72xf32>
    tpu.vector_store %arg37[%c0_242, %c0_243], %172 {strides = array<i32>} : memref<32x72xf32, #tpu.memory_space<vmem>>, vector<32x72xf32>,
    %c0_244 = arith.constant 0 : index
    %c0_245 = arith.constant 0 : index
    %174 = vector.load %arg36[%c0_244, %c0_245] : memref<32x8xf32, #tpu.memory_space<vmem>>, vector<32x8xf32>
    %c0_246 = arith.constant 0 : index
    %c0_247 = arith.constant 0 : index
    %175 = vector.load %arg37[%c0_246, %c0_247] : memref<32x72xf32, #tpu.memory_space<vmem>>, vector<32x8xf32>
    tpu.vector_store %arg37[%c0_246, %c0_247], %174 {strides = array<i32>} : memref<32x72xf32, #tpu.memory_space<vmem>>, vector<32x8xf32>,
    %c1_248 = arith.constant 1 : index
    %c0_249 = arith.constant 0 : index
    %176 = vector.load %arg36[%c1_248, %c0_249] : memref<32x8xf32, #tpu.memory_space<vmem>>, vector<31x8xf32>
    %c0_250 = arith.constant 0 : index
    %c8_251 = arith.constant 8 : index
    %177 = vector.load %arg37[%c0_250, %c8_251] : memref<32x72xf32, #tpu.memory_space<vmem>>, vector<31x8xf32>
    tpu.vector_store %arg37[%c0_250, %c8_251], %176 {strides = array<i32>} : memref<32x72xf32, #tpu.memory_space<vmem>>, vector<31x8xf32>,
    %c2_252 = arith.constant 2 : index
    %c0_253 = arith.constant 0 : index
    %178 = vector.load %arg36[%c2_252, %c0_253] : memref<32x8xf32, #tpu.memory_space<vmem>>, vector<30x8xf32>
    %c0_254 = arith.constant 0 : index
    %c16_255 = arith.constant 16 : index
    %179 = vector.load %arg37[%c0_254, %c16_255] : memref<32x72xf32, #tpu.memory_space<vmem>>, vector<30x8xf32>
    tpu.vector_store %arg37[%c0_254, %c16_255], %178 {strides = array<i32>} : memref<32x72xf32, #tpu.memory_space<vmem>>, vector<30x8xf32>,
    %c4_256 = arith.constant 4 : index
    %c0_257 = arith.constant 0 : index
    %180 = vector.load %arg36[%c4_256, %c0_257] : memref<32x8xf32, #tpu.memory_space<vmem>>, vector<28x8xf32>
    %c0_258 = arith.constant 0 : index
    %c24_259 = arith.constant 24 : index
    %181 = vector.load %arg37[%c0_258, %c24_259] : memref<32x72xf32, #tpu.memory_space<vmem>>, vector<28x8xf32>
    tpu.vector_store %arg37[%c0_258, %c24_259], %180 {strides = array<i32>} : memref<32x72xf32, #tpu.memory_space<vmem>>, vector<28x8xf32>,
    %c5_260 = arith.constant 5 : index
    %c0_261 = arith.constant 0 : index
    %182 = vector.load %arg36[%c5_260, %c0_261] : memref<32x8xf32, #tpu.memory_space<vmem>>, vector<27x8xf32>
    %c0_262 = arith.constant 0 : index
    %c32_263 = arith.constant 32 : index
    %183 = vector.load %arg37[%c0_262, %c32_263] : memref<32x72xf32, #tpu.memory_space<vmem>>, vector<27x8xf32>
    tpu.vector_store %arg37[%c0_262, %c32_263], %182 {strides = array<i32>} : memref<32x72xf32, #tpu.memory_space<vmem>>, vector<27x8xf32>,
    %c6_264 = arith.constant 6 : index
    %c0_265 = arith.constant 0 : index
    %184 = vector.load %arg36[%c6_264, %c0_265] : memref<32x8xf32, #tpu.memory_space<vmem>>, vector<26x8xf32>
    %c0_266 = arith.constant 0 : index
    %c40_267 = arith.constant 40 : index
    %185 = vector.load %arg37[%c0_266, %c40_267] : memref<32x72xf32, #tpu.memory_space<vmem>>, vector<26x8xf32>
    tpu.vector_store %arg37[%c0_266, %c40_267], %184 {strides = array<i32>} : memref<32x72xf32, #tpu.memory_space<vmem>>, vector<26x8xf32>,
    %c8_268 = arith.constant 8 : index
    %c0_269 = arith.constant 0 : index
    %186 = vector.load %arg36[%c8_268, %c0_269] : memref<32x8xf32, #tpu.memory_space<vmem>>, vector<24x8xf32>
    %c0_270 = arith.constant 0 : index
    %c48_271 = arith.constant 48 : index
    %187 = vector.load %arg37[%c0_270, %c48_271] : memref<32x72xf32, #tpu.memory_space<vmem>>, vector<24x8xf32>
    tpu.vector_store %arg37[%c0_270, %c48_271], %186 {strides = array<i32>} : memref<32x72xf32, #tpu.memory_space<vmem>>, vector<24x8xf32>,
    %c9_272 = arith.constant 9 : index
    %c0_273 = arith.constant 0 : index
    %188 = vector.load %arg36[%c9_272, %c0_273] : memref<32x8xf32, #tpu.memory_space<vmem>>, vector<23x8xf32>
    %c0_274 = arith.constant 0 : index
    %c56_275 = arith.constant 56 : index
    %189 = vector.load %arg37[%c0_274, %c56_275] : memref<32x72xf32, #tpu.memory_space<vmem>>, vector<23x8xf32>
    tpu.vector_store %arg37[%c0_274, %c56_275], %188 {strides = array<i32>} : memref<32x72xf32, #tpu.memory_space<vmem>>, vector<23x8xf32>,
    %c10_276 = arith.constant 10 : index
    %c0_277 = arith.constant 0 : index
    %190 = vector.load %arg36[%c10_276, %c0_277] : memref<32x8xf32, #tpu.memory_space<vmem>>, vector<22x8xf32>
    %c0_278 = arith.constant 0 : index
    %c64_279 = arith.constant 64 : index
    %191 = vector.load %arg37[%c0_278, %c64_279] : memref<32x72xf32, #tpu.memory_space<vmem>>, vector<22x8xf32>
    tpu.vector_store %arg37[%c0_278, %c64_279], %190 {strides = array<i32>} : memref<32x72xf32, #tpu.memory_space<vmem>>, vector<22x8xf32>,
    %c0_280 = arith.constant 0 : index
    %c0_281 = arith.constant 0 : index
    %192 = vector.load %arg37[%c0_280, %c0_281] : memref<32x72xf32, #tpu.memory_space<vmem>>, vector<32x72xf32>
    %193 = arith.truncf %192 : vector<32x72xf32> to vector<32x72xbf16>
    %c0_282 = arith.constant 0 : index
    %c0_283 = arith.constant 0 : index
    %194 = vector.load %arg17[%c0_282, %c0_283] : memref<72x8xbf16, #tpu.memory_space<vmem>>, vector<72x8xbf16>
    %cst_284 = arith.constant dense<0.000000e+00> : vector<32x8xf32>
    %195 = tpu.matmul %193, %194, %cst_284 {dimension_numbers = #tpu.dot_dimension_numbers<[1], [0], [0], [1], [0, 0, 1, 1], [], []>} : vector<32x72xbf16>, vector<72x8xbf16>, vector<32x8xf32> -> vector<32x8xf32>
    %c0_285 = arith.constant 0 : index
    %c0_286 = arith.constant 0 : index
    %196 = vector.load %arg18[%c0_285, %c0_286] : memref<1x8xf32, #tpu.memory_space<vmem>>, vector<1x8xf32>
    %197 = vector.broadcast %196 : vector<1x8xf32> to vector<32x8xf32>
    %198 = arith.mulf %195, %197 : vector<32x8xf32>
    %c0_287 = arith.constant 0 : index
    %c0_288 = arith.constant 0 : index
    %199 = vector.load %arg19[%c0_287, %c0_288] : memref<1x8xf32, #tpu.memory_space<vmem>>, vector<1x8xf32>
    %200 = vector.broadcast %199 : vector<1x8xf32> to vector<32x8xf32>
    %201 = arith.addf %198, %200 : vector<32x8xf32>
    %c0_289 = arith.constant 0 : index
    %c0_290 = arith.constant 0 : index
    %202 = vector.load %arg22[%c0_289, %c0_290] : memref<2x32xf32, #tpu.memory_space<vmem>>, vector<2x32xf32>
    %cst_291 = arith.constant dense<0.000000e+00> : vector<2x8xf32>
    %203 = tpu.matmul %202, %201, %cst_291 {dimension_numbers = #tpu.dot_dimension_numbers<[1], [0], [0], [1], [0, 0, 1, 1], [], []>} : vector<2x32xf32>, vector<32x8xf32>, vector<2x8xf32> -> vector<2x8xf32>
    %204 = arith.addf %101, %203 : vector<2x8xf32>
    %c0_292 = arith.constant 0 : index
    %c0_293 = arith.constant 0 : index
    %205 = vector.load %arg23[%c0_292, %c0_293] : memref<8x8xf32, #tpu.memory_space<vmem>>, vector<8x8xf32>
    %cst_294 = arith.constant dense<0.000000e+00> : vector<2x8xf32>
    %206 = tpu.matmul %204, %205, %cst_294 {dimension_numbers = #tpu.dot_dimension_numbers<[1], [0], [0], [1], [0, 0, 1, 1], [], []>} : vector<2x8xf32>, vector<8x8xf32>, vector<2x8xf32> -> vector<2x8xf32>
    %c0_295 = arith.constant 0 : index
    %c0_296 = arith.constant 0 : index
    %207 = vector.load %arg24[%c0_295, %c0_296] : memref<1x8xf32, #tpu.memory_space<vmem>>, vector<1x8xf32>
    %208 = vector.broadcast %207 : vector<1x8xf32> to vector<2x8xf32>
    %209 = arith.addf %206, %208 : vector<2x8xf32>
    %c0_297 = arith.constant 0 : index
    %c0_298 = arith.constant 0 : index
    %210 = vector.load %arg25[%c0_297, %c0_298] : memref<8x1xf32, #tpu.memory_space<vmem>>, vector<8x1xf32>
    %cst_299 = arith.constant dense<0.000000e+00> : vector<2x1xf32>
    %211 = tpu.matmul %209, %210, %cst_299 {dimension_numbers = #tpu.dot_dimension_numbers<[1], [0], [0], [1], [0, 0, 1, 1], [], []>} : vector<2x8xf32>, vector<8x1xf32>, vector<2x1xf32> -> vector<2x1xf32>
    %c0_300 = arith.constant 0 : index
    %c0_301 = arith.constant 0 : index
    %212 = vector.load %arg26[%c0_300, %c0_301] : memref<1x1xf32, #tpu.memory_space<vmem>>, vector<1x1xf32>
    %213 = vector.broadcast %212 : vector<1x1xf32> to vector<2x1xf32>
    %214 = arith.addf %211, %213 : vector<2x1xf32>
    %c0_302 = arith.constant 0 : index
    %c0_303 = arith.constant 0 : index
    %215 = vector.load %arg27[%c0_302, %c0_303] : memref<2x1xf32, #tpu.memory_space<vmem>>, vector<2x1xf32>
    tpu.vector_store %arg27[%c0_302, %c0_303], %214 {strides = array<i32>} : memref<2x1xf32, #tpu.memory_space<vmem>>, vector<2x1xf32>,
    return
  }
}

</mosaic_0001>

<bundles_post_ra>
// kernel: tpu_custom_call.1
= control target key start
LH: loop header
LB: loop body
LE: loop exit
PB: predicated region body
PF: predicated region fallthrough
CT: control target
= control target key end

     0   :  { %vm10027_vm0 = vcmask 293888   ;;  %v6587_v2 = vmov 0.0   ;;  %s10011_s28 = smov 4   ;;  %vm140_vm1 = vcmask 31744   ;;  %vm10015_vm2 = vcmask 1041408   ;;  %s10072_s30 = smov 20   ;;  %s9964_s0 = inlined_call_operand.vmem [shape: f32[200,4], index: 0, kind: input, shape index: {}]   ;;  %s9965_s2 = inlined_call_operand.vmem [shape: bf16[36,8], index: 2, kind: input, shape index: {}]   ;;  %s9966_s3 = inlined_call_operand.vmem [shape: f32[1,8], index: 3, kind: input, shape index: {}]   ;;  %s9967_s4 = inlined_call_operand.vmem [shape: f32[1,8], index: 4, kind: input, shape index: {}]   ;;  %s9968_s20 = inlined_call_operand.vmem [shape: f32[72,200], index: 20, kind: input, shape index: {}]   ;;  %s9969_s1 = inlined_call_operand.vmem [shape: f32[200,4], index: 1, kind: input, shape index: {}]   ;;  %s9970_s5 = inlined_call_operand.vmem [shape: bf16[72,8], index: 5, kind: input, shape index: {}]   ;;  %s9971_s21 = inlined_call_operand.vmem [shape: f32[32,72], index: 21, kind: input, shape index: {}]   ;;  %s9972_s11 = inlined_call_operand.vmem [shape: bf16[36,8], index: 11, kind: input, shape index: {}]   ;;  %s9973_s6 = inlined_call_operand.vmem [shape: f32[1,8], index: 6, kind: input, shape index: {}]   ;;  %s9974_s7 = inlined_call_operand.vmem [shape: f32[1,8], index: 7, kind: input, shape index: {}]   ;;  %s9975_s12 = inlined_call_operand.vmem [shape: f32[1,8], index: 12, kind: input, shape index: {}]   ;;  %s9976_s13 = inlined_call_operand.vmem [shape: f32[1,8], index: 13, kind: input, shape index: {}]   ;;  %s9977_s8 = inlined_call_operand.vmem [shape: bf16[72,8], index: 8, kind: input, shape index: {}]   ;;  %s9978_s9 = inlined_call_operand.vmem [shape: f32[1,8], index: 9, kind: input, shape index: {}]   ;;  %s9979_s10 = inlined_call_operand.vmem [shape: f32[1,8], index: 10, kind: input, shape index: {}]   ;;  %s9980_s14 = inlined_call_operand.vmem [shape: bf16[72,8], index: 14, kind: input, shape index: {}]   ;;  %s9981_s15 = inlined_call_operand.vmem [shape: f32[1,8], index: 15, kind: input, shape index: {}]   ;;  %s9982_s16 = inlined_call_operand.vmem [shape: f32[1,8], index: 16, kind: input, shape index: {}]   ;;  %s9983_s17 = inlined_call_operand.vmem [shape: bf16[72,8], index: 17, kind: input, shape index: {}]   ;;  %s9984_s18 = inlined_call_operand.vmem [shape: f32[1,8], index: 18, kind: input, shape index: {}]   ;;  %s9985_s19 = inlined_call_operand.vmem [shape: f32[1,8], index: 19, kind: input, shape index: {}]   ;;  %s9986_s22 = inlined_call_operand.vmem [shape: f32[2,32], index: 22, kind: input, shape index: {}]   ;;  %s9987_s23 = inlined_call_operand.vmem [shape: f32[8,8], index: 23, kind: input, shape index: {}]   ;;  %s9988_s25 = inlined_call_operand.vmem [shape: f32[8,1], index: 25, kind: input, shape index: {}]   ;;  %s9989_s26 = inlined_call_operand.<no memory space> [shape: f32[1,1], index: 26, kind: input, shape index: {}]   ;;  %s9990_s24 = inlined_call_operand.vmem [shape: f32[1,8], index: 24, kind: input, shape index: {}]   ;;  %s9991_s27 = inlined_call_operand.vmem [shape: f32[2,1], index: 27, kind: output, shape index: {}]  }
   0x1   :  { %10052 = sst [smem:[#allocation13_spill]] %s9964_s0  ;;  %90 = vst.msk [vmem:[#allocation2] sm:$0xff] %vm10027_vm0, %v6587_v2  ;;  %91 = vst.msk [vmem:[#allocation2 + $0x8] sm:$0xff] %vm10027_vm0, %v6587_v2  ;;  %6142 = vmatprep.subr.bf16.mxu0 %v6587_v2  ;;  %vm6595_vm3 = vmmov 0   ;;  %vm291_vm4 = vcmask 64544   ;;  %vm443_vm5 = vcmask 97344  }
   0x2   :  { %10053 = sst [smem:[#allocation14_spill]] %s9965_s2  ;;  %92 = vst.msk [vmem:[#allocation2 + $0x10] sm:$0xff] %vm10027_vm0, %v6587_v2  ;;  %93 = vst.msk [vmem:[#allocation2 + $0x18] sm:$0xff] %vm10027_vm0, %v6587_v2  ;;  %s10001_s2 = smov 24   ;;  %6148 = vmatprep.mubr.msk.bf16.mxu0 %vm6595_vm3, %v6587_v2  ;;  %vm590_vm6 = vcmask 130144   ;;  %vm736_vm7 = vcmask 162944  }
   0x3   :  { %10054 = sst [smem:[#allocation15_spill]] %s9966_s3  ;;  %94 = vst.msk [vmem:[#allocation2 + $0x20] sm:$0xff] %vm10027_vm0, %v6587_v2  ;;  %95 = vst.msk [vmem:[#allocation2 + $0x28] sm:$0xff] %vm10027_vm0, %v6587_v2  ;;  %s10005_s3 = smov 12   ;;  %vm882_vm8 = vcmask 195744   ;;  %vm10029_vm9 = vcmask 228544  }
   0x4   :  { %10055 = sst [smem:[#allocation16_spill]] %s9967_s4  ;;  %96 = vst.msk [vmem:[#allocation2 + $0x30] sm:$0xff] %vm10027_vm0, %v6587_v2  ;;  %97 = vst.msk [vmem:[#allocation2 + $0x38] sm:$0xff] %vm10027_vm0, %v6587_v2  ;;  %s9999_s4 = smov 20   ;;  %vm10028_vm10 = vcmask 261344   ;;  %vm10016_vm11 = vcmask 294144  }
   0x5   :  { %10056 = sst [smem:[#allocation17_spill]] %s9968_s20  ;;  %s10069_s20 = sld [smem:[#allocation13_spill]]  ;;  %98 = vst.msk [vmem:[#allocation2 + $0x40] sm:$0xff] %vm10027_vm0, %v6587_v2  ;;  %99 = vst.msk [vmem:[#allocation2 + $0x48] sm:$0xff] %vm10027_vm0, %v6587_v2  ;;  %vm10017_vm12 = vcmask 128096   ;;  %vm10018_vm13 = vcmask 159872  }
   0x6   :  { %10057 = sst [smem:[#allocation18_spill]] %s9969_s1  ;;  %100 = vst.msk [vmem:[#allocation2 + $0x50] sm:$0xff] %vm10027_vm0, %v6587_v2  ;;  %101 = vst.msk [vmem:[#allocation2 + $0x58] sm:$0xff] %vm10027_vm0, %v6587_v2  ;;  %s10007_s1 = smov 8   ;;  %vm10026_vm14 = vcmask 224448   ;;  %vm10021_vm15 = vcmask 191648  }
   0x7   :  { %10058 = sst [smem:[#allocation19_spill]] %s9970_s5  ;;  %102 = vst.msk [vmem:[#allocation2 + $0x60] sm:$0xff] %vm10027_vm0, %v6587_v2  ;;  %103 = vst.msk [vmem:[#allocation2 + $0x68] sm:$0xff] %vm10027_vm0, %v6587_v2  ;;  %s10013_s5 = smov 28  }
   0x8   :  { %10059 = sst [smem:[#allocation20_spill]] %s9971_s21  ;;  %104 = vst.msk [vmem:[#allocation2 + $0x70] sm:$0xff] %vm10027_vm0, %v6587_v2  ;;  %105 = vst.msk [vmem:[#allocation2 + $0x78] sm:$0xff] %vm10027_vm0, %v6587_v2  ;;  %s10079_s29 = sld [smem:[#allocation15_spill]] }
   0x9   :  { %10060 = sst [smem:[#allocation21_spill]] %s9972_s11  ;;  %106 = vst.msk [vmem:[#allocation2 + $0x80] sm:$0xff] %vm10027_vm0, %v6587_v2  ;;  %107 = vst.msk [vmem:[#allocation2 + $0x88] sm:$0xff] %vm10027_vm0, %v6587_v2  ;;  %s10073_s11 = smov 24  }
   0xa   :  { %10061 = sst [smem:[#allocation22_spill]] %s9973_s6  ;;  %108 = vst.msk [vmem:[#allocation2 + $0x90] sm:$0xff] %vm10027_vm0, %v6587_v2  ;;  %109 = vst.msk [vmem:[#allocation2 + $0x98] sm:$0xff] %vm10027_vm0, %v6587_v2  ;;  %s10003_s6 = smov 16  }
   0xb   :  { %10062 = sst [smem:[#allocation23_spill]] %s9974_s7  ;;  %v318_v0 = vld [vmem:[%s10069_s20 + $0x2] sm:$0xff]  ;;  %110 = vst.msk [vmem:[#allocation2 + $0xa0] sm:$0xff] %vm10027_vm0, %v6587_v2  ;;  %111 = vst.msk [vmem:[#allocation2 + $0xa8] sm:$0xff] %vm10027_vm0, %v6587_v2  ;;  %v319_v3 = vld [vmem:[%s10069_s20 + $0xa] sm:$0xff]  ;;  %s10078_s7 = smov 28  }
   0xc   :  { %10063 = sst [smem:[#allocation24_spill]] %s9975_s12  ;;  %v166_v1 = vld [vmem:[%s10069_s20 + $0x1] sm:$0xff]  ;;  %112 = vst.msk [vmem:[#allocation2 + $0xb0] sm:$0xff] %vm10027_vm0, %v6587_v2  ;;  %113 = vst.msk [vmem:[#allocation2 + $0xb8] sm:$0xff] %vm10027_vm0, %v6587_v2  ;;  %368 = vrot.lane.b32.xlu1 %v318_v0, %s10007_s1  ;;  %v167_v4 = vld [vmem:[%s10069_s20 + $0x9] sm:$0xff]  ;;  %s10071_s12 = smov 16  }
   0xd   :  { %10064 = sst [smem:[#allocation25_spill]] %s9987_s23  ;;  %114 = vst.msk [vmem:[#allocation2 + $0xc0] sm:$0xff] %vm10027_vm0, %v6587_v2  ;;  %2871 = vst.msk [vmem:[#allocation7] sm:$0xff] %vm10027_vm0, %v6587_v2  ;;  %216 = vrot.lane.b32.xlu0 %v166_v1, %s10011_s28  ;;  %v471_v5 = vld [vmem:[%s10069_s20 + $0x12] sm:$0xff]  ;;  %v115_v10 = vld [vmem:[%s10069_s20] sm:$0xff]  ;;  %s10085_s21 = sld [smem:[#allocation19_spill]] }
   0xe   :  { %10065 = sst [smem:[#allocation26_spill]] %s9988_s25  ;;  %2872 = vst.msk [vmem:[#allocation7 + $0x8] sm:$0xff] %vm10027_vm0, %v6587_v2  ;;  %2873 = vst.msk [vmem:[#allocation7 + $0x10] sm:$0xff] %vm10027_vm0, %v6587_v2  ;;  %v617_v6 = vld [vmem:[%s10069_s20 + $0x13] sm:$0xff]  ;;  %v616_v7 = vld [vmem:[%s10069_s20 + $0xb] sm:$0xff]  ;;  %s10032_s0 = smov 56  }
   0xf   :  { %10066 = sst [smem:[#allocation27_spill]] %s9989_s26  ;;  %2874 = vst.msk [vmem:[#allocation7 + $0x18] sm:$0xff] %vm10027_vm0, %v6587_v2  ;;  %2875 = vst.msk [vmem:[#allocation7 + $0x20] sm:$0xff] %vm10027_vm0, %v6587_v2  ;;  %v763_v8 = vld [vmem:[%s10069_s20 + $0x14] sm:$0xff]  ;;  %v762_v9 = vld [vmem:[%s10069_s20 + $0xc] sm:$0xff]  ;;  %s10098_s23 = sld [smem:[#allocation22_spill]] }
  0x10   :  { %10067 = sst [smem:[#allocation28_spill]] %s9990_s24  ;;  %2876 = vst.msk [vmem:[#allocation7 + $0x28] sm:$0xff] %vm10027_vm0, %v6587_v2  ;;  %2877 = vst.msk [vmem:[#allocation7 + $0x30] sm:$0xff] %vm10027_vm0, %v6587_v2  ;;  %370 = vrot.lane.b32.xlu1 %v319_v3, %s10007_s1  ;;  %v116_v11 = vld [vmem:[%s10069_s20 + $0x8] sm:$0xff]  ;;  %v909_v12 = vld [vmem:[%s10069_s20 + $0x1c] sm:$0xff]  ;;  %s10099_s24 = sld [smem:[#allocation23_spill]] }
  0x11   :  { %10068 = sst [smem:[#allocation29_spill]] %s9991_s27  ;;  %2878 = vst.msk [vmem:[#allocation7 + $0x38] sm:$0xff] %vm10027_vm0, %v6587_v2  ;;  %2879 = vst.msk [vmem:[#allocation7 + $0x40] sm:$0xff] %vm10027_vm0, %v6587_v2  ;;  %218 = vrot.lane.b32.xlu0 %v167_v4, %s10011_s28  ;;  %v1049_v13 = vld [vmem:[%s10069_s20 + $0x1d] sm:$0xff]  ;;  %v1048_v14 = vld [vmem:[%s10069_s20 + $0x15] sm:$0xff]  ;;  %s10076_s27 = smov 32  }
  0x12   :  { %2880 = vst.msk [vmem:[#allocation7 + $0x48] sm:$0xff] %vm10027_vm0, %v6587_v2  ;;  %2881 = vst.msk [vmem:[#allocation7 + $0x50] sm:$0xff] %vm10027_vm0, %v6587_v2  ;;  %v118_v16 = vld [vmem:[%s10069_s20 + $0x18] sm:$0xff]  ;;  %v117_v18 = vld [vmem:[%s10069_s20 + $0x10] sm:$0xff]  ;;  %s10167_s26 = smov 56  }
  0x13   :  { %2882 = vst.msk [vmem:[#allocation7 + $0x58] sm:$0xff] %vm10027_vm0, %v6587_v2  ;;  %2883 = vst.msk [vmem:[#allocation7 + $0x60] sm:$0xff] %vm10027_vm0, %v6587_v2  ;;  %v1189_v20 = vld [vmem:[%s10069_s20 + $0x1e] sm:$0xff]  ;;  %v1188_v21 = vld [vmem:[%s10069_s20 + $0x16] sm:$0xff] }
  0x14   :  { %2884 = vst.msk [vmem:[#allocation7 + $0x68] sm:$0xff] %vm10027_vm0, %v6587_v2  ;;  %2885 = vst.msk [vmem:[#allocation7 + $0x70] sm:$0xff] %vm10027_vm0, %v6587_v2  ;;  %520 = vrot.lane.b32.xlu1 %v471_v5, %s10005_s3  ;;  %v169_v23 = vld [vmem:[%s10069_s20 + $0x19] sm:$0xff]  ;;  %v168_v24 = vld [vmem:[%s10069_s20 + $0x11] sm:$0xff] }
  0x15   :  { %2886 = vst.msk [vmem:[#allocation7 + $0x78] sm:$0xff] %vm10027_vm0, %v6587_v2  ;;  %2887 = vst.msk [vmem:[#allocation7 + $0x80] sm:$0xff] %vm10027_vm0, %v6587_v2  ;;  %518 = vrot.lane.b32.xlu0 %v319_v3, %s10005_s3  ;;  %v321_v25 = vld [vmem:[%s10069_s20 + $0x1a] sm:$0xff]  ;;  %v473_v26 = vld [vmem:[%s10069_s20 + $0x22] sm:$0xff] }
  0x16   :  { %2888 = vst.msk [vmem:[#allocation7 + $0x88] sm:$0xff] %vm10027_vm0, %v6587_v2  ;;  %2889 = vst.msk [vmem:[#allocation7 + $0x90] sm:$0xff] %vm10027_vm0, %v6587_v2  ;;  %v619_v27 = vld [vmem:[%s10069_s20 + $0x23] sm:$0xff]  ;;  %v618_v28 = vld [vmem:[%s10069_s20 + $0x1b] sm:$0xff] }
  0x17   :  { %2890 = vst.msk [vmem:[#allocation7 + $0x98] sm:$0xff] %vm10027_vm0, %v6587_v2  ;;  %2891 = vst.msk [vmem:[#allocation7 + $0xa0] sm:$0xff] %vm10027_vm0, %v6587_v2  ;;  %v765_v29 = vld [vmem:[%s10069_s20 + $0x24] sm:$0xff]  ;;  %v911_v30 = vld [vmem:[%s10069_s20 + $0x2c] sm:$0xff] }
  0x18   :  { %2892 = vst.msk [vmem:[#allocation7 + $0xa8] sm:$0xff] %vm10027_vm0, %v6587_v2  ;;  %2893 = vst.msk [vmem:[#allocation7 + $0xb0] sm:$0xff] %vm10027_vm0, %v6587_v2  ;;  %666 = vrot.lane.b32.xlu1 %v617_v6, %s10003_s6  ;;  %v119_v31 = vld [vmem:[%s10069_s20 + $0x20] sm:$0xff]  ;;  %v120_v32 = vld [vmem:[%s10069_s20 + $0x28] sm:$0xff] }
  0x19   :  { %2894 = vst.msk [vmem:[#allocation7 + $0xb8] sm:$0xff] %vm10027_vm0, %v6587_v2  ;;  %2895 = vst.msk [vmem:[#allocation7 + $0xc0] sm:$0xff] %vm10027_vm0, %v6587_v2  ;;  %664 = vrot.lane.b32.xlu0 %v616_v7, %s10003_s6  ;;  %s10009_s6 = smov 32   ;;  %v1051_v33 = vld [vmem:[%s10069_s20 + $0x2d] sm:$0xff]  ;;  %v1050_v34 = vld [vmem:[%s10069_s20 + $0x25] sm:$0xff] }
  0x1a   :  { %141 = vst.msk [vmem:[#allocation2] sm:$0xff] %vm140_vm1, %v115_v10  ;;  %142 = vst.msk [vmem:[#allocation2 + $0x8] sm:$0xff] %vm140_vm1, %v116_v11  ;;  %v1191_v35 = vld [vmem:[%s10069_s20 + $0x2e] sm:$0xff]  ;;  %v1190_v36 = vld [vmem:[%s10069_s20 + $0x26] sm:$0xff] }
  0x1b   :  { %144 = vst.msk [vmem:[#allocation2 + $0x18] sm:$0xff] %vm140_vm1, %v118_v16  ;;  %143 = vst.msk [vmem:[#allocation2 + $0x10] sm:$0xff] %vm140_vm1, %v117_v18  ;;  %v171_v37 = vld [vmem:[%s10069_s20 + $0x29] sm:$0xff]  ;;  %v170_v38 = vld [vmem:[%s10069_s20 + $0x21] sm:$0xff] }
  0x1c   :  { %812 = vrot.lane.b32.xlu1 %v763_v8, %s9999_s4  ;;  %145 = vst.msk [vmem:[#allocation2 + $0x20] sm:$0xff] %vm140_vm1, %v119_v31  ;;  %146 = vst.msk [vmem:[#allocation2 + $0x28] sm:$0xff] %vm140_vm1, %v120_v32  ;;  %v323_v39 = vld [vmem:[%s10069_s20 + $0x2a] sm:$0xff]  ;;  %v475_v40 = vld [vmem:[%s10069_s20 + $0x32] sm:$0xff] }
  0x1d   :  { %810 = vrot.lane.b32.xlu0 %v762_v9, %s9999_s4  ;;  %s10070_s4 = sld [smem:[#allocation14_spill]]  ;;  %v621_v41 = vld [vmem:[%s10069_s20 + $0x33] sm:$0xff]  ;;  %v620_v42 = vld [vmem:[%s10069_s20 + $0x2b] sm:$0xff]  ;;  %v913_v44 = vld [vmem:[%s10069_s20 + $0x3c] sm:$0xff] }
  0x1e   :  { %v767_v43 = vld [vmem:[%s10069_s20 + $0x34] sm:$0xff]  ;;  %v1053_v47 = vld [vmem:[%s10069_s20 + $0x3d] sm:$0xff]  ;;  %v7085_v58 = vld [vmem:[%s10069_s20 + $0x4c] sm:$0xff] }
  0x1f   :  { %v121_v45 = vld [vmem:[%s10069_s20 + $0x30] sm:$0xff]  ;;  %v122_v46 = vld [vmem:[%s10069_s20 + $0x38] sm:$0xff]  ;;  %v477_v54 = vld [vmem:[%s10069_s20 + $0x42] sm:$0xff] }
  0x20   :  { %956 = vrot.lane.b32.xlu1 %v909_v12, %s10001_s2  ;;  %147 = vst.msk [vmem:[#allocation2 + $0x30] sm:$0xff] %vm140_vm1, %v121_v45  ;;  %148 = vst.msk [vmem:[#allocation2 + $0x38] sm:$0xff] %vm140_vm1, %v122_v46  ;;  %v1052_v48 = vld [vmem:[%s10069_s20 + $0x35] sm:$0xff]  ;;  %v1193_v49 = vld [vmem:[%s10069_s20 + $0x3e] sm:$0xff] }
  0x21   :  { %954 = vrot.lane.b32.xlu0 %v763_v8, %s10001_s2  ;;  %s10074_s2 = smov 8   ;;  %v1192_v50 = vld [vmem:[%s10069_s20 + $0x36] sm:$0xff]  ;;  %v623_v55 = vld [vmem:[%s10069_s20 + $0x43] sm:$0xff]  ;;  %v1055_v63 = vld [vmem:[%s10069_s20 + $0x4d] sm:$0xff] }
  0x22   :  { %v173_v51 = vld [vmem:[%s10069_s20 + $0x39] sm:$0xff]  ;;  %v172_v52 = vld [vmem:[%s10069_s20 + $0x31] sm:$0xff]  ;;  %v769_v57 = vld [vmem:[%s10069_s20 + $0x44] sm:$0xff] }
  0x23   :  { %v6561_v15 = vld [vmem:[%s10070_s4] sm:$0xff]   ;;  %v6562_v17 = vld [vmem:[%s10070_s4 + $0x8] sm:$0xff]   ;;  %v6563_v19 = vld [vmem:[%s10070_s4 + $0x10] ss:$0 sps:$4 sm:$0x33]   ;;  %s10044_s4 = smov 40  }
  0x24   :  { %6143 = vmatpush3.bf16.msra.mxu0 %v6561_v15  ;;  %1096 = vrot.lane.b32.xlu1 %v1049_v13, %s10013_s5  ;;  %v1427_v22 = vsel %vm10015_vm2, %v6563_v19, 0  ;;  %v325_v53 = vld [vmem:[%s10069_s20 + $0x3a] sm:$0xff]  ;;  %v124_v62 = vld [vmem:[%s10069_s20 + $0x48] sm:$0xff]  ;;  %v7140_v15 = vld [vmem:[%s10069_s20 + $0x52] sm:$0xff]  ;;  %vm10025_vm2 = vcmask 256224  }
  0x25   :  { %1094 = vrot.lane.b32.xlu0 %v1048_v14, %s10013_s5  ;;  %6144 = vmatprep.subr.bf16.mxu0 %v6587_v2  ;;  %v622_v56 = vld [vmem:[%s10069_s20 + $0x3b] sm:$0xff]  ;;  %150 = vst.msk [vmem:[#allocation2 + $0x48] sm:$0xff] %vm140_vm1, %v124_v62  ;;  %v1054_v0 = vld [vmem:[%s10069_s20 + $0x45] sm:$0xff]  ;;  %v1195_v4 = vld [vmem:[%s10069_s20 + $0x4e] sm:$0xff] }
  0x26   :  { %v123_v59 = vld [vmem:[%s10069_s20 + $0x40] sm:$0xff]  ;;  %v175_v8 = vld [vmem:[%s10069_s20 + $0x49] sm:$0xff]  ;;  %v625_v18 = vld [vmem:[%s10069_s20 + $0x53] sm:$0xff] }
  0x27   :  { %149 = vst.msk [vmem:[#allocation2 + $0x40] sm:$0xff] %vm140_vm1, %v123_v59  ;;  %v174_v9 = vld [vmem:[%s10069_s20 + $0x41] sm:$0xff]  ;;  %v624_v19 = vld [vmem:[%s10069_s20 + $0x4b] sm:$0xff]  ;;  %v1056_v31 = vld [vmem:[%s10069_s20 + $0x55] sm:$0xff] }
  0x28   :  { %6145 = vmatpush3.bf16.msra.mxu0 %v6562_v17  ;;  %1236 = vrot.lane.b32.xlu1 %v1189_v20, %s10009_s6  ;;  %v329_v45 = vld [vmem:[%s10069_s20 + $0x5a] sm:$0xff]  ;;  %v128_v62 = vld [vmem:[%s10069_s20 + $0x68] sm:$0xff] }
  0x29   :  { %1234 = vrot.lane.b32.xlu0 %v1188_v21, %s10009_s6  ;;  %6146 = vmatprep.subr.bf16.mxu0 %v6587_v2  ;;  %v127_v59 = vld [vmem:[%s10069_s20 + $0x60] sm:$0xff]  ;;  %154 = vst.msk [vmem:[#allocation2 + $0x68] sm:$0xff] %vm140_vm1, %v128_v62 }
  0x2a   :  { %153 = vst.msk [vmem:[#allocation2 + $0x60] sm:$0xff] %vm140_vm1, %v127_v59 }
  0x2c   :  { %6147 = vmatpush3.bf16.msra.mxu0 %v1427_v22  ;;  %222 = vrot.lane.b32.xlu1 %v169_v23, %s10011_s28  ;;  %v771_v22 = vld [vmem:[%s10069_s20 + $0x54] sm:$0xff] }
  0x2d   :  { %220 = vrot.lane.b32.xlu0 %v168_v24, %s10011_s28 }
  0x30   :  { %374 = vrot.lane.b32.xlu1 %v321_v25, %s10007_s1 }
  0x31   :  { %372 = vrot.lane.b32.xlu0 %v471_v5, %s10007_s1  ;;  %s10075_s1 = smov 12   ;;  %v1194_v5 = vld [vmem:[%s10069_s20 + $0x46] sm:$0xff] }
  0x34   :  { %524 = vrot.lane.b32.xlu1 %v473_v26, %s10005_s3 }
  0x35   :  { %522 = vrot.lane.b32.xlu0 %v321_v25, %s10005_s3  ;;  %v7168_v25 = vld [vmem:[%s10069_s20 + $0x5c] sm:$0xff]  ;;  %s10115_s3 = sld [smem:[#allocation21_spill]] }
  0x38   :  { %670 = vrot.lane.b32.xlu1 %v619_v27, %s10071_s12 }
  0x39   :  { %668 = vrot.lane.b32.xlu0 %v618_v28, %s10071_s12 }
  0x3c   :  { %816 = vrot.lane.b32.xlu1 %v765_v29, %s10072_s30 }
  0x3d   :  { %814 = vrot.lane.b32.xlu0 %v909_v12, %s10072_s30  ;;  %v327_v12 = vld [vmem:[%s10069_s20 + $0x4a] sm:$0xff] }
  0x40   :  { %960 = vrot.lane.b32.xlu1 %v911_v30, %s10073_s11 }
  0x41   :  { %958 = vrot.lane.b32.xlu0 %v765_v29, %s10073_s11  ;;  %v126_v29 = vld [vmem:[%s10069_s20 + $0x58] sm:$0xff] }
  0x42   :  { %152 = vst.msk [vmem:[#allocation2 + $0x58] sm:$0xff] %vm140_vm1, %v126_v29  ;;  %v129_v29 = vld [vmem:[%s10069_s20 + $0x70] sm:$0xff] }
  0x43   :  { %155 = vst.msk [vmem:[#allocation2 + $0x70] sm:$0xff] %vm140_vm1, %v129_v29  ;;  %v779_v29 = vld [vmem:[%s10069_s20 + $0x94] sm:$0xff] }
  0x44   :  { %1100 = vrot.lane.b32.xlu1 %v1051_v33, %s10013_s5 }
  0x45   :  { %1098 = vrot.lane.b32.xlu0 %v1050_v34, %s10013_s5 }
  0x48   :  { %1240 = vrot.lane.b32.xlu1 %v1191_v35, %s10009_s6 }
  0x49   :  { %1238 = vrot.lane.b32.xlu0 %v1190_v36, %s10009_s6  ;;  %s10030_s6 = smov 64  }
  0x4c   :  { %226 = vrot.lane.b32.xlu1 %v171_v37, %s10011_s28  ;;  %v1197_v37 = vld [vmem:[%s10069_s20 + $0x5e] sm:$0xff] }
  0x4d   :  { %224 = vrot.lane.b32.xlu0 %v170_v38, %s10011_s28  ;;  %v1196_v38 = vld [vmem:[%s10069_s20 + $0x56] sm:$0xff]  ;;  %s10080_s28 = sld [smem:[#allocation16_spill]] }
  0x50   :  { %378 = vrot.lane.b32.xlu1 %v323_v39, %s10074_s2 }
  0x51   :  { %376 = vrot.lane.b32.xlu0 %v473_v26, %s10074_s2  ;;  %v125_v26 = vld [vmem:[%s10069_s20 + $0x50] sm:$0xff] }
  0x52   :  { %151 = vst.msk [vmem:[#allocation2 + $0x50] sm:$0xff] %vm140_vm1, %v125_v26 }
  0x54   :  { %528 = vrot.lane.b32.xlu1 %v475_v40, %s10075_s1 }
  0x55   :  { %526 = vrot.lane.b32.xlu0 %v323_v39, %s10075_s1 }
  0x58   :  { %674 = vrot.lane.b32.xlu1 %v621_v41, %s10071_s12  ;;  %v177_v41 = vld [vmem:[%s10069_s20 + $0x59] sm:$0xff] }
  0x59   :  { %672 = vrot.lane.b32.xlu0 %v620_v42, %s10071_s12  ;;  %v176_v42 = vld [vmem:[%s10069_s20 + $0x51] sm:$0xff] }
  0x5c   :  { %820 = vrot.lane.b32.xlu1 %v767_v43, %s10072_s30 }
  0x5d   :  { %818 = vrot.lane.b32.xlu0 %v911_v30, %s10072_s30  ;;  %v1057_v30 = vld [vmem:[%s10069_s20 + $0x5d] sm:$0xff] }
  0x60   :  { %964 = vrot.lane.b32.xlu1 %v913_v44, %s10073_s11 }
  0x61   :  { %962 = vrot.lane.b32.xlu0 %v767_v43, %s10073_s11 }
  0x64   :  { %1104 = vrot.lane.b32.xlu1 %v1053_v47, %s10013_s5 }
  0x65   :  { %1102 = vrot.lane.b32.xlu0 %v1052_v48, %s10013_s5  ;;  %s10077_s5 = smov 4   ;;  %v7227_v48 = vld [vmem:[%s10069_s20 + $0x62] sm:$0xff] }
  0x68   :  { %1244 = vrot.lane.b32.xlu1 %v1193_v49, %s10076_s27 }
  0x69   :  { %1242 = vrot.lane.b32.xlu0 %v1192_v50, %s10076_s27 }
  0x6c   :  { %230 = vrot.lane.b32.xlu1 %v173_v51, %s10077_s5  ;;  %v627_v51 = vld [vmem:[%s10069_s20 + $0x63] sm:$0xff] }
  0x6d   :  { %228 = vrot.lane.b32.xlu0 %v172_v52, %s10077_s5  ;;  %v626_v52 = vld [vmem:[%s10069_s20 + $0x5b] sm:$0xff] }
  0x70   :  { %382 = vrot.lane.b32.xlu1 %v325_v53, %s10074_s2 }
  0x71   :  { %380 = vrot.lane.b32.xlu0 %v475_v40, %s10074_s2 }
  0x74   :  { %532 = vrot.lane.b32.xlu1 %v477_v54, %s10075_s1 }
  0x75   :  { %530 = vrot.lane.b32.xlu0 %v325_v53, %s10075_s1 }
  0x78   :  { %678 = vrot.lane.b32.xlu1 %v623_v55, %s10071_s12  ;;  %v773_v55 = vld [vmem:[%s10069_s20 + $0x64] sm:$0xff] }
  0x79   :  { %676 = vrot.lane.b32.xlu0 %v622_v56, %s10071_s12 }
  0x7c   :  { %824 = vrot.lane.b32.xlu1 %v769_v57, %s10072_s30 }
  0x7d   :  { %822 = vrot.lane.b32.xlu0 %v913_v44, %s10072_s30 }
  0x7e   :  { %v369_v60 = vpop.permute.xlu1 %368 }
  0x7f   :  { %v217_v61 = vpop.permute.xlu0 %216 }
  0x80   :  { %292 = vst.msk [vmem:[#allocation2] sm:$0xff] %vm291_vm4, %v217_v61  ;;  %968 = vrot.lane.b32.xlu1 %v7085_v58, %s10073_s11 }
  0x81   :  { %966 = vrot.lane.b32.xlu0 %v769_v57, %s10073_s11  ;;  %444 = vst.msk [vmem:[#allocation2] sm:$0xff] %vm443_vm5, %v369_v60 }
  0x82   :  { %v371_v1 = vpop.permute.xlu1 %370 }
  0x83   :  { %v219_v3 = vpop.permute.xlu0 %218 }
  0x84   :  { %293 = vst.msk [vmem:[#allocation2 + $0x8] sm:$0xff] %vm291_vm4, %v219_v3  ;;  %1108 = vrot.lane.b32.xlu1 %v1055_v63, %s10078_s7  ;;  %v1059_v63 = vld [vmem:[%s10069_s20 + $0x6d] sm:$0xff] }
  0x85   :  { %1106 = vrot.lane.b32.xlu0 %v1054_v0, %s10078_s7  ;;  %445 = vst.msk [vmem:[#allocation2 + $0x8] sm:$0xff] %vm443_vm5, %v371_v1  ;;  %v1058_v0 = vld [vmem:[%s10069_s20 + $0x65] sm:$0xff] }
  0x86   :  { %v521_v6 = vpop.permute.xlu1 %520 }
  0x87   :  { %v519_v7 = vpop.permute.xlu0 %518  ;;  %592 = vst.msk [vmem:[#allocation2 + $0x8] sm:$0xff] %vm590_vm6, %v521_v6 }
  0x88   :  { %591 = vst.msk [vmem:[#allocation2] sm:$0xff] %vm590_vm6, %v519_v7  ;;  %1248 = vrot.lane.b32.xlu1 %v1195_v4, %s10076_s27  ;;  %v1199_v7 = vld [vmem:[%s10069_s20 + $0x6e] sm:$0xff] }
  0x89   :  { %1246 = vrot.lane.b32.xlu0 %v1194_v5, %s10076_s27 }
  0x8a   :  { %v667_v10 = vpop.permute.xlu1 %666 }
  0x8b   :  { %v665_v11 = vpop.permute.xlu0 %664  ;;  %738 = vst.msk [vmem:[#allocation2 + $0x8] sm:$0xff] %vm736_vm7, %v667_v10 }
  0x8c   :  { %737 = vst.msk [vmem:[#allocation2] sm:$0xff] %vm736_vm7, %v665_v11  ;;  %234 = vrot.lane.b32.xlu1 %v175_v8, %s10077_s5  ;;  %v1198_v8 = vld [vmem:[%s10069_s20 + $0x66] sm:$0xff] }
  0x8d   :  { %232 = vrot.lane.b32.xlu0 %v174_v9, %s10077_s5  ;;  %v179_v11 = vld [vmem:[%s10069_s20 + $0x69] sm:$0xff] }
  0x8e   :  { %v813_v13 = vpop.permute.xlu1 %812 }
  0x8f   :  { %v811_v14 = vpop.permute.xlu0 %810  ;;  %884 = vst.msk [vmem:[#allocation2 + $0x8] sm:$0xff] %vm882_vm8, %v813_v13 }
  0x90   :  { %883 = vst.msk [vmem:[#allocation2] sm:$0xff] %vm882_vm8, %v811_v14  ;;  %386 = vrot.lane.b32.xlu1 %v327_v12, %s10074_s2 }
  0x91   :  { %384 = vrot.lane.b32.xlu0 %v477_v54, %s10074_s2 }
  0x92   :  { %v957_v16 = vpop.permute.xlu1 %956 }
  0x93   :  { %v955_v17 = vpop.permute.xlu0 %954  ;;  %1025 = vst.msk [vmem:[#allocation2 + $0x8] sm:$0xff] %vm10029_vm9, %v957_v16 }
  0x94   :  { %1024 = vst.msk [vmem:[#allocation2] sm:$0xff] %vm10029_vm9, %v955_v17  ;;  %536 = vrot.lane.b32.xlu1 %v7140_v15, %s10075_s1 }
  0x95   :  { %534 = vrot.lane.b32.xlu0 %v327_v12, %s10075_s1  ;;  %v178_v12 = vld [vmem:[%s10069_s20 + $0x61] sm:$0xff] }
  0x96   :  { %v1097_v20 = vpop.permute.xlu1 %1096 }
  0x97   :  { %v1095_v21 = vpop.permute.xlu0 %1094  ;;  %1165 = vst.msk [vmem:[#allocation2 + $0x8] sm:$0xff] %vm10028_vm10, %v1097_v20 }
  0x98   :  { %1164 = vst.msk [vmem:[#allocation2] sm:$0xff] %vm10028_vm10, %v1095_v21  ;;  %682 = vrot.lane.b32.xlu1 %v625_v18, %s10071_s12  ;;  %v7314_v18 = vld [vmem:[%s10069_s20 + $0x72] sm:$0xff] }
  0x99   :  { %680 = vrot.lane.b32.xlu0 %v624_v19, %s10071_s12  ;;  %v629_v21 = vld [vmem:[%s10069_s20 + $0x73] sm:$0xff] }
  0x9a   :  { %v1237_v23 = vpop.permute.xlu1 %1236 }
  0x9b   :  { %v1235_v24 = vpop.permute.xlu0 %1234  ;;  %1305 = vst.msk [vmem:[#allocation2 + $0x8] sm:$0xff] %vm10016_vm11, %v1237_v23 }
  0x9c   :  { %1304 = vst.msk [vmem:[#allocation2] sm:$0xff] %vm10016_vm11, %v1235_v24  ;;  %828 = vrot.lane.b32.xlu1 %v771_v22, %s10072_s30 }
  0x9d   :  { %826 = vrot.lane.b32.xlu0 %v7085_v58, %s10072_s30  ;;  %v7255_v58 = vld [vmem:[%s10069_s20 + $0x6c] sm:$0xff] }
  0x9e   :  { %v223_v27 = vpop.permute.xlu1 %222 }
  0x9f   :  { %v221_v28 = vpop.permute.xlu0 %220  ;;  %295 = vst.msk [vmem:[#allocation2 + $0x18] sm:$0xff] %vm291_vm4, %v223_v27 }
  0xa0   :  { %294 = vst.msk [vmem:[#allocation2 + $0x10] sm:$0xff] %vm291_vm4, %v221_v28  ;;  %972 = vrot.lane.b32.xlu1 %v7168_v25, %s10073_s11  ;;  %v7342_v28 = vld [vmem:[%s10069_s20 + $0x7c] sm:$0xff] }
  0xa1   :  { %970 = vrot.lane.b32.xlu0 %v771_v22, %s10073_s11  ;;  %v628_v22 = vld [vmem:[%s10069_s20 + $0x6b] sm:$0xff] }
  0xa2   :  { %v375_v32 = vpop.permute.xlu1 %374  ;;  %v1329_v35 = vld [vmem:[#allocation2 + $0x8] sm:$0xff] }
  0xa3   :  { %v373_v33 = vpop.permute.xlu0 %372  ;;  %v1328_v34 = vld [vmem:[#allocation2] sm:$0xff]  ;;  %447 = vst.msk [vmem:[#allocation2 + $0x18] sm:$0xff] %vm443_vm5, %v375_v32  ;;  %v130_v32 = vld [vmem:[%s10069_s20 + $0x78] sm:$0xff] }
  0xa4   :  { %446 = vst.msk [vmem:[#allocation2 + $0x10] sm:$0xff] %vm443_vm5, %v373_v33  ;;  %v1353_v36 = vpack.c.bf16 %v1329_v35, %v1328_v34  ;;  %1112 = vrot.lane.b32.xlu1 %v1057_v30, %s10078_s7  ;;  %v1061_v33 = vld [vmem:[%s10069_s20 + $0x7d] sm:$0xff]  ;;  %v1060_v34 = vld [vmem:[%s10069_s20 + $0x75] sm:$0xff] }
  0xa5   :  { %1110 = vrot.lane.b32.xlu0 %v1056_v31, %s10078_s7  ;;  %156 = vst.msk [vmem:[#allocation2 + $0x78] sm:$0xff] %vm140_vm1, %v130_v32  ;;  %v7517_v32 = vld [vmem:[%s10069_s20 + $0x9c] sm:$0xff] }
  0xa6   :  { %6149 = vmatmul.mubr.msk.bf16.vlgmr.msra.gmra.mrb[0].mxu0 %vm10027_vm0, %v1353_v36  ;;  %v525_v39 = vpop.permute.xlu1 %524 }
  0xa7   :  { %v523_v40 = vpop.permute.xlu0 %522  ;;  %6152 = vmatprep.mubr.msk.bf16.mxu0 %vm6595_vm3, %v6587_v2  ;;  %594 = vst.msk [vmem:[#allocation2 + $0x18] sm:$0xff] %vm590_vm6, %v525_v39 }
  0xa8   :  { %593 = vst.msk [vmem:[#allocation2 + $0x10] sm:$0xff] %vm590_vm6, %v523_v40  ;;  %1252 = vrot.lane.b32.xlu1 %v1197_v37, %s10076_s27  ;;  %v1201_v40 = vld [vmem:[%s10069_s20 + $0x7e] sm:$0xff] }
  0xa9   :  { %1250 = vrot.lane.b32.xlu0 %v1196_v38, %s10076_s27 }
  0xaa   :  { %v671_v43 = vpop.permute.xlu1 %670 }
  0xab   :  { %v669_v44 = vpop.permute.xlu0 %668  ;;  %740 = vst.msk [vmem:[#allocation2 + $0x18] sm:$0xff] %vm736_vm7, %v671_v43 }
  0xac   :  { %739 = vst.msk [vmem:[#allocation2 + $0x10] sm:$0xff] %vm736_vm7, %v669_v44  ;;  %238 = vrot.lane.b32.xlu1 %v177_v41, %s10077_s5  ;;  %v1200_v41 = vld [vmem:[%s10069_s20 + $0x76] sm:$0xff] }
  0xad   :  { %236 = vrot.lane.b32.xlu0 %v176_v42, %s10077_s5  ;;  %v181_v44 = vld [vmem:[%s10069_s20 + $0x79] sm:$0xff] }
  0xae   :  { %v817_v46 = vpop.permute.xlu1 %816 }
  0xaf   :  { %v815_v47 = vpop.permute.xlu0 %814  ;;  %886 = vst.msk [vmem:[#allocation2 + $0x18] sm:$0xff] %vm882_vm8, %v817_v46 }
  0xb0   :  { %885 = vst.msk [vmem:[#allocation2 + $0x10] sm:$0xff] %vm882_vm8, %v815_v47  ;;  %390 = vrot.lane.b32.xlu1 %v329_v45, %s10074_s2 }
  0xb1   :  { %388 = vrot.lane.b32.xlu0 %v7140_v15, %s10074_s2  ;;  %v331_v15 = vld [vmem:[%s10069_s20 + $0x6a] sm:$0xff] }
  0xb2   :  { %v961_v49 = vpop.permute.xlu1 %960 }
  0xb3   :  { %v959_v50 = vpop.permute.xlu0 %958  ;;  %1027 = vst.msk [vmem:[#allocation2 + $0x18] sm:$0xff] %vm10029_vm9, %v961_v49 }
  0xb4   :  { %1026 = vst.msk [vmem:[#allocation2 + $0x10] sm:$0xff] %vm10029_vm9, %v959_v50  ;;  %540 = vrot.lane.b32.xlu1 %v7227_v48, %s10075_s1 }
  0xb5   :  { %538 = vrot.lane.b32.xlu0 %v329_v45, %s10075_s1  ;;  %v180_v45 = vld [vmem:[%s10069_s20 + $0x71] sm:$0xff] }
  0xb6   :  { %v1101_v53 = vpop.permute.xlu1 %1100 }
  0xb7   :  { %v1099_v54 = vpop.permute.xlu0 %1098  ;;  %1167 = vst.msk [vmem:[#allocation2 + $0x18] sm:$0xff] %vm10028_vm10, %v1101_v53 }
  0xb8   :  { %1166 = vst.msk [vmem:[#allocation2 + $0x10] sm:$0xff] %vm10028_vm10, %v1099_v54  ;;  %686 = vrot.lane.b32.xlu1 %v627_v51, %s10071_s12  ;;  %v7401_v51 = vld [vmem:[%s10069_s20 + $0x82] sm:$0xff] }
  0xb9   :  { %684 = vrot.lane.b32.xlu0 %v626_v52, %s10071_s12  ;;  %v631_v54 = vld [vmem:[%s10069_s20 + $0x83] sm:$0xff] }
  0xba   :  { %v1241_v56 = vpop.permute.xlu1 %1240 }
  0xbb   :  { %v1239_v57 = vpop.permute.xlu0 %1238  ;;  %1307 = vst.msk [vmem:[#allocation2 + $0x18] sm:$0xff] %vm10016_vm11, %v1241_v56 }
  0xbc   :  { %1306 = vst.msk [vmem:[#allocation2 + $0x10] sm:$0xff] %vm10016_vm11, %v1239_v57  ;;  %832 = vrot.lane.b32.xlu1 %v773_v55, %s10072_s30 }
  0xbd   :  { %830 = vrot.lane.b32.xlu0 %v7168_v25, %s10072_s30  ;;  %v775_v25 = vld [vmem:[%s10069_s20 + $0x74] sm:$0xff] }
  0xbe   :  { %v227_v60 = vpop.permute.xlu1 %226 }
  0xbf   :  { %v225_v61 = vpop.permute.xlu0 %224  ;;  %297 = vst.msk [vmem:[#allocation2 + $0x28] sm:$0xff] %vm291_vm4, %v227_v60 }
  0xc0   :  { %296 = vst.msk [vmem:[#allocation2 + $0x20] sm:$0xff] %vm291_vm4, %v225_v61  ;;  %976 = vrot.lane.b32.xlu1 %v7255_v58, %s10073_s11  ;;  %v7429_v61 = vld [vmem:[%s10069_s20 + $0x8c] sm:$0xff] }
  0xc1   :  { %974 = vrot.lane.b32.xlu0 %v773_v55, %s10073_s11  ;;  %v630_v55 = vld [vmem:[%s10069_s20 + $0x7b] sm:$0xff] }
  0xc2   :  { %v379_v1 = vpop.permute.xlu1 %378  ;;  %v1331_v5 = vld [vmem:[#allocation2 + $0x18] sm:$0xff] }
  0xc3   :  { %v377_v3 = vpop.permute.xlu0 %376  ;;  %v1330_v4 = vld [vmem:[#allocation2 + $0x10] sm:$0xff]  ;;  %449 = vst.msk [vmem:[#allocation2 + $0x28] sm:$0xff] %vm443_vm5, %v379_v1  ;;  %v132_v1 = vld [vmem:[%s10069_s20 + $0x88] sm:$0xff] }
  0xc4   :  { %448 = vst.msk [vmem:[#allocation2 + $0x20] sm:$0xff] %vm443_vm5, %v377_v3  ;;  %v1354_v6 = vpack.c.bf16 %v1331_v5, %v1330_v4  ;;  %1116 = vrot.lane.b32.xlu1 %v1059_v63, %s10078_s7  ;;  %v1063_v3 = vld [vmem:[%s10069_s20 + $0x8d] sm:$0xff]  ;;  %v1062_v4 = vld [vmem:[%s10069_s20 + $0x85] sm:$0xff]  ;;  %v6597_v5 = vmov 0.0|0.0  }
  0xc5   :  { %1114 = vrot.lane.b32.xlu0 %v1058_v0, %s10078_s7  ;;  %v131_v0 = vld [vmem:[%s10069_s20 + $0x80] sm:$0xff]  ;;  %158 = vst.msk [vmem:[#allocation2 + $0x88] sm:$0xff] %vm140_vm1, %v132_v1  ;;  %6426 = vmatprep.subr.bf16.mxu1 %v6597_v5  ;;  %v7604_v1 = vld [vmem:[%s10069_s20 + $0xac] sm:$0xff] }
  0xc6   :  { %6153 = vmatmul.mubr.msk.bf16.gmra.mrb[4].mxu0 %vm10027_vm0, %v1354_v6  ;;  %v529_v9 = vpop.permute.xlu1 %528  ;;  %157 = vst.msk [vmem:[#allocation2 + $0x80] sm:$0xff] %vm140_vm1, %v131_v0 }
  0xc7   :  { %v527_v10 = vpop.permute.xlu0 %526  ;;  %6156 = vmatprep.mubr.msk.bf16.mxu0 %vm6595_vm3, %v6587_v2  ;;  %596 = vst.msk [vmem:[#allocation2 + $0x28] sm:$0xff] %vm590_vm6, %v529_v9 }
  0xc8   :  { %595 = vst.msk [vmem:[#allocation2 + $0x20] sm:$0xff] %vm590_vm6, %v527_v10  ;;  %1256 = vrot.lane.b32.xlu1 %v1199_v7, %s10076_s27 }
  0xc9   :  { %1254 = vrot.lane.b32.xlu0 %v1198_v8, %s10076_s27 }
  0xca   :  { %v675_v13 = vpop.permute.xlu1 %674 }
  0xcb   :  { %v673_v14 = vpop.permute.xlu0 %672  ;;  %742 = vst.msk [vmem:[#allocation2 + $0x28] sm:$0xff] %vm736_vm7, %v675_v13 }
  0xcc   :  { %741 = vst.msk [vmem:[#allocation2 + $0x20] sm:$0xff] %vm736_vm7, %v673_v14  ;;  %242 = vrot.lane.b32.xlu1 %v179_v11, %s10077_s5  ;;  %v1203_v11 = vld [vmem:[%s10069_s20 + $0x8e] sm:$0xff] }
  0xcd   :  { %240 = vrot.lane.b32.xlu0 %v178_v12, %s10077_s5  ;;  %v1202_v12 = vld [vmem:[%s10069_s20 + $0x86] sm:$0xff] }
  0xce   :  { %v821_v16 = vpop.permute.xlu1 %820 }
  0xcf   :  { %v819_v17 = vpop.permute.xlu0 %818  ;;  %888 = vst.msk [vmem:[#allocation2 + $0x28] sm:$0xff] %vm882_vm8, %v821_v16  ;;  %v182_v16 = vld [vmem:[%s10069_s20 + $0x81] sm:$0xff] }
  0xd0   :  { %887 = vst.msk [vmem:[#allocation2 + $0x20] sm:$0xff] %vm882_vm8, %v819_v17  ;;  %394 = vrot.lane.b32.xlu1 %v331_v15, %s10074_s2 }
  0xd1   :  { %392 = vrot.lane.b32.xlu0 %v7227_v48, %s10074_s2  ;;  %v333_v48 = vld [vmem:[%s10069_s20 + $0x7a] sm:$0xff] }
  0xd2   :  { %v965_v19 = vpop.permute.xlu1 %964 }
  0xd3   :  { %v963_v20 = vpop.permute.xlu0 %962  ;;  %1029 = vst.msk [vmem:[#allocation2 + $0x28] sm:$0xff] %vm10029_vm9, %v965_v19  ;;  %v335_v19 = vld [vmem:[%s10069_s20 + $0x8a] sm:$0xff] }
  0xd4   :  { %1028 = vst.msk [vmem:[#allocation2 + $0x20] sm:$0xff] %vm10029_vm9, %v963_v20  ;;  %544 = vrot.lane.b32.xlu1 %v7314_v18, %s10075_s1 }
  0xd5   :  { %542 = vrot.lane.b32.xlu0 %v331_v15, %s10075_s1  ;;  %v183_v15 = vld [vmem:[%s10069_s20 + $0x89] sm:$0xff] }
  0xd6   :  { %v1105_v23 = vpop.permute.xlu1 %1104 }
  0xd7   :  { %v1103_v24 = vpop.permute.xlu0 %1102  ;;  %1169 = vst.msk [vmem:[#allocation2 + $0x28] sm:$0xff] %vm10028_vm10, %v1105_v23 }
  0xd8   :  { %1168 = vst.msk [vmem:[#allocation2 + $0x20] sm:$0xff] %vm10028_vm10, %v1103_v24  ;;  %690 = vrot.lane.b32.xlu1 %v629_v21, %s10071_s12 }
  0xd9   :  { %688 = vrot.lane.b32.xlu0 %v628_v22, %s10071_s12  ;;  %v7489_v22 = vld [vmem:[%s10069_s20 + $0x92] sm:$0xff] }
  0xda   :  { %v1245_v26 = vpop.permute.xlu1 %1244 }
  0xdb   :  { %v1243_v27 = vpop.permute.xlu0 %1242  ;;  %1309 = vst.msk [vmem:[#allocation2 + $0x28] sm:$0xff] %vm10016_vm11, %v1245_v26  ;;  %v632_v26 = vld [vmem:[%s10069_s20 + $0x8b] sm:$0xff] }
  0xdc   :  { %1308 = vst.msk [vmem:[#allocation2 + $0x20] sm:$0xff] %vm10016_vm11, %v1243_v27  ;;  %836 = vrot.lane.b32.xlu1 %v775_v25, %s10072_s30 }
  0xdd   :  { %834 = vrot.lane.b32.xlu0 %v7255_v58, %s10072_s30  ;;  %v777_v58 = vld [vmem:[%s10069_s20 + $0x84] sm:$0xff] }
  0xde   :  { %v231_v30 = vpop.permute.xlu1 %230 }
  0xdf   :  { %v229_v31 = vpop.permute.xlu0 %228  ;;  %299 = vst.msk [vmem:[#allocation2 + $0x38] sm:$0xff] %vm291_vm4, %v231_v30 }
  0xe0   :  { %298 = vst.msk [vmem:[#allocation2 + $0x30] sm:$0xff] %vm291_vm4, %v229_v31  ;;  %980 = vrot.lane.b32.xlu1 %v7342_v28, %s10073_s11 }
  0xe1   :  { %978 = vrot.lane.b32.xlu0 %v775_v25, %s10073_s11  ;;  %v633_v25 = vld [vmem:[%s10069_s20 + $0x93] sm:$0xff] }
  0xe2   :  { %v383_v35 = vpop.permute.xlu1 %382  ;;  %v1333_v38 = vld [vmem:[#allocation2 + $0x28] sm:$0xff] }
  0xe3   :  { %v381_v36 = vpop.permute.xlu0 %380  ;;  %v1332_v37 = vld [vmem:[#allocation2 + $0x20] sm:$0xff]  ;;  %451 = vst.msk [vmem:[#allocation2 + $0x38] sm:$0xff] %vm443_vm5, %v383_v35  ;;  %v133_v35 = vld [vmem:[%s10069_s20 + $0x90] sm:$0xff] }
  0xe4   :  { %450 = vst.msk [vmem:[#allocation2 + $0x30] sm:$0xff] %vm443_vm5, %v381_v36  ;;  %v1355_v39 = vpack.c.bf16 %v1333_v38, %v1332_v37  ;;  %1120 = vrot.lane.b32.xlu1 %v1061_v33, %s10078_s7  ;;  %v134_v36 = vld [vmem:[%s10069_s20 + $0x98] sm:$0xff] }
  0xe5   :  { %1118 = vrot.lane.b32.xlu0 %v1060_v34, %s10078_s7  ;;  %159 = vst.msk [vmem:[#allocation2 + $0x90] sm:$0xff] %vm140_vm1, %v133_v35  ;;  %v1065_v37 = vld [vmem:[%s10069_s20 + $0x9d] sm:$0xff]  ;;  %v1064_v38 = vld [vmem:[%s10069_s20 + $0x95] sm:$0xff]  ;;  %160 = vst.msk [vmem:[#allocation2 + $0x98] sm:$0xff] %vm140_vm1, %v134_v36 }
  0xe6   :  { %6157 = vmatmul.mubr.msk.bf16.gmra.mrb[8].mxu0 %vm10027_vm0, %v1355_v39  ;;  %v533_v42 = vpop.permute.xlu1 %532  ;;  %v929_v36 = vld [vmem:[%s10069_s20 + $0xbc] sm:$0xff] }
  0xe7   :  { %v531_v43 = vpop.permute.xlu0 %530  ;;  %6160 = vmatprep.mubr.msk.bf16.mxu0 %vm6595_vm3, %v6587_v2  ;;  %598 = vst.msk [vmem:[#allocation2 + $0x38] sm:$0xff] %vm590_vm6, %v533_v42 }
  0xe8   :  { %597 = vst.msk [vmem:[#allocation2 + $0x30] sm:$0xff] %vm590_vm6, %v531_v43  ;;  %1260 = vrot.lane.b32.xlu1 %v1201_v40, %s10076_s27 }
  0xe9   :  { %1258 = vrot.lane.b32.xlu0 %v1200_v41, %s10076_s27 }
  0xea   :  { %v679_v46 = vpop.permute.xlu1 %678 }
  0xeb   :  { %v677_v47 = vpop.permute.xlu0 %676  ;;  %744 = vst.msk [vmem:[#allocation2 + $0x38] sm:$0xff] %vm736_vm7, %v679_v46 }
  0xec   :  { %743 = vst.msk [vmem:[#allocation2 + $0x30] sm:$0xff] %vm736_vm7, %v677_v47  ;;  %246 = vrot.lane.b32.xlu1 %v181_v44, %s10077_s5  ;;  %v1205_v44 = vld [vmem:[%s10069_s20 + $0x9e] sm:$0xff] }
  0xed   :  { %244 = vrot.lane.b32.xlu0 %v180_v45, %s10077_s5  ;;  %v1204_v45 = vld [vmem:[%s10069_s20 + $0x96] sm:$0xff] }
  0xee   :  { %v825_v49 = vpop.permute.xlu1 %824 }
  0xef   :  { %v823_v50 = vpop.permute.xlu0 %822  ;;  %890 = vst.msk [vmem:[#allocation2 + $0x38] sm:$0xff] %vm882_vm8, %v825_v49  ;;  %v184_v49 = vld [vmem:[%s10069_s20 + $0x91] sm:$0xff] }
  0xf0   :  { %889 = vst.msk [vmem:[#allocation2 + $0x30] sm:$0xff] %vm882_vm8, %v823_v50  ;;  %398 = vrot.lane.b32.xlu1 %v333_v48, %s10074_s2 }
  0xf1   :  { %396 = vrot.lane.b32.xlu0 %v7314_v18, %s10074_s2 }
  0xf2   :  { %v969_v52 = vpop.permute.xlu1 %968 }
  0xf3   :  { %v967_v53 = vpop.permute.xlu0 %966  ;;  %1031 = vst.msk [vmem:[#allocation2 + $0x38] sm:$0xff] %vm10029_vm9, %v969_v52  ;;  %v337_v52 = vld [vmem:[%s10069_s20 + $0x9a] sm:$0xff] }
  0xf4   :  { %1030 = vst.msk [vmem:[#allocation2 + $0x30] sm:$0xff] %vm10029_vm9, %v967_v53  ;;  %548 = vrot.lane.b32.xlu1 %v7401_v51, %s10075_s1 }
  0xf5   :  { %546 = vrot.lane.b32.xlu0 %v333_v48, %s10075_s1  ;;  %v185_v48 = vld [vmem:[%s10069_s20 + $0x99] sm:$0xff] }
  0xf6   :  { %v1109_v56 = vpop.permute.xlu1 %1108 }
  0xf7   :  { %v1107_v57 = vpop.permute.xlu0 %1106  ;;  %1171 = vst.msk [vmem:[#allocation2 + $0x38] sm:$0xff] %vm10028_vm10, %v1109_v56 }
  0xf8   :  { %1170 = vst.msk [vmem:[#allocation2 + $0x30] sm:$0xff] %vm10028_vm10, %v1107_v57  ;;  %694 = vrot.lane.b32.xlu1 %v631_v54, %s10071_s12 }
  0xf9   :  { %692 = vrot.lane.b32.xlu0 %v630_v55, %s10071_s12  ;;  %v7576_v55 = vld [vmem:[%s10069_s20 + $0xa2] sm:$0xff] }
  0xfa   :  { %v1249_v59 = vpop.permute.xlu1 %1248 }
  0xfb   :  { %v1247_v60 = vpop.permute.xlu0 %1246  ;;  %1311 = vst.msk [vmem:[#allocation2 + $0x38] sm:$0xff] %vm10016_vm11, %v1249_v59  ;;  %v634_v59 = vld [vmem:[%s10069_s20 + $0x9b] sm:$0xff] }
  0xfc   :  { %1310 = vst.msk [vmem:[#allocation2 + $0x30] sm:$0xff] %vm10016_vm11, %v1247_v60  ;;  %840 = vrot.lane.b32.xlu1 %v777_v58, %s10072_s30 }
  0xfd   :  { %838 = vrot.lane.b32.xlu0 %v7342_v28, %s10072_s30 }
  0xfe   :  { %v235_v62 = vpop.permute.xlu1 %234 }
  0xff   :  { %v233_v63 = vpop.permute.xlu0 %232  ;;  %301 = vst.msk [vmem:[#allocation2 + $0x48] sm:$0xff] %vm291_vm4, %v235_v62  ;;  %v781_v62 = vld [vmem:[%s10069_s20 + $0xa4] sm:$0xff] }
 0x100   :  { %300 = vst.msk [vmem:[#allocation2 + $0x40] sm:$0xff] %vm291_vm4, %v233_v63  ;;  %984 = vrot.lane.b32.xlu1 %v7429_v61, %s10073_s11 }
 0x101   :  { %982 = vrot.lane.b32.xlu0 %v777_v58, %s10073_s11  ;;  %v635_v58 = vld [vmem:[%s10069_s20 + $0xa3] sm:$0xff] }
 0x102   :  { %v387_v6 = vpop.permute.xlu1 %386  ;;  %v1335_v9 = vld [vmem:[#allocation2 + $0x38] sm:$0xff] }
 0x103   :  { %v385_v7 = vpop.permute.xlu0 %384  ;;  %v1334_v8 = vld [vmem:[#allocation2 + $0x30] sm:$0xff]  ;;  %453 = vst.msk [vmem:[#allocation2 + $0x48] sm:$0xff] %vm443_vm5, %v387_v6  ;;  %v135_v6 = vld [vmem:[%s10069_s20 + $0xa0] sm:$0xff] }
 0x104   :  { %452 = vst.msk [vmem:[#allocation2 + $0x40] sm:$0xff] %vm443_vm5, %v385_v7  ;;  %v1356_v10 = vpack.c.bf16 %v1335_v9, %v1334_v8  ;;  %1124 = vrot.lane.b32.xlu1 %v1063_v3, %s10078_s7  ;;  %v136_v7 = vld [vmem:[%s10069_s20 + $0xa8] sm:$0xff] }
 0x105   :  { %1122 = vrot.lane.b32.xlu0 %v1062_v4, %s10078_s7  ;;  %161 = vst.msk [vmem:[#allocation2 + $0xa0] sm:$0xff] %vm140_vm1, %v135_v6  ;;  %v1067_v8 = vld [vmem:[%s10069_s20 + $0xad] sm:$0xff]  ;;  %v1066_v9 = vld [vmem:[%s10069_s20 + $0xa5] sm:$0xff]  ;;  %162 = vst.msk [vmem:[#allocation2 + $0xa8] sm:$0xff] %vm140_vm1, %v136_v7 }
 0x106   :  { %6161 = vmatmul.mubr.msk.bf16.gmra.mrb[12].mxu0 %vm10027_vm0, %v1356_v10  ;;  %v537_v13 = vpop.permute.xlu1 %536 }
 0x107   :  { %v535_v14 = vpop.permute.xlu0 %534  ;;  %6164 = vmatprep.mubr.msk.bf16.mxu0 %vm6595_vm3, %v6587_v2  ;;  %600 = vst.msk [vmem:[#allocation2 + $0x48] sm:$0xff] %vm590_vm6, %v537_v13 }
 0x108   :  { %599 = vst.msk [vmem:[#allocation2 + $0x40] sm:$0xff] %vm590_vm6, %v535_v14  ;;  %1264 = vrot.lane.b32.xlu1 %v1203_v11, %s10076_s27 }
 0x109   :  { %1262 = vrot.lane.b32.xlu0 %v1202_v12, %s10076_s27 }
 0x10a   :  { %v683_v17 = vpop.permute.xlu1 %682 }
 0x10b   :  { %v681_v18 = vpop.permute.xlu0 %680  ;;  %746 = vst.msk [vmem:[#allocation2 + $0x48] sm:$0xff] %vm736_vm7, %v683_v17 }
 0x10c   :  { %745 = vst.msk [vmem:[#allocation2 + $0x40] sm:$0xff] %vm736_vm7, %v681_v18  ;;  %250 = vrot.lane.b32.xlu1 %v183_v15, %s10077_s5  ;;  %v1207_v15 = vld [vmem:[%s10069_s20 + $0xae] sm:$0xff] }
 0x10d   :  { %248 = vrot.lane.b32.xlu0 %v182_v16, %s10077_s5  ;;  %v1206_v16 = vld [vmem:[%s10069_s20 + $0xa6] sm:$0xff] }
 0x10e   :  { %v829_v20 = vpop.permute.xlu1 %828 }
 0x10f   :  { %v827_v21 = vpop.permute.xlu0 %826  ;;  %892 = vst.msk [vmem:[#allocation2 + $0x48] sm:$0xff] %vm882_vm8, %v829_v20  ;;  %v186_v20 = vld [vmem:[%s10069_s20 + $0xa1] sm:$0xff] }
 0x110   :  { %891 = vst.msk [vmem:[#allocation2 + $0x40] sm:$0xff] %vm882_vm8, %v827_v21  ;;  %402 = vrot.lane.b32.xlu1 %v335_v19, %s10074_s2 }
 0x111   :  { %400 = vrot.lane.b32.xlu0 %v7401_v51, %s10074_s2 }
 0x112   :  { %v973_v23 = vpop.permute.xlu1 %972 }
 0x113   :  { %v971_v24 = vpop.permute.xlu0 %970  ;;  %1033 = vst.msk [vmem:[#allocation2 + $0x48] sm:$0xff] %vm10029_vm9, %v973_v23  ;;  %v339_v23 = vld [vmem:[%s10069_s20 + $0xaa] sm:$0xff] }
 0x114   :  { %1032 = vst.msk [vmem:[#allocation2 + $0x40] sm:$0xff] %vm10029_vm9, %v971_v24  ;;  %552 = vrot.lane.b32.xlu1 %v7489_v22, %s10075_s1 }
 0x115   :  { %550 = vrot.lane.b32.xlu0 %v335_v19, %s10075_s1  ;;  %v187_v19 = vld [vmem:[%s10069_s20 + $0xa9] sm:$0xff] }
 0x116   :  { %v1113_v27 = vpop.permute.xlu1 %1112 }
 0x117   :  { %v1111_v28 = vpop.permute.xlu0 %1110  ;;  %1173 = vst.msk [vmem:[#allocation2 + $0x48] sm:$0xff] %vm10028_vm10, %v1113_v27 }
 0x118   :  { %1172 = vst.msk [vmem:[#allocation2 + $0x40] sm:$0xff] %vm10028_vm10, %v1111_v28  ;;  %698 = vrot.lane.b32.xlu1 %v633_v25, %s10071_s12 }
 0x119   :  { %696 = vrot.lane.b32.xlu0 %v632_v26, %s10071_s12  ;;  %v491_v26 = vld [vmem:[%s10069_s20 + $0xb2] sm:$0xff] }
 0x11a   :  { %v1253_v30 = vpop.permute.xlu1 %1252 }
 0x11b   :  { %v1251_v31 = vpop.permute.xlu0 %1250  ;;  %1313 = vst.msk [vmem:[#allocation2 + $0x48] sm:$0xff] %vm10016_vm11, %v1253_v30  ;;  %v636_v30 = vld [vmem:[%s10069_s20 + $0xab] sm:$0xff] }
 0x11c   :  { %1312 = vst.msk [vmem:[#allocation2 + $0x40] sm:$0xff] %vm10016_vm11, %v1251_v31  ;;  %844 = vrot.lane.b32.xlu1 %v779_v29, %s10072_s30 }
 0x11d   :  { %842 = vrot.lane.b32.xlu0 %v7429_v61, %s10072_s30 }
 0x11e   :  { %v239_v33 = vpop.permute.xlu1 %238 }
 0x11f   :  { %v237_v34 = vpop.permute.xlu0 %236  ;;  %303 = vst.msk [vmem:[#allocation2 + $0x58] sm:$0xff] %vm291_vm4, %v239_v33  ;;  %v783_v33 = vld [vmem:[%s10069_s20 + $0xb4] sm:$0xff] }
 0x120   :  { %302 = vst.msk [vmem:[#allocation2 + $0x50] sm:$0xff] %vm291_vm4, %v237_v34  ;;  %988 = vrot.lane.b32.xlu1 %v7517_v32, %s10073_s11 }
 0x121   :  { %986 = vrot.lane.b32.xlu0 %v779_v29, %s10073_s11  ;;  %v637_v29 = vld [vmem:[%s10069_s20 + $0xb3] sm:$0xff] }
 0x122   :  { %v391_v39 = vpop.permute.xlu1 %390  ;;  %v1337_v42 = vld [vmem:[#allocation2 + $0x48] sm:$0xff] }
 0x123   :  { %v389_v40 = vpop.permute.xlu0 %388  ;;  %v1336_v41 = vld [vmem:[#allocation2 + $0x40] sm:$0xff]  ;;  %455 = vst.msk [vmem:[#allocation2 + $0x58] sm:$0xff] %vm443_vm5, %v391_v39  ;;  %v137_v39 = vld [vmem:[%s10069_s20 + $0xb0] sm:$0xff] }
 0x124   :  { %454 = vst.msk [vmem:[#allocation2 + $0x50] sm:$0xff] %vm443_vm5, %v389_v40  ;;  %v1357_v43 = vpack.c.bf16 %v1337_v42, %v1336_v41  ;;  %1128 = vrot.lane.b32.xlu1 %v1065_v37, %s10078_s7  ;;  %v1069_v40 = vld [vmem:[%s10069_s20 + $0xbd] sm:$0xff]  ;;  %v1068_v41 = vld [vmem:[%s10069_s20 + $0xb5] sm:$0xff] }
 0x125   :  { %1126 = vrot.lane.b32.xlu0 %v1064_v38, %s10078_s7  ;;  %163 = vst.msk [vmem:[#allocation2 + $0xb0] sm:$0xff] %vm140_vm1, %v137_v39 }
 0x126   :  { %6165 = vmatmul.mubr.msk.bf16.gmra.mrb[16].mxu0 %vm10027_vm0, %v1357_v43  ;;  %v541_v46 = vpop.permute.xlu1 %540 }
 0x127   :  { %v539_v47 = vpop.permute.xlu0 %538  ;;  %6168 = vmatprep.mubr.msk.bf16.mxu0 %vm6595_vm3, %v6587_v2  ;;  %602 = vst.msk [vmem:[#allocation2 + $0x58] sm:$0xff] %vm590_vm6, %v541_v46  ;;  %v138_v46 = vld [vmem:[%s10069_s20 + $0xb8] sm:$0xff] }
 0x128   :  { %601 = vst.msk [vmem:[#allocation2 + $0x50] sm:$0xff] %vm590_vm6, %v539_v47  ;;  %1268 = vrot.lane.b32.xlu1 %v1205_v44, %s10076_s27 }
 0x129   :  { %1266 = vrot.lane.b32.xlu0 %v1204_v45, %s10076_s27  ;;  %164 = vst.msk [vmem:[#allocation2 + $0xb8] sm:$0xff] %vm140_vm1, %v138_v46 }
 0x12a   :  { %v687_v50 = vpop.permute.xlu1 %686 }
 0x12b   :  { %v685_v51 = vpop.permute.xlu0 %684  ;;  %748 = vst.msk [vmem:[#allocation2 + $0x58] sm:$0xff] %vm736_vm7, %v687_v50 }
 0x12c   :  { %747 = vst.msk [vmem:[#allocation2 + $0x50] sm:$0xff] %vm736_vm7, %v685_v51  ;;  %254 = vrot.lane.b32.xlu1 %v185_v48, %s10077_s5  ;;  %v1209_v48 = vld [vmem:[%s10069_s20 + $0xbe] sm:$0xff] }
 0x12d   :  { %252 = vrot.lane.b32.xlu0 %v184_v49, %s10077_s5  ;;  %v1208_v49 = vld [vmem:[%s10069_s20 + $0xb6] sm:$0xff] }
 0x12e   :  { %v833_v53 = vpop.permute.xlu1 %832 }
 0x12f   :  { %v831_v54 = vpop.permute.xlu0 %830  ;;  %894 = vst.msk [vmem:[#allocation2 + $0x58] sm:$0xff] %vm882_vm8, %v833_v53 }
 0x130   :  { %893 = vst.msk [vmem:[#allocation2 + $0x50] sm:$0xff] %vm882_vm8, %v831_v54  ;;  %406 = vrot.lane.b32.xlu1 %v337_v52, %s10074_s2 }
 0x131   :  { %404 = vrot.lane.b32.xlu0 %v7489_v22, %s10074_s2 }
 0x132   :  { %v977_v56 = vpop.permute.xlu1 %976 }
 0x133   :  { %v975_v57 = vpop.permute.xlu0 %974  ;;  %1035 = vst.msk [vmem:[#allocation2 + $0x58] sm:$0xff] %vm10029_vm9, %v977_v56  ;;  %v492_v56 = vld [vmem:[%s10069_s20 + $0xba] sm:$0xff] }
 0x134   :  { %1034 = vst.msk [vmem:[#allocation2 + $0x50] sm:$0xff] %vm10029_vm9, %v975_v57  ;;  %556 = vrot.lane.b32.xlu1 %v7576_v55, %s10075_s1 }
 0x135   :  { %554 = vrot.lane.b32.xlu0 %v337_v52, %s10075_s1  ;;  %v188_v52 = vld [vmem:[%s10069_s20 + $0xb1] sm:$0xff] }
 0x136   :  { %v1117_v60 = vpop.permute.xlu1 %1116 }
 0x137   :  { %v1115_v61 = vpop.permute.xlu0 %1114  ;;  %1175 = vst.msk [vmem:[#allocation2 + $0x58] sm:$0xff] %vm10028_vm10, %v1117_v60 }
 0x138   :  { %1174 = vst.msk [vmem:[#allocation2 + $0x50] sm:$0xff] %vm10028_vm10, %v1115_v61  ;;  %702 = vrot.lane.b32.xlu1 %v635_v58, %s10071_s12 }
 0x139   :  { %700 = vrot.lane.b32.xlu0 %v634_v59, %s10071_s12  ;;  %v638_v59 = vld [vmem:[%s10069_s20 + $0xbb] sm:$0xff] }
 0x13a   :  { %v1257_v63 = vpop.permute.xlu1 %1256 }
 0x13b   :  { %v1255_v0 = vpop.permute.xlu0 %1254  ;;  %1315 = vst.msk [vmem:[#allocation2 + $0x58] sm:$0xff] %vm10016_vm11, %v1257_v63 }
 0x13c   :  { %1314 = vst.msk [vmem:[#allocation2 + $0x50] sm:$0xff] %vm10016_vm11, %v1255_v0  ;;  %848 = vrot.lane.b32.xlu1 %v781_v62, %s10072_s30 }
 0x13d   :  { %846 = vrot.lane.b32.xlu0 %v7517_v32, %s10072_s30 }
 0x13e   :  { %v243_v3 = vpop.permute.xlu1 %242 }
 0x13f   :  { %v241_v4 = vpop.permute.xlu0 %240  ;;  %305 = vst.msk [vmem:[#allocation2 + $0x68] sm:$0xff] %vm291_vm4, %v243_v3 }
 0x140   :  { %304 = vst.msk [vmem:[#allocation2 + $0x60] sm:$0xff] %vm291_vm4, %v241_v4  ;;  %992 = vrot.lane.b32.xlu1 %v7604_v1, %s10073_s11  ;;  %v7762_v4 = vld [vmem:[%s10080_s28] ss:$0 sm:$0xff]  ;;  %s10082_s28 = sld [smem:[#allocation18_spill]] }
 0x141   :  { %990 = vrot.lane.b32.xlu0 %v781_v62, %s10073_s11  ;;  %v493_v62 = vld [vmem:[%s10069_s20 + $0xc2] sm:$0x3f] }
 0x142   :  { %v395_v10 = vpop.permute.xlu1 %394  ;;  %v1339_v13 = vld [vmem:[#allocation2 + $0x58] sm:$0xff] }
 0x143   :  { %v393_v11 = vpop.permute.xlu0 %392  ;;  %v1338_v12 = vld [vmem:[#allocation2 + $0x50] sm:$0xff]  ;;  %457 = vst.msk [vmem:[#allocation2 + $0x68] sm:$0xff] %vm443_vm5, %v395_v10 }
 0x144   :  { %456 = vst.msk [vmem:[#allocation2 + $0x60] sm:$0xff] %vm443_vm5, %v393_v11  ;;  %v1358_v14 = vpack.c.bf16 %v1339_v13, %v1338_v12  ;;  %1132 = vrot.lane.b32.xlu1 %v1067_v8, %s10078_s7  ;;  %v639_v8 = vld [vmem:[%s10069_s20 + $0xc3] sm:$0x1f] }
 0x145   :  { %1130 = vrot.lane.b32.xlu0 %v1066_v9, %s10078_s7  ;;  %v930_v9 = vld [vmem:[%s10069_s20 + $0xc4] sm:$0xf] }
 0x146   :  { %6169 = vmatmul.mubr.msk.bf16.gmra.mrb[20].mxu0 %vm10027_vm0, %v1358_v14  ;;  %v545_v17 = vpop.permute.xlu1 %544 }
 0x147   :  { %v543_v18 = vpop.permute.xlu0 %542  ;;  %6172 = vmatprep.mubr.msk.bf16.mxu0 %vm6595_vm3, %v6587_v2  ;;  %604 = vst.msk [vmem:[#allocation2 + $0x68] sm:$0xff] %vm590_vm6, %v545_v17  ;;  %v785_v17 = vld [vmem:[%s10069_s20 + $0xc4] sm:$0xf] }
 0x148   :  { %603 = vst.msk [vmem:[#allocation2 + $0x60] sm:$0xff] %vm590_vm6, %v543_v18  ;;  %1272 = vrot.lane.b32.xlu1 %v1207_v15, %s10076_s27  ;;  %v1070_v18 = vld [vmem:[%s10069_s20 + $0xc5] sm:$0x7] }
 0x149   :  { %1270 = vrot.lane.b32.xlu0 %v1206_v16, %s10076_s27  ;;  %v139_v16 = vld [vmem:[%s10069_s20 + $0xc0] sm:$0xff] }
 0x14a   :  { %v691_v21 = vpop.permute.xlu1 %690  ;;  %165 = vst.msk [vmem:[#allocation2 + $0xc0] sm:$0xff] %vm140_vm1, %v139_v16 }
 0x14b   :  { %v689_v22 = vpop.permute.xlu0 %688  ;;  %750 = vst.msk [vmem:[#allocation2 + $0x68] sm:$0xff] %vm736_vm7, %v691_v21 }
 0x14c   :  { %749 = vst.msk [vmem:[#allocation2 + $0x60] sm:$0xff] %vm736_vm7, %v689_v22  ;;  %258 = vrot.lane.b32.xlu1 %v187_v19, %s10077_s5 }
 0x14d   :  { %256 = vrot.lane.b32.xlu0 %v186_v20, %s10077_s5 }
 0x14e   :  { %v837_v24 = vpop.permute.xlu1 %836 }
 0x14f   :  { %v835_v25 = vpop.permute.xlu0 %834  ;;  %896 = vst.msk [vmem:[#allocation2 + $0x68] sm:$0xff] %vm882_vm8, %v837_v24  ;;  %v1210_v24 = vld [vmem:[%s10069_s20 + $0xc6] sm:$0x3] }
 0x150   :  { %895 = vst.msk [vmem:[#allocation2 + $0x60] sm:$0xff] %vm882_vm8, %v835_v25  ;;  %410 = vrot.lane.b32.xlu1 %v339_v23, %s10074_s2 }
 0x151   :  { %408 = vrot.lane.b32.xlu0 %v7576_v55, %s10074_s2  ;;  %v189_v55 = vld [vmem:[%s10069_s20 + $0xb9] sm:$0xff] }
 0x152   :  { %v981_v27 = vpop.permute.xlu1 %980 }
 0x153   :  { %v979_v28 = vpop.permute.xlu0 %978  ;;  %1037 = vst.msk [vmem:[#allocation2 + $0x68] sm:$0xff] %vm10029_vm9, %v981_v27 }
 0x154   :  { %1036 = vst.msk [vmem:[#allocation2 + $0x60] sm:$0xff] %vm10029_vm9, %v979_v28  ;;  %560 = vrot.lane.b32.xlu1 %v491_v26, %s10075_s1 }
 0x155   :  { %558 = vrot.lane.b32.xlu0 %v339_v23, %s10075_s1 }
 0x156   :  { %v1121_v31 = vpop.permute.xlu1 %1120 }
 0x157   :  { %v1119_v32 = vpop.permute.xlu0 %1118  ;;  %1177 = vst.msk [vmem:[#allocation2 + $0x68] sm:$0xff] %vm10028_vm10, %v1121_v31 }
 0x158   :  { %1176 = vst.msk [vmem:[#allocation2 + $0x60] sm:$0xff] %vm10028_vm10, %v1119_v32  ;;  %706 = vrot.lane.b32.xlu1 %v637_v29, %s10071_s12  ;;  %v342_v32 = vld [vmem:[%s10069_s20 + $0xc2] sm:$0x3f] }
 0x159   :  { %704 = vrot.lane.b32.xlu0 %v636_v30, %s10071_s12  ;;  %v190_v30 = vld [vmem:[%s10069_s20 + $0xc1] sm:$0x7f]  ;;  %s10046_s20 = smov 48  }
 0x15a   :  { %v1261_v34 = vpop.permute.xlu1 %1260 }
 0x15b   :  { %v1259_v35 = vpop.permute.xlu0 %1258  ;;  %1317 = vst.msk [vmem:[#allocation2 + $0x68] sm:$0xff] %vm10016_vm11, %v1261_v34 }
 0x15c   :  { %1316 = vst.msk [vmem:[#allocation2 + $0x60] sm:$0xff] %vm10016_vm11, %v1259_v35  ;;  %852 = vrot.lane.b32.xlu1 %v783_v33, %s10072_s30 }
 0x15d   :  { %850 = vrot.lane.b32.xlu0 %v7604_v1, %s10072_s30  ;;  %v7753_v1 = vld [vmem:[%s10079_s29] ss:$0 sm:$0xff]  ;;  %s10081_s29 = sld [smem:[#allocation17_spill]] }
 0x15e   :  { %v247_v37 = vpop.permute.xlu1 %246 }
 0x15f   :  { %v245_v38 = vpop.permute.xlu0 %244  ;;  %307 = vst.msk [vmem:[#allocation2 + $0x78] sm:$0xff] %vm291_vm4, %v247_v37 }
 0x160   :  { %306 = vst.msk [vmem:[#allocation2 + $0x70] sm:$0xff] %vm291_vm4, %v245_v38  ;;  %996 = vrot.lane.b32.xlu1 %v929_v36, %s10073_s11 }
 0x161   :  { %994 = vrot.lane.b32.xlu0 %v783_v33, %s10073_s11 }
 0x162   :  { %v399_v42 = vpop.permute.xlu1 %398  ;;  %v1341_v45 = vld [vmem:[#allocation2 + $0x68] sm:$0xff] }
 0x163   :  { %v397_v43 = vpop.permute.xlu0 %396  ;;  %v1340_v44 = vld [vmem:[#allocation2 + $0x60] sm:$0xff]  ;;  %459 = vst.msk [vmem:[#allocation2 + $0x78] sm:$0xff] %vm443_vm5, %v399_v42 }
 0x164   :  { %458 = vst.msk [vmem:[#allocation2 + $0x70] sm:$0xff] %vm443_vm5, %v397_v43  ;;  %v1359_v47 = vpack.c.bf16 %v1341_v45, %v1340_v44  ;;  %1136 = vrot.lane.b32.xlu1 %v1069_v40, %s10078_s7 }
 0x165   :  { %1134 = vrot.lane.b32.xlu0 %v1068_v41, %s10078_s7 }
 0x166   :  { %6173 = vmatmul.mubr.msk.bf16.gmra.mrb[24].mxu0 %vm10027_vm0, %v1359_v47  ;;  %v549_v50 = vpop.permute.xlu1 %548 }
 0x167   :  { %v547_v51 = vpop.permute.xlu0 %546  ;;  %6176 = vmatprep.mubr.msk.bf16.mxu0 %vm6595_vm3, %v6587_v2  ;;  %606 = vst.msk [vmem:[#allocation2 + $0x78] sm:$0xff] %vm590_vm6, %v549_v50 }
 0x168   :  { %605 = vst.msk [vmem:[#allocation2 + $0x70] sm:$0xff] %vm590_vm6, %v547_v51  ;;  %1276 = vrot.lane.b32.xlu1 %v1209_v48, %s10076_s27 }
 0x169   :  { %1274 = vrot.lane.b32.xlu0 %v1208_v49, %s10076_s27 }
 0x16a   :  { %v695_v53 = vpop.permute.xlu1 %694 }
 0x16b   :  { %v693_v54 = vpop.permute.xlu0 %692  ;;  %752 = vst.msk [vmem:[#allocation2 + $0x78] sm:$0xff] %vm736_vm7, %v695_v53 }
 0x16c   :  { %751 = vst.msk [vmem:[#allocation2 + $0x70] sm:$0xff] %vm736_vm7, %v693_v54  ;;  %412 = vrot.lane.b32.xlu1 %v491_v26, %s10074_s2 }
 0x16d   :  { %260 = vrot.lane.b32.xlu0 %v188_v52, %s10077_s5 }
 0x16e   :  { %v841_v57 = vpop.permute.xlu1 %840 }
 0x16f   :  { %v839_v58 = vpop.permute.xlu0 %838  ;;  %898 = vst.msk [vmem:[#allocation2 + $0x78] sm:$0xff] %vm882_vm8, %v841_v57 }
 0x170   :  { %897 = vst.msk [vmem:[#allocation2 + $0x70] sm:$0xff] %vm882_vm8, %v839_v58  ;;  %262 = vrot.lane.b32.xlu1 %v189_v55, %s10077_s5 }
 0x171   :  { %562 = vrot.lane.b32.xlu0 %v492_v56, %s10075_s1 }
 0x172   :  { %v985_v60 = vpop.permute.xlu1 %984 }
 0x173   :  { %v983_v61 = vpop.permute.xlu0 %982  ;;  %1039 = vst.msk [vmem:[#allocation2 + $0x78] sm:$0xff] %vm10029_vm9, %v985_v60 }
 0x174   :  { %1038 = vst.msk [vmem:[#allocation2 + $0x70] sm:$0xff] %vm10029_vm9, %v983_v61  ;;  %414 = vrot.lane.b32.xlu1 %v492_v56, %s10074_s2 }
 0x175   :  { %708 = vrot.lane.b32.xlu0 %v638_v59, %s10071_s12 }
 0x176   :  { %v1125_v63 = vpop.permute.xlu1 %1124 }
 0x177   :  { %v1123_v0 = vpop.permute.xlu0 %1122  ;;  %1179 = vst.msk [vmem:[#allocation2 + $0x78] sm:$0xff] %vm10028_vm10, %v1125_v63 }
 0x178   :  { %1178 = vst.msk [vmem:[#allocation2 + $0x70] sm:$0xff] %vm10028_vm10, %v1123_v0  ;;  %564 = vrot.lane.b32.xlu1 %v493_v62, %s10075_s1 }
 0x179   :  { %854 = vrot.lane.b32.xlu0 %v929_v36, %s10072_s30  ;;  %v1463_v3 = vpop.f32.mrb[0].mxu0 }
 0x17a   :  { %v1572_v6 = vmul.f32 %v7753_v1, %v1463_v3  ;;  %v6150_v7 = vpop.f32.mrb[1].mxu0  ;;  %v1265_v10 = vpop.permute.xlu1 %1264 }
 0x17b   :  { %v1263_v11 = vpop.permute.xlu0 %1262  ;;  %1319 = vst.msk [vmem:[#allocation2 + $0x78] sm:$0xff] %vm10016_vm11, %v1265_v10  ;;  %v1466_v12 = vpop.f32.mrb[2].mxu0 }
 0x17c   :  { %1318 = vst.msk [vmem:[#allocation2 + $0x70] sm:$0xff] %vm10016_vm11, %v1263_v11  ;;  %v1604_v13 = vadd.f32 %v7762_v4, %v1572_v6  ;;  %v1573_v14 = vmul.f32 %v7753_v1, %v1466_v12  ;;  %v6151_v15 = vpop.f32.mrb[3].mxu0  ;;  %710 = vrot.lane.b32.xlu1 %v639_v8, %s10071_s12 }
 0x17d   :  { %998 = vrot.lane.b32.xlu0 %v930_v9, %s10073_s11 }
 0x17e   :  { %v1605_v19 = vadd.f32 %v7762_v4, %v1573_v14  ;;  %v251_v20 = vpop.permute.xlu1 %250  ;;  %v1629_v22 = vmax.f32 %v1604_v13, 0.0 }
 0x17f   :  { %v249_v21 = vpop.permute.xlu0 %248  ;;  %309 = vst.msk [vmem:[#allocation2 + $0x88] sm:$0xff] %vm291_vm4, %v251_v20 }
 0x180   :  { %308 = vst.msk [vmem:[#allocation2 + $0x80] sm:$0xff] %vm291_vm4, %v249_v21  ;;  %v1630_v23 = vmax.f32 %v1605_v19, 0.0  ;;  %856 = vrot.lane.b32.xlu1 %v785_v17, %s10072_s30 }
 0x181   :  { %1138 = vrot.lane.b32.xlu0 %v1070_v18, %s10078_s7 }
 0x182   :  { %v403_v25 = vpop.permute.xlu1 %402  ;;  %v6427_v27 = vpack.c.bf16 %v1630_v23, %v1629_v22  ;;  %v1343_v29 = vld [vmem:[#allocation2 + $0x78] sm:$0xff] }
 0x183   :  { %v401_v26 = vpop.permute.xlu0 %400  ;;  %v1342_v28 = vld [vmem:[#allocation2 + $0x70] sm:$0xff]  ;;  %461 = vst.msk [vmem:[#allocation2 + $0x88] sm:$0xff] %vm443_vm5, %v403_v25 }
 0x184   :  { %460 = vst.msk [vmem:[#allocation2 + $0x80] sm:$0xff] %vm443_vm5, %v401_v26  ;;  %v1360_v31 = vpack.c.bf16 %v1343_v29, %v1342_v28  ;;  %6428 = vmatpush1.bf16.msra.mxu1 %v6427_v27  ;;  %264 = vrot.lane.b32.xlu1 %v190_v30, %s10077_s5 }
 0x185   :  { %1278 = vrot.lane.b32.xlu0 %v1210_v24, %s10076_s27  ;;  %6429 = vmatprep.subr.bf16.mxu1 %v6597_v5 }
 0x186   :  { %6177 = vmatmul.mubr.msk.bf16.gmra.mrb[28].mxu0 %vm10027_vm0, %v1360_v31  ;;  %v553_v33 = vpop.permute.xlu1 %552 }
 0x187   :  { %v551_v34 = vpop.permute.xlu0 %550  ;;  %6180 = vmatprep.mubr.msk.bf16.mxu0 %vm6595_vm3, %v6587_v2  ;;  %608 = vst.msk [vmem:[#allocation2 + $0x88] sm:$0xff] %vm590_vm6, %v553_v33 }
 0x188   :  { %607 = vst.msk [vmem:[#allocation2 + $0x80] sm:$0xff] %vm590_vm6, %v551_v34 }
 0x189   :  { %416 = vrot.lane.b32.xlu0 %v342_v32, %s10074_s2 }
 0x18a   :  { %v699_v35 = vpop.permute.xlu1 %698 }
 0x18b   :  { %v697_v36 = vpop.permute.xlu0 %696  ;;  %754 = vst.msk [vmem:[#allocation2 + $0x88] sm:$0xff] %vm736_vm7, %v699_v35 }
 0x18c   :  { %753 = vst.msk [vmem:[#allocation2 + $0x80] sm:$0xff] %vm736_vm7, %v697_v36 }
 0x18e   :  { %v845_v37 = vpop.permute.xlu1 %844 }
 0x18f   :  { %v843_v38 = vpop.permute.xlu0 %842  ;;  %900 = vst.msk [vmem:[#allocation2 + $0x88] sm:$0xff] %vm882_vm8, %v845_v37 }
 0x190   :  { %899 = vst.msk [vmem:[#allocation2 + $0x80] sm:$0xff] %vm882_vm8, %v843_v38 }
 0x192   :  { %v989_v39 = vpop.permute.xlu1 %988 }
 0x193   :  { %v987_v40 = vpop.permute.xlu0 %986  ;;  %1041 = vst.msk [vmem:[#allocation2 + $0x88] sm:$0xff] %vm10029_vm9, %v989_v39 }
 0x194   :  { %1040 = vst.msk [vmem:[#allocation2 + $0x80] sm:$0xff] %vm10029_vm9, %v987_v40 }
 0x196   :  { %v1129_v41 = vpop.permute.xlu1 %1128 }
 0x197   :  { %v1127_v42 = vpop.permute.xlu0 %1126  ;;  %1181 = vst.msk [vmem:[#allocation2 + $0x88] sm:$0xff] %vm10028_vm10, %v1129_v41 }
 0x198   :  { %1180 = vst.msk [vmem:[#allocation2 + $0x80] sm:$0xff] %vm10028_vm10, %v1127_v42 }
 0x199   :  { %v1471_v43 = vpop.f32.mrb[4].mxu0 }
 0x19a   :  { %v1574_v44 = vmul.f32 %v7753_v1, %v1471_v43  ;;  %v6154_v45 = vpop.f32.mrb[5].mxu0  ;;  %v1269_v46 = vpop.permute.xlu1 %1268 }
 0x19b   :  { %v1267_v47 = vpop.permute.xlu0 %1266  ;;  %1321 = vst.msk [vmem:[#allocation2 + $0x88] sm:$0xff] %vm10016_vm11, %v1269_v46  ;;  %v1474_v48 = vpop.f32.mrb[6].mxu0 }
 0x19c   :  { %1320 = vst.msk [vmem:[#allocation2 + $0x80] sm:$0xff] %vm10016_vm11, %v1267_v47  ;;  %v1606_v49 = vadd.f32 %v7762_v4, %v1574_v44  ;;  %v1575_v50 = vmul.f32 %v7753_v1, %v1474_v48  ;;  %v6155_v51 = vpop.f32.mrb[7].mxu0 }
 0x19e   :  { %v1607_v52 = vadd.f32 %v7762_v4, %v1575_v50  ;;  %v255_v53 = vpop.permute.xlu1 %254  ;;  %v1631_v55 = vmax.f32 %v1606_v49, 0.0 }
 0x19f   :  { %v253_v54 = vpop.permute.xlu0 %252  ;;  %311 = vst.msk [vmem:[#allocation2 + $0x98] sm:$0xff] %vm291_vm4, %v255_v53 }
 0x1a0   :  { %310 = vst.msk [vmem:[#allocation2 + $0x90] sm:$0xff] %vm291_vm4, %v253_v54  ;;  %v1632_v56 = vmax.f32 %v1607_v52, 0.0 }
 0x1a2   :  { %v407_v57 = vpop.permute.xlu1 %406  ;;  %v6430_v59 = vpack.c.bf16 %v1632_v56, %v1631_v55  ;;  %v1345_v61 = vld [vmem:[#allocation2 + $0x88] sm:$0xff] }
 0x1a3   :  { %v405_v58 = vpop.permute.xlu0 %404  ;;  %v1344_v60 = vld [vmem:[#allocation2 + $0x80] sm:$0xff]  ;;  %463 = vst.msk [vmem:[#allocation2 + $0x98] sm:$0xff] %vm443_vm5, %v407_v57 }
 0x1a4   :  { %462 = vst.msk [vmem:[#allocation2 + $0x90] sm:$0xff] %vm443_vm5, %v405_v58  ;;  %v1361_v62 = vpack.c.bf16 %v1345_v61, %v1344_v60  ;;  %6431 = vmatpush1.bf16.msra.mxu1 %v6430_v59 }
 0x1a5   :  { %6432 = vmatprep.subr.bf16.mxu1 %v6597_v5 }
 0x1a6   :  { %6181 = vmatmul.mubr.msk.bf16.gmra.mrb[32].mxu0 %vm10027_vm0, %v1361_v62  ;;  %v557_v63 = vpop.permute.xlu1 %556 }
 0x1a7   :  { %v555_v0 = vpop.permute.xlu0 %554  ;;  %6184 = vmatprep.mubr.msk.bf16.mxu0 %vm6595_vm3, %v6587_v2  ;;  %610 = vst.msk [vmem:[#allocation2 + $0x98] sm:$0xff] %vm590_vm6, %v557_v63 }
 0x1a8   :  { %609 = vst.msk [vmem:[#allocation2 + $0x90] sm:$0xff] %vm590_vm6, %v555_v0 }
 0x1aa   :  { %v703_v3 = vpop.permute.xlu1 %702 }
 0x1ab   :  { %v701_v6 = vpop.permute.xlu0 %700  ;;  %756 = vst.msk [vmem:[#allocation2 + $0x98] sm:$0xff] %vm736_vm7, %v703_v3 }
 0x1ac   :  { %755 = vst.msk [vmem:[#allocation2 + $0x90] sm:$0xff] %vm736_vm7, %v701_v6 }
 0x1ae   :  { %v849_v7 = vpop.permute.xlu1 %848 }
 0x1af   :  { %v847_v8 = vpop.permute.xlu0 %846  ;;  %902 = vst.msk [vmem:[#allocation2 + $0x98] sm:$0xff] %vm882_vm8, %v849_v7 }
 0x1b0   :  { %901 = vst.msk [vmem:[#allocation2 + $0x90] sm:$0xff] %vm882_vm8, %v847_v8 }
 0x1b2   :  { %v993_v9 = vpop.permute.xlu1 %992 }
 0x1b3   :  { %v991_v10 = vpop.permute.xlu0 %990  ;;  %1043 = vst.msk [vmem:[#allocation2 + $0x98] sm:$0xff] %vm10029_vm9, %v993_v9 }
 0x1b4   :  { %1042 = vst.msk [vmem:[#allocation2 + $0x90] sm:$0xff] %vm10029_vm9, %v991_v10 }
 0x1b6   :  { %v1133_v11 = vpop.permute.xlu1 %1132 }
 0x1b7   :  { %v1131_v12 = vpop.permute.xlu0 %1130  ;;  %1183 = vst.msk [vmem:[#allocation2 + $0x98] sm:$0xff] %vm10028_vm10, %v1133_v11 }
 0x1b8   :  { %1182 = vst.msk [vmem:[#allocation2 + $0x90] sm:$0xff] %vm10028_vm10, %v1131_v12 }
 0x1b9   :  { %v1479_v13 = vpop.f32.mrb[8].mxu0 }
 0x1ba   :  { %v1576_v14 = vmul.f32 %v7753_v1, %v1479_v13  ;;  %v6158_v15 = vpop.f32.mrb[9].mxu0  ;;  %v1273_v16 = vpop.permute.xlu1 %1272 }
 0x1bb   :  { %v1271_v17 = vpop.permute.xlu0 %1270  ;;  %1323 = vst.msk [vmem:[#allocation2 + $0x98] sm:$0xff] %vm10016_vm11, %v1273_v16  ;;  %v1482_v18 = vpop.f32.mrb[10].mxu0 }
 0x1bc   :  { %1322 = vst.msk [vmem:[#allocation2 + $0x90] sm:$0xff] %vm10016_vm11, %v1271_v17  ;;  %v1608_v19 = vadd.f32 %v7762_v4, %v1576_v14  ;;  %v1577_v20 = vmul.f32 %v7753_v1, %v1482_v18  ;;  %v6159_v21 = vpop.f32.mrb[11].mxu0 }
 0x1be   :  { %v1609_v22 = vadd.f32 %v7762_v4, %v1577_v20  ;;  %v259_v23 = vpop.permute.xlu1 %258  ;;  %v1633_v25 = vmax.f32 %v1608_v19, 0.0 }
 0x1bf   :  { %v257_v24 = vpop.permute.xlu0 %256  ;;  %313 = vst.msk [vmem:[#allocation2 + $0xa8] sm:$0xff] %vm291_vm4, %v259_v23 }
 0x1c0   :  { %312 = vst.msk [vmem:[#allocation2 + $0xa0] sm:$0xff] %vm291_vm4, %v257_v24  ;;  %v1634_v26 = vmax.f32 %v1609_v22, 0.0 }
 0x1c2   :  { %v411_v27 = vpop.permute.xlu1 %410  ;;  %v6433_v29 = vpack.c.bf16 %v1634_v26, %v1633_v25  ;;  %v1347_v31 = vld [vmem:[#allocation2 + $0x98] sm:$0xff] }
 0x1c3   :  { %v409_v28 = vpop.permute.xlu0 %408  ;;  %v1346_v30 = vld [vmem:[#allocation2 + $0x90] sm:$0xff]  ;;  %465 = vst.msk [vmem:[#allocation2 + $0xa8] sm:$0xff] %vm443_vm5, %v411_v27 }
 0x1c4   :  { %464 = vst.msk [vmem:[#allocation2 + $0xa0] sm:$0xff] %vm443_vm5, %v409_v28  ;;  %v1362_v32 = vpack.c.bf16 %v1347_v31, %v1346_v30  ;;  %6434 = vmatpush1.bf16.msra.mxu1 %v6433_v29 }
 0x1c5   :  { %6435 = vmatprep.subr.bf16.mxu1 %v6597_v5 }
 0x1c6   :  { %6185 = vmatmul.mubr.msk.bf16.gmra.mrb[36].mxu0 %vm10027_vm0, %v1362_v32  ;;  %v561_v33 = vpop.permute.xlu1 %560 }
 0x1c7   :  { %v559_v34 = vpop.permute.xlu0 %558  ;;  %6188 = vmatprep.mubr.msk.bf16.mxu0 %vm6595_vm3, %v6587_v2  ;;  %612 = vst.msk [vmem:[#allocation2 + $0xa8] sm:$0xff] %vm590_vm6, %v561_v33 }
 0x1c8   :  { %611 = vst.msk [vmem:[#allocation2 + $0xa0] sm:$0xff] %vm590_vm6, %v559_v34 }
 0x1ca   :  { %v707_v35 = vpop.permute.xlu1 %706 }
 0x1cb   :  { %v705_v36 = vpop.permute.xlu0 %704  ;;  %758 = vst.msk [vmem:[#allocation2 + $0xa8] sm:$0xff] %vm736_vm7, %v707_v35 }
 0x1cc   :  { %757 = vst.msk [vmem:[#allocation2 + $0xa0] sm:$0xff] %vm736_vm7, %v705_v36 }
 0x1ce   :  { %v853_v37 = vpop.permute.xlu1 %852 }
 0x1cf   :  { %v851_v38 = vpop.permute.xlu0 %850  ;;  %904 = vst.msk [vmem:[#allocation2 + $0xa8] sm:$0xff] %vm882_vm8, %v853_v37 }
 0x1d0   :  { %903 = vst.msk [vmem:[#allocation2 + $0xa0] sm:$0xff] %vm882_vm8, %v851_v38 }
 0x1d2   :  { %v997_v39 = vpop.permute.xlu1 %996 }
 0x1d3   :  { %v995_v40 = vpop.permute.xlu0 %994  ;;  %1045 = vst.msk [vmem:[#allocation2 + $0xa8] sm:$0xff] %vm10029_vm9, %v997_v39 }
 0x1d4   :  { %1044 = vst.msk [vmem:[#allocation2 + $0xa0] sm:$0xff] %vm10029_vm9, %v995_v40 }
 0x1d6   :  { %v1137_v41 = vpop.permute.xlu1 %1136 }
 0x1d7   :  { %v1135_v42 = vpop.permute.xlu0 %1134  ;;  %1185 = vst.msk [vmem:[#allocation2 + $0xa8] sm:$0xff] %vm10028_vm10, %v1137_v41 }
 0x1d8   :  { %1184 = vst.msk [vmem:[#allocation2 + $0xa0] sm:$0xff] %vm10028_vm10, %v1135_v42 }
 0x1d9   :  { %v1487_v43 = vpop.f32.mrb[12].mxu0 }
 0x1da   :  { %v1578_v44 = vmul.f32 %v7753_v1, %v1487_v43  ;;  %v6162_v45 = vpop.f32.mrb[13].mxu0  ;;  %v1277_v46 = vpop.permute.xlu1 %1276 }
 0x1db   :  { %v1275_v47 = vpop.permute.xlu0 %1274  ;;  %1325 = vst.msk [vmem:[#allocation2 + $0xa8] sm:$0xff] %vm10016_vm11, %v1277_v46  ;;  %v1490_v48 = vpop.f32.mrb[14].mxu0 }
 0x1dc   :  { %1324 = vst.msk [vmem:[#allocation2 + $0xa0] sm:$0xff] %vm10016_vm11, %v1275_v47  ;;  %v1610_v49 = vadd.f32 %v7762_v4, %v1578_v44  ;;  %v1579_v50 = vmul.f32 %v7753_v1, %v1490_v48  ;;  %v6163_v51 = vpop.f32.mrb[15].mxu0  ;;  %vm10022_vm11 = vcmask 288000  }
 0x1de   :  { %v1611_v52 = vadd.f32 %v7762_v4, %v1579_v50  ;;  %v413_v53 = vpop.permute.xlu1 %412  ;;  %v1635_v55 = vmax.f32 %v1610_v49, 0.0 }
 0x1df   :  { %v261_v54 = vpop.permute.xlu0 %260 }
 0x1e0   :  { %314 = vst.msk [vmem:[#allocation2 + $0xb0] sm:$0xff] %vm291_vm4, %v261_v54  ;;  %v1636_v56 = vmax.f32 %v1611_v52, 0.0 }
 0x1e1   :  { %466 = vst.msk [vmem:[#allocation2 + $0xb0] sm:$0xff] %vm443_vm5, %v413_v53 }
 0x1e2   :  { %v263_v57 = vpop.permute.xlu1 %262  ;;  %v6436_v59 = vpack.c.bf16 %v1636_v56, %v1635_v55  ;;  %v1349_v61 = vld [vmem:[#allocation2 + $0xa8] sm:$0xff] }
 0x1e3   :  { %v563_v58 = vpop.permute.xlu0 %562  ;;  %v1348_v60 = vld [vmem:[#allocation2 + $0xa0] sm:$0xff]  ;;  %315 = vst.msk [vmem:[#allocation2 + $0xb8] sm:$0xff] %vm291_vm4, %v263_v57 }
 0x1e4   :  { %613 = vst.msk [vmem:[#allocation2 + $0xb0] sm:$0xff] %vm590_vm6, %v563_v58  ;;  %v1363_v62 = vpack.c.bf16 %v1349_v61, %v1348_v60  ;;  %6437 = vmatpush1.bf16.msra.mxu1 %v6436_v59 }
 0x1e5   :  { %6438 = vmatprep.subr.bf16.mxu1 %v6597_v5 }
 0x1e6   :  { %6189 = vmatmul.mubr.msk.bf16.gmra.mrb[40].mxu0 %vm10027_vm0, %v1363_v62  ;;  %v415_v63 = vpop.permute.xlu1 %414 }
 0x1e7   :  { %v709_v0 = vpop.permute.xlu0 %708  ;;  %6192 = vmatprep.mubr.msk.bf16.mxu0 %vm6595_vm3, %v6587_v2  ;;  %467 = vst.msk [vmem:[#allocation2 + $0xb8] sm:$0xff] %vm443_vm5, %v415_v63  ;;  %v1655_v63 = vld [vmem:[%s10081_s29 + $0x8] sm:$0xff] }
 0x1e8   :  { %759 = vst.msk [vmem:[#allocation2 + $0xb0] sm:$0xff] %vm736_vm7, %v709_v0 }
 0x1ea   :  { %v565_v3 = vpop.permute.xlu1 %564 }
 0x1eb   :  { %v855_v6 = vpop.permute.xlu0 %854  ;;  %615 = vst.msk [vmem:[#allocation2 + $0xb8] sm:$0x3f] %vm10017_vm12, %v565_v3  ;;  %vm10020_vm12 = vcmask 63520  }
 0x1ec   :  { %905 = vst.msk [vmem:[#allocation2 + $0xb0] sm:$0xff] %vm882_vm8, %v855_v6 }
 0x1ee   :  { %v711_v7 = vpop.permute.xlu1 %710 }
 0x1ef   :  { %v999_v8 = vpop.permute.xlu0 %998  ;;  %761 = vst.msk [vmem:[#allocation2 + $0xb8] sm:$0x1f] %vm10018_vm13, %v711_v7  ;;  %vm10019_vm13 = vcmask 95296  }
 0x1f0   :  { %1047 = vst.msk [vmem:[#allocation2 + $0xb0] sm:$0xf] %vm10026_vm14, %v999_v8  ;;  %vm10036_vm14 = vcmask 392512  }
 0x1f2   :  { %v857_v9 = vpop.permute.xlu1 %856 }
 0x1f3   :  { %v1139_v10 = vpop.permute.xlu0 %1138  ;;  %907 = vst.msk [vmem:[#allocation2 + $0xb8] sm:$0xf] %vm10021_vm15, %v857_v9 }
 0x1f4   :  { %1187 = vst.msk [vmem:[#allocation2 + $0xb0] sm:$0x7] %vm10025_vm2, %v1139_v10  ;;  %vm10037_vm2 = vcmask 326912  }
 0x1f6   :  { %v265_v12 = vpop.permute.xlu1 %264 }
 0x1f7   :  { %v1279_v11 = vpop.permute.xlu0 %1278  ;;  %317 = vst.msk [vmem:[#allocation2 + $0xc0] sm:$0x7f] %vm10020_vm12, %v265_v12  ;;  %vm10083_vm12 = vcmask 294144  }
 0x1f8   :  { %1327 = vst.msk [vmem:[#allocation2 + $0xb0] sm:$0x3] %vm10022_vm11, %v1279_v11  ;;  %vm10084_vm15 = vmmov %vm10083_vm12  ;;  %vm10024_vm11 = vcmask 64512  }
 0x1f9   :  { %v1495_v13 = vpop.f32.mrb[16].mxu0 }
 0x1fa   :  { %v1580_v14 = vmul.f32 %v7753_v1, %v1495_v13  ;;  %v6166_v15 = vpop.f32.mrb[17].mxu0  ;;  %v1351_v23 = vld [vmem:[#allocation2 + $0xb8] sm:$0xff] }
 0x1fb   :  { %v1498_v16 = vpop.f32.mrb[18].mxu0  ;;  %v417_v17 = vpop.permute.xlu0 %416  ;;  %v2946_v15 = vld [vmem:[%s10082_s28 + $0x1] sm:$0xff] }
 0x1fc   :  { %v1612_v18 = vadd.f32 %v7762_v4, %v1580_v14  ;;  %v1581_v19 = vmul.f32 %v7753_v1, %v1498_v16  ;;  %v6167_v20 = vpop.f32.mrb[19].mxu0  ;;  %469 = vst.msk [vmem:[#allocation2 + $0xc0] sm:$0x3f] %vm10019_vm13, %v417_v17  ;;  %vm10048_vm13 = vcmask 588800   ;;  %v2947_v16 = vld [vmem:[%s10082_s28 + $0x9] sm:$0xff]  ;;  %2996 = vrot.lane.b32.xlu1 %v2946_v15, %s10077_s5  ;;  %v1666_v15 = vld [vmem:[%s10081_s29 + $0x60] sm:$0xff] }
 0x1fd   :  { %5944 = vmatprep.mubr.msk.f32.mxu1 %vm10048_vm13, %v1655_v63  ;;  %1820 = vst.msk [vmem:[#allocation4] sm:$0xff] %vm10048_vm13, %v6587_v2  ;;  %1821 = vst.msk [vmem:[#allocation4 + $0x8] sm:$0xff] %vm10048_vm13, %v6587_v2  ;;  %2998 = vrot.lane.b32.xlu0 %v2947_v16, %s10077_s5  ;;  %v3096_v17 = vld [vmem:[%s10082_s28 + $0x2] sm:$0xff]  ;;  %v3390_v20 = vld [vmem:[%s10082_s28 + $0xb] sm:$0xff] }
 0x1fe   :  { %v1613_v21 = vadd.f32 %v7762_v4, %v1581_v19  ;;  %v1637_v24 = vmax.f32 %v1612_v18, 0.0  ;;  %1822 = vst.msk [vmem:[#allocation4 + $0x10] sm:$0xff] %vm10048_vm13, %v6587_v2  ;;  %1823 = vst.msk [vmem:[#allocation4 + $0x18] sm:$0xff] %vm10048_vm13, %v6587_v2  ;;  %v3097_v18 = vld [vmem:[%s10082_s28 + $0xa] sm:$0xff]  ;;  %v7997_v19 = vld [vmem:[%s10082_s28 + $0x12] sm:$0xff] }
 0x1ff   :  { %v1350_v22 = vld [vmem:[#allocation2 + $0xb0] sm:$0xff]  ;;  %1824 = vst.msk [vmem:[#allocation4 + $0x20] sm:$0xff] %vm10048_vm13, %v6587_v2  ;;  %1825 = vst.msk [vmem:[#allocation4 + $0x28] sm:$0xff] %vm10048_vm13, %v6587_v2  ;;  %v1669_v16 = vld [vmem:[%s10081_s29 + $0x78] sm:$0xff] }
 0x200   :  { %v1638_v25 = vmax.f32 %v1613_v21, 0.0  ;;  %v1364_v26 = vpack.c.bf16 %v1351_v23, %v1350_v22  ;;  %1826 = vst.msk [vmem:[#allocation4 + $0x30] sm:$0xff] %vm10048_vm13, %v6587_v2  ;;  %1827 = vst.msk [vmem:[#allocation4 + $0x38] sm:$0xff] %vm10048_vm13, %v6587_v2  ;;  %3146 = vrot.lane.b32.xlu1 %v3096_v17, %s10074_s2  ;;  %v3391_v21 = vld [vmem:[%s10082_s28 + $0x13] sm:$0xff] }
 0x201   :  { %1828 = vst.msk [vmem:[#allocation4 + $0x40] sm:$0xff] %vm10048_vm13, %v6587_v2  ;;  %2557 = vst.msk [vmem:[#allocation6] sm:$0xff] %vm10048_vm13, %v6587_v2  ;;  %3148 = vrot.lane.b32.xlu0 %v3097_v18, %s10074_s2  ;;  %v3534_v22 = vld [vmem:[%s10082_s28 + $0xc] sm:$0xff]  ;;  %v3535_v23 = vld [vmem:[%s10082_s28 + $0x14] sm:$0xff] }
 0x202   :  { %6193 = vmatmul.mubr.msk.bf16.gmra.mrb[44].mxu0 %vm10027_vm0, %v1364_v26  ;;  %v6439_v27 = vpack.c.bf16 %v1638_v25, %v1637_v24  ;;  %2558 = vst.msk [vmem:[#allocation6 + $0x8] sm:$0xff] %vm10048_vm13, %v6587_v2  ;;  %2559 = vst.msk [vmem:[#allocation6 + $0x10] sm:$0xff] %vm10048_vm13, %v6587_v2  ;;  %v8021_v24 = vld [vmem:[%s10082_s28 + $0x1c] sm:$0xff]  ;;  %v1668_v17 = vld [vmem:[%s10081_s29 + $0x70] sm:$0xff] }
 0x203   :  { %6196 = vmatprep.mubr.msk.bf16.mxu0 %vm6595_vm3, %v6587_v2  ;;  %v1352_v28 = vld [vmem:[#allocation2 + $0xc0] sm:$0xff]  ;;  %2560 = vst.msk [vmem:[#allocation6 + $0x18] sm:$0xff] %vm10048_vm13, %v6587_v2  ;;  %4581 = vst.msk [vmem:[#allocation9] sm:$0xff] %vm10048_vm13, %v6587_v2 }
 0x204   :  { %6440 = vmatpush1.bf16.msra.mxu1 %v6439_v27  ;;  %v1365_v29 = vpack.c.bf16 %v1352_v28, %v1352_v28  ;;  %4582 = vst.msk [vmem:[#allocation9 + $0x8] sm:$0xff] %vm10048_vm13, %v6587_v2  ;;  %4583 = vst.msk [vmem:[#allocation9 + $0x10] sm:$0xff] %vm10048_vm13, %v6587_v2  ;;  %3294 = vrot.lane.b32.xlu1 %v3097_v18, %s10075_s1  ;;  %v1671_v18 = vld [vmem:[%s10081_s29 + $0x88] sm:$0xff] }
 0x205   :  { %6441 = vmatprep.subr.bf16.mxu1 %v6597_v5  ;;  %4584 = vst.msk [vmem:[#allocation9 + $0x18] sm:$0xff] %vm10048_vm13, %v6587_v2  ;;  %4585 = vst.msk [vmem:[#allocation9 + $0x20] sm:$0xff] %vm10048_vm13, %v6587_v2  ;;  %3296 = vrot.lane.b32.xlu0 %v7997_v19, %s10075_s1 }
 0x206   :  { %4586 = vst.msk [vmem:[#allocation9 + $0x28] sm:$0xff] %vm10048_vm13, %v6587_v2  ;;  %4587 = vst.msk [vmem:[#allocation9 + $0x30] sm:$0xff] %vm10048_vm13, %v6587_v2 }
 0x207   :  { %4588 = vst.msk [vmem:[#allocation9 + $0x38] sm:$0xff] %vm10048_vm13, %v6587_v2  ;;  %4589 = vst.msk [vmem:[#allocation9 + $0x40] sm:$0xff] %vm10048_vm13, %v6587_v2 }
 0x208   :  { %5302 = vst.msk [vmem:[#allocation11] sm:$0xff] %vm10048_vm13, %v6587_v2  ;;  %5303 = vst.msk [vmem:[#allocation11 + $0x8] sm:$0xff] %vm10048_vm13, %v6587_v2  ;;  %3438 = vrot.lane.b32.xlu1 %v3390_v20, %s10071_s12  ;;  %v1670_v20 = vld [vmem:[%s10081_s29 + $0x80] sm:$0xff] }
 0x209   :  { %5304 = vst.msk [vmem:[#allocation11 + $0x10] sm:$0xff] %vm10048_vm13, %v6587_v2  ;;  %5305 = vst.msk [vmem:[#allocation11 + $0x18] sm:$0xff] %vm10048_vm13, %v6587_v2  ;;  %3440 = vrot.lane.b32.xlu0 %v3391_v21, %s10071_s12  ;;  %v3816_v21 = vld [vmem:[%s10082_s28 + $0x15] sm:$0xff] }
 0x20a   :  { %6197 = vmatmul.mubr.msk.bf16.gmra.mrb[48].mxu0 %vm10027_vm0, %v1365_v29  ;;  %vm10035_vm0 = vcmask 458112  }
 0x20c   :  { %3582 = vrot.lane.b32.xlu1 %v3534_v22, %s10072_s30  ;;  %v3817_v22 = vld [vmem:[%s10082_s28 + $0x1d] sm:$0xff] }
 0x20d   :  { %3584 = vrot.lane.b32.xlu0 %v3535_v23, %s10072_s30 }
 0x210   :  { %3724 = vrot.lane.b32.xlu1 %v3535_v23, %s10073_s11  ;;  %v3954_v23 = vld [vmem:[%s10082_s28 + $0x16] sm:$0xff] }
 0x211   :  { %3726 = vrot.lane.b32.xlu0 %v8021_v24, %s10073_s11 }
 0x214   :  { %3862 = vrot.lane.b32.xlu1 %v3816_v21, %s10078_s7 }
 0x215   :  { %3864 = vrot.lane.b32.xlu0 %v3817_v22, %s10078_s7 }
 0x218   :  { %4000 = vrot.lane.b32.xlu1 %v3954_v23, %s10076_s27  ;;  %v6567_v23 = vld [vmem:[%s10085_s21 + $0x18] sm:$0xff]  }
 0x219   :  { %v1503_v30 = vpop.f32.mrb[20].mxu0 }
 0x21a   :  { %v1582_v31 = vmul.f32 %v7753_v1, %v1503_v30  ;;  %v6170_v32 = vpop.f32.mrb[21].mxu0 }
 0x21b   :  { %v1506_v33 = vpop.f32.mrb[22].mxu0 }
 0x21c   :  { %v1614_v34 = vadd.f32 %v7762_v4, %v1582_v31  ;;  %v1583_v35 = vmul.f32 %v7753_v1, %v1506_v33  ;;  %v6171_v36 = vpop.f32.mrb[23].mxu0 }
 0x21e   :  { %v1615_v37 = vadd.f32 %v7762_v4, %v1583_v35  ;;  %v1639_v38 = vmax.f32 %v1614_v34, 0.0 }
 0x220   :  { %v1640_v39 = vmax.f32 %v1615_v37, 0.0 }
 0x222   :  { %v6442_v40 = vpack.c.bf16 %v1640_v39, %v1639_v38 }
 0x224   :  { %6443 = vmatpush1.bf16.msra.mxu1 %v6442_v40 }
 0x225   :  { %6444 = vmatprep.subr.bf16.mxu1 %v6597_v5 }
 0x239   :  { %v1511_v41 = vpop.f32.mrb[24].mxu0 }
 0x23a   :  { %v1584_v42 = vmul.f32 %v7753_v1, %v1511_v41  ;;  %v6174_v43 = vpop.f32.mrb[25].mxu0 }
 0x23b   :  { %v1514_v44 = vpop.f32.mrb[26].mxu0 }
 0x23c   :  { %v1616_v45 = vadd.f32 %v7762_v4, %v1584_v42  ;;  %v1585_v46 = vmul.f32 %v7753_v1, %v1514_v44  ;;  %v6175_v47 = vpop.f32.mrb[27].mxu0 }
 0x23e   :  { %v1617_v48 = vadd.f32 %v7762_v4, %v1585_v46  ;;  %v1641_v49 = vmax.f32 %v1616_v45, 0.0 }
 0x240   :  { %v1642_v50 = vmax.f32 %v1617_v48, 0.0 }
 0x242   :  { %v6445_v51 = vpack.c.bf16 %v1642_v50, %v1641_v49 }
 0x244   :  { %6446 = vmatpush1.bf16.msra.mxu1 %v6445_v51 }
 0x245   :  { %6447 = vmatprep.subr.bf16.mxu1 %v6597_v5 }
 0x259   :  { %v1519_v52 = vpop.f32.mrb[28].mxu0 }
 0x25a   :  { %v1586_v53 = vmul.f32 %v7753_v1, %v1519_v52  ;;  %v6178_v54 = vpop.f32.mrb[29].mxu0 }
 0x25b   :  { %v1522_v55 = vpop.f32.mrb[30].mxu0 }
 0x25c   :  { %v1618_v56 = vadd.f32 %v7762_v4, %v1586_v53  ;;  %v1587_v57 = vmul.f32 %v7753_v1, %v1522_v55  ;;  %v6179_v58 = vpop.f32.mrb[31].mxu0 }
 0x25e   :  { %v1619_v59 = vadd.f32 %v7762_v4, %v1587_v57  ;;  %v1643_v60 = vmax.f32 %v1618_v56, 0.0 }
 0x260   :  { %v1644_v61 = vmax.f32 %v1619_v59, 0.0 }
 0x262   :  { %v6448_v62 = vpack.c.bf16 %v1644_v61, %v1643_v60 }
 0x264   :  { %6449 = vmatpush1.bf16.msra.mxu1 %v6448_v62 }
 0x265   :  { %6450 = vmatprep.subr.bf16.mxu1 %v6597_v5 }
 0x279   :  { %v1527_v0 = vpop.f32.mrb[32].mxu0 }
 0x27a   :  { %v1588_v3 = vmul.f32 %v7753_v1, %v1527_v0  ;;  %v6182_v6 = vpop.f32.mrb[33].mxu0 }
 0x27b   :  { %v1530_v7 = vpop.f32.mrb[34].mxu0  ;;  %v1657_v6 = vld [vmem:[%s10081_s29 + $0x18] sm:$0xff] }
 0x27c   :  { %v1620_v8 = vadd.f32 %v7762_v4, %v1588_v3  ;;  %v1589_v9 = vmul.f32 %v7753_v1, %v1530_v7  ;;  %v6183_v10 = vpop.f32.mrb[35].mxu0  ;;  %v1654_v3 = vld [vmem:[%s10081_s29] sm:$0xff] }
 0x27d   :  { %v1658_v7 = vld [vmem:[%s10081_s29 + $0x20] sm:$0xff]  ;;  %v1663_v10 = vld [vmem:[%s10081_s29 + $0x48] sm:$0xff] }
 0x27e   :  { %v1621_v11 = vadd.f32 %v7762_v4, %v1589_v9  ;;  %v1645_v12 = vmax.f32 %v1620_v8, 0.0  ;;  %v1661_v8 = vld [vmem:[%s10081_s29 + $0x38] sm:$0xff]  ;;  %v1660_v9 = vld [vmem:[%s10081_s29 + $0x30] sm:$0xff] }
 0x280   :  { %v1646_v13 = vmax.f32 %v1621_v11, 0.0  ;;  %v1662_v11 = vld [vmem:[%s10081_s29 + $0x40] sm:$0xff] }
 0x282   :  { %v6451_v14 = vpack.c.bf16 %v1646_v13, %v1645_v12  ;;  %v1665_v12 = vld [vmem:[%s10081_s29 + $0x58] sm:$0xff]  ;;  %v1664_v13 = vld [vmem:[%s10081_s29 + $0x50] sm:$0xff] }
 0x284   :  { %6452 = vmatpush1.bf16.msra.mxu1 %v6451_v14  ;;  %v1667_v14 = vld [vmem:[%s10081_s29 + $0x68] sm:$0xff] }
 0x285   :  { %6453 = vmatprep.subr.bf16.mxu1 %v6597_v5 }
 0x299   :  { %v1535_v25 = vpop.f32.mrb[36].mxu0 }
 0x29a   :  { %v1590_v26 = vmul.f32 %v7753_v1, %v1535_v25  ;;  %v6186_v27 = vpop.f32.mrb[37].mxu0  ;;  %v3955_v25 = vld [vmem:[%s10082_s28 + $0x1e] sm:$0xff] }
 0x29b   :  { %v1538_v28 = vpop.f32.mrb[38].mxu0  ;;  %4002 = vrot.lane.b32.xlu0 %v3955_v25, %s10076_s27  ;;  %v2896_v27 = vld [vmem:[%s10082_s28] sm:$0xff] }
 0x29c   :  { %v1622_v29 = vadd.f32 %v7762_v4, %v1590_v26  ;;  %v1591_v30 = vmul.f32 %v7753_v1, %v1538_v28  ;;  %v6187_v31 = vpop.f32.mrb[39].mxu0  ;;  %v2948_v26 = vld [vmem:[%s10082_s28 + $0x11] sm:$0xff]  ;;  %v2997_v28 = vpop.permute.xlu1 %2996  ;;  %2921 = vst.msk [vmem:[#allocation7] sm:$0xff] %vm140_vm1, %v2896_v27 }
 0x29d   :  { %3000 = vrot.lane.b32.xlu1 %v2948_v26, %s10077_s5  ;;  %3071 = vst.msk [vmem:[#allocation7] sm:$0xff] %vm291_vm4, %v2997_v28  ;;  %v6568_v28 = vld [vmem:[%s10085_s21 + $0x20] ss:$0 sps:$4 sm:$0xff]  }
 0x29e   :  { %v1623_v32 = vadd.f32 %v7762_v4, %v1591_v30  ;;  %v1647_v33 = vmax.f32 %v1622_v29, 0.0  ;;  %v2897_v29 = vld [vmem:[%s10082_s28 + $0x8] sm:$0xff]  ;;  %v2999_v30 = vpop.permute.xlu0 %2998 }
 0x29f   :  { %2922 = vst.msk [vmem:[#allocation7 + $0x8] sm:$0xff] %vm140_vm1, %v2897_v29 }
 0x2a0   :  { %v1648_v34 = vmax.f32 %v1623_v32, 0.0  ;;  %v3147_v31 = vpop.permute.xlu1 %3146  ;;  %3072 = vst.msk [vmem:[#allocation7 + $0x8] sm:$0xff] %vm291_vm4, %v2999_v30 }
 0x2a1   :  { %3221 = vst.msk [vmem:[#allocation7] sm:$0xff] %vm443_vm5, %v3147_v31 }
 0x2a2   :  { %v6454_v35 = vpack.c.bf16 %v1648_v34, %v1647_v33  ;;  %v3149_v32 = vpop.permute.xlu0 %3148 }
 0x2a3   :  { %3222 = vst.msk [vmem:[#allocation7 + $0x8] sm:$0xff] %vm443_vm5, %v3149_v32 }
 0x2a4   :  { %6455 = vmatpush1.bf16.msra.mxu1 %v6454_v35  ;;  %v3295_v33 = vpop.permute.xlu1 %3294 }
 0x2a5   :  { %6456 = vmatprep.subr.bf16.mxu1 %v6597_v5  ;;  %3366 = vst.msk [vmem:[#allocation7] sm:$0xff] %vm590_vm6, %v3295_v33 }
 0x2a6   :  { %v3297_v34 = vpop.permute.xlu0 %3296 }
 0x2a7   :  { %3367 = vst.msk [vmem:[#allocation7 + $0x8] sm:$0xff] %vm590_vm6, %v3297_v34 }
 0x2a8   :  { %v3439_v35 = vpop.permute.xlu1 %3438 }
 0x2a9   :  { %3510 = vst.msk [vmem:[#allocation7] sm:$0xff] %vm736_vm7, %v3439_v35 }
 0x2b9   :  { %v1543_v36 = vpop.f32.mrb[40].mxu0 }
 0x2ba   :  { %v1592_v37 = vmul.f32 %v7753_v1, %v1543_v36  ;;  %v6190_v38 = vpop.f32.mrb[41].mxu0  ;;  %v3441_v36 = vpop.permute.xlu0 %3440 }
 0x2bb   :  { %v1546_v39 = vpop.f32.mrb[42].mxu0  ;;  %3511 = vst.msk [vmem:[#allocation7 + $0x8] sm:$0xff] %vm736_vm7, %v3441_v36 }
 0x2bc   :  { %v1624_v40 = vadd.f32 %v7762_v4, %v1592_v37  ;;  %v1593_v41 = vmul.f32 %v7753_v1, %v1546_v39  ;;  %v6191_v42 = vpop.f32.mrb[43].mxu0  ;;  %v3583_v37 = vpop.permute.xlu1 %3582 }
 0x2bd   :  { %3654 = vst.msk [vmem:[#allocation7] sm:$0xff] %vm882_vm8, %v3583_v37 }
 0x2be   :  { %v1625_v43 = vadd.f32 %v7762_v4, %v1593_v41  ;;  %v1649_v44 = vmax.f32 %v1624_v40, 0.0  ;;  %v3585_v38 = vpop.permute.xlu0 %3584 }
 0x2bf   :  { %3655 = vst.msk [vmem:[#allocation7 + $0x8] sm:$0xff] %vm882_vm8, %v3585_v38 }
 0x2c0   :  { %v1650_v45 = vmax.f32 %v1625_v43, 0.0  ;;  %v3725_v39 = vpop.permute.xlu1 %3724 }
 0x2c1   :  { %3793 = vst.msk [vmem:[#allocation7] sm:$0xff] %vm10029_vm9, %v3725_v39 }
 0x2c2   :  { %v6457_v46 = vpack.c.bf16 %v1650_v45, %v1649_v44  ;;  %v3727_v40 = vpop.permute.xlu0 %3726  ;;  %v2898_v45 = vld [vmem:[%s10082_s28 + $0x10] sm:$0xff] }
 0x2c3   :  { %3794 = vst.msk [vmem:[#allocation7 + $0x8] sm:$0xff] %vm10029_vm9, %v3727_v40  ;;  %vm10043_vm9 = vcmask 589312  }
 0x2c4   :  { %6458 = vmatpush1.bf16.msra.mxu1 %v6457_v46  ;;  %v3863_v41 = vpop.permute.xlu1 %3862  ;;  %2923 = vst.msk [vmem:[#allocation7 + $0x10] sm:$0xff] %vm140_vm1, %v2898_v45 }
 0x2c5   :  { %6459 = vmatprep.subr.bf16.mxu1 %v6597_v5  ;;  %3931 = vst.msk [vmem:[#allocation7] sm:$0xff] %vm10028_vm10, %v3863_v41 }
 0x2c6   :  { %v3865_v42 = vpop.permute.xlu0 %3864 }
 0x2c7   :  { %3932 = vst.msk [vmem:[#allocation7 + $0x8] sm:$0xff] %vm10028_vm10, %v3865_v42  ;;  %vm10049_vm10 = vcmask 523712  }
 0x2c8   :  { %v4001_v43 = vpop.permute.xlu1 %4000 }
 0x2c9   :  { %4069 = vst.msk [vmem:[#allocation7] sm:$0xff] %vm10083_vm12, %v4001_v43  ;;  %vm10023_vm12 = vcmask 1043456  }
 0x2ca   :  { %v2337_v30 = vsel %vm10023_vm12, %v6568_v28, 0  ;;  %vm1948_vm12 = vcmask 195712  }
 0x2d5   :  { %v1551_v47 = vpop.f32.mrb[44].mxu0 }
 0x2d6   :  { %v1594_v48 = vmul.f32 %v7753_v1, %v1551_v47  ;;  %v6194_v49 = vpop.f32.mrb[45].mxu0 }
 0x2d7   :  { %v1554_v50 = vpop.f32.mrb[46].mxu0 }
 0x2d8   :  { %v1626_v51 = vadd.f32 %v7762_v4, %v1594_v48  ;;  %v1595_v52 = vmul.f32 %v7753_v1, %v1554_v50  ;;  %v6195_v53 = vpop.f32.mrb[47].mxu0 }
 0x2da   :  { %v1627_v54 = vadd.f32 %v7762_v4, %v1595_v52  ;;  %v1651_v55 = vmax.f32 %v1626_v51, 0.0 }
 0x2dc   :  { %v1652_v56 = vmax.f32 %v1627_v54, 0.0 }
 0x2dd   :  { %v1559_v57 = vpop.f32.mrb[48].mxu0 }
 0x2de   :  { %v1596_v58 = vmul.f32 %v7753_v1, %v1559_v57  ;;  %v6198_v59 = vpop.f32.mrb[49].mxu0  ;;  %v6460_v60 = vpack.c.bf16 %v1652_v56, %v1651_v55  ;;  %v1656_v1 = vld [vmem:[%s10081_s29 + $0x10] sm:$0xff] }
 0x2df   :  { %v1562_v61 = vpop.f32.mrb[50].mxu0 }
 0x2e0   :  { %v1628_v62 = vadd.f32 %v7762_v4, %v1596_v58  ;;  %v6199_v63 = vpop.f32.mrb[51].mxu0  ;;  %6461 = vmatpush1.bf16.msra.mxu1 %v6460_v60  ;;  %v1659_v4 = vld [vmem:[%s10081_s29 + $0x28] sm:$0xff] }
 0x2e1   :  { %1748 = vmatprep.subr.mxu1 %v6587_v2 }
 0x2e2   :  { %v1653_v0 = vmax.f32 %v1628_v62, 0.0 }
 0x2e4   :  { %1749 = vmatpush1.msra.mxu1 %v1653_v0 }
 0x2e5   :  { %1765 = vmatmul.mubr.f32.vlgmr.msra.gmra.mrb[0].mxu1 %v1654_v3  ;;  %6200 = vmatprep.subr.bf16.mxu1 %v6587_v2 }
 0x2e6   :  { %5945 = vmatprep.mubr.msk.f32.mxu1 %vm10048_vm13, %v1657_v6 }
 0x2e9   :  { %1770 = vmatmul.mubr.f32.gmra.mrb[2].mxu1 %v1656_v1 }
 0x2ea   :  { %5946 = vmatprep.mubr.msk.f32.mxu1 %vm10048_vm13, %v1659_v4  ;;  %v6564_v4 = vld [vmem:[%s10085_s21] sm:$0xff]  }
 0x2eb   :  { %6201 = vmatpush3.bf16.msra.mxu1 %v6564_v4 }
 0x2ec   :  { %6202 = vmatprep.subr.bf16.mxu1 %v6587_v2 }
 0x2ed   :  { %1775 = vmatmul.mubr.f32.gmra.mrb[4].mxu1 %v1658_v7 }
 0x2ee   :  { %5947 = vmatprep.mubr.msk.f32.mxu1 %vm10048_vm13, %v1661_v8 }
 0x2f1   :  { %1780 = vmatmul.mubr.f32.gmra.mrb[6].mxu1 %v1660_v9 }
 0x2f2   :  { %5948 = vmatprep.mubr.msk.f32.mxu1 %vm10048_vm13, %v1663_v10 }
 0x2f5   :  { %1785 = vmatmul.mubr.f32.gmra.mrb[8].mxu1 %v1662_v11 }
 0x2f6   :  { %5949 = vmatprep.mubr.msk.f32.mxu1 %vm10048_vm13, %v1665_v12  ;;  %v6565_v12 = vld [vmem:[%s10085_s21 + $0x8] sm:$0xff]  }
 0x2f7   :  { %6203 = vmatpush3.bf16.msra.mxu1 %v6565_v12 }
 0x2f8   :  { %6204 = vmatprep.subr.bf16.mxu1 %v6587_v2 }
 0x2f9   :  { %1790 = vmatmul.mubr.f32.gmra.mrb[10].mxu1 %v1664_v13 }
 0x2fa   :  { %5950 = vmatprep.mubr.msk.f32.mxu1 %vm10048_vm13, %v1667_v14 }
 0x2fd   :  { %1795 = vmatmul.mubr.f32.gmra.mrb[12].mxu1 %v1666_v15 }
 0x2fe   :  { %5951 = vmatprep.mubr.msk.f32.mxu1 %vm10048_vm13, %v1669_v16 }
 0x301   :  { %1800 = vmatmul.mubr.f32.gmra.mrb[14].mxu1 %v1668_v17  ;;  %v6566_v17 = vld [vmem:[%s10085_s21 + $0x10] sm:$0xff]   ;;  %s10307_s21 = sld [smem:[#allocation29_spill]] }
 0x302   :  { %5952 = vmatprep.mubr.msk.f32.mxu1 %vm10048_vm13, %v1671_v18  ;;  %6205 = vmatpush3.bf16.msra.mxu1 %v6566_v17 }
 0x303   :  { %6206 = vmatprep.subr.bf16.mxu1 %v6587_v2 }
 0x305   :  { %1805 = vmatmul.mubr.f32.gmra.mrb[16].mxu1 %v1670_v20 }
 0x306   :  { %6210 = vmatprep.mubr.msk.bf16.mxu1 %vm6595_vm3, %v6587_v2  ;;  %6207 = vmatpush3.bf16.msra.mxu1 %v6567_v23  ;;  %v2949_v23 = vld [vmem:[%s10082_s28 + $0x19] sm:$0xff] }
 0x307   :  { %6208 = vmatprep.subr.bf16.mxu1 %v6587_v2 }
 0x30a   :  { %6209 = vmatpush3.bf16.msra.mxu1 %v2337_v30  ;;  %v2899_v30 = vld [vmem:[%s10082_s28 + $0x18] sm:$0xff] }
 0x30b   :  { %2924 = vst.msk [vmem:[#allocation7 + $0x18] sm:$0xff] %vm140_vm1, %v2899_v30 }
 0x30d   :  { %v4003_v44 = vpop.permute.xlu0 %4002 }
 0x30e   :  { %4070 = vst.msk [vmem:[#allocation7 + $0x8] sm:$0xff] %vm10084_vm15, %v4003_v44  ;;  %vm1892_vm15 = vcmask 130112  }
 0x30f   :  { %v3001_v46 = vpop.permute.xlu1 %3000 }
 0x310   :  { %3073 = vst.msk [vmem:[#allocation7 + $0x10] sm:$0xff] %vm291_vm4, %v3001_v46 }
 0x3b8   :  { %v1766_v47 = vpop.f32.mrb[0].mxu1 }
 0x3b9   :  { %1811 = vst.msk [vmem:[#allocation3] sm:$0xff] %vm10024_vm11, %v1766_v47  ;;  %v1768_v48 = vpop.f32.mrb[1].mxu1 }
 0x3bc   :  { %v1771_v49 = vpop.f32.mrb[2].mxu1 }
 0x3bd   :  { %1812 = vst.msk [vmem:[#allocation3 + $0x8] sm:$0xff] %vm10024_vm11, %v1771_v49  ;;  %v1773_v50 = vpop.f32.mrb[3].mxu1 }
 0x3c0   :  { %v1776_v51 = vpop.f32.mrb[4].mxu1  ;;  %v1829_v52 = vld [vmem:[#allocation3] sm:$0xff] }
 0x3c1   :  { %1813 = vst.msk [vmem:[#allocation3 + $0x10] sm:$0xff] %vm10024_vm11, %v1776_v51  ;;  %v1778_v53 = vpop.f32.mrb[5].mxu1  ;;  %1838 = vst.msk [vmem:[#allocation4] sm:$0xff] %vm10024_vm11, %v1829_v52 }
 0x3c4   :  { %v1781_v54 = vpop.f32.mrb[6].mxu1  ;;  %v1847_v55 = vld [vmem:[#allocation3 + $0x1] sm:$0xff] }
 0x3c5   :  { %1814 = vst.msk [vmem:[#allocation3 + $0x18] sm:$0xff] %vm10024_vm11, %v1781_v54  ;;  %1865 = vrot.lane.b32.xlu1 %v1847_v55, %s10074_s2  ;;  %v1783_v56 = vpop.f32.mrb[7].mxu1  ;;  %v2071_v57 = vld [vmem:[#allocation3 + $0x8] sm:$0xff] }
 0x3c6   :  { %1839 = vst.msk [vmem:[#allocation4 + $0x8] sm:$0xff] %vm10024_vm11, %v2071_v57  ;;  %v1903_v58 = vld [vmem:[#allocation3 + $0x2] sm:$0xff] }
 0x3c7   :  { %v1959_v63 = vld [vmem:[#allocation3 + $0x6] sm:$0xff] }
 0x3c8   :  { %v1848_v59 = vld [vmem:[#allocation3 + $0x9] sm:$0xff]  ;;  %v1786_v60 = vpop.f32.mrb[8].mxu1 }
 0x3c9   :  { %1921 = vrot.lane.b32.xlu1 %v1903_v58, %s10071_s12  ;;  %1867 = vrot.lane.b32.xlu0 %v1848_v59, %s10074_s2  ;;  %1815 = vst.msk [vmem:[#allocation3 + $0x20] sm:$0xff] %vm10024_vm11, %v1786_v60  ;;  %v2072_v61 = vld [vmem:[#allocation3 + $0x10] sm:$0xff]  ;;  %v1788_v62 = vpop.f32.mrb[9].mxu1  ;;  %v2015_v7 = vld [vmem:[#allocation3 + $0x7] sm:$0xff] }
 0x3ca   :  { %1840 = vst.msk [vmem:[#allocation4 + $0x10] sm:$0xff] %vm10024_vm11, %v2072_v61  ;;  %v1904_v0 = vld [vmem:[#allocation3 + $0xa] sm:$0xff] }
 0x3cb   :  { %v1960_v8 = vld [vmem:[#allocation3 + $0xe] sm:$0xff] }
 0x3cc   :  { %v1791_v3 = vpop.f32.mrb[10].mxu1  ;;  %v8168_v1 = vld [vmem:[#allocation3 + $0x18] sm:$0xff]  ;;  %v2016_v13 = vld [vmem:[#allocation3 + $0xf] sm:$0xff] }
 0x3cd   :  { %1977 = vrot.lane.b32.xlu1 %v1959_v63, %s10073_s11  ;;  %1923 = vrot.lane.b32.xlu0 %v1904_v0, %s10071_s12  ;;  %1816 = vst.msk [vmem:[#allocation3 + $0x28] sm:$0xff] %vm10024_vm11, %v1791_v3  ;;  %v1793_v6 = vpop.f32.mrb[11].mxu1  ;;  %1841 = vst.msk [vmem:[#allocation4 + $0x18] sm:$0xff] %vm10024_vm11, %v8168_v1  ;;  %v2120_v18 = vld [vmem:[#allocation3 + $0xc] sm:$0xff]  ;;  %v2121_v26 = vld [vmem:[#allocation3 + $0x14] sm:$0xff] }
 0x3ce   :  { %v2170_v25 = vld [vmem:[#allocation3 + $0xd] sm:$0xff]  ;;  %v2171_v29 = vld [vmem:[#allocation3 + $0x15] sm:$0xff] }
 0x3cf   :  { %v2221_v32 = vld [vmem:[#allocation3 + $0x16] sm:$0xff] }
 0x3d0   :  { %v1796_v9 = vpop.f32.mrb[12].mxu1  ;;  %v8178_v10 = vld [vmem:[#allocation3 + $0x20] sm:$0xff]  ;;  %v1849_v33 = vld [vmem:[#allocation3 + $0x11] sm:$0xff] }
 0x3d1   :  { %2033 = vrot.lane.b32.xlu1 %v2015_v7, %s10076_s27  ;;  %1979 = vrot.lane.b32.xlu0 %v1960_v8, %s10073_s11  ;;  %1817 = vst.msk [vmem:[#allocation3 + $0x30] sm:$0xff] %vm10024_vm11, %v1796_v9  ;;  %v1798_v11 = vpop.f32.mrb[13].mxu1  ;;  %1842 = vst.msk [vmem:[#allocation4 + $0x20] sm:$0xff] %vm10024_vm11, %v8178_v10  ;;  %v1905_v34 = vld [vmem:[#allocation3 + $0x12] sm:$0xff]  ;;  %v1906_v36 = vld [vmem:[#allocation3 + $0x1a] sm:$0xff] }
 0x3d2   :  { %v1850_v35 = vld [vmem:[#allocation3 + $0x19] sm:$0xff] }
 0x3d3   :  { %v2017_v37 = vld [vmem:[#allocation3 + $0x17] sm:$0xff]  ;;  %v2018_v39 = vld [vmem:[#allocation3 + $0x1f] sm:$0xff] }
 0x3d4   :  { %v1801_v14 = vpop.f32.mrb[14].mxu1  ;;  %v8189_v16 = vld [vmem:[#allocation3 + $0x28] sm:$0xff]  ;;  %v1962_v38 = vld [vmem:[#allocation3 + $0x1e] sm:$0xff] }
 0x3d5   :  { %2087 = vrot.lane.b32.xlu1 %v2071_v57, %s10044_s4  ;;  %2035 = vrot.lane.b32.xlu0 %v2016_v13, %s10076_s27  ;;  %1818 = vst.msk [vmem:[#allocation3 + $0x38] sm:$0xff] %vm10024_vm11, %v1801_v14  ;;  %v1803_v15 = vpop.f32.mrb[15].mxu1  ;;  %1843 = vst.msk [vmem:[#allocation4 + $0x28] sm:$0xff] %vm10024_vm11, %v8189_v16  ;;  %v2122_v40 = vld [vmem:[#allocation3 + $0x1c] sm:$0xff]  ;;  %v2123_v42 = vld [vmem:[#allocation3 + $0x24] sm:$0xff] }
 0x3d6   :  { %v2172_v41 = vld [vmem:[#allocation3 + $0x1d] sm:$0xff]  ;;  %v2173_v43 = vld [vmem:[#allocation3 + $0x25] sm:$0xff] }
 0x3d7   :  { %v2223_v44 = vld [vmem:[#allocation3 + $0x26] sm:$0xff] }
 0x3d8   :  { %v1806_v20 = vpop.f32.mrb[16].mxu1  ;;  %v8200_v21 = vld [vmem:[#allocation3 + $0x30] sm:$0xff]  ;;  %v1851_v45 = vld [vmem:[#allocation3 + $0x21] sm:$0xff] }
 0x3d9   :  { %2136 = vrot.lane.b32.xlu1 %v2120_v18, %s10046_s20  ;;  %2089 = vrot.lane.b32.xlu0 %v2072_v61, %s10044_s4  ;;  %1819 = vst.msk [vmem:[#allocation3 + $0x40] sm:$0xff] %vm10024_vm11, %v1806_v20  ;;  %v1808_v22 = vpop.f32.mrb[17].mxu1  ;;  %1844 = vst.msk [vmem:[#allocation4 + $0x30] sm:$0xff] %vm10024_vm11, %v8200_v21  ;;  %v1907_v46 = vld [vmem:[#allocation3 + $0x22] sm:$0xff]  ;;  %v1908_v48 = vld [vmem:[#allocation3 + $0x2a] sm:$0xff] }
 0x3da   :  { %v1852_v47 = vld [vmem:[#allocation3 + $0x29] sm:$0xff] }
 0x3db   :  { %v2019_v49 = vld [vmem:[#allocation3 + $0x27] sm:$0xff]  ;;  %v2020_v51 = vld [vmem:[#allocation3 + $0x2f] sm:$0xff] }
 0x3dc   :  { %v8210_v27 = vld [vmem:[#allocation3 + $0x38] sm:$0xff]  ;;  %v1964_v50 = vld [vmem:[#allocation3 + $0x2e] sm:$0xff] }
 0x3dd   :  { %2186 = vrot.lane.b32.xlu1 %v2170_v25, %s10032_s0  ;;  %2138 = vrot.lane.b32.xlu0 %v2121_v26, %s10046_s20  ;;  %1845 = vst.msk [vmem:[#allocation4 + $0x38] sm:$0xff] %vm10024_vm11, %v8210_v27  ;;  %v2124_v52 = vld [vmem:[#allocation3 + $0x2c] sm:$0xff]  ;;  %v2125_v54 = vld [vmem:[#allocation3 + $0x34] sm:$0xff] }
 0x3de   :  { %v2174_v53 = vld [vmem:[#allocation3 + $0x2d] sm:$0xff]  ;;  %v2175_v55 = vld [vmem:[#allocation3 + $0x35] sm:$0xff] }
 0x3df   :  { %v2225_v56 = vld [vmem:[#allocation3 + $0x36] sm:$0xff] }
 0x3e0   :  { %v8221_v31 = vld [vmem:[#allocation3 + $0x40] sm:$0xff]  ;;  %v1853_v57 = vld [vmem:[#allocation3 + $0x31] sm:$0xff] }
 0x3e1   :  { %2236 = vrot.lane.b32.xlu1 %v1960_v8, %s10030_s6  ;;  %2188 = vrot.lane.b32.xlu0 %v2171_v29, %s10032_s0  ;;  %1846 = vst.msk [vmem:[#allocation4 + $0x40] sm:$0xff] %vm10024_vm11, %v8221_v31  ;;  %v1909_v58 = vld [vmem:[#allocation3 + $0x32] sm:$0xff]  ;;  %v1910_v60 = vld [vmem:[#allocation3 + $0x3a] sm:$0xff]  ;;  %v2127_v7 = vld [vmem:[#allocation3 + $0x44] sm:$0xf]  ;;  %vm10034_vm11 = vcmask 261312  }
 0x3e2   :  { %v1854_v59 = vld [vmem:[#allocation3 + $0x39] sm:$0xff]  ;;  %v1855_v13 = vld [vmem:[#allocation3 + $0x41] sm:$0x7f] }
 0x3e3   :  { %v2021_v61 = vld [vmem:[#allocation3 + $0x37] sm:$0xff]  ;;  %v2022_v63 = vld [vmem:[#allocation3 + $0x3f] sm:$0xff]  ;;  %v2023_v22 = vld [vmem:[#allocation3 + $0x47] sm:$0x1] }
 0x3e4   :  { %v1966_v62 = vld [vmem:[#allocation3 + $0x3e] sm:$0xff]  ;;  %v2227_v14 = vld [vmem:[#allocation3 + $0x46] sm:$0x3]  ;;  %v3248_v25 = vld [vmem:[%s10082_s28 + $0x1a] sm:$0xff] }
 0x3e5   :  { %2238 = vrot.lane.b32.xlu0 %v2221_v32, %s10030_s6  ;;  %1869 = vrot.lane.b32.xlu1 %v1849_v33, %s10074_s2  ;;  %v2126_v3 = vld [vmem:[#allocation3 + $0x3c] sm:$0xff]  ;;  %v1967_v17 = vld [vmem:[#allocation3 + $0x46] sm:$0x3] }
 0x3e6   :  { %v2176_v4 = vld [vmem:[#allocation3 + $0x3d] sm:$0xff] }
 0x3e7   :  { %v1911_v18 = vld [vmem:[#allocation3 + $0x42] sm:$0x3f] }
 0x3e9   :  { %1925 = vrot.lane.b32.xlu1 %v1905_v34, %s10071_s12  ;;  %1871 = vrot.lane.b32.xlu0 %v1850_v35, %s10074_s2  ;;  %v3393_v34 = vld [vmem:[%s10082_s28 + $0x23] sm:$0xff] }
 0x3ea   :  { %v3680_v35 = vld [vmem:[%s10082_s28 + $0x24] sm:$0xff] }
 0x3ed   :  { %1981 = vrot.lane.b32.xlu1 %v2221_v32, %s10073_s11  ;;  %1927 = vrot.lane.b32.xlu0 %v1906_v36, %s10071_s12 }
 0x3f1   :  { %2037 = vrot.lane.b32.xlu1 %v2017_v37, %s10076_s27  ;;  %1983 = vrot.lane.b32.xlu0 %v1962_v38, %s10073_s11 }
 0x3f5   :  { %2091 = vrot.lane.b32.xlu1 %v8168_v1, %s10044_s4  ;;  %2039 = vrot.lane.b32.xlu0 %v2018_v39, %s10076_s27 }
 0x3f9   :  { %2140 = vrot.lane.b32.xlu1 %v2122_v40, %s10046_s20  ;;  %2093 = vrot.lane.b32.xlu0 %v8178_v10, %s10044_s4  ;;  %v2177_v10 = vld [vmem:[#allocation3 + $0x45] sm:$0x7] }
 0x3fd   :  { %2190 = vrot.lane.b32.xlu1 %v2172_v41, %s10032_s0  ;;  %2142 = vrot.lane.b32.xlu0 %v2123_v42, %s10046_s20 }
 0x401   :  { %2240 = vrot.lane.b32.xlu1 %v1962_v38, %s10030_s6  ;;  %2192 = vrot.lane.b32.xlu0 %v2173_v43, %s10032_s0  ;;  %v3818_v38 = vld [vmem:[%s10082_s28 + $0x25] sm:$0xff] }
 0x405   :  { %2242 = vrot.lane.b32.xlu0 %v2223_v44, %s10030_s6  ;;  %1873 = vrot.lane.b32.xlu1 %v1851_v45, %s10074_s2  ;;  %v3956_v45 = vld [vmem:[%s10082_s28 + $0x26] sm:$0xff] }
 0x409   :  { %1929 = vrot.lane.b32.xlu1 %v1907_v46, %s10071_s12  ;;  %1875 = vrot.lane.b32.xlu0 %v1852_v47, %s10074_s2 }
 0x40d   :  { %1985 = vrot.lane.b32.xlu1 %v2223_v44, %s10073_s11  ;;  %1931 = vrot.lane.b32.xlu0 %v1908_v48, %s10071_s12  ;;  %v3681_v44 = vld [vmem:[%s10082_s28 + $0x2c] sm:$0xff] }
 0x40e   :  { %v3819_v48 = vld [vmem:[%s10082_s28 + $0x2d] sm:$0xff] }
 0x411   :  { %2041 = vrot.lane.b32.xlu1 %v2019_v49, %s10076_s27  ;;  %1987 = vrot.lane.b32.xlu0 %v1964_v50, %s10073_s11  ;;  %v2950_v49 = vld [vmem:[%s10082_s28 + $0x21] sm:$0xff] }
 0x415   :  { %2095 = vrot.lane.b32.xlu1 %v8189_v16, %s10044_s4  ;;  %2043 = vrot.lane.b32.xlu0 %v2020_v51, %s10076_s27 }
 0x419   :  { %2144 = vrot.lane.b32.xlu1 %v2124_v52, %s10046_s20  ;;  %2097 = vrot.lane.b32.xlu0 %v8200_v21, %s10044_s4  ;;  %v3957_v52 = vld [vmem:[%s10082_s28 + $0x2e] sm:$0xff] }
 0x41d   :  { %2194 = vrot.lane.b32.xlu1 %v2174_v53, %s10032_s0  ;;  %2146 = vrot.lane.b32.xlu0 %v2125_v54, %s10046_s20 }
 0x421   :  { %2244 = vrot.lane.b32.xlu1 %v1964_v50, %s10030_s6  ;;  %2196 = vrot.lane.b32.xlu0 %v2175_v55, %s10032_s0  ;;  %v2951_v55 = vld [vmem:[%s10082_s28 + $0x29] sm:$0xff] }
 0x425   :  { %2246 = vrot.lane.b32.xlu0 %v2225_v56, %s10030_s6  ;;  %1877 = vrot.lane.b32.xlu1 %v1853_v57, %s10074_s2 }
 0x429   :  { %1933 = vrot.lane.b32.xlu1 %v1909_v58, %s10071_s12  ;;  %1879 = vrot.lane.b32.xlu0 %v1854_v59, %s10074_s2  ;;  %v3394_v59 = vld [vmem:[%s10082_s28 + $0x2b] sm:$0xff] }
 0x42d   :  { %1989 = vrot.lane.b32.xlu1 %v2225_v56, %s10073_s11  ;;  %1935 = vrot.lane.b32.xlu0 %v1910_v60, %s10071_s12  ;;  %v3250_v56 = vld [vmem:[%s10082_s28 + $0x2a] sm:$0xff] }
 0x431   :  { %2045 = vrot.lane.b32.xlu1 %v2021_v61, %s10076_s27  ;;  %1991 = vrot.lane.b32.xlu0 %v1966_v62, %s10073_s11 }
 0x435   :  { %2099 = vrot.lane.b32.xlu1 %v8210_v27, %s10044_s4  ;;  %2047 = vrot.lane.b32.xlu0 %v2022_v63, %s10076_s27 }
 0x437   :  { %v1866_v0 = vpop.permute.xlu1 %1865 }
 0x438   :  { %1893 = vst.msk [vmem:[#allocation4] sm:$0xff] %vm1892_vm15, %v1866_v0 }
 0x439   :  { %2148 = vrot.lane.b32.xlu1 %v2126_v3, %s10046_s20  ;;  %2101 = vrot.lane.b32.xlu0 %v8221_v31, %s10044_s4  ;;  %v3249_v31 = vld [vmem:[%s10082_s28 + $0x22] sm:$0xff]  ;;  %v3395_v3 = vld [vmem:[%s10082_s28 + $0x33] sm:$0xff]  ;;  %s10096_s4 = sld [smem:[#allocation20_spill]] }
 0x43b   :  { %v1922_v6 = vpop.permute.xlu1 %1921  ;;  %v1868_v1 = vpop.permute.xlu0 %1867 }
 0x43c   :  { %1949 = vst.msk [vmem:[#allocation4] sm:$0xff] %vm1948_vm12, %v1922_v6  ;;  %v3682_v6 = vld [vmem:[%s10082_s28 + $0x34] sm:$0xff] }
 0x43d   :  { %1894 = vst.msk [vmem:[#allocation4 + $0x8] sm:$0xff] %vm1892_vm15, %v1868_v1  ;;  %2198 = vrot.lane.b32.xlu1 %v2176_v4, %s10032_s0  ;;  %2150 = vrot.lane.b32.xlu0 %v2127_v7, %s10046_s20  ;;  %v3820_v7 = vld [vmem:[%s10082_s28 + $0x35] sm:$0xff]  ;;  %s10162_s20 = sld [smem:[#allocation24_spill]] }
 0x43f   :  { %v1978_v8 = vpop.permute.xlu1 %1977  ;;  %v1924_v9 = vpop.permute.xlu0 %1923 }
 0x440   :  { %2005 = vst.msk [vmem:[#allocation4] sm:$0xff] %vm10034_vm11, %v1978_v8 }
 0x441   :  { %1950 = vst.msk [vmem:[#allocation4 + $0x8] sm:$0xff] %vm1948_vm12, %v1924_v9  ;;  %2248 = vrot.lane.b32.xlu1 %v1966_v62, %s10030_s6  ;;  %2200 = vrot.lane.b32.xlu0 %v2177_v10, %s10032_s0  ;;  %v3251_v62 = vld [vmem:[%s10082_s28 + $0x32] sm:$0xff] }
 0x443   :  { %v2034_v11 = vpop.permute.xlu1 %2033  ;;  %v1980_v12 = vpop.permute.xlu0 %1979 }
 0x444   :  { %2061 = vst.msk [vmem:[#allocation4] sm:$0xff] %vm10037_vm2, %v2034_v11 }
 0x445   :  { %2006 = vst.msk [vmem:[#allocation4 + $0x8] sm:$0xff] %vm10034_vm11, %v1980_v12  ;;  %1881 = vrot.lane.b32.xlu1 %v1855_v13, %s10074_s2  ;;  %2250 = vrot.lane.b32.xlu0 %v2227_v14, %s10030_s6  ;;  %v3683_v13 = vld [vmem:[%s10082_s28 + $0x3c] sm:$0xff] }
 0x446   :  { %v3958_v14 = vld [vmem:[%s10082_s28 + $0x36] sm:$0xff] }
 0x447   :  { %v2088_v15 = vpop.permute.xlu1 %2087  ;;  %v2036_v16 = vpop.permute.xlu0 %2035 }
 0x448   :  { %2112 = vst.msk [vmem:[#allocation4] sm:$0xff] %vm10036_vm14, %v2088_v15 }
 0x449   :  { %2062 = vst.msk [vmem:[#allocation4 + $0x8] sm:$0xff] %vm10037_vm2, %v2036_v16  ;;  %1993 = vrot.lane.b32.xlu1 %v1967_v17, %s10073_s11  ;;  %1937 = vrot.lane.b32.xlu0 %v1911_v18, %s10071_s12  ;;  %v3821_v17 = vld [vmem:[%s10082_s28 + $0x3d] sm:$0xff]  ;;  %v2952_v18 = vld [vmem:[%s10082_s28 + $0x31] sm:$0xff] }
 0x44b   :  { %v2137_v20 = vpop.permute.xlu1 %2136  ;;  %v2090_v21 = vpop.permute.xlu0 %2089 }
 0x44c   :  { %2161 = vst.msk [vmem:[#allocation4] sm:$0xff] %vm10035_vm0, %v2137_v20 }
 0x44d   :  { %2113 = vst.msk [vmem:[#allocation4 + $0x8] sm:$0xff] %vm10036_vm14, %v2090_v21  ;;  %2049 = vrot.lane.b32.xlu0 %v2023_v22, %s10076_s27  ;;  %3150 = vrot.lane.b32.xlu1 %v7997_v19, %s10074_s2  ;;  %v3392_v19 = vld [vmem:[%s10082_s28 + $0x1b] sm:$0xff] }
 0x44e   :  { %v3959_v22 = vld [vmem:[%s10082_s28 + $0x3e] sm:$0xff] }
 0x44f   :  { %v2187_v26 = vpop.permute.xlu1 %2186  ;;  %v2139_v27 = vpop.permute.xlu0 %2138 }
 0x450   :  { %2211 = vst.msk [vmem:[#allocation4] sm:$0xff] %vm10049_vm10, %v2187_v26  ;;  %v2953_v26 = vld [vmem:[%s10082_s28 + $0x39] sm:$0xff] }
 0x451   :  { %2162 = vst.msk [vmem:[#allocation4 + $0x8] sm:$0xff] %vm10035_vm0, %v2139_v27  ;;  %3002 = vrot.lane.b32.xlu0 %v2949_v23, %s10077_s5  ;;  %3298 = vrot.lane.b32.xlu1 %v3248_v25, %s10075_s1  ;;  %v3252_v27 = vld [vmem:[%s10082_s28 + $0x3a] sm:$0xff] }
 0x453   :  { %v2237_v28 = vpop.permute.xlu1 %2236  ;;  %v2189_v29 = vpop.permute.xlu0 %2188 }
 0x454   :  { %2261 = vst.msk [vmem:[#allocation4] sm:$0xff] %vm10043_vm9, %v2237_v28 }
 0x455   :  { %2212 = vst.msk [vmem:[#allocation4 + $0x8] sm:$0xff] %vm10049_vm10, %v2189_v29  ;;  %3152 = vrot.lane.b32.xlu0 %v3248_v25, %s10074_s2  ;;  %3442 = vrot.lane.b32.xlu1 %v3392_v19, %s10071_s12  ;;  %v3396_v29 = vld [vmem:[%s10082_s28 + $0x3b] sm:$0xff] }
 0x457   :  { %v2239_v32 = vpop.permute.xlu0 %2238  ;;  %v1870_v33 = vpop.permute.xlu1 %1869 }
 0x458   :  { %2262 = vst.msk [vmem:[#allocation4 + $0x8] sm:$0xff] %vm10043_vm9, %v2239_v32  ;;  %v3253_v32 = vld [vmem:[%s10082_s28 + $0x42] sm:$0xff] }
 0x459   :  { %1895 = vst.msk [vmem:[#allocation4 + $0x10] sm:$0xff] %vm1892_vm15, %v1870_v33  ;;  %3300 = vrot.lane.b32.xlu0 %v3249_v31, %s10075_s1  ;;  %3586 = vrot.lane.b32.xlu1 %v8021_v24, %s10072_s30  ;;  %v2900_v24 = vld [vmem:[%s10082_s28 + $0x20] sm:$0xff] }
 0x45a   :  { %2925 = vst.msk [vmem:[#allocation7 + $0x20] sm:$0xff] %vm140_vm1, %v2900_v24 }
 0x45b   :  { %v1926_v36 = vpop.permute.xlu1 %1925  ;;  %v1872_v37 = vpop.permute.xlu0 %1871  ;;  %v2270_v41 = vld [vmem:[#allocation4] sm:$0xff] }
 0x45c   :  { %1951 = vst.msk [vmem:[#allocation4 + $0x10] sm:$0xff] %vm1948_vm12, %v1926_v36  ;;  %v3684_v36 = vld [vmem:[%s10082_s28 + $0x44] sm:$0xff] }
 0x45d   :  { %1896 = vst.msk [vmem:[#allocation4 + $0x18] sm:$0xff] %vm1892_vm15, %v1872_v37  ;;  %3444 = vrot.lane.b32.xlu0 %v3393_v34, %s10071_s12  ;;  %3728 = vrot.lane.b32.xlu1 %v3680_v35, %s10073_s11 }
 0x45f   :  { %v1982_v39 = vpop.permute.xlu1 %1981  ;;  %v1928_v40 = vpop.permute.xlu0 %1927  ;;  %v2271_v42 = vld [vmem:[#allocation4 + $0x8] sm:$0xff] }
 0x460   :  { %2007 = vst.msk [vmem:[#allocation4 + $0x10] sm:$0xff] %vm10034_vm11, %v1982_v39  ;;  %v2279_v43 = vpack.c.bf16 %v2271_v42, %v2270_v41 }
 0x461   :  { %1952 = vst.msk [vmem:[#allocation4 + $0x18] sm:$0xff] %vm1948_vm12, %v1928_v40  ;;  %3588 = vrot.lane.b32.xlu0 %v3680_v35, %s10072_s30  ;;  %3866 = vrot.lane.b32.xlu1 %v3818_v38, %s10078_s7  ;;  %v3397_v35 = vld [vmem:[%s10082_s28 + $0x43] sm:$0xff] }
 0x462   :  { %6211 = vmatmul.mubr.msk.bf16.vlgmr.msra.gmra.mrb[20].mxu1 %vm10048_vm13, %v2279_v43  ;;  %v3822_v38 = vld [vmem:[%s10082_s28 + $0x45] sm:$0xff] }
 0x463   :  { %v2038_v46 = vpop.permute.xlu1 %2037  ;;  %v1984_v47 = vpop.permute.xlu0 %1983  ;;  %6214 = vmatprep.mubr.msk.bf16.mxu1 %vm6595_vm3, %v6587_v2 }
 0x464   :  { %2063 = vst.msk [vmem:[#allocation4 + $0x10] sm:$0xff] %vm10037_vm2, %v2038_v46 }
 0x465   :  { %2008 = vst.msk [vmem:[#allocation4 + $0x18] sm:$0xff] %vm10034_vm11, %v1984_v47  ;;  %3730 = vrot.lane.b32.xlu0 %v3681_v44, %s10073_s11  ;;  %4004 = vrot.lane.b32.xlu1 %v3956_v45, %s10076_s27  ;;  %v3960_v45 = vld [vmem:[%s10082_s28 + $0x46] sm:$0xff] }
 0x467   :  { %v2092_v50 = vpop.permute.xlu1 %2091  ;;  %v2040_v51 = vpop.permute.xlu0 %2039 }
 0x468   :  { %2114 = vst.msk [vmem:[#allocation4 + $0x10] sm:$0xff] %vm10036_vm14, %v2092_v50 }
 0x469   :  { %2064 = vst.msk [vmem:[#allocation4 + $0x18] sm:$0xff] %vm10037_vm2, %v2040_v51  ;;  %3868 = vrot.lane.b32.xlu0 %v3819_v48, %s10078_s7  ;;  %3004 = vrot.lane.b32.xlu1 %v2950_v49, %s10077_s5  ;;  %v3823_v48 = vld [vmem:[%s10082_s28 + $0x4d] sm:$0xff]  ;;  %v2954_v49 = vld [vmem:[%s10082_s28 + $0x41] sm:$0xff] }
 0x46b   :  { %v2141_v53 = vpop.permute.xlu1 %2140  ;;  %v2094_v54 = vpop.permute.xlu0 %2093 }
 0x46c   :  { %2163 = vst.msk [vmem:[#allocation4 + $0x10] sm:$0xff] %vm10035_vm0, %v2141_v53 }
 0x46d   :  { %2115 = vst.msk [vmem:[#allocation4 + $0x18] sm:$0xff] %vm10036_vm14, %v2094_v54  ;;  %4006 = vrot.lane.b32.xlu0 %v3957_v52, %s10076_s27  ;;  %3154 = vrot.lane.b32.xlu1 %v3249_v31, %s10074_s2  ;;  %v3961_v52 = vld [vmem:[%s10082_s28 + $0x4e] sm:$0xff] }
 0x46f   :  { %v2191_v57 = vpop.permute.xlu1 %2190  ;;  %v2143_v58 = vpop.permute.xlu0 %2142 }
 0x470   :  { %2213 = vst.msk [vmem:[#allocation4 + $0x10] sm:$0xff] %vm10049_vm10, %v2191_v57 }
 0x471   :  { %2164 = vst.msk [vmem:[#allocation4 + $0x18] sm:$0xff] %vm10035_vm0, %v2143_v58  ;;  %3006 = vrot.lane.b32.xlu0 %v2951_v55, %s10077_s5  ;;  %3302 = vrot.lane.b32.xlu1 %v3250_v56, %s10075_s1  ;;  %v2955_v55 = vld [vmem:[%s10082_s28 + $0x49] sm:$0xff] }
 0x473   :  { %v2241_v60 = vpop.permute.xlu1 %2240  ;;  %v2193_v61 = vpop.permute.xlu0 %2192 }
 0x474   :  { %2263 = vst.msk [vmem:[#allocation4 + $0x10] sm:$0xff] %vm10043_vm9, %v2241_v60 }
 0x475   :  { %2214 = vst.msk [vmem:[#allocation4 + $0x18] sm:$0xff] %vm10049_vm10, %v2193_v61  ;;  %3156 = vrot.lane.b32.xlu0 %v3250_v56, %s10074_s2  ;;  %3446 = vrot.lane.b32.xlu1 %v3394_v59, %s10071_s12  ;;  %v3254_v56 = vld [vmem:[%s10082_s28 + $0x4a] sm:$0xff] }
 0x476   :  { %v3398_v59 = vld [vmem:[%s10082_s28 + $0x4b] sm:$0xff] }
 0x477   :  { %v2243_v63 = vpop.permute.xlu0 %2242  ;;  %v1874_v0 = vpop.permute.xlu1 %1873 }
 0x478   :  { %2264 = vst.msk [vmem:[#allocation4 + $0x18] sm:$0xff] %vm10043_vm9, %v2243_v63 }
 0x479   :  { %1897 = vst.msk [vmem:[#allocation4 + $0x20] sm:$0xff] %vm1892_vm15, %v1874_v0  ;;  %3304 = vrot.lane.b32.xlu0 %v3251_v62, %s10075_s1  ;;  %3590 = vrot.lane.b32.xlu1 %v3681_v44, %s10072_s30  ;;  %v3685_v44 = vld [vmem:[%s10082_s28 + $0x4c] sm:$0xff] }
 0x47b   :  { %v1930_v1 = vpop.permute.xlu1 %1929  ;;  %v1876_v4 = vpop.permute.xlu0 %1875  ;;  %v2272_v10 = vld [vmem:[#allocation4 + $0x10] sm:$0xff] }
 0x47c   :  { %1953 = vst.msk [vmem:[#allocation4 + $0x20] sm:$0xff] %vm1948_vm12, %v1930_v1 }
 0x47d   :  { %1898 = vst.msk [vmem:[#allocation4 + $0x28] sm:$0xff] %vm1892_vm15, %v1876_v4  ;;  %3448 = vrot.lane.b32.xlu0 %v3395_v3, %s10071_s12  ;;  %3732 = vrot.lane.b32.xlu1 %v3682_v6, %s10073_s11  ;;  %v3399_v3 = vld [vmem:[%s10082_s28 + $0x53] sm:$0xff] }
 0x47f   :  { %v1986_v8 = vpop.permute.xlu1 %1985  ;;  %v1932_v9 = vpop.permute.xlu0 %1931  ;;  %v2273_v11 = vld [vmem:[#allocation4 + $0x18] sm:$0xff] }
 0x480   :  { %2009 = vst.msk [vmem:[#allocation4 + $0x20] sm:$0xff] %vm10034_vm11, %v1986_v8  ;;  %v2280_v12 = vpack.c.bf16 %v2273_v11, %v2272_v10  ;;  %v3824_v8 = vld [vmem:[%s10082_s28 + $0x55] sm:$0xff] }
 0x481   :  { %1954 = vst.msk [vmem:[#allocation4 + $0x28] sm:$0xff] %vm1948_vm12, %v1932_v9  ;;  %3592 = vrot.lane.b32.xlu0 %v3682_v6, %s10072_s30  ;;  %3870 = vrot.lane.b32.xlu1 %v3820_v7, %s10078_s7  ;;  %v3686_v6 = vld [vmem:[%s10082_s28 + $0x54] sm:$0xff]  ;;  %v2901_v7 = vld [vmem:[%s10082_s28 + $0x28] sm:$0xff] }
 0x482   :  { %6215 = vmatmul.mubr.msk.bf16.gmra.mrb[24].mxu1 %vm10048_vm13, %v2280_v12  ;;  %2926 = vst.msk [vmem:[#allocation7 + $0x28] sm:$0xff] %vm140_vm1, %v2901_v7  ;;  %v3690_v7 = vld [vmem:[%s10082_s28 + $0x74] sm:$0xff] }
 0x483   :  { %v2042_v15 = vpop.permute.xlu1 %2041  ;;  %v1988_v16 = vpop.permute.xlu0 %1987  ;;  %6218 = vmatprep.mubr.msk.bf16.mxu1 %vm6595_vm3, %v6587_v2 }
 0x484   :  { %2065 = vst.msk [vmem:[#allocation4 + $0x20] sm:$0xff] %vm10037_vm2, %v2042_v15  ;;  %v3962_v15 = vld [vmem:[%s10082_s28 + $0x56] sm:$0xff] }
 0x485   :  { %2010 = vst.msk [vmem:[#allocation4 + $0x28] sm:$0xff] %vm10034_vm11, %v1988_v16  ;;  %3734 = vrot.lane.b32.xlu0 %v3683_v13, %s10073_s11  ;;  %4008 = vrot.lane.b32.xlu1 %v3958_v14, %s10076_s27  ;;  %v3687_v14 = vld [vmem:[%s10082_s28 + $0x5c] sm:$0xff] }
 0x487   :  { %v2096_v20 = vpop.permute.xlu1 %2095  ;;  %v2044_v21 = vpop.permute.xlu0 %2043 }
 0x488   :  { %2116 = vst.msk [vmem:[#allocation4 + $0x20] sm:$0xff] %vm10036_vm14, %v2096_v20  ;;  %v3825_v20 = vld [vmem:[%s10082_s28 + $0x5d] sm:$0xff] }
 0x489   :  { %2066 = vst.msk [vmem:[#allocation4 + $0x28] sm:$0xff] %vm10037_vm2, %v2044_v21  ;;  %3872 = vrot.lane.b32.xlu0 %v3821_v17, %s10078_s7  ;;  %3008 = vrot.lane.b32.xlu1 %v2952_v18, %s10077_s5  ;;  %v2902_v18 = vld [vmem:[%s10082_s28 + $0x30] sm:$0xff] }
 0x48a   :  { %2927 = vst.msk [vmem:[#allocation7 + $0x30] sm:$0xff] %vm140_vm1, %v2902_v18  ;;  %v2956_v21 = vld [vmem:[%s10082_s28 + $0x51] sm:$0xff] }
 0x48b   :  { %v2145_v23 = vpop.permute.xlu1 %2144  ;;  %v2098_v25 = vpop.permute.xlu0 %2097  ;;  %v2906_v18 = vld [vmem:[%s10082_s28 + $0x50] sm:$0xff] }
 0x48c   :  { %2165 = vst.msk [vmem:[#allocation4 + $0x20] sm:$0xff] %vm10035_vm0, %v2145_v23 }
 0x48d   :  { %2117 = vst.msk [vmem:[#allocation4 + $0x28] sm:$0xff] %vm10036_vm14, %v2098_v25  ;;  %4010 = vrot.lane.b32.xlu0 %v3959_v22, %s10076_s27  ;;  %3158 = vrot.lane.b32.xlu1 %v3251_v62, %s10074_s2  ;;  %v3255_v62 = vld [vmem:[%s10082_s28 + $0x52] sm:$0xff] }
 0x48e   :  { %2931 = vst.msk [vmem:[#allocation7 + $0x50] sm:$0xff] %vm140_vm1, %v2906_v18 }
 0x48f   :  { %v2195_v19 = vpop.permute.xlu1 %2194  ;;  %v2147_v28 = vpop.permute.xlu0 %2146 }
 0x490   :  { %2215 = vst.msk [vmem:[#allocation4 + $0x20] sm:$0xff] %vm10049_vm10, %v2195_v19 }
 0x491   :  { %2166 = vst.msk [vmem:[#allocation4 + $0x28] sm:$0xff] %vm10035_vm0, %v2147_v28  ;;  %3010 = vrot.lane.b32.xlu0 %v2953_v26, %s10077_s5  ;;  %3306 = vrot.lane.b32.xlu1 %v3252_v27, %s10075_s1 }
 0x493   :  { %v2245_v30 = vpop.permute.xlu1 %2244  ;;  %v2197_v31 = vpop.permute.xlu0 %2196 }
 0x494   :  { %2265 = vst.msk [vmem:[#allocation4 + $0x20] sm:$0xff] %vm10043_vm9, %v2245_v30  ;;  %v3256_v30 = vld [vmem:[%s10082_s28 + $0x5a] sm:$0xff] }
 0x495   :  { %2216 = vst.msk [vmem:[#allocation4 + $0x28] sm:$0xff] %vm10049_vm10, %v2197_v31  ;;  %3160 = vrot.lane.b32.xlu0 %v3252_v27, %s10074_s2  ;;  %3450 = vrot.lane.b32.xlu1 %v3396_v29, %s10071_s12  ;;  %v3963_v27 = vld [vmem:[%s10082_s28 + $0x5e] sm:$0xff] }
 0x496   :  { %v2957_v29 = vld [vmem:[%s10082_s28 + $0x59] sm:$0xff] }
 0x497   :  { %v2247_v33 = vpop.permute.xlu0 %2246  ;;  %v1878_v34 = vpop.permute.xlu1 %1877 }
 0x498   :  { %2266 = vst.msk [vmem:[#allocation4 + $0x28] sm:$0xff] %vm10043_vm9, %v2247_v33  ;;  %v3400_v33 = vld [vmem:[%s10082_s28 + $0x5b] sm:$0xff] }
 0x499   :  { %1899 = vst.msk [vmem:[#allocation4 + $0x30] sm:$0xff] %vm1892_vm15, %v1878_v34  ;;  %3308 = vrot.lane.b32.xlu0 %v3253_v32, %s10075_s1  ;;  %3594 = vrot.lane.b32.xlu1 %v3683_v13, %s10072_s30 }
 0x49b   :  { %v1934_v37 = vpop.permute.xlu1 %1933  ;;  %v1880_v24 = vpop.permute.xlu0 %1879  ;;  %v2274_v41 = vld [vmem:[#allocation4 + $0x20] sm:$0xff] }
 0x49c   :  { %1955 = vst.msk [vmem:[#allocation4 + $0x30] sm:$0xff] %vm1948_vm12, %v1934_v37 }
 0x49d   :  { %1900 = vst.msk [vmem:[#allocation4 + $0x38] sm:$0xff] %vm1892_vm15, %v1880_v24  ;;  %3452 = vrot.lane.b32.xlu0 %v3397_v35, %s10071_s12  ;;  %3736 = vrot.lane.b32.xlu1 %v3684_v36, %s10073_s11 }
 0x49f   :  { %v1990_v39 = vpop.permute.xlu1 %1989  ;;  %v1936_v40 = vpop.permute.xlu0 %1935  ;;  %v2275_v42 = vld [vmem:[#allocation4 + $0x28] sm:$0xff] }
 0x4a0   :  { %2011 = vst.msk [vmem:[#allocation4 + $0x30] sm:$0xff] %vm10034_vm11, %v1990_v39  ;;  %v2281_v43 = vpack.c.bf16 %v2275_v42, %v2274_v41  ;;  %v3688_v39 = vld [vmem:[%s10082_s28 + $0x64] sm:$0xff]  ;;  %v2903_v42 = vld [vmem:[%s10082_s28 + $0x38] sm:$0xff] }
 0x4a1   :  { %1956 = vst.msk [vmem:[#allocation4 + $0x38] sm:$0xff] %vm1948_vm12, %v1936_v40  ;;  %3596 = vrot.lane.b32.xlu0 %v3684_v36, %s10072_s30  ;;  %3874 = vrot.lane.b32.xlu1 %v3822_v38, %s10078_s7  ;;  %v3257_v36 = vld [vmem:[%s10082_s28 + $0x62] sm:$0xff] }
 0x4a2   :  { %6219 = vmatmul.mubr.msk.bf16.gmra.mrb[28].mxu1 %vm10048_vm13, %v2281_v43  ;;  %v3401_v38 = vld [vmem:[%s10082_s28 + $0x63] sm:$0xff]  ;;  %2928 = vst.msk [vmem:[#allocation7 + $0x38] sm:$0xff] %vm140_vm1, %v2903_v42 }
 0x4a3   :  { %v2046_v46 = vpop.permute.xlu1 %2045  ;;  %v1992_v47 = vpop.permute.xlu0 %1991  ;;  %6222 = vmatprep.mubr.msk.bf16.mxu1 %vm6595_vm3, %v6587_v2  ;;  %v3826_v43 = vld [vmem:[%s10082_s28 + $0x65] sm:$0xff] }
 0x4a4   :  { %2067 = vst.msk [vmem:[#allocation4 + $0x30] sm:$0xff] %vm10037_vm2, %v2046_v46  ;;  %v3689_v46 = vld [vmem:[%s10082_s28 + $0x6c] sm:$0xff] }
 0x4a5   :  { %2012 = vst.msk [vmem:[#allocation4 + $0x38] sm:$0xff] %vm10034_vm11, %v1992_v47  ;;  %3738 = vrot.lane.b32.xlu0 %v3685_v44, %s10073_s11  ;;  %4012 = vrot.lane.b32.xlu1 %v3960_v45, %s10076_s27  ;;  %vm10038_vm11 = vcmask 454016   ;;  %v3964_v47 = vld [vmem:[%s10082_s28 + $0x66] sm:$0xff] }
 0x4a7   :  { %v2100_v50 = vpop.permute.xlu1 %2099  ;;  %v2048_v51 = vpop.permute.xlu0 %2047 }
 0x4a8   :  { %2118 = vst.msk [vmem:[#allocation4 + $0x30] sm:$0xff] %vm10036_vm14, %v2100_v50  ;;  %v2904_v50 = vld [vmem:[%s10082_s28 + $0x40] sm:$0xff] }
 0x4a9   :  { %2068 = vst.msk [vmem:[#allocation4 + $0x38] sm:$0xff] %vm10037_vm2, %v2048_v51  ;;  %3876 = vrot.lane.b32.xlu0 %v3823_v48, %s10078_s7  ;;  %3012 = vrot.lane.b32.xlu1 %v2954_v49, %s10077_s5  ;;  %vm10040_vm2 = vcmask 583168   ;;  %v3827_v51 = vld [vmem:[%s10082_s28 + $0x6d] sm:$0xff] }
 0x4aa   :  { %2929 = vst.msk [vmem:[#allocation7 + $0x40] sm:$0xff] %vm140_vm1, %v2904_v50  ;;  %v2452_v50 = vld [vmem:[%s10096_s4] sm:$0xff] }
 0x4ab   :  { %v2149_v53 = vpop.permute.xlu1 %2148  ;;  %v2102_v54 = vpop.permute.xlu0 %2101  ;;  %6248 = vmatprep.mubr.msk.f32.mxu0 %vm10048_vm13, %v2452_v50 }
 0x4ac   :  { %2167 = vst.msk [vmem:[#allocation4 + $0x30] sm:$0xff] %vm10035_vm0, %v2149_v53  ;;  %vm10039_vm0 = vcmask 518592  }
 0x4ad   :  { %2119 = vst.msk [vmem:[#allocation4 + $0x38] sm:$0xff] %vm10036_vm14, %v2102_v54  ;;  %4014 = vrot.lane.b32.xlu0 %v3961_v52, %s10076_s27  ;;  %3162 = vrot.lane.b32.xlu1 %v3253_v32, %s10074_s2  ;;  %vm1901_vm14 = vcmask 129088   ;;  %v2958_v52 = vld [vmem:[%s10082_s28 + $0x61] sm:$0xff] }
 0x4af   :  { %v2199_v57 = vpop.permute.xlu1 %2198  ;;  %v2151_v58 = vpop.permute.xlu0 %2150 }
 0x4b0   :  { %2217 = vst.msk [vmem:[#allocation4 + $0x30] sm:$0xff] %vm10049_vm10, %v2199_v57  ;;  %vm10121_vm10 = vcmask 294144  }
 0x4b1   :  { %2169 = vst.msk [vmem:[#allocation4 + $0x38] sm:$0xf] %vm10038_vm11, %v2151_v58  ;;  %3014 = vrot.lane.b32.xlu0 %v2955_v55, %s10077_s5  ;;  %3310 = vrot.lane.b32.xlu1 %v3254_v56, %s10075_s1  ;;  %vm1957_vm11 = vcmask 193664   ;;  %v3965_v55 = vld [vmem:[%s10082_s28 + $0x6e] sm:$0xff] }
 0x4b2   :  { %v2959_v58 = vld [vmem:[%s10082_s28 + $0x69] sm:$0xff] }
 0x4b3   :  { %v2249_v60 = vpop.permute.xlu1 %2248  ;;  %v2201_v61 = vpop.permute.xlu0 %2200 }
 0x4b4   :  { %2267 = vst.msk [vmem:[#allocation4 + $0x30] sm:$0xff] %vm10043_vm9, %v2249_v60  ;;  %vm10088_vm9 = vcmask 294144  }
 0x4b5   :  { %2219 = vst.msk [vmem:[#allocation4 + $0x38] sm:$0x7] %vm10039_vm0, %v2201_v61  ;;  %3164 = vrot.lane.b32.xlu0 %v3254_v56, %s10074_s2  ;;  %3454 = vrot.lane.b32.xlu1 %v3398_v59, %s10071_s12  ;;  %vm10042_vm0 = vcmask 255168   ;;  %v3258_v59 = vld [vmem:[%s10082_s28 + $0x6a] sm:$0xff] }
 0x4b7   :  { %v1882_v63 = vpop.permute.xlu1 %1881  ;;  %v2251_v0 = vpop.permute.xlu0 %2250 }
 0x4b8   :  { %1902 = vst.msk [vmem:[#allocation4 + $0x40] sm:$0x7f] %vm1901_vm14, %v1882_v63 }
 0x4b9   :  { %2269 = vst.msk [vmem:[#allocation4 + $0x38] sm:$0x3] %vm10040_vm2, %v2251_v0  ;;  %3312 = vrot.lane.b32.xlu0 %v3255_v62, %s10075_s1  ;;  %3598 = vrot.lane.b32.xlu1 %v3685_v44, %s10072_s30  ;;  %vm10041_vm2 = vcmask 319744  }
 0x4bb   :  { %v1994_v1 = vpop.permute.xlu1 %1993  ;;  %v1938_v4 = vpop.permute.xlu0 %1937  ;;  %v2276_v10 = vld [vmem:[#allocation4 + $0x30] sm:$0xff] }
 0x4bc   :  { %1958 = vst.msk [vmem:[#allocation4 + $0x40] sm:$0x3f] %vm1957_vm11, %v1938_v4  ;;  %v3403_v4 = vld [vmem:[%s10082_s28 + $0x73] sm:$0xff] }
 0x4bd   :  { %2014 = vst.msk [vmem:[#allocation4 + $0x40] sm:$0x3] %vm10042_vm0, %v1994_v1  ;;  %3456 = vrot.lane.b32.xlu0 %v3399_v3, %s10071_s12  ;;  %3740 = vrot.lane.b32.xlu1 %v3686_v6, %s10073_s11  ;;  %vm10087_vm0 = vcmask 261344   ;;  %v3259_v3 = vld [vmem:[%s10082_s28 + $0x72] sm:$0xff] }
 0x4bf   :  { %v2050_v9 = vpop.permute.xlu0 %2049  ;;  %v3151_v12 = vpop.permute.xlu1 %3150 }
 0x4c0   :  { %v2277_v11 = vld [vmem:[#allocation4 + $0x38] sm:$0xff]  ;;  %2070 = vst.msk [vmem:[#allocation4 + $0x40] sm:$0x1] %vm10041_vm2, %v2050_v9  ;;  %vm10086_vm2 = vcmask 228544  }
 0x4c1   :  { %v2282_v13 = vpack.c.bf16 %v2277_v11, %v2276_v10  ;;  %3223 = vst.msk [vmem:[#allocation7 + $0x10] sm:$0xff] %vm443_vm5, %v3151_v12  ;;  %3600 = vrot.lane.b32.xlu0 %v3686_v6, %s10072_s30  ;;  %3878 = vrot.lane.b32.xlu1 %v3824_v8, %s10078_s7  ;;  %v2905_v10 = vld [vmem:[%s10082_s28 + $0x48] sm:$0xff]  ;;  %v3828_v11 = vld [vmem:[%s10082_s28 + $0x75] sm:$0xff] }
 0x4c2   :  { %2930 = vst.msk [vmem:[#allocation7 + $0x48] sm:$0xff] %vm140_vm1, %v2905_v10 }
 0x4c3   :  { %6223 = vmatmul.mubr.msk.bf16.gmra.mrb[32].mxu1 %vm10048_vm13, %v2282_v13  ;;  %v3003_v16 = vpop.permute.xlu0 %3002  ;;  %v3299_v17 = vpop.permute.xlu1 %3298 }
 0x4c4   :  { %6226 = vmatprep.mubr.msk.bf16.mxu1 %vm6595_vm3, %v6587_v2  ;;  %3074 = vst.msk [vmem:[#allocation7 + $0x18] sm:$0xff] %vm291_vm4, %v3003_v16 }
 0x4c5   :  { %3368 = vst.msk [vmem:[#allocation7 + $0x10] sm:$0xff] %vm590_vm6, %v3299_v17  ;;  %3742 = vrot.lane.b32.xlu0 %v3687_v14, %s10073_s11  ;;  %4016 = vrot.lane.b32.xlu1 %v3962_v15, %s10076_s27  ;;  %v3966_v15 = vld [vmem:[%s10082_s28 + $0x76] sm:$0xff] }
 0x4c7   :  { %v2278_v22 = vld [vmem:[#allocation4 + $0x40] sm:$0xff]  ;;  %v3153_v23 = vpop.permute.xlu0 %3152  ;;  %v3443_v25 = vpop.permute.xlu1 %3442 }
 0x4c8   :  { %v2283_v26 = vpack.c.bf16 %v2278_v22, %v2278_v22  ;;  %3224 = vst.msk [vmem:[#allocation7 + $0x18] sm:$0xff] %vm443_vm5, %v3153_v23 }
 0x4c9   :  { %3512 = vst.msk [vmem:[#allocation7 + $0x10] sm:$0xff] %vm736_vm7, %v3443_v25  ;;  %3880 = vrot.lane.b32.xlu0 %v3825_v20, %s10078_s7  ;;  %3016 = vrot.lane.b32.xlu1 %v2956_v21, %s10077_s5  ;;  %v3829_v20 = vld [vmem:[%s10082_s28 + $0x7d] sm:$0xff]  ;;  %v2960_v21 = vld [vmem:[%s10082_s28 + $0x71] sm:$0xff] }
 0x4ca   :  { %v3967_v25 = vld [vmem:[%s10082_s28 + $0x7e] sm:$0xff] }
 0x4cb   :  { %6227 = vmatmul.mubr.msk.bf16.gmra.mrb[36].mxu1 %vm10048_vm13, %v2283_v26  ;;  %v3301_v19 = vpop.permute.xlu0 %3300  ;;  %v3587_v28 = vpop.permute.xlu1 %3586 }
 0x4cc   :  { %3369 = vst.msk [vmem:[#allocation7 + $0x18] sm:$0xff] %vm590_vm6, %v3301_v19  ;;  %v2961_v19 = vld [vmem:[%s10082_s28 + $0x79] sm:$0xff] }
 0x4cd   :  { %3656 = vst.msk [vmem:[#allocation7 + $0x10] sm:$0xff] %vm882_vm8, %v3587_v28  ;;  %4018 = vrot.lane.b32.xlu0 %v3963_v27, %s10076_s27  ;;  %3166 = vrot.lane.b32.xlu1 %v3255_v62, %s10074_s2  ;;  %v3402_v62 = vld [vmem:[%s10082_s28 + $0x6b] sm:$0xff]  ;;  %v3260_v28 = vld [vmem:[%s10082_s28 + $0x7a] sm:$0xff] }
 0x4cf   :  { %v3445_v31 = vpop.permute.xlu0 %3444  ;;  %v3729_v32 = vpop.permute.xlu1 %3728 }
 0x4d0   :  { %3513 = vst.msk [vmem:[#allocation7 + $0x18] sm:$0xff] %vm736_vm7, %v3445_v31  ;;  %v3404_v31 = vld [vmem:[%s10082_s28 + $0x7b] sm:$0xff] }
 0x4d1   :  { %3795 = vst.msk [vmem:[#allocation7 + $0x10] sm:$0xff] %vm10086_vm2, %v3729_v32  ;;  %3018 = vrot.lane.b32.xlu0 %v2957_v29, %s10077_s5  ;;  %3314 = vrot.lane.b32.xlu1 %v3256_v30, %s10075_s1 }
 0x4d3   :  { %v3589_v34 = vpop.permute.xlu0 %3588  ;;  %v3867_v35 = vpop.permute.xlu1 %3866 }
 0x4d4   :  { %3657 = vst.msk [vmem:[#allocation7 + $0x18] sm:$0xff] %vm882_vm8, %v3589_v34  ;;  %v3261_v34 = vld [vmem:[%s10082_s28 + $0x82] sm:$0xff] }
 0x4d5   :  { %3933 = vst.msk [vmem:[#allocation7 + $0x10] sm:$0xff] %vm10087_vm0, %v3867_v35  ;;  %3168 = vrot.lane.b32.xlu0 %v3256_v30, %s10074_s2  ;;  %3458 = vrot.lane.b32.xlu1 %v3400_v33, %s10071_s12 }
 0x4d7   :  { %v3731_v37 = vpop.permute.xlu0 %3730  ;;  %v4005_v24 = vpop.permute.xlu1 %4004 }
 0x4d8   :  { %3796 = vst.msk [vmem:[#allocation7 + $0x18] sm:$0xff] %vm10086_vm2, %v3731_v37  ;;  %v3405_v37 = vld [vmem:[%s10082_s28 + $0x83] sm:$0xff] }
 0x4d9   :  { %4071 = vst.msk [vmem:[#allocation7 + $0x10] sm:$0xff] %vm10088_vm9, %v4005_v24  ;;  %3316 = vrot.lane.b32.xlu0 %v3257_v36, %s10075_s1  ;;  %3602 = vrot.lane.b32.xlu1 %v3687_v14, %s10072_s30  ;;  %v3691_v14 = vld [vmem:[%s10082_s28 + $0x7c] sm:$0xff]  ;;  %v3692_v24 = vld [vmem:[%s10082_s28 + $0x84] sm:$0xff] }
 0x4db   :  { %v3869_v40 = vpop.permute.xlu0 %3868  ;;  %v3005_v41 = vpop.permute.xlu1 %3004 }
 0x4dc   :  { %3934 = vst.msk [vmem:[#allocation7 + $0x18] sm:$0xff] %vm10087_vm0, %v3869_v40  ;;  %v2907_v40 = vld [vmem:[%s10082_s28 + $0x58] sm:$0xff] }
 0x4dd   :  { %3075 = vst.msk [vmem:[#allocation7 + $0x20] sm:$0xff] %vm291_vm4, %v3005_v41  ;;  %3460 = vrot.lane.b32.xlu0 %v3401_v38, %s10071_s12  ;;  %3744 = vrot.lane.b32.xlu1 %v3688_v39, %s10073_s11  ;;  %v3830_v41 = vld [vmem:[%s10082_s28 + $0x85] sm:$0xff] }
 0x4de   :  { %2932 = vst.msk [vmem:[#allocation7 + $0x58] sm:$0xff] %vm140_vm1, %v2907_v40 }
 0x4df   :  { %v4007_v44 = vpop.permute.xlu0 %4006  ;;  %v3155_v45 = vpop.permute.xlu1 %3154 }
 0x4e0   :  { %4072 = vst.msk [vmem:[#allocation7 + $0x18] sm:$0xff] %vm10088_vm9, %v4007_v44  ;;  %vm10089_vm9 = vmmov %vm10086_vm2  ;;  %v8799_v44 = vld [vmem:[%s10082_s28 + $0x8c] sm:$0xff] }
 0x4e1   :  { %3225 = vst.msk [vmem:[#allocation7 + $0x20] sm:$0xff] %vm443_vm5, %v3155_v45  ;;  %3604 = vrot.lane.b32.xlu0 %v3688_v39, %s10072_s30  ;;  %3882 = vrot.lane.b32.xlu1 %v3826_v43, %s10078_s7  ;;  %v3968_v45 = vld [vmem:[%s10082_s28 + $0x86] sm:$0xff] }
 0x4e3   :  { %v3007_v48 = vpop.permute.xlu0 %3006  ;;  %v3303_v49 = vpop.permute.xlu1 %3302 }
 0x4e4   :  { %3076 = vst.msk [vmem:[#allocation7 + $0x28] sm:$0xff] %vm291_vm4, %v3007_v48  ;;  %v3831_v48 = vld [vmem:[%s10082_s28 + $0x8d] sm:$0xff] }
 0x4e5   :  { %3370 = vst.msk [vmem:[#allocation7 + $0x20] sm:$0xff] %vm590_vm6, %v3303_v49  ;;  %3746 = vrot.lane.b32.xlu0 %v3689_v46, %s10073_s11  ;;  %4020 = vrot.lane.b32.xlu1 %v3964_v47, %s10076_s27  ;;  %v2962_v49 = vld [vmem:[%s10082_s28 + $0x81] sm:$0xff] }
 0x4e7   :  { %v3157_v53 = vpop.permute.xlu0 %3156  ;;  %v3447_v54 = vpop.permute.xlu1 %3446 }
 0x4e8   :  { %3226 = vst.msk [vmem:[#allocation7 + $0x28] sm:$0xff] %vm443_vm5, %v3157_v53  ;;  %v3969_v53 = vld [vmem:[%s10082_s28 + $0x8e] sm:$0xff] }
 0x4e9   :  { %3514 = vst.msk [vmem:[#allocation7 + $0x20] sm:$0xff] %vm736_vm7, %v3447_v54  ;;  %3884 = vrot.lane.b32.xlu0 %v3827_v51, %s10078_s7  ;;  %3020 = vrot.lane.b32.xlu1 %v2958_v52, %s10077_s5 }
 0x4eb   :  { %v3305_v56 = vpop.permute.xlu0 %3304  ;;  %v3591_v57 = vpop.permute.xlu1 %3590 }
 0x4ec   :  { %3371 = vst.msk [vmem:[#allocation7 + $0x28] sm:$0xff] %vm590_vm6, %v3305_v56  ;;  %v2963_v56 = vld [vmem:[%s10082_s28 + $0x89] sm:$0xff] }
 0x4ed   :  { %3658 = vst.msk [vmem:[#allocation7 + $0x20] sm:$0xff] %vm882_vm8, %v3591_v57  ;;  %4022 = vrot.lane.b32.xlu0 %v3965_v55, %s10076_s27  ;;  %3170 = vrot.lane.b32.xlu1 %v3257_v36, %s10074_s2  ;;  %v3262_v57 = vld [vmem:[%s10082_s28 + $0x8a] sm:$0xff] }
 0x4ef   :  { %v3449_v60 = vpop.permute.xlu0 %3448  ;;  %v3733_v61 = vpop.permute.xlu1 %3732 }
 0x4f0   :  { %3515 = vst.msk [vmem:[#allocation7 + $0x28] sm:$0xff] %vm736_vm7, %v3449_v60  ;;  %v3406_v60 = vld [vmem:[%s10082_s28 + $0x8b] sm:$0xff] }
 0x4f1   :  { %3797 = vst.msk [vmem:[#allocation7 + $0x20] sm:$0xff] %vm10086_vm2, %v3733_v61  ;;  %3022 = vrot.lane.b32.xlu0 %v2959_v58, %s10077_s5  ;;  %3318 = vrot.lane.b32.xlu1 %v3258_v59, %s10075_s1  ;;  %vm10090_vm2 = vcmask 294144   ;;  %v2908_v61 = vld [vmem:[%s10082_s28 + $0x60] sm:$0xff] }
 0x4f2   :  { %2933 = vst.msk [vmem:[#allocation7 + $0x60] sm:$0xff] %vm140_vm1, %v2908_v61 }
 0x4f3   :  { %v3593_v63 = vpop.permute.xlu0 %3592  ;;  %v3871_v0 = vpop.permute.xlu1 %3870 }
 0x4f4   :  { %3659 = vst.msk [vmem:[#allocation7 + $0x28] sm:$0xff] %vm882_vm8, %v3593_v63  ;;  %v8852_v63 = vld [vmem:[%s10098_s23] ss:$0 sm:$0xff] }
 0x4f5   :  { %3935 = vst.msk [vmem:[#allocation7 + $0x20] sm:$0xff] %vm10087_vm0, %v3871_v0  ;;  %3172 = vrot.lane.b32.xlu0 %v3258_v59, %s10074_s2  ;;  %3462 = vrot.lane.b32.xlu1 %v3402_v62, %s10071_s12  ;;  %v2909_v62 = vld [vmem:[%s10082_s28 + $0x68] sm:$0xff] }
 0x4f6   :  { %2934 = vst.msk [vmem:[#allocation7 + $0x68] sm:$0xff] %vm140_vm1, %v2909_v62 }
 0x4f7   :  { %v3735_v6 = vpop.permute.xlu0 %3734  ;;  %v4009_v1 = vpop.permute.xlu1 %4008 }
 0x4f8   :  { %3798 = vst.msk [vmem:[#allocation7 + $0x28] sm:$0xff] %vm10089_vm9, %v3735_v6  ;;  %vm10091_vm9 = vmmov %vm10090_vm2 }
 0x4f9   :  { %4073 = vst.msk [vmem:[#allocation7 + $0x20] sm:$0xff] %vm10090_vm2, %v4009_v1  ;;  %3320 = vrot.lane.b32.xlu0 %v3259_v3, %s10075_s1  ;;  %3606 = vrot.lane.b32.xlu1 %v3689_v46, %s10072_s30  ;;  %vm10092_vm2 = vcmask 228544   ;;  %v8861_v1 = vld [vmem:[%s10099_s24] ss:$0 sm:$0xff] }
 0x4fb   :  { %v3873_v8 = vpop.permute.xlu0 %3872  ;;  %v3009_v9 = vpop.permute.xlu1 %3008 }
 0x4fc   :  { %3936 = vst.msk [vmem:[#allocation7 + $0x28] sm:$0xff] %vm10087_vm0, %v3873_v8  ;;  %v3263_v8 = vld [vmem:[%s10082_s28 + $0x92] sm:$0xff] }
 0x4fd   :  { %3077 = vst.msk [vmem:[#allocation7 + $0x30] sm:$0xff] %vm291_vm4, %v3009_v9  ;;  %3464 = vrot.lane.b32.xlu0 %v3403_v4, %s10071_s12  ;;  %3748 = vrot.lane.b32.xlu1 %v3690_v7, %s10073_s11 }
 0x4ff   :  { %v4011_v12 = vpop.permute.xlu0 %4010  ;;  %v3159_v13 = vpop.permute.xlu1 %3158 }
 0x500   :  { %4074 = vst.msk [vmem:[#allocation7 + $0x28] sm:$0xff] %vm10091_vm9, %v4011_v12  ;;  %vm10093_vm9 = vmmov %vm10092_vm2 }
 0x501   :  { %3227 = vst.msk [vmem:[#allocation7 + $0x30] sm:$0xff] %vm443_vm5, %v3159_v13  ;;  %3608 = vrot.lane.b32.xlu0 %v3690_v7, %s10072_s30  ;;  %3886 = vrot.lane.b32.xlu1 %v3828_v11, %s10078_s7 }
 0x503   :  { %v3011_v16 = vpop.permute.xlu0 %3010  ;;  %v3307_v17 = vpop.permute.xlu1 %3306 }
 0x504   :  { %3078 = vst.msk [vmem:[#allocation7 + $0x38] sm:$0xff] %vm291_vm4, %v3011_v16  ;;  %v3407_v16 = vld [vmem:[%s10082_s28 + $0x93] sm:$0xff] }
 0x505   :  { %3372 = vst.msk [vmem:[#allocation7 + $0x30] sm:$0xff] %vm590_vm6, %v3307_v17  ;;  %3750 = vrot.lane.b32.xlu0 %v3691_v14, %s10073_s11  ;;  %4024 = vrot.lane.b32.xlu1 %v3966_v15, %s10076_s27  ;;  %v3694_v17 = vld [vmem:[%s10082_s28 + $0x94] sm:$0xff] }
 0x507   :  { %v3161_v22 = vpop.permute.xlu0 %3160  ;;  %v3451_v23 = vpop.permute.xlu1 %3450 }
 0x508   :  { %3228 = vst.msk [vmem:[#allocation7 + $0x38] sm:$0xff] %vm443_vm5, %v3161_v22 }
 0x509   :  { %3516 = vst.msk [vmem:[#allocation7 + $0x30] sm:$0xff] %vm736_vm7, %v3451_v23  ;;  %3888 = vrot.lane.b32.xlu0 %v3829_v20, %s10078_s7  ;;  %3024 = vrot.lane.b32.xlu1 %v2960_v21, %s10077_s5 }
 0x50b   :  { %v3309_v26 = vpop.permute.xlu0 %3308  ;;  %v3595_v27 = vpop.permute.xlu1 %3594 }
 0x50c   :  { %3373 = vst.msk [vmem:[#allocation7 + $0x38] sm:$0xff] %vm590_vm6, %v3309_v26  ;;  %v3832_v26 = vld [vmem:[%s10082_s28 + $0x95] sm:$0xff] }
 0x50d   :  { %3660 = vst.msk [vmem:[#allocation7 + $0x30] sm:$0xff] %vm882_vm8, %v3595_v27  ;;  %4026 = vrot.lane.b32.xlu0 %v3967_v25, %s10076_s27  ;;  %3174 = vrot.lane.b32.xlu1 %v3259_v3, %s10074_s2 }
 0x50f   :  { %v3453_v29 = vpop.permute.xlu0 %3452  ;;  %v3737_v30 = vpop.permute.xlu1 %3736 }
 0x510   :  { %3517 = vst.msk [vmem:[#allocation7 + $0x38] sm:$0xff] %vm736_vm7, %v3453_v29  ;;  %v3970_v29 = vld [vmem:[%s10082_s28 + $0x96] sm:$0xff] }
 0x511   :  { %3799 = vst.msk [vmem:[#allocation7 + $0x30] sm:$0xff] %vm10092_vm2, %v3737_v30  ;;  %3026 = vrot.lane.b32.xlu0 %v2961_v19, %s10077_s5  ;;  %3322 = vrot.lane.b32.xlu1 %v3260_v28, %s10075_s1  ;;  %vm10094_vm2 = vcmask 294144   ;;  %v3695_v19 = vld [vmem:[%s10082_s28 + $0x9c] sm:$0xff] }
 0x513   :  { %v3597_v32 = vpop.permute.xlu0 %3596  ;;  %v3875_v33 = vpop.permute.xlu1 %3874 }
 0x514   :  { %3661 = vst.msk [vmem:[#allocation7 + $0x38] sm:$0xff] %vm882_vm8, %v3597_v32 }
 0x515   :  { %3937 = vst.msk [vmem:[#allocation7 + $0x30] sm:$0xff] %vm10087_vm0, %v3875_v33  ;;  %3176 = vrot.lane.b32.xlu0 %v3260_v28, %s10074_s2  ;;  %3466 = vrot.lane.b32.xlu1 %v3404_v31, %s10071_s12  ;;  %v3833_v31 = vld [vmem:[%s10082_s28 + $0x9d] sm:$0xff]  ;;  %v2964_v33 = vld [vmem:[%s10082_s28 + $0x91] sm:$0xff] }
 0x517   :  { %v3739_v35 = vpop.permute.xlu0 %3738  ;;  %v4013_v36 = vpop.permute.xlu1 %4012 }
 0x518   :  { %3800 = vst.msk [vmem:[#allocation7 + $0x38] sm:$0xff] %vm10093_vm9, %v3739_v35  ;;  %vm10095_vm9 = vmmov %vm10094_vm2  ;;  %v3971_v35 = vld [vmem:[%s10082_s28 + $0x9e] sm:$0xff] }
 0x519   :  { %4075 = vst.msk [vmem:[#allocation7 + $0x30] sm:$0xff] %vm10094_vm2, %v4013_v36  ;;  %3324 = vrot.lane.b32.xlu0 %v3261_v34, %s10075_s1  ;;  %3610 = vrot.lane.b32.xlu1 %v3691_v14, %s10072_s30  ;;  %vm10097_vm2 = vcmask 228544  }
 0x51b   :  { %v3877_v38 = vpop.permute.xlu0 %3876  ;;  %v3013_v39 = vpop.permute.xlu1 %3012 }
 0x51c   :  { %3938 = vst.msk [vmem:[#allocation7 + $0x38] sm:$0xff] %vm10087_vm0, %v3877_v38 }
 0x51d   :  { %3079 = vst.msk [vmem:[#allocation7 + $0x40] sm:$0xff] %vm291_vm4, %v3013_v39  ;;  %3468 = vrot.lane.b32.xlu0 %v3405_v37, %s10071_s12  ;;  %3752 = vrot.lane.b32.xlu1 %v3692_v24, %s10073_s11  ;;  %v3264_v39 = vld [vmem:[%s10082_s28 + $0x9a] sm:$0xff] }
 0x51f   :  { %v4015_v42 = vpop.permute.xlu0 %4014  ;;  %v3163_v43 = vpop.permute.xlu1 %3162 }
 0x520   :  { %4076 = vst.msk [vmem:[#allocation7 + $0x38] sm:$0xff] %vm10095_vm9, %v4015_v42  ;;  %vm10100_vm9 = vmmov %vm10097_vm2  ;;  %v2911_v42 = vld [vmem:[%s10082_s28 + $0x78] sm:$0xff] }
 0x521   :  { %3229 = vst.msk [vmem:[#allocation7 + $0x40] sm:$0xff] %vm443_vm5, %v3163_v43  ;;  %3612 = vrot.lane.b32.xlu0 %v3692_v24, %s10072_s30  ;;  %3890 = vrot.lane.b32.xlu1 %v3830_v41, %s10078_s7  ;;  %v2965_v24 = vld [vmem:[%s10082_s28 + $0x99] sm:$0xff]  ;;  %v2910_v41 = vld [vmem:[%s10082_s28 + $0x70] sm:$0xff] }
 0x522   :  { %2935 = vst.msk [vmem:[#allocation7 + $0x70] sm:$0xff] %vm140_vm1, %v2910_v41  ;;  %2936 = vst.msk [vmem:[#allocation7 + $0x78] sm:$0xff] %vm140_vm1, %v2911_v42  ;;  %v3411_v42 = vld [vmem:[%s10082_s28 + $0xb3] sm:$0xff] }
 0x523   :  { %v3015_v46 = vpop.permute.xlu0 %3014  ;;  %v3311_v47 = vpop.permute.xlu1 %3310 }
 0x524   :  { %3080 = vst.msk [vmem:[#allocation7 + $0x48] sm:$0xff] %vm291_vm4, %v3015_v46 }
 0x525   :  { %3374 = vst.msk [vmem:[#allocation7 + $0x40] sm:$0xff] %vm590_vm6, %v3311_v47  ;;  %3754 = vrot.lane.b32.xlu0 %v8799_v44, %s10073_s11  ;;  %4028 = vrot.lane.b32.xlu1 %v3968_v45, %s10076_s27 }
 0x527   :  { %v3165_v51 = vpop.permute.xlu0 %3164  ;;  %v3455_v52 = vpop.permute.xlu1 %3454 }
 0x528   :  { %3230 = vst.msk [vmem:[#allocation7 + $0x48] sm:$0xff] %vm443_vm5, %v3165_v51 }
 0x529   :  { %3518 = vst.msk [vmem:[#allocation7 + $0x40] sm:$0xff] %vm736_vm7, %v3455_v52  ;;  %3892 = vrot.lane.b32.xlu0 %v3831_v48, %s10078_s7  ;;  %3028 = vrot.lane.b32.xlu1 %v2962_v49, %s10077_s5  ;;  %v3265_v49 = vld [vmem:[%s10082_s28 + $0xa2] sm:$0xff] }
 0x52b   :  { %v3313_v54 = vpop.permute.xlu0 %3312  ;;  %v3599_v55 = vpop.permute.xlu1 %3598 }
 0x52c   :  { %3375 = vst.msk [vmem:[#allocation7 + $0x48] sm:$0xff] %vm590_vm6, %v3313_v54 }
 0x52d   :  { %3662 = vst.msk [vmem:[#allocation7 + $0x40] sm:$0xff] %vm882_vm8, %v3599_v55  ;;  %4030 = vrot.lane.b32.xlu0 %v3969_v53, %s10076_s27  ;;  %3178 = vrot.lane.b32.xlu1 %v3261_v34, %s10074_s2 }
 0x52f   :  { %v3457_v58 = vpop.permute.xlu0 %3456  ;;  %v3741_v59 = vpop.permute.xlu1 %3740 }
 0x530   :  { %3519 = vst.msk [vmem:[#allocation7 + $0x48] sm:$0xff] %vm736_vm7, %v3457_v58 }
 0x531   :  { %3801 = vst.msk [vmem:[#allocation7 + $0x40] sm:$0xff] %vm10097_vm2, %v3741_v59  ;;  %3030 = vrot.lane.b32.xlu0 %v2963_v56, %s10077_s5  ;;  %3326 = vrot.lane.b32.xlu1 %v3262_v57, %s10075_s1  ;;  %vm10101_vm2 = vcmask 294144   ;;  %v3696_v59 = vld [vmem:[%s10082_s28 + $0xa4] sm:$0xff] }
 0x533   :  { %v3601_v0 = vpop.permute.xlu0 %3600  ;;  %v3879_v3 = vpop.permute.xlu1 %3878 }
 0x534   :  { %3663 = vst.msk [vmem:[#allocation7 + $0x48] sm:$0xff] %vm882_vm8, %v3601_v0 }
 0x535   :  { %3939 = vst.msk [vmem:[#allocation7 + $0x40] sm:$0xff] %vm10087_vm0, %v3879_v3  ;;  %v2373_v6 = vpop.f32.mrb[20].mxu1  ;;  %3180 = vrot.lane.b32.xlu0 %v3262_v57, %s10074_s2  ;;  %3470 = vrot.lane.b32.xlu1 %v3406_v60, %s10071_s12  ;;  %v3409_v57 = vld [vmem:[%s10082_s28 + $0xa3] sm:$0xff] }
 0x536   :  { %v2418_v4 = vmul.f32 %v8852_v63, %v2373_v6  ;;  %v6212_v7 = vpop.f32.mrb[21].mxu1  ;;  %v3834_v6 = vld [vmem:[%s10082_s28 + $0xa5] sm:$0xff] }
 0x537   :  { %v2376_v9 = vpop.f32.mrb[22].mxu1  ;;  %v3743_v10 = vpop.permute.xlu0 %3742  ;;  %v8977_v7 = vld [vmem:[%s10082_s28 + $0xac] sm:$0xff] }
 0x538   :  { %v2434_v11 = vadd.f32 %v8861_v1, %v2418_v4  ;;  %v2419_v12 = vmul.f32 %v8852_v63, %v2376_v9  ;;  %v6213_v13 = vpop.f32.mrb[23].mxu1  ;;  %3802 = vst.msk [vmem:[#allocation7 + $0x48] sm:$0xff] %vm10100_vm9, %v3743_v10  ;;  %v4017_v14 = vpop.permute.xlu1 %4016  ;;  %vm10102_vm9 = vmmov %vm10101_vm2  ;;  %v3972_v9 = vld [vmem:[%s10082_s28 + $0xa6] sm:$0xff] }
 0x539   :  { %3328 = vrot.lane.b32.xlu0 %v3263_v8, %s10075_s1  ;;  %4077 = vst.msk [vmem:[#allocation7 + $0x40] sm:$0xff] %vm10101_vm2, %v4017_v14  ;;  %3614 = vrot.lane.b32.xlu1 %v8799_v44, %s10072_s30  ;;  %vm10103_vm2 = vcmask 228544   ;;  %v3408_v44 = vld [vmem:[%s10082_s28 + $0x9b] sm:$0xff]  ;;  %v3835_v13 = vld [vmem:[%s10082_s28 + $0xad] sm:$0xff] }
 0x53a   :  { %v2435_v15 = vadd.f32 %v8861_v1, %v2419_v12  ;;  %v2443_v20 = vmax.f32 %v2434_v11, 0.0  ;;  %v2912_v10 = vld [vmem:[%s10082_s28 + $0x80] sm:$0xff]  ;;  %v2913_v12 = vld [vmem:[%s10082_s28 + $0x88] sm:$0xff] }
 0x53b   :  { %v3881_v18 = vpop.permute.xlu0 %3880  ;;  %2937 = vst.msk [vmem:[#allocation7 + $0x80] sm:$0xff] %vm140_vm1, %v2912_v10  ;;  %2938 = vst.msk [vmem:[#allocation7 + $0x88] sm:$0xff] %vm140_vm1, %v2913_v12 }
 0x53c   :  { %v2444_v21 = vmax.f32 %v2435_v15, 0.0  ;;  %3940 = vst.msk [vmem:[#allocation7 + $0x48] sm:$0xff] %vm10087_vm0, %v3881_v18  ;;  %v3017_v22 = vpop.permute.xlu1 %3016  ;;  %v2966_v15 = vld [vmem:[%s10082_s28 + $0xa1] sm:$0xff]  ;;  %v2914_v18 = vld [vmem:[%s10082_s28 + $0x90] sm:$0xff] }
 0x53d   :  { %3472 = vrot.lane.b32.xlu0 %v3407_v16, %s10071_s12  ;;  %3081 = vst.msk [vmem:[#allocation7 + $0x50] sm:$0xff] %vm291_vm4, %v3017_v22  ;;  %3756 = vrot.lane.b32.xlu1 %v3694_v17, %s10073_s11 }
 0x53e   :  { %v6462_v23 = vpack.c.bf16 %v2444_v21, %v2443_v20  ;;  %2939 = vst.msk [vmem:[#allocation7 + $0x90] sm:$0xff] %vm140_vm1, %v2914_v18  ;;  %v2915_v21 = vld [vmem:[%s10082_s28 + $0x98] sm:$0xff] }
 0x53f   :  { %v4019_v25 = vpop.permute.xlu0 %4018  ;;  %2940 = vst.msk [vmem:[#allocation7 + $0x98] sm:$0xff] %vm140_vm1, %v2915_v21 }
 0x540   :  { %6463 = vmatprep.subr.bf16.mxu0 %v6462_v23  ;;  %4078 = vst.msk [vmem:[#allocation7 + $0x48] sm:$0xff] %vm10102_vm9, %v4019_v25  ;;  %v3167_v27 = vpop.permute.xlu1 %3166  ;;  %vm10104_vm9 = vmmov %vm10103_vm2 }
 0x541   :  { %6465 = vmatpush3.bf16.msra.mxu0 %v6462_v23  ;;  %3616 = vrot.lane.b32.xlu0 %v3694_v17, %s10072_s30  ;;  %3231 = vst.msk [vmem:[#allocation7 + $0x50] sm:$0xff] %vm443_vm5, %v3167_v27  ;;  %v3973_v17 = vld [vmem:[%s10082_s28 + $0xae] sm:$0xff] }
 0x542   :  { %3894 = vrot.lane.b32.xlu1 %v3832_v26, %s10078_s7  ;;  %v2967_v23 = vld [vmem:[%s10082_s28 + $0xa9] sm:$0xff] }
 0x543   :  { %v3019_v28 = vpop.permute.xlu0 %3018  ;;  %v3266_v26 = vld [vmem:[%s10082_s28 + $0xaa] sm:$0xff] }
 0x544   :  { %3082 = vst.msk [vmem:[#allocation7 + $0x58] sm:$0xff] %vm291_vm4, %v3019_v28  ;;  %v3315_v30 = vpop.permute.xlu1 %3314  ;;  %v2917_v28 = vld [vmem:[%s10082_s28 + $0xa8] sm:$0xff] }
 0x545   :  { %3758 = vrot.lane.b32.xlu0 %v3695_v19, %s10073_s11  ;;  %3376 = vst.msk [vmem:[#allocation7 + $0x50] sm:$0xff] %vm590_vm6, %v3315_v30  ;;  %v3410_v30 = vld [vmem:[%s10082_s28 + $0xab] sm:$0xff] }
 0x546   :  { %4032 = vrot.lane.b32.xlu1 %v3970_v29, %s10076_s27  ;;  %2942 = vst.msk [vmem:[#allocation7 + $0xa8] sm:$0xff] %vm140_vm1, %v2917_v28 }
 0x547   :  { %v3169_v32 = vpop.permute.xlu0 %3168 }
 0x548   :  { %3232 = vst.msk [vmem:[#allocation7 + $0x58] sm:$0xff] %vm443_vm5, %v3169_v32  ;;  %v3459_v34 = vpop.permute.xlu1 %3458 }
 0x549   :  { %3896 = vrot.lane.b32.xlu0 %v3833_v31, %s10078_s7  ;;  %3520 = vst.msk [vmem:[#allocation7 + $0x50] sm:$0xff] %vm736_vm7, %v3459_v34 }
 0x54a   :  { %3032 = vrot.lane.b32.xlu1 %v2964_v33, %s10077_s5 }
 0x54b   :  { %v3317_v36 = vpop.permute.xlu0 %3316 }
 0x54c   :  { %3377 = vst.msk [vmem:[#allocation7 + $0x58] sm:$0xff] %vm590_vm6, %v3317_v36  ;;  %v3603_v37 = vpop.permute.xlu1 %3602 }
 0x54d   :  { %4034 = vrot.lane.b32.xlu0 %v3971_v35, %s10076_s27  ;;  %3664 = vst.msk [vmem:[#allocation7 + $0x50] sm:$0xff] %vm882_vm8, %v3603_v37  ;;  %v9049_v35 = vld [vmem:[%s10082_s28 + $0xb2] sm:$0xff] }
 0x54e   :  { %3182 = vrot.lane.b32.xlu1 %v3263_v8, %s10074_s2 }
 0x54f   :  { %v3461_v38 = vpop.permute.xlu0 %3460 }
 0x550   :  { %3521 = vst.msk [vmem:[#allocation7 + $0x58] sm:$0xff] %vm736_vm7, %v3461_v38  ;;  %v3745_v40 = vpop.permute.xlu1 %3744 }
 0x551   :  { %3034 = vrot.lane.b32.xlu0 %v2965_v24, %s10077_s5  ;;  %3803 = vst.msk [vmem:[#allocation7 + $0x50] sm:$0xff] %vm10103_vm2, %v3745_v40  ;;  %vm10105_vm2 = vcmask 294144  }
 0x552   :  { %3330 = vrot.lane.b32.xlu1 %v3264_v39, %s10075_s1 }
 0x553   :  { %v3605_v43 = vpop.permute.xlu0 %3604 }
 0x554   :  { %3665 = vst.msk [vmem:[#allocation7 + $0x58] sm:$0xff] %vm882_vm8, %v3605_v43  ;;  %v3883_v45 = vpop.permute.xlu1 %3882 }
 0x555   :  { %v2381_v46 = vpop.f32.mrb[24].mxu1  ;;  %3184 = vrot.lane.b32.xlu0 %v3264_v39, %s10074_s2  ;;  %3941 = vst.msk [vmem:[#allocation7 + $0x50] sm:$0xff] %vm10087_vm0, %v3883_v45 }
 0x556   :  { %v2420_v47 = vmul.f32 %v8852_v63, %v2381_v46  ;;  %v6216_v48 = vpop.f32.mrb[25].mxu1  ;;  %3474 = vrot.lane.b32.xlu1 %v3408_v44, %s10071_s12  ;;  %v3698_v44 = vld [vmem:[%s10082_s28 + $0xb4] sm:$0xff] }
 0x557   :  { %v2384_v50 = vpop.f32.mrb[26].mxu1  ;;  %v3747_v51 = vpop.permute.xlu0 %3746  ;;  %v2918_v48 = vld [vmem:[%s10082_s28 + $0xb0] sm:$0xff] }
 0x558   :  { %v2436_v52 = vadd.f32 %v8861_v1, %v2420_v47  ;;  %v2421_v53 = vmul.f32 %v8852_v63, %v2384_v50  ;;  %v6217_v54 = vpop.f32.mrb[27].mxu1  ;;  %3804 = vst.msk [vmem:[#allocation7 + $0x58] sm:$0xff] %vm10104_vm9, %v3747_v51  ;;  %v4021_v55 = vpop.permute.xlu1 %4020  ;;  %vm10106_vm9 = vmmov %vm10105_vm2  ;;  %v3836_v51 = vld [vmem:[%s10082_s28 + $0xb5] sm:$0xff] }
 0x559   :  { %3332 = vrot.lane.b32.xlu0 %v3265_v49, %s10075_s1  ;;  %4079 = vst.msk [vmem:[#allocation7 + $0x50] sm:$0xff] %vm10105_vm2, %v4021_v55  ;;  %vm10107_vm2 = vcmask 228544   ;;  %v3974_v55 = vld [vmem:[%s10082_s28 + $0xb6] sm:$0xff] }
 0x55a   :  { %v2437_v56 = vadd.f32 %v8861_v1, %v2421_v53  ;;  %3618 = vrot.lane.b32.xlu1 %v3695_v19, %s10072_s30  ;;  %v2445_v60 = vmax.f32 %v2436_v52, 0.0  ;;  %v2916_v19 = vld [vmem:[%s10082_s28 + $0xa0] sm:$0xff]  ;;  %2943 = vst.msk [vmem:[#allocation7 + $0xb0] sm:$0xff] %vm140_vm1, %v2918_v48  ;;  %v6570_v48 = vld [vmem:[%s10115_s3 + $0x8] sm:$0xff]  }
 0x55b   :  { %v3885_v58 = vpop.permute.xlu0 %3884  ;;  %2941 = vst.msk [vmem:[#allocation7 + $0xa0] sm:$0xff] %vm140_vm1, %v2916_v19  ;;  %v3699_v53 = vld [vmem:[%s10082_s28 + $0xbc] sm:$0xff] }
 0x55c   :  { %v2446_v61 = vmax.f32 %v2437_v56, 0.0  ;;  %3942 = vst.msk [vmem:[#allocation7 + $0x58] sm:$0xff] %vm10087_vm0, %v3885_v58  ;;  %v3021_v62 = vpop.permute.xlu1 %3020  ;;  %v2919_v58 = vld [vmem:[%s10082_s28 + $0xb8] sm:$0xff] }
 0x55d   :  { %3476 = vrot.lane.b32.xlu0 %v3409_v57, %s10071_s12  ;;  %3083 = vst.msk [vmem:[#allocation7 + $0x60] sm:$0xff] %vm291_vm4, %v3021_v62  ;;  %v3837_v57 = vld [vmem:[%s10082_s28 + $0xbd] sm:$0xff] }
 0x55e   :  { %v6466_v0 = vpack.c.bf16 %v2446_v61, %v2445_v60  ;;  %3760 = vrot.lane.b32.xlu1 %v3696_v59, %s10073_s11  ;;  %v2968_v60 = vld [vmem:[%s10082_s28 + $0xb1] sm:$0xff]  ;;  %2944 = vst.msk [vmem:[#allocation7 + $0xb8] sm:$0xff] %vm140_vm1, %v2919_v58  ;;  %v3975_v62 = vld [vmem:[%s10082_s28 + $0xbe] sm:$0xff] }
 0x55f   :  { %v4023_v3 = vpop.permute.xlu0 %4022 }
 0x560   :  { %6467 = vmatprep.subr.bf16.mxu0 %v6466_v0  ;;  %4080 = vst.msk [vmem:[#allocation7 + $0x58] sm:$0xff] %vm10106_vm9, %v4023_v3  ;;  %v3171_v4 = vpop.permute.xlu1 %3170  ;;  %vm10108_vm9 = vmmov %vm10107_vm2  ;;  %v3268_v3 = vld [vmem:[%s10082_s28 + $0xba] sm:$0xff] }
 0x561   :  { %6469 = vmatpush3.bf16.msra.mxu0 %v6466_v0  ;;  %3620 = vrot.lane.b32.xlu0 %v3696_v59, %s10072_s30  ;;  %3233 = vst.msk [vmem:[#allocation7 + $0x60] sm:$0xff] %vm443_vm5, %v3171_v4 }
 0x562   :  { %3898 = vrot.lane.b32.xlu1 %v3834_v6, %s10078_s7 }
 0x563   :  { %v3023_v8 = vpop.permute.xlu0 %3022 }
 0x564   :  { %3084 = vst.msk [vmem:[#allocation7 + $0x68] sm:$0xff] %vm291_vm4, %v3023_v8  ;;  %v3319_v11 = vpop.permute.xlu1 %3318 }
 0x565   :  { %3762 = vrot.lane.b32.xlu0 %v8977_v7, %s10073_s11  ;;  %3378 = vst.msk [vmem:[#allocation7 + $0x60] sm:$0xff] %vm590_vm6, %v3319_v11 }
 0x566   :  { %4036 = vrot.lane.b32.xlu1 %v3972_v9, %s10076_s27  ;;  %v2969_v9 = vld [vmem:[%s10082_s28 + $0xb9] sm:$0xff] }
 0x567   :  { %v3173_v14 = vpop.permute.xlu0 %3172 }
 0x568   :  { %3234 = vst.msk [vmem:[#allocation7 + $0x68] sm:$0xff] %vm443_vm5, %v3173_v14  ;;  %v3463_v16 = vpop.permute.xlu1 %3462 }
 0x569   :  { %3900 = vrot.lane.b32.xlu0 %v3835_v13, %s10078_s7  ;;  %3522 = vst.msk [vmem:[#allocation7 + $0x60] sm:$0xff] %vm736_vm7, %v3463_v16 }
 0x56a   :  { %3036 = vrot.lane.b32.xlu1 %v2966_v15, %s10077_s5 }
 0x56b   :  { %v3321_v20 = vpop.permute.xlu0 %3320 }
 0x56c   :  { %3379 = vst.msk [vmem:[#allocation7 + $0x68] sm:$0xff] %vm590_vm6, %v3321_v20  ;;  %v3607_v22 = vpop.permute.xlu1 %3606 }
 0x56d   :  { %4038 = vrot.lane.b32.xlu0 %v3973_v17, %s10076_s27  ;;  %3666 = vst.msk [vmem:[#allocation7 + $0x60] sm:$0xff] %vm882_vm8, %v3607_v22  ;;  %v3700_v17 = vld [vmem:[%s10082_s28 + $0xc4] sm:$0xf] }
 0x56e   :  { %3186 = vrot.lane.b32.xlu1 %v3265_v49, %s10074_s2 }
 0x56f   :  { %v3465_v25 = vpop.permute.xlu0 %3464 }
 0x570   :  { %3523 = vst.msk [vmem:[#allocation7 + $0x68] sm:$0xff] %vm736_vm7, %v3465_v25  ;;  %v3749_v27 = vpop.permute.xlu1 %3748  ;;  %v3269_v25 = vld [vmem:[%s10082_s28 + $0xc2] sm:$0x3f] }
 0x571   :  { %3038 = vrot.lane.b32.xlu0 %v2967_v23, %s10077_s5  ;;  %3805 = vst.msk [vmem:[#allocation7 + $0x60] sm:$0xff] %vm10107_vm2, %v3749_v27  ;;  %vm10109_vm2 = vcmask 294144   ;;  %v3838_v27 = vld [vmem:[%s10082_s28 + $0xc5] sm:$0x7] }
 0x572   :  { %3334 = vrot.lane.b32.xlu1 %v3266_v26, %s10075_s1 }
 0x573   :  { %v3609_v29 = vpop.permute.xlu0 %3608 }
 0x574   :  { %3667 = vst.msk [vmem:[#allocation7 + $0x68] sm:$0xff] %vm882_vm8, %v3609_v29  ;;  %v3887_v31 = vpop.permute.xlu1 %3886 }
 0x575   :  { %v2389_v32 = vpop.f32.mrb[28].mxu1  ;;  %3188 = vrot.lane.b32.xlu0 %v3266_v26, %s10074_s2  ;;  %3943 = vst.msk [vmem:[#allocation7 + $0x60] sm:$0xff] %vm10087_vm0, %v3887_v31 }
 0x576   :  { %v2422_v33 = vmul.f32 %v8852_v63, %v2389_v32  ;;  %v6220_v34 = vpop.f32.mrb[29].mxu1  ;;  %3478 = vrot.lane.b32.xlu1 %v3410_v30, %s10071_s12 }
 0x577   :  { %v2392_v36 = vpop.f32.mrb[30].mxu1  ;;  %v3751_v37 = vpop.permute.xlu0 %3750  ;;  %v3413_v34 = vld [vmem:[%s10082_s28 + $0xc3] sm:$0x1f] }
 0x578   :  { %v2438_v24 = vadd.f32 %v8861_v1, %v2422_v33  ;;  %v2423_v38 = vmul.f32 %v8852_v63, %v2392_v36  ;;  %v6221_v39 = vpop.f32.mrb[31].mxu1  ;;  %3806 = vst.msk [vmem:[#allocation7 + $0x68] sm:$0xff] %vm10108_vm9, %v3751_v37  ;;  %v4025_v40 = vpop.permute.xlu1 %4024  ;;  %vm10110_vm9 = vmmov %vm10109_vm2  ;;  %v3976_v37 = vld [vmem:[%s10082_s28 + $0xc6] sm:$0x3] }
 0x579   :  { %3336 = vrot.lane.b32.xlu0 %v9049_v35, %s10075_s1  ;;  %4081 = vst.msk [vmem:[#allocation7 + $0x60] sm:$0xff] %vm10109_vm2, %v4025_v40  ;;  %vm10111_vm2 = vcmask 228544   ;;  %v3557_v40 = vld [vmem:[%s10082_s28 + $0xc4] sm:$0xf] }
 0x57a   :  { %v2439_v41 = vadd.f32 %v8861_v1, %v2423_v38  ;;  %3622 = vrot.lane.b32.xlu1 %v8977_v7, %s10072_s30  ;;  %v2447_v45 = vmax.f32 %v2438_v24, 0.0  ;;  %v3412_v7 = vld [vmem:[%s10082_s28 + $0xbb] sm:$0xff] }
 0x57b   :  { %v3889_v43 = vpop.permute.xlu0 %3888 }
 0x57c   :  { %v2448_v46 = vmax.f32 %v2439_v41, 0.0  ;;  %3944 = vst.msk [vmem:[#allocation7 + $0x68] sm:$0xff] %vm10087_vm0, %v3889_v43  ;;  %v3025_v47 = vpop.permute.xlu1 %3024  ;;  %v6569_v41 = vld [vmem:[%s10115_s3] sm:$0xff]   ;;  %v2454_v43 = vld [vmem:[%s10096_s4 + $0x10] sm:$0xff] }
 0x57d   :  { %3480 = vrot.lane.b32.xlu0 %v3411_v42, %s10071_s12  ;;  %3085 = vst.msk [vmem:[#allocation7 + $0x70] sm:$0xff] %vm291_vm4, %v3025_v47  ;;  %v2455_v47 = vld [vmem:[%s10096_s4 + $0x18] sm:$0xff] }
 0x57e   :  { %v6470_v49 = vpack.c.bf16 %v2448_v46, %v2447_v45  ;;  %3764 = vrot.lane.b32.xlu1 %v3698_v44, %s10073_s11  ;;  %v3120_v45 = vld [vmem:[%s10082_s28 + $0xc2] sm:$0x3f] }
 0x57f   :  { %v4027_v50 = vpop.permute.xlu0 %4026  ;;  %v2970_v46 = vld [vmem:[%s10082_s28 + $0xc1] sm:$0x7f] }
 0x580   :  { %6471 = vmatprep.subr.bf16.mxu0 %v6470_v49  ;;  %4082 = vst.msk [vmem:[#allocation7 + $0x68] sm:$0xff] %vm10110_vm9, %v4027_v50  ;;  %v3175_v52 = vpop.permute.xlu1 %3174  ;;  %vm10112_vm9 = vmmov %vm10111_vm2  ;;  %v6571_v50 = vld [vmem:[%s10115_s3 + $0x10] ss:$0 sps:$4 sm:$0x33]  }
 0x581   :  { %6473 = vmatpush3.bf16.msra.mxu0 %v6470_v49  ;;  %3624 = vrot.lane.b32.xlu0 %v3698_v44, %s10072_s30  ;;  %3235 = vst.msk [vmem:[#allocation7 + $0x70] sm:$0xff] %vm443_vm5, %v3175_v52 }
 0x582   :  { %3902 = vrot.lane.b32.xlu1 %v3836_v51, %s10078_s7 }
 0x583   :  { %v3027_v54 = vpop.permute.xlu0 %3026 }
 0x584   :  { %3086 = vst.msk [vmem:[#allocation7 + $0x78] sm:$0xff] %vm291_vm4, %v3027_v54  ;;  %v3323_v56 = vpop.permute.xlu1 %3322 }
 0x585   :  { %3766 = vrot.lane.b32.xlu0 %v3699_v53, %s10073_s11  ;;  %3380 = vst.msk [vmem:[#allocation7 + $0x70] sm:$0xff] %vm590_vm6, %v3323_v56  ;;  %v4093_v56 = vld [vmem:[#allocation7 + $0x8] sm:$0xff] }
 0x586   :  { %4040 = vrot.lane.b32.xlu1 %v3974_v55, %s10076_s27  ;;  %v4092_v55 = vld [vmem:[#allocation7] sm:$0xff] }
 0x587   :  { %v3177_v59 = vpop.permute.xlu0 %3176  ;;  %v4117_v58 = vpack.c.bf16 %v4093_v56, %v4092_v55 }
 0x588   :  { %3236 = vst.msk [vmem:[#allocation7 + $0x78] sm:$0xff] %vm443_vm5, %v3177_v59  ;;  %v3467_v61 = vpop.permute.xlu1 %3466 }
 0x589   :  { %3904 = vrot.lane.b32.xlu0 %v3837_v57, %s10078_s7  ;;  %3524 = vst.msk [vmem:[#allocation7 + $0x70] sm:$0xff] %vm736_vm7, %v3467_v61 }
 0x58a   :  { %3040 = vrot.lane.b32.xlu1 %v2968_v60, %s10077_s5 }
 0x58b   :  { %v3325_v0 = vpop.permute.xlu0 %3324 }
 0x58c   :  { %3381 = vst.msk [vmem:[#allocation7 + $0x78] sm:$0xff] %vm590_vm6, %v3325_v0  ;;  %v3611_v6 = vpop.permute.xlu1 %3610  ;;  %v4095_v0 = vld [vmem:[#allocation7 + $0x18] sm:$0xff] }
 0x58d   :  { %4042 = vrot.lane.b32.xlu0 %v3975_v62, %s10076_s27  ;;  %3668 = vst.msk [vmem:[#allocation7 + $0x70] sm:$0xff] %vm882_vm8, %v3611_v6  ;;  %v4094_v62 = vld [vmem:[#allocation7 + $0x10] sm:$0xff] }
 0x58e   :  { %3338 = vrot.lane.b32.xlu1 %v3268_v3, %s10075_s1  ;;  %v4118_v6 = vpack.c.bf16 %v4095_v0, %v4094_v62  ;;  %v2920_v0 = vld [vmem:[%s10082_s28 + $0xc0] sm:$0xff]  ;;  %s10160_s28 = smov 48  }
 0x58f   :  { %v3469_v4 = vpop.permute.xlu0 %3468  ;;  %2945 = vst.msk [vmem:[#allocation7 + $0xc0] sm:$0xff] %vm140_vm1, %v2920_v0 }
 0x590   :  { %3525 = vst.msk [vmem:[#allocation7 + $0x78] sm:$0xff] %vm736_vm7, %v3469_v4  ;;  %v3753_v8 = vpop.permute.xlu1 %3752 }
 0x591   :  { %3190 = vrot.lane.b32.xlu0 %v9049_v35, %s10074_s2  ;;  %3807 = vst.msk [vmem:[#allocation7 + $0x70] sm:$0xff] %vm10111_vm2, %v3753_v8  ;;  %vm10113_vm2 = vcmask 294144  }
 0x592   :  { %3482 = vrot.lane.b32.xlu1 %v3412_v7, %s10071_s12 }
 0x593   :  { %v3613_v10 = vpop.permute.xlu0 %3612 }
 0x594   :  { %3669 = vst.msk [vmem:[#allocation7 + $0x78] sm:$0xff] %vm882_vm8, %v3613_v10  ;;  %v3891_v11 = vpop.permute.xlu1 %3890  ;;  %v4097_v10 = vld [vmem:[#allocation7 + $0x28] sm:$0xff] }
 0x595   :  { %3042 = vrot.lane.b32.xlu0 %v2969_v9, %s10077_s5  ;;  %3945 = vst.msk [vmem:[#allocation7 + $0x70] sm:$0xff] %vm10087_vm0, %v3891_v11  ;;  %v4096_v9 = vld [vmem:[#allocation7 + $0x20] sm:$0xff] }
 0x596   :  { %v2397_v12 = vpop.f32.mrb[32].mxu1  ;;  %3626 = vrot.lane.b32.xlu1 %v3699_v53, %s10072_s30 }
 0x597   :  { %v2424_v13 = vmul.f32 %v8852_v63, %v2397_v12  ;;  %v6224_v14 = vpop.f32.mrb[33].mxu1  ;;  %v3755_v16 = vpop.permute.xlu0 %3754  ;;  %v4119_v12 = vpack.c.bf16 %v4097_v10, %v4096_v9 }
 0x598   :  { %v2400_v15 = vpop.f32.mrb[34].mxu1  ;;  %3808 = vst.msk [vmem:[#allocation7 + $0x78] sm:$0xff] %vm10112_vm9, %v3755_v16  ;;  %v4029_v22 = vpop.permute.xlu1 %4028  ;;  %vm10114_vm9 = vmmov %vm10113_vm2  ;;  %v4098_v16 = vld [vmem:[#allocation7 + $0x30] sm:$0xff] }
 0x599   :  { %v2440_v18 = vadd.f32 %v8861_v1, %v2424_v13  ;;  %v2425_v20 = vmul.f32 %v8852_v63, %v2400_v15  ;;  %v6225_v21 = vpop.f32.mrb[35].mxu1  ;;  %3192 = vrot.lane.b32.xlu0 %v3268_v3, %s10074_s2  ;;  %4083 = vst.msk [vmem:[#allocation7 + $0x70] sm:$0xff] %vm10113_vm2, %v4029_v22  ;;  %vm10116_vm2 = vcmask 1041408  }
 0x59a   :  { %3768 = vrot.lane.b32.xlu1 %v3700_v17, %s10073_s11  ;;  %v4190_v53 = vsel %vm10116_vm2, %v6571_v50, 0  ;;  %vm10119_vm2 = vcmask 261344   ;;  %v4099_v17 = vld [vmem:[#allocation7 + $0x38] sm:$0xff] }
 0x59b   :  { %v2441_v23 = vadd.f32 %v8861_v1, %v2425_v20  ;;  %v3893_v26 = vpop.permute.xlu0 %3892  ;;  %v2449_v19 = vmax.f32 %v2440_v18, 0.0  ;;  %v4120_v20 = vpack.c.bf16 %v4099_v17, %v4098_v16 }
 0x59c   :  { %3946 = vst.msk [vmem:[#allocation7 + $0x78] sm:$0xff] %vm10087_vm0, %v3893_v26  ;;  %v3029_v29 = vpop.permute.xlu1 %3028  ;;  %vm10117_vm0 = vcmask 228544   ;;  %v4101_v26 = vld [vmem:[#allocation7 + $0x48] sm:$0xff] }
 0x59d   :  { %v2450_v28 = vmax.f32 %v2441_v23, 0.0  ;;  %3340 = vrot.lane.b32.xlu0 %v3269_v25, %s10075_s1  ;;  %3087 = vst.msk [vmem:[#allocation7 + $0x80] sm:$0xff] %vm291_vm4, %v3029_v29  ;;  %v4100_v25 = vld [vmem:[#allocation7 + $0x40] sm:$0xff]  ;;  %s10168_s1 = smov 64  }
 0x59e   :  { %v2405_v30 = vpop.f32.mrb[36].mxu1  ;;  %3906 = vrot.lane.b32.xlu1 %v3838_v27, %s10078_s7 }
 0x59f   :  { %v2426_v31 = vmul.f32 %v8852_v63, %v2405_v30  ;;  %v6228_v32 = vpop.f32.mrb[37].mxu1  ;;  %v6474_v33 = vpack.c.bf16 %v2450_v28, %v2449_v19  ;;  %v4031_v36 = vpop.permute.xlu0 %4030  ;;  %v4121_v19 = vpack.c.bf16 %v4101_v26, %v4100_v25 }
 0x5a0   :  { %v2408_v35 = vpop.f32.mrb[38].mxu1  ;;  %4084 = vst.msk [vmem:[#allocation7 + $0x78] sm:$0xff] %vm10114_vm9, %v4031_v36  ;;  %v3179_v63 = vpop.permute.xlu1 %3178  ;;  %vm10118_vm9 = vcmask 293888   ;;  %v4103_v32 = vld [vmem:[#allocation7 + $0x58] sm:$0xff]  ;;  %v4104_v36 = vld [vmem:[#allocation7 + $0x60] sm:$0xff] }
 0x5a1   :  { %v2442_v24 = vadd.f32 %v8861_v1, %v2426_v31  ;;  %v6229_v38 = vpop.f32.mrb[39].mxu1  ;;  %6475 = vmatprep.subr.bf16.mxu0 %v6474_v33  ;;  %3484 = vrot.lane.b32.xlu0 %v3413_v34, %s10071_s12  ;;  %3237 = vst.msk [vmem:[#allocation7 + $0x80] sm:$0xff] %vm443_vm5, %v3179_v63  ;;  %v2453_v1 = vld [vmem:[%s10096_s4 + $0x8] sm:$0xff] }
 0x5a2   :  { %6477 = vmatpush3.bf16.msra.mxu0 %v6474_v33  ;;  %4044 = vrot.lane.b32.xlu1 %v3976_v37, %s10076_s27  ;;  %v4102_v31 = vld [vmem:[#allocation7 + $0x50] sm:$0xff]  ;;  %v4105_v37 = vld [vmem:[#allocation7 + $0x68] sm:$0xff] }
 0x5a3   :  { %v2451_v39 = vmax.f32 %v2442_v24, 0.0  ;;  %v3031_v42 = vpop.permute.xlu0 %3030  ;;  %v4122_v34 = vpack.c.bf16 %v4103_v32, %v4102_v31  ;;  %v4123_v63 = vpack.c.bf16 %v4105_v37, %v4104_v36  ;;  %v9320_v37 = vld [vmem:[%s9976_s13] ss:$0 sm:$0xff]  ;;  %s10166_s13 = smov 40  }
 0x5a4   :  { %3088 = vst.msk [vmem:[#allocation7 + $0x88] sm:$0xff] %vm291_vm4, %v3031_v42  ;;  %v3327_v44 = vpop.permute.xlu1 %3326 }
 0x5a5   :  { %6246 = vmatprep.subr.mxu0 %v2451_v39  ;;  %3628 = vrot.lane.b32.xlu0 %v3557_v40, %s10072_s30  ;;  %3382 = vst.msk [vmem:[#allocation7 + $0x80] sm:$0xff] %vm590_vm6, %v3327_v44  ;;  %s10303_s30 = sld [smem:[#allocation26_spill]] }
 0x5a6   :  { %6247 = vmatpush3.msra.mxu0 %v2451_v39  ;;  %3194 = vrot.lane.b32.xlu1 %v3120_v45, %s10074_s2 }
 0x5a7   :  { %6249 = vmatmul.mubr.msk.f32.vlgmr.msra.gmra.mrb[52].mxu0 %vm10048_vm13, %v2453_v1  ;;  %6268 = vmatprep.subr.bf16.mxu0 %v6587_v2  ;;  %v3181_v49 = vpop.permute.xlu0 %3180  ;;  %v4106_v1 = vld [vmem:[#allocation7 + $0x70] sm:$0xff] }
 0x5a8   :  { %6269 = vmatpush3.bf16.msra.mxu0 %v6569_v41  ;;  %6251 = vmatprep.mubr.msk.f32.mxu0 %vm10048_vm13, %v2454_v43  ;;  %3238 = vst.msk [vmem:[#allocation7 + $0x88] sm:$0xff] %vm443_vm5, %v3181_v49  ;;  %v3471_v51 = vpop.permute.xlu1 %3470  ;;  %v4107_v41 = vld [vmem:[#allocation7 + $0x78] sm:$0xff] }
 0x5a9   :  { %6270 = vmatprep.subr.bf16.mxu0 %v6587_v2  ;;  %3526 = vst.msk [vmem:[#allocation7 + $0x80] sm:$0xff] %vm736_vm7, %v3471_v51  ;;  %3044 = vrot.lane.b32.xlu0 %v2970_v46, %s10077_s5  ;;  %v4124_v44 = vpack.c.bf16 %v4107_v41, %v4106_v1 }
 0x5ab   :  { %6252 = vmatmul.mubr.msk.f32.gmra.mrb[54].mxu0 %vm10048_vm13, %v2455_v47  ;;  %v3329_v52 = vpop.permute.xlu0 %3328  ;;  %vm10120_vm13 = vmmov %vm10117_vm0 }
 0x5ac   :  { %6271 = vmatpush3.bf16.msra.mxu0 %v6570_v48  ;;  %6274 = vmatprep.mubr.msk.bf16.mxu0 %vm6595_vm3, %v6587_v2  ;;  %3383 = vst.msk [vmem:[#allocation7 + $0x88] sm:$0xff] %vm590_vm6, %v3329_v52  ;;  %v3615_v54 = vpop.permute.xlu1 %3614 }
 0x5ad   :  { %6272 = vmatprep.subr.bf16.mxu0 %v6587_v2  ;;  %3670 = vst.msk [vmem:[#allocation7 + $0x80] sm:$0xff] %vm882_vm8, %v3615_v54 }
 0x5af   :  { %v3473_v57 = vpop.permute.xlu0 %3472 }
 0x5b0   :  { %6273 = vmatpush3.bf16.msra.mxu0 %v4190_v53  ;;  %3527 = vst.msk [vmem:[#allocation7 + $0x88] sm:$0xff] %vm736_vm7, %v3473_v57  ;;  %v3757_v59 = vpop.permute.xlu1 %3756 }
 0x5b1   :  { %3809 = vst.msk [vmem:[#allocation7 + $0x80] sm:$0xff] %vm10117_vm0, %v3757_v59  ;;  %vm10122_vm0 = vmmov %vm10118_vm9 }
 0x5b3   :  { %6275 = vmatmul.mubr.msk.bf16.vlgmr.msra.gmra.mrb[56].mxu0 %vm10118_vm9, %v4117_v58  ;;  %v3617_v60 = vpop.permute.xlu0 %3616  ;;  %vm10123_vm9 = vmmov %vm10119_vm2 }
 0x5b4   :  { %6278 = vmatprep.mubr.msk.bf16.mxu0 %vm6595_vm3, %v6587_v2  ;;  %3671 = vst.msk [vmem:[#allocation7 + $0x88] sm:$0xff] %vm882_vm8, %v3617_v60  ;;  %v3895_v61 = vpop.permute.xlu1 %3894 }
 0x5b5   :  { %3947 = vst.msk [vmem:[#allocation7 + $0x80] sm:$0xff] %vm10119_vm2, %v3895_v61  ;;  %vm10124_vm2 = vmmov %vm10121_vm10 }
 0x5b7   :  { %v3759_v3 = vpop.permute.xlu0 %3758 }
 0x5b8   :  { %3810 = vst.msk [vmem:[#allocation7 + $0x88] sm:$0xff] %vm10120_vm13, %v3759_v3  ;;  %v4033_v4 = vpop.permute.xlu1 %4032  ;;  %vm10126_vm13 = vmmov %vm10122_vm0 }
 0x5b9   :  { %4085 = vst.msk [vmem:[#allocation7 + $0x80] sm:$0xff] %vm10121_vm10, %v4033_v4  ;;  %vm10125_vm10 = vmmov %vm10122_vm0 }
 0x5bb   :  { %6279 = vmatmul.mubr.msk.bf16.gmra.mrb[60].mxu0 %vm10122_vm0, %v4118_v6  ;;  %v3897_v7 = vpop.permute.xlu0 %3896  ;;  %vm10127_vm0 = vcmask 228544  }
 0x5bc   :  { %6282 = vmatprep.mubr.msk.bf16.mxu0 %vm6595_vm3, %v6587_v2  ;;  %3948 = vst.msk [vmem:[#allocation7 + $0x88] sm:$0xff] %vm10123_vm9, %v3897_v7  ;;  %v3033_v8 = vpop.permute.xlu1 %3032  ;;  %vm10128_vm9 = vmmov %vm10125_vm10 }
 0x5bd   :  { %3089 = vst.msk [vmem:[#allocation7 + $0x90] sm:$0xff] %vm291_vm4, %v3033_v8 }
 0x5bf   :  { %v4035_v11 = vpop.permute.xlu0 %4034 }
 0x5c0   :  { %4086 = vst.msk [vmem:[#allocation7 + $0x88] sm:$0xff] %vm10124_vm2, %v4035_v11  ;;  %v3183_v13 = vpop.permute.xlu1 %3182  ;;  %vm10129_vm2 = vcmask 261344   ;;  %v4108_v47 = vld [vmem:[#allocation7 + $0x80] sm:$0xff] }
 0x5c1   :  { %3239 = vst.msk [vmem:[#allocation7 + $0x90] sm:$0xff] %vm443_vm5, %v3183_v13 }
 0x5c3   :  { %6283 = vmatmul.mubr.msk.bf16.gmra.mrb[64].mxu0 %vm10125_vm10, %v4119_v12  ;;  %v3035_v14 = vpop.permute.xlu0 %3034  ;;  %vm10130_vm10 = vmmov %vm10127_vm0 }
 0x5c4   :  { %6286 = vmatprep.mubr.msk.bf16.mxu0 %vm6595_vm3, %v6587_v2  ;;  %3090 = vst.msk [vmem:[#allocation7 + $0x98] sm:$0xff] %vm291_vm4, %v3035_v14  ;;  %v3331_v15 = vpop.permute.xlu1 %3330 }
 0x5c5   :  { %3384 = vst.msk [vmem:[#allocation7 + $0x90] sm:$0xff] %vm590_vm6, %v3331_v15 }
 0x5c7   :  { %v3185_v18 = vpop.permute.xlu0 %3184  ;;  %v4109_v48 = vld [vmem:[#allocation7 + $0x88] sm:$0xff] }
 0x5c8   :  { %3240 = vst.msk [vmem:[#allocation7 + $0x98] sm:$0xff] %vm443_vm5, %v3185_v18  ;;  %v3475_v21 = vpop.permute.xlu1 %3474  ;;  %v4125_v51 = vpack.c.bf16 %v4109_v48, %v4108_v47 }
 0x5c9   :  { %3528 = vst.msk [vmem:[#allocation7 + $0x90] sm:$0xff] %vm736_vm7, %v3475_v21 }
 0x5cb   :  { %6287 = vmatmul.mubr.msk.bf16.gmra.mrb[68].mxu0 %vm10126_vm13, %v4120_v20  ;;  %v3333_v22 = vpop.permute.xlu0 %3332  ;;  %vm10131_vm13 = vcmask 294144  }
 0x5cc   :  { %6290 = vmatprep.mubr.msk.bf16.mxu0 %vm6595_vm3, %v6587_v2  ;;  %3385 = vst.msk [vmem:[#allocation7 + $0x98] sm:$0xff] %vm590_vm6, %v3333_v22  ;;  %v3619_v23 = vpop.permute.xlu1 %3618 }
 0x5cd   :  { %3672 = vst.msk [vmem:[#allocation7 + $0x90] sm:$0xff] %vm882_vm8, %v3619_v23 }
 0x5cf   :  { %v3477_v27 = vpop.permute.xlu0 %3476 }
 0x5d0   :  { %3529 = vst.msk [vmem:[#allocation7 + $0x98] sm:$0xff] %vm736_vm7, %v3477_v27  ;;  %v3761_v28 = vpop.permute.xlu1 %3760 }
 0x5d1   :  { %3811 = vst.msk [vmem:[#allocation7 + $0x90] sm:$0xff] %vm10127_vm0, %v3761_v28  ;;  %vm10132_vm0 = vmmov %vm10128_vm9 }
 0x5d3   :  { %6291 = vmatmul.mubr.msk.bf16.gmra.mrb[72].mxu0 %vm10128_vm9, %v4121_v19  ;;  %v3621_v29 = vpop.permute.xlu0 %3620  ;;  %vm10133_vm9 = vmmov %vm10129_vm2 }
 0x5d4   :  { %6294 = vmatprep.mubr.msk.bf16.mxu0 %vm6595_vm3, %v6587_v2  ;;  %3673 = vst.msk [vmem:[#allocation7 + $0x98] sm:$0xff] %vm882_vm8, %v3621_v29  ;;  %v3899_v30 = vpop.permute.xlu1 %3898 }
 0x5d5   :  { %3949 = vst.msk [vmem:[#allocation7 + $0x90] sm:$0xff] %vm10129_vm2, %v3899_v30  ;;  %vm10134_vm2 = vmmov %vm10131_vm13 }
 0x5d7   :  { %v3763_v33 = vpop.permute.xlu0 %3762 }
 0x5d8   :  { %3812 = vst.msk [vmem:[#allocation7 + $0x98] sm:$0xff] %vm10130_vm10, %v3763_v33  ;;  %v4037_v35 = vpop.permute.xlu1 %4036  ;;  %vm10135_vm10 = vmmov %vm10132_vm0 }
 0x5d9   :  { %4087 = vst.msk [vmem:[#allocation7 + $0x90] sm:$0xff] %vm10131_vm13, %v4037_v35  ;;  %vm10136_vm13 = vmmov %vm10132_vm0 }
 0x5db   :  { %6295 = vmatmul.mubr.msk.bf16.gmra.mrb[76].mxu0 %vm10132_vm0, %v4122_v34  ;;  %v3901_v24 = vpop.permute.xlu0 %3900  ;;  %vm10137_vm0 = vcmask 228544   ;;  %v9314_v34 = vld [vmem:[%s10162_s20] ss:$0 sm:$0xff] }
 0x5dc   :  { %6298 = vmatprep.mubr.msk.bf16.mxu0 %vm6595_vm3, %v6587_v2  ;;  %3950 = vst.msk [vmem:[#allocation7 + $0x98] sm:$0xff] %vm10133_vm9, %v3901_v24  ;;  %v3037_v38 = vpop.permute.xlu1 %3036  ;;  %vm10138_vm9 = vmmov %vm10135_vm10 }
 0x5dd   :  { %3091 = vst.msk [vmem:[#allocation7 + $0xa0] sm:$0xff] %vm291_vm4, %v3037_v38 }
 0x5df   :  { %v4039_v39 = vpop.permute.xlu0 %4038 }
 0x5e0   :  { %4088 = vst.msk [vmem:[#allocation7 + $0x98] sm:$0xff] %vm10134_vm2, %v4039_v39  ;;  %v3187_v40 = vpop.permute.xlu1 %3186  ;;  %v4110_v54 = vld [vmem:[#allocation7 + $0x90] sm:$0xff]  ;;  %vm10139_vm2 = vcmask 261344  }
 0x5e1   :  { %3241 = vst.msk [vmem:[#allocation7 + $0xa0] sm:$0xff] %vm443_vm5, %v3187_v40 }
 0x5e3   :  { %6299 = vmatmul.mubr.msk.bf16.gmra.mrb[80].mxu0 %vm10135_vm10, %v4123_v63  ;;  %v3039_v42 = vpop.permute.xlu0 %3038  ;;  %vm10140_vm10 = vmmov %vm10137_vm0 }
 0x5e4   :  { %6302 = vmatprep.mubr.msk.bf16.mxu0 %vm6595_vm3, %v6587_v2  ;;  %3092 = vst.msk [vmem:[#allocation7 + $0xa8] sm:$0xff] %vm291_vm4, %v3039_v42  ;;  %v3335_v43 = vpop.permute.xlu1 %3334 }
 0x5e5   :  { %3386 = vst.msk [vmem:[#allocation7 + $0xa0] sm:$0xff] %vm590_vm6, %v3335_v43 }
 0x5e7   :  { %v3189_v45 = vpop.permute.xlu0 %3188  ;;  %v4111_v55 = vld [vmem:[#allocation7 + $0x98] sm:$0xff] }
 0x5e8   :  { %3242 = vst.msk [vmem:[#allocation7 + $0xa8] sm:$0xff] %vm443_vm5, %v3189_v45  ;;  %v3479_v46 = vpop.permute.xlu1 %3478  ;;  %v4126_v58 = vpack.c.bf16 %v4111_v55, %v4110_v54 }
 0x5e9   :  { %3530 = vst.msk [vmem:[#allocation7 + $0xa0] sm:$0xff] %vm736_vm7, %v3479_v46 }
 0x5eb   :  { %6303 = vmatmul.mubr.msk.bf16.gmra.mrb[84].mxu0 %vm10136_vm13, %v4124_v44  ;;  %v3337_v49 = vpop.permute.xlu0 %3336  ;;  %vm10141_vm13 = vcmask 294144  }
 0x5ec   :  { %6306 = vmatprep.mubr.msk.bf16.mxu0 %vm6595_vm3, %v6587_v2  ;;  %3387 = vst.msk [vmem:[#allocation7 + $0xa8] sm:$0xff] %vm590_vm6, %v3337_v49  ;;  %v3623_v50 = vpop.permute.xlu1 %3622 }
 0x5ed   :  { %3674 = vst.msk [vmem:[#allocation7 + $0xa0] sm:$0xff] %vm882_vm8, %v3623_v50 }
 0x5ef   :  { %v3481_v52 = vpop.permute.xlu0 %3480 }
 0x5f0   :  { %3531 = vst.msk [vmem:[#allocation7 + $0xa8] sm:$0xff] %vm736_vm7, %v3481_v52  ;;  %v3765_v53 = vpop.permute.xlu1 %3764 }
 0x5f1   :  { %3813 = vst.msk [vmem:[#allocation7 + $0xa0] sm:$0xff] %vm10137_vm0, %v3765_v53  ;;  %vm10142_vm0 = vmmov %vm10138_vm9 }
 0x5f2   :  { %vm10145_vm1 = vmmov %vm10142_vm0 }
 0x5f3   :  { %6307 = vmatmul.mubr.msk.bf16.gmra.mrb[88].mxu0 %vm10138_vm9, %v4125_v51  ;;  %v3625_v56 = vpop.permute.xlu0 %3624  ;;  %vm10143_vm9 = vmmov %vm10139_vm2 }
 0x5f4   :  { %6310 = vmatprep.mubr.msk.bf16.mxu0 %vm6595_vm3, %v6587_v2  ;;  %3675 = vst.msk [vmem:[#allocation7 + $0xa8] sm:$0xff] %vm882_vm8, %v3625_v56  ;;  %v3903_v57 = vpop.permute.xlu1 %3902 }
 0x5f5   :  { %3951 = vst.msk [vmem:[#allocation7 + $0xa0] sm:$0xff] %vm10139_vm2, %v3903_v57  ;;  %vm10144_vm2 = vmmov %vm10141_vm13 }
 0x5f7   :  { %v3767_v59 = vpop.permute.xlu0 %3766 }
 0x5f8   :  { %3814 = vst.msk [vmem:[#allocation7 + $0xa8] sm:$0xff] %vm10140_vm10, %v3767_v59  ;;  %v4041_v60 = vpop.permute.xlu1 %4040  ;;  %vm10149_vm10 = vcmask 159872  }
 0x5f9   :  { %4089 = vst.msk [vmem:[#allocation7 + $0xa0] sm:$0xff] %vm10141_vm13, %v4041_v60  ;;  %vm10151_vm13 = vcmask 191648  }
 0x5fb   :  { %6311 = vmatmul.mubr.msk.bf16.gmra.mrb[92].mxu0 %vm10142_vm0, %v4126_v58  ;;  %v3905_v61 = vpop.permute.xlu0 %3904  ;;  %vm10153_vm0 = vcmask 95296  }
 0x5fc   :  { %6314 = vmatprep.mubr.msk.bf16.mxu0 %vm6595_vm3, %v6587_v2  ;;  %3952 = vst.msk [vmem:[#allocation7 + $0xa8] sm:$0xff] %vm10143_vm9, %v3905_v61  ;;  %v3041_v62 = vpop.permute.xlu1 %3040  ;;  %vm10154_vm9 = vmmov %vm10145_vm1 }
 0x5fd   :  { %3093 = vst.msk [vmem:[#allocation7 + $0xb0] sm:$0xff] %vm291_vm4, %v3041_v62 }
 0x5ff   :  { %v4043_v3 = vpop.permute.xlu0 %4042 }
 0x600   :  { %4090 = vst.msk [vmem:[#allocation7 + $0xa8] sm:$0xff] %vm10144_vm2, %v4043_v3  ;;  %v3339_v6 = vpop.permute.xlu1 %3338  ;;  %v4112_v8 = vld [vmem:[#allocation7 + $0xa0] sm:$0xff]  ;;  %vm10155_vm2 = vmmov %vm10145_vm1 }
 0x603   :  { %v3191_v4 = vpop.permute.xlu0 %3190 }
 0x604   :  { %3243 = vst.msk [vmem:[#allocation7 + $0xb0] sm:$0xff] %vm443_vm5, %v3191_v4  ;;  %v3483_v7 = vpop.permute.xlu1 %3482 }
 0x605   :  { %3388 = vst.msk [vmem:[#allocation7 + $0xb0] sm:$0xff] %vm590_vm6, %v3339_v6  ;;  %vm10146_vm6 = vcmask 224448  }
 0x606   :  { %3532 = vst.msk [vmem:[#allocation7 + $0xb0] sm:$0xff] %vm736_vm7, %v3483_v7  ;;  %vm10147_vm7 = vcmask 128096  }
 0x607   :  { %v3043_v9 = vpop.permute.xlu0 %3042  ;;  %v4113_v10 = vld [vmem:[#allocation7 + $0xa8] sm:$0xff] }
 0x608   :  { %3094 = vst.msk [vmem:[#allocation7 + $0xb8] sm:$0xff] %vm291_vm4, %v3043_v9  ;;  %v3627_v11 = vpop.permute.xlu1 %3626  ;;  %v4127_v12 = vpack.c.bf16 %v4113_v10, %v4112_v8  ;;  %vm10148_vm4 = vcmask 256224  }
 0x609   :  { %3676 = vst.msk [vmem:[#allocation7 + $0xb0] sm:$0xff] %vm882_vm8, %v3627_v11  ;;  %vm10150_vm8 = vcmask 288000  }
 0x60a   :  { %6315 = vmatmul.mubr.msk.bf16.gmra.mrb[96].mxu0 %vm10145_vm1, %v4127_v12  ;;  %vm10156_vm1 = vcmask 64512  }
 0x60b   :  { %v3193_v13 = vpop.permute.xlu0 %3192  ;;  %6318 = vmatprep.mubr.msk.bf16.mxu0 %vm6595_vm3, %v6587_v2 }
 0x60c   :  { %3244 = vst.msk [vmem:[#allocation7 + $0xb8] sm:$0xff] %vm443_vm5, %v3193_v13  ;;  %v3769_v14 = vpop.permute.xlu1 %3768  ;;  %vm10152_vm5 = vcmask 63520  }
 0x60d   :  { %3815 = vst.msk [vmem:[#allocation7 + $0xb0] sm:$0xf] %vm10146_vm6, %v3769_v14  ;;  %vm10157_vm6 = vmmov %vm10156_vm1 }
 0x60f   :  { %v3341_v15 = vpop.permute.xlu0 %3340 }
 0x610   :  { %3389 = vst.msk [vmem:[#allocation7 + $0xb8] sm:$0x3f] %vm10147_vm7, %v3341_v15  ;;  %v3907_v16 = vpop.permute.xlu1 %3906  ;;  %vm10158_vm7 = vmmov %vm10156_vm1 }
 0x611   :  { %3953 = vst.msk [vmem:[#allocation7 + $0xb0] sm:$0x7] %vm10148_vm4, %v3907_v16  ;;  %vm10159_vm4 = vmmov %vm10156_vm1 }
 0x613   :  { %v3485_v17 = vpop.permute.xlu0 %3484 }
 0x614   :  { %3533 = vst.msk [vmem:[#allocation7 + $0xb8] sm:$0x1f] %vm10149_vm10, %v3485_v17  ;;  %v4045_v18 = vpop.permute.xlu1 %4044  ;;  %vm10161_vm10 = vmmov %vm10156_vm1 }
 0x615   :  { %4091 = vst.msk [vmem:[#allocation7 + $0xb0] sm:$0x3] %vm10150_vm8, %v4045_v18  ;;  %vm10163_vm8 = vmmov %vm10156_vm1 }
 0x617   :  { %v3629_v20 = vpop.permute.xlu0 %3628 }
 0x618   :  { %3677 = vst.msk [vmem:[#allocation7 + $0xb8] sm:$0xf] %vm10151_vm13, %v3629_v20  ;;  %v3195_v21 = vpop.permute.xlu1 %3194  ;;  %vm10164_vm13 = vmmov %vm10156_vm1 }
 0x61b   :  { %v3045_v22 = vpop.permute.xlu0 %3044 }
 0x61c   :  { %3095 = vst.msk [vmem:[#allocation7 + $0xc0] sm:$0x7f] %vm10152_vm5, %v3045_v22  ;;  %v4114_v23 = vld [vmem:[#allocation7 + $0xb0] sm:$0xff]  ;;  %vm10165_vm5 = vmmov %vm10156_vm1 }
 0x61d   :  { %3245 = vst.msk [vmem:[#allocation7 + $0xc0] sm:$0x3f] %vm10153_vm0, %v3195_v21  ;;  %vm10169_vm0 = vcmask 1043456  }
 0x61f   :  { %v4115_v25 = vld [vmem:[#allocation7 + $0xb8] sm:$0xff] }
 0x620   :  { %v4128_v26 = vpack.c.bf16 %v4115_v25, %v4114_v23 }
 0x622   :  { %6319 = vmatmul.mubr.msk.bf16.gmra.mrb[100].mxu0 %vm10154_vm9, %v4128_v26  ;;  %vm10170_vm9 = vmmov %vm10169_vm0 }
 0x623   :  { %6322 = vmatprep.mubr.msk.bf16.mxu0 %vm6595_vm3, %v6587_v2 }
 0x624   :  { %v4116_v27 = vld [vmem:[#allocation7 + $0xc0] sm:$0xff] }
 0x625   :  { %v4129_v19 = vpack.c.bf16 %v4116_v27, %v4116_v27 }
 0x62a   :  { %6323 = vmatmul.mubr.msk.bf16.gmra.mrb[104].mxu0 %vm10155_vm2, %v4129_v19  ;;  %vm10171_vm2 = vcmask 261312  }
 0x67a   :  { %v6250_v28 = vpop.f32.mrb[52].mxu0 }
 0x67b   :  { %2554 = vst.msk [vmem:[#allocation5 + $0x8] sm:$0xff] %vm10156_vm1, %v6250_v28  ;;  %v2534_v29 = vpop.f32.mrb[53].mxu0  ;;  %vm10172_vm1 = vcmask 326912  }
 0x67c   :  { %2553 = vst.msk [vmem:[#allocation5] sm:$0xff] %vm10157_vm6, %v2534_v29  ;;  %vm10173_vm6 = vcmask 392512  }
 0x67e   :  { %v6253_v30 = vpop.f32.mrb[54].mxu0 }
 0x67f   :  { %2556 = vst.msk [vmem:[#allocation5 + $0x18] sm:$0xff] %vm10158_vm7, %v6253_v30  ;;  %v2544_v31 = vpop.f32.mrb[55].mxu0  ;;  %vm10174_vm7 = vcmask 458112  }
 0x680   :  { %2555 = vst.msk [vmem:[#allocation5 + $0x10] sm:$0xff] %vm10159_vm4, %v2544_v31  ;;  %vm2640_vm4 = vcmask 257216  }
 0x682   :  { %v2692_v32 = vld [vmem:[#allocation5 + $0x8] sm:$0xff] }
 0x683   :  { %2698 = vrot.lane.b32.xlu1 %v2692_v32, %s10160_s28  ;;  %v2569_v33 = vld [vmem:[#allocation5 + $0x1] sm:$0xff]  ;;  %2566 = vst.msk [vmem:[#allocation6 + $0x8] sm:$0xff] %vm10161_vm10, %v2692_v32  ;;  %vm2665_vm10 = vcmask 321792  }
 0x684   :  { %2577 = vrot.lane.b32.xlu0 %v2569_v33, %s10074_s2  ;;  %v2561_v35 = vld [vmem:[#allocation5] sm:$0xff]  ;;  %v6572_v33 = vld [vmem:[%s9977_s8] sm:$0xff]  }
 0x685   :  { %2565 = vst.msk [vmem:[#allocation6] sm:$0xff] %vm10163_vm8, %v2561_v35  ;;  %v2593_v24 = vld [vmem:[#allocation5 + $0x2] sm:$0xff]  ;;  %6254 = vmatprep.subr.bf16.mxu1 %v6572_v33  ;;  %vm10175_vm8 = vmmov %vm10171_vm2 }
 0x686   :  { %v4226_v36 = vpop.f32.mrb[56].mxu0  ;;  %v2694_v38 = vld [vmem:[#allocation5 + $0x18] sm:$0xff]  ;;  %v2617_v40 = vld [vmem:[#allocation5 + $0x4] sm:$0xff]  ;;  %6255 = vmatpush3.bf16.msra.mxu1 %v6572_v33 }
 0x687   :  { %v4335_v63 = vmul.f32 %v9314_v34, %v4226_v36  ;;  %2601 = vrot.lane.b32.xlu1 %v2593_v24, %s10071_s12  ;;  %v6276_v39 = vpop.f32.mrb[57].mxu0  ;;  %2568 = vst.msk [vmem:[#allocation6 + $0x18] sm:$0xff] %vm10164_vm13, %v2694_v38  ;;  %v2642_v44 = vld [vmem:[#allocation5 + $0x5] sm:$0xff]  ;;  %v9330_v46 = vld [vmem:[#allocation5 + $0x10] sm:$0xff]  ;;  %v2712_v54 = vld [vmem:[#allocation5 + $0x19] sm:$0x7f] }
 0x688   :  { %2625 = vrot.lane.b32.xlu0 %v2617_v40, %s10073_s11  ;;  %v4229_v1 = vpop.f32.mrb[58].mxu0  ;;  %2567 = vst.msk [vmem:[#allocation6 + $0x10] sm:$0xff] %vm10165_vm5, %v9330_v46  ;;  %v2667_v50 = vld [vmem:[#allocation5 + $0x6] sm:$0xff]  ;;  %v2572_v59 = vld [vmem:[#allocation5 + $0x19] sm:$0x7f]  ;;  %v9344_v61 = vld [vmem:[#allocation5 + $0x11] sm:$0xff] }
 0x689   :  { %v4367_v41 = vadd.f32 %v9320_v37, %v4335_v63  ;;  %v4336_v42 = vmul.f32 %v9314_v34, %v4229_v1  ;;  %v6277_v43 = vpop.f32.mrb[59].mxu0  ;;  %v2596_v6 = vld [vmem:[#allocation5 + $0x1a] sm:$0x3f]  ;;  %v9352_v9 = vld [vmem:[#allocation5 + $0xa] sm:$0xff]  ;;  %vm10176_vm13 = vmmov %vm10172_vm1 }
 0x68a   :  { %v2620_v14 = vld [vmem:[#allocation5 + $0x1c] sm:$0xf]  ;;  %v2619_v16 = vld [vmem:[#allocation5 + $0x14] sm:$0xff]  ;;  %v2570_v30 = vld [vmem:[#allocation5 + $0x9] sm:$0xff] }
 0x68b   :  { %v4368_v45 = vadd.f32 %v9320_v37, %v4336_v42  ;;  %2650 = vrot.lane.b32.xlu1 %v2642_v44, %s10076_s27  ;;  %v4392_v47 = vmax.f32 %v4367_v41, 0.0  ;;  %v2645_v21 = vld [vmem:[#allocation5 + $0x1d] sm:$0x7]  ;;  %v2643_v26 = vld [vmem:[#allocation5 + $0xd] sm:$0xff]  ;;  %v2644_v32 = vld [vmem:[#allocation5 + $0x15] sm:$0xff] }
 0x68c   :  { %2702 = vrot.lane.b32.xlu0 %v2694_v38, %s10160_s28  ;;  %v2595_v38 = vld [vmem:[#allocation5 + $0x12] sm:$0xff]  ;;  %vm10177_vm5 = vmmov %vm10171_vm2 }
 0x68d   :  { %v4393_v48 = vmax.f32 %v4368_v45, 0.0  ;;  %v2668_v1 = vld [vmem:[#allocation5 + $0xe] sm:$0xff] }
 0x68e   :  { %v4234_v49 = vpop.f32.mrb[60].mxu0  ;;  %v6573_v41 = vld [vmem:[%s9977_s8 + $0x8] sm:$0xff]  }
 0x68f   :  { %v9335_v51 = vpack.c.bf16 %v4393_v48, %v4392_v47  ;;  %v4337_v52 = vmul.f32 %v9314_v34, %v4234_v49  ;;  %2675 = vrot.lane.b32.xlu1 %v2667_v50, %s10166_s13  ;;  %v6280_v53 = vpop.f32.mrb[61].mxu0  ;;  %6256 = vmatprep.subr.bf16.mxu1 %v6573_v41  ;;  %v2618_v47 = vld [vmem:[#allocation5 + $0xc] sm:$0xff]  ;;  %v2669_v49 = vld [vmem:[#allocation5 + $0x16] sm:$0xff] }
 0x690   :  { %2720 = vrot.lane.b32.xlu0 %v2712_v54, %s10167_s26  ;;  %v4237_v55 = vpop.f32.mrb[62].mxu0  ;;  %6257 = vmatpush3.bf16.msra.mxu1 %v6573_v41  ;;  %v6574_v50 = vld [vmem:[%s9977_s8 + $0x10] sm:$0xff]  }
 0x691   :  { %v4369_v56 = vadd.f32 %v9320_v37, %v4337_v52  ;;  %v4338_v57 = vmul.f32 %v9314_v34, %v4237_v55  ;;  %v6281_v58 = vpop.f32.mrb[63].mxu0  ;;  %6258 = vmatprep.subr.bf16.mxu1 %v6574_v50 }
 0x692   :  { %v6575_v58 = vld [vmem:[%s9977_s8 + $0x18] sm:$0xff]  }
 0x693   :  { %v4370_v60 = vadd.f32 %v9320_v37, %v4338_v57  ;;  %2583 = vrot.lane.b32.xlu1 %v2572_v59, %s10074_s2  ;;  %v4394_v62 = vmax.f32 %v4369_v56, 0.0 }
 0x694   :  { %2581 = vrot.lane.b32.xlu0 %v9344_v61, %s10074_s2  ;;  %6259 = vmatpush3.bf16.msra.mxu1 %v6574_v50 }
 0x695   :  { %v4395_v0 = vmax.f32 %v4370_v60, 0.0  ;;  %v6576_v60 = vld [vmem:[%s9977_s8 + $0x20] ss:$0 sps:$4 sm:$0xff]   ;;  %6260 = vmatprep.subr.bf16.mxu1 %v6575_v58  ;;  %s10301_s8 = sld [smem:[#allocation25_spill]] }
 0x696   :  { %v4242_v3 = vpop.f32.mrb[64].mxu0 }
 0x697   :  { %v9348_v4 = vpack.c.bf16 %v4395_v0, %v4394_v62  ;;  %v4339_v7 = vmul.f32 %v9314_v34, %v4242_v3  ;;  %2607 = vrot.lane.b32.xlu1 %v2596_v6, %s10071_s12  ;;  %v6284_v8 = vpop.f32.mrb[65].mxu0 }
 0x698   :  { %v4245_v10 = vpop.f32.mrb[66].mxu0  ;;  %2603 = vrot.lane.b32.xlu0 %v9352_v9, %s10071_s12  ;;  %6261 = vmatpush3.bf16.msra.mxu1 %v6575_v58 }
 0x699   :  { %v4371_v11 = vadd.f32 %v9320_v37, %v4339_v7  ;;  %v4340_v12 = vmul.f32 %v9314_v34, %v4245_v10  ;;  %v6285_v13 = vpop.f32.mrb[67].mxu0  ;;  %6544 = vmatprep.subr.msk.bf16.mxu1 %vm10169_vm0, %v6576_v60  ;;  %v2670_v10 = vld [vmem:[#allocation5 + $0x1e] sm:$0x3]  ;;  %vm2727_vm0 = vcmask 522688  }
 0x69b   :  { %v4372_v15 = vadd.f32 %v9320_v37, %v4340_v12  ;;  %2631 = vrot.lane.b32.xlu1 %v2620_v14, %s10073_s11  ;;  %v4396_v17 = vmax.f32 %v4371_v11, 0.0 }
 0x69c   :  { %2629 = vrot.lane.b32.xlu0 %v2619_v16, %s10073_s11 }
 0x69d   :  { %v4397_v18 = vmax.f32 %v4372_v15, 0.0 }
 0x69e   :  { %v4250_v20 = vpop.f32.mrb[68].mxu0 }
 0x69f   :  { %v9361_v22 = vpack.c.bf16 %v4397_v18, %v4396_v17  ;;  %v4341_v23 = vmul.f32 %v9314_v34, %v4250_v20  ;;  %2656 = vrot.lane.b32.xlu1 %v2645_v21, %s10076_s27  ;;  %v6288_v25 = vpop.f32.mrb[69].mxu0  ;;  %v2731_v18 = vld [vmem:[#allocation5 + $0x1a] sm:$0x3f] }
 0x6a0   :  { %v4253_v27 = vpop.f32.mrb[70].mxu0  ;;  %2652 = vrot.lane.b32.xlu0 %v2643_v26, %s10076_s27 }
 0x6a1   :  { %v4373_v19 = vadd.f32 %v9320_v37, %v4341_v23  ;;  %v4342_v28 = vmul.f32 %v9314_v34, %v4253_v27  ;;  %v6289_v29 = vpop.f32.mrb[71].mxu0 }
 0x6a3   :  { %v4374_v31 = vadd.f32 %v9320_v37, %v4342_v28  ;;  %2579 = vrot.lane.b32.xlu1 %v2570_v30, %s10074_s2  ;;  %v4398_v35 = vmax.f32 %v4373_v19, 0.0 }
 0x6a4   :  { %2654 = vrot.lane.b32.xlu0 %v2644_v32, %s10076_s27 }
 0x6a5   :  { %v4399_v36 = vmax.f32 %v4374_v31, 0.0 }
 0x6a6   :  { %v4258_v24 = vpop.f32.mrb[72].mxu0 }
 0x6a7   :  { %v9374_v63 = vpack.c.bf16 %v4399_v36, %v4398_v35  ;;  %v4343_v39 = vmul.f32 %v9314_v34, %v4258_v24  ;;  %v6292_v40 = vpop.f32.mrb[73].mxu0  ;;  %2605 = vrot.lane.b32.xlu1 %v2595_v38, %s10071_s12 }
 0x6a8   :  { %v4261_v42 = vpop.f32.mrb[74].mxu0  ;;  %2677 = vrot.lane.b32.xlu0 %v2668_v1, %s10166_s13 }
 0x6a9   :  { %v4375_v43 = vadd.f32 %v9320_v37, %v4343_v39  ;;  %v4344_v44 = vmul.f32 %v9314_v34, %v4261_v42  ;;  %v6293_v45 = vpop.f32.mrb[75].mxu0 }
 0x6ab   :  { %v4376_v48 = vadd.f32 %v9320_v37, %v4344_v44  ;;  %2627 = vrot.lane.b32.xlu1 %v2618_v47, %s10073_s11  ;;  %v4400_v52 = vmax.f32 %v4375_v43, 0.0 }
 0x6ac   :  { %2679 = vrot.lane.b32.xlu0 %v2669_v49, %s10166_s13 }
 0x6ad   :  { %v4401_v53 = vmax.f32 %v4376_v48, 0.0 }
 0x6ae   :  { %v4266_v54 = vpop.f32.mrb[76].mxu0 }
 0x6af   :  { %v9390_v55 = vpack.c.bf16 %v4401_v53, %v4400_v52  ;;  %v4345_v56 = vmul.f32 %v9314_v34, %v4266_v54  ;;  %v6296_v57 = vpop.f32.mrb[77].mxu0  ;;  %2716 = vrot.lane.b32.xlu1 %v2570_v30, %s10167_s26 }
 0x6b0   :  { %v4269_v59 = vpop.f32.mrb[78].mxu0  ;;  %2700 = vrot.lane.b32.xlu0 %v9330_v46, %s10160_s28  ;;  %v2797_v46 = vsel %vm10170_vm9, %v6576_v60, 0  ;;  %vm10178_vm9 = vmmov %vm10172_vm1 }
 0x6b1   :  { %v4377_v62 = vadd.f32 %v9320_v37, %v4345_v56  ;;  %v4346_v0 = vmul.f32 %v9314_v34, %v4269_v59  ;;  %v6297_v3 = vpop.f32.mrb[79].mxu0  ;;  %6263 = vmatpush3.bf16.msra.mxu1 %v2797_v46 }
 0x6b2   :  { %6478 = vmatprep.subr.bf16.mxu1 %v6597_v5 }
 0x6b3   :  { %v4378_v6 = vadd.f32 %v9320_v37, %v4346_v0  ;;  %2735 = vrot.lane.b32.xlu1 %v9352_v9, %s10168_s1  ;;  %v4402_v7 = vmax.f32 %v4377_v62, 0.0 }
 0x6b4   :  { %2718 = vrot.lane.b32.xlu0 %v9344_v61, %s10167_s26 }
 0x6b5   :  { %v4403_v8 = vmax.f32 %v4378_v6, 0.0 }
 0x6b6   :  { %v4274_v11 = vpop.f32.mrb[80].mxu0 }
 0x6b7   :  { %v9411_v12 = vpack.c.bf16 %v4403_v8, %v4402_v7  ;;  %2681 = vrot.lane.b32.xlu1 %v2670_v10, %s10166_s13  ;;  %v4347_v13 = vmul.f32 %v9314_v34, %v4274_v11  ;;  %v6300_v14 = vpop.f32.mrb[81].mxu0 }
 0x6b8   :  { %2737 = vrot.lane.b32.xlu0 %v2595_v38, %s10168_s1  ;;  %v4277_v9 = vpop.f32.mrb[82].mxu0 }
 0x6b9   :  { %v4379_v61 = vadd.f32 %v9320_v37, %v4347_v13  ;;  %v4348_v15 = vmul.f32 %v9314_v34, %v4277_v9  ;;  %v6301_v16 = vpop.f32.mrb[83].mxu0 }
 0x6bb   :  { %v4404_v17 = vmax.f32 %v4379_v61, 0.0  ;;  %v4380_v20 = vadd.f32 %v9320_v37, %v4348_v15 }
 0x6bc   :  { %2739 = vrot.lane.b32.xlu0 %v2731_v18, %s10168_s1 }
 0x6bd   :  { %v4405_v21 = vmax.f32 %v4380_v20, 0.0 }
 0x6be   :  { %v4282_v23 = vpop.f32.mrb[84].mxu0 }
 0x6bf   :  { %v9421_v25 = vpack.c.bf16 %v4405_v21, %v4404_v17  ;;  %v4349_v26 = vmul.f32 %v9314_v34, %v4282_v23  ;;  %v6304_v27 = vpop.f32.mrb[85].mxu0 }
 0x6c0   :  { %v4285_v19 = vpop.f32.mrb[86].mxu0 }
 0x6c1   :  { %v4381_v28 = vadd.f32 %v9320_v37, %v4349_v26  ;;  %v4350_v29 = vmul.f32 %v9314_v34, %v4285_v19  ;;  %v6305_v30 = vpop.f32.mrb[87].mxu0 }
 0x6c3   :  { %v4406_v31 = vmax.f32 %v4381_v28, 0.0  ;;  %v4382_v32 = vadd.f32 %v9320_v37, %v4350_v29 }
 0x6c5   :  { %v4407_v33 = vmax.f32 %v4382_v32, 0.0 }
 0x6c6   :  { %v4290_v35 = vpop.f32.mrb[88].mxu0 }
 0x6c7   :  { %v9427_v36 = vpack.c.bf16 %v4407_v33, %v4406_v31  ;;  %v4351_v24 = vmul.f32 %v9314_v34, %v4290_v35  ;;  %v6308_v38 = vpop.f32.mrb[89].mxu0 }
 0x6c8   :  { %v4293_v39 = vpop.f32.mrb[90].mxu0 }
 0x6c9   :  { %v4383_v40 = vadd.f32 %v9320_v37, %v4351_v24  ;;  %v4352_v1 = vmul.f32 %v9314_v34, %v4293_v39  ;;  %v6309_v41 = vpop.f32.mrb[91].mxu0 }
 0x6cb   :  { %v4408_v42 = vmax.f32 %v4383_v40, 0.0  ;;  %v4384_v43 = vadd.f32 %v9320_v37, %v4352_v1 }
 0x6cd   :  { %v4409_v44 = vmax.f32 %v4384_v43, 0.0 }
 0x6ce   :  { %v4298_v45 = vpop.f32.mrb[92].mxu0 }
 0x6cf   :  { %v9433_v47 = vpack.c.bf16 %v4409_v44, %v4408_v42  ;;  %v4353_v48 = vmul.f32 %v9314_v34, %v4298_v45  ;;  %v6312_v49 = vpop.f32.mrb[93].mxu0 }
 0x6d0   :  { %v4301_v50 = vpop.f32.mrb[94].mxu0 }
 0x6d1   :  { %v4385_v52 = vadd.f32 %v9320_v37, %v4353_v48  ;;  %v4354_v53 = vmul.f32 %v9314_v34, %v4301_v50  ;;  %v6313_v54 = vpop.f32.mrb[95].mxu0 }
 0x6d3   :  { %v4410_v56 = vmax.f32 %v4385_v52, 0.0  ;;  %v4386_v57 = vadd.f32 %v9320_v37, %v4354_v53 }
 0x6d5   :  { %v4411_v58 = vmax.f32 %v4386_v57, 0.0 }
 0x6d7   :  { %v9439_v59 = vpack.c.bf16 %v4411_v58, %v4410_v56 }
 0x6dd   :  { %v4306_v60 = vpop.f32.mrb[96].mxu0 }
 0x6de   :  { %v4355_v62 = vmul.f32 %v9314_v34, %v4306_v60  ;;  %v6316_v0 = vpop.f32.mrb[97].mxu0 }
 0x6df   :  { %v4309_v3 = vpop.f32.mrb[98].mxu0 }
 0x6e0   :  { %v4387_v6 = vadd.f32 %v9320_v37, %v4355_v62  ;;  %v4356_v46 = vmul.f32 %v9314_v34, %v4309_v3  ;;  %v6317_v7 = vpop.f32.mrb[99].mxu0 }
 0x6e2   :  { %v4412_v8 = vmax.f32 %v4387_v6, 0.0  ;;  %v4388_v10 = vadd.f32 %v9320_v37, %v4356_v46 }
 0x6e4   :  { %v4413_v11 = vmax.f32 %v4388_v10, 0.0 }
 0x6e6   :  { %v9445_v13 = vpack.c.bf16 %v4413_v11, %v4412_v8 }
 0x6f5   :  { %v2699_v14 = vpop.permute.xlu1 %2698  ;;  %v4314_v61 = vpop.f32.mrb[100].mxu0 }
 0x6f6   :  { %v2578_v9 = vpop.permute.xlu0 %2577  ;;  %v4357_v15 = vmul.f32 %v9314_v34, %v4314_v61  ;;  %v6320_v16 = vpop.f32.mrb[101].mxu0  ;;  %v4427_v61 = vld [vmem:[%s10081_s29 + $0x50] sm:$0xff] }
 0x6f7   :  { %2589 = vst.msk [vmem:[#allocation6] sm:$0xff] %vm1892_vm15, %v2578_v9  ;;  %v4317_v17 = vpop.f32.mrb[102].mxu0  ;;  %v4418_v9 = vld [vmem:[%s10081_s29 + $0x8] sm:$0xff]  ;;  %v4429_v16 = vld [vmem:[%s10081_s29 + $0x60] sm:$0xff] }
 0x6f8   :  { %v4389_v20 = vadd.f32 %v9320_v37, %v4357_v15  ;;  %v4358_v21 = vmul.f32 %v9314_v34, %v4317_v17  ;;  %v6321_v23 = vpop.f32.mrb[103].mxu0  ;;  %v4430_v15 = vld [vmem:[%s10081_s29 + $0x68] sm:$0xff]  ;;  %v4432_v17 = vld [vmem:[%s10081_s29 + $0x78] sm:$0xff] }
 0x6f9   :  { %v2602_v18 = vpop.permute.xlu1 %2601  ;;  %v5976_v23 = vld [vmem:[%s9978_s9] ss:$0 sm:$0xff] }
 0x6fa   :  { %2613 = vst.msk [vmem:[#allocation6] sm:$0xff] %vm1948_vm12, %v2602_v18  ;;  %v2626_v26 = vpop.permute.xlu0 %2625  ;;  %v4414_v27 = vmax.f32 %v4389_v20, 0.0  ;;  %v4390_v19 = vadd.f32 %v9320_v37, %v4358_v21  ;;  %v4431_v18 = vld [vmem:[%s10081_s29 + $0x70] sm:$0xff]  ;;  %v4434_v20 = vld [vmem:[%s10081_s29 + $0x88] sm:$0xff]  ;;  %v4433_v21 = vld [vmem:[%s10081_s29 + $0x80] sm:$0xff] }
 0x6fb   :  { %2637 = vst.msk [vmem:[#allocation6] sm:$0xff] %vm10171_vm2, %v2626_v26  ;;  %vm10179_vm2 = vmmov %vm10173_vm6 }
 0x6fc   :  { %v4415_v29 = vmax.f32 %v4390_v19, 0.0 }
 0x6fd   :  { %v2651_v28 = vpop.permute.xlu1 %2650  ;;  %v9455_v31 = vpop.f32.mrb[104].mxu0 }
 0x6fe   :  { %2662 = vst.msk [vmem:[#allocation6] sm:$0xff] %vm10172_vm1, %v2651_v28  ;;  %v2703_v30 = vpop.permute.xlu0 %2702  ;;  %v9457_v32 = vpack.c.bf16 %v4415_v29, %v4414_v27  ;;  %v6324_v33 = vpop.f32.mrb[105].mxu0  ;;  %vm10180_vm1 = vmmov %vm10179_vm2  ;;  %v5977_v28 = vld [vmem:[%s9979_s10] ss:$0 sm:$0xff] }
 0x6ff   :  { %v4325_v35 = vpop.f32.mrb[106].mxu0 }
 0x700   :  { %v6325_v38 = vpop.f32.mrb[107].mxu0 }
 0x701   :  { %v2676_v24 = vpop.permute.xlu1 %2675 }
 0x702   :  { %2687 = vst.msk [vmem:[#allocation6] sm:$0xff] %vm10173_vm6, %v2676_v24  ;;  %v2721_v39 = vpop.permute.xlu0 %2720  ;;  %vm10181_vm6 = vmmov %vm10174_vm7 }
 0x703   :  { %2707 = vst.msk [vmem:[#allocation6] sm:$0xff] %vm10174_vm7, %v2699_v14  ;;  %vm10182_vm7 = vcmask 523712  }
 0x705   :  { %v2584_v40 = vpop.permute.xlu1 %2583 }
 0x706   :  { %2592 = vst.msk [vmem:[#allocation6 + $0x18] sm:$0x7f] %vm1901_vm14, %v2584_v40  ;;  %v2582_v1 = vpop.permute.xlu0 %2581 }
 0x707   :  { %2591 = vst.msk [vmem:[#allocation6 + $0x10] sm:$0xff] %vm1892_vm15, %v2582_v1 }
 0x709   :  { %v2608_v41 = vpop.permute.xlu1 %2607 }
 0x70a   :  { %2616 = vst.msk [vmem:[#allocation6 + $0x18] sm:$0x3f] %vm1957_vm11, %v2608_v41  ;;  %v2604_v42 = vpop.permute.xlu0 %2603 }
 0x70d   :  { %v2632_v43 = vpop.permute.xlu1 %2631 }
 0x70e   :  { %2641 = vst.msk [vmem:[#allocation6 + $0x18] sm:$0xf] %vm2640_vm4, %v2632_v43  ;;  %v2630_v44 = vpop.permute.xlu0 %2629 }
 0x711   :  { %v2657_v45 = vpop.permute.xlu1 %2656 }
 0x712   :  { %2666 = vst.msk [vmem:[#allocation6 + $0x18] sm:$0x7] %vm2665_vm10, %v2657_v45  ;;  %v2653_v48 = vpop.permute.xlu0 %2652 }
 0x715   :  { %v2580_v49 = vpop.permute.xlu1 %2579 }
 0x716   :  { %2590 = vst.msk [vmem:[#allocation6 + $0x8] sm:$0xff] %vm1892_vm15, %v2580_v49  ;;  %v2655_v50 = vpop.permute.xlu0 %2654 }
 0x717   :  { %2614 = vst.msk [vmem:[#allocation6 + $0x8] sm:$0xff] %vm1948_vm12, %v2604_v42 }
 0x719   :  { %v2606_v52 = vpop.permute.xlu1 %2605 }
 0x71a   :  { %2615 = vst.msk [vmem:[#allocation6 + $0x10] sm:$0xff] %vm1948_vm12, %v2606_v52  ;;  %v2678_v53 = vpop.permute.xlu0 %2677 }
 0x71b   :  { %2639 = vst.msk [vmem:[#allocation6 + $0x10] sm:$0xff] %vm10175_vm8, %v2630_v44  ;;  %vm10183_vm8 = vmmov %vm10181_vm6 }
 0x71c   :  { %2664 = vst.msk [vmem:[#allocation6 + $0x10] sm:$0xff] %vm10176_vm13, %v2655_v50  ;;  %vm10184_vm13 = vcmask 589312  }
 0x71d   :  { %v2628_v54 = vpop.permute.xlu1 %2627 }
 0x71e   :  { %2638 = vst.msk [vmem:[#allocation6 + $0x8] sm:$0xff] %vm10177_vm5, %v2628_v54  ;;  %v2680_v56 = vpop.permute.xlu0 %2679  ;;  %vm10185_vm5 = vmmov %vm10182_vm7 }
 0x71f   :  { %2663 = vst.msk [vmem:[#allocation6 + $0x8] sm:$0xff] %vm10178_vm9, %v2653_v48  ;;  %vm10051_vm9 = vcmask 386368  }
 0x720   :  { %2689 = vst.msk [vmem:[#allocation6 + $0x10] sm:$0xff] %vm10179_vm2, %v2680_v56  ;;  %vm10186_vm2 = vmmov %vm10184_vm13 }
 0x721   :  { %2688 = vst.msk [vmem:[#allocation6 + $0x8] sm:$0xff] %vm10180_vm1, %v2678_v53  ;;  %v2717_v57 = vpop.permute.xlu1 %2716  ;;  %vm10050_vm1 = vcmask 587264  }
 0x722   :  { %2709 = vst.msk [vmem:[#allocation6 + $0x10] sm:$0xff] %vm10181_vm6, %v2703_v30  ;;  %v2701_v58 = vpop.permute.xlu0 %2700  ;;  %vm10187_vm6 = vcmask 588800  }
 0x723   :  { %2728 = vst.msk [vmem:[#allocation6 + $0x10] sm:$0x7f] %vm2727_vm0, %v2721_v39 }
 0x724   :  { %2725 = vst.msk [vmem:[#allocation6] sm:$0xff] %vm10182_vm7, %v2717_v57  ;;  %vm10188_vm7 = vmmov %vm10187_vm6 }
 0x725   :  { %2708 = vst.msk [vmem:[#allocation6 + $0x8] sm:$0xff] %vm10183_vm8, %v2701_v58  ;;  %v2736_v60 = vpop.permute.xlu1 %2735  ;;  %vm10189_vm8 = vmmov %vm10187_vm6 }
 0x726   :  { %2744 = vst.msk [vmem:[#allocation6] sm:$0xff] %vm10184_vm13, %v2736_v60  ;;  %v2719_v62 = vpop.permute.xlu0 %2718  ;;  %vm10190_vm13 = vmmov %vm10187_vm6 }
 0x727   :  { %2726 = vst.msk [vmem:[#allocation6 + $0x8] sm:$0xff] %vm10185_vm5, %v2719_v62  ;;  %vm10191_vm5 = vmmov %vm10187_vm6 }
 0x729   :  { %v2682_v0 = vpop.permute.xlu1 %2681 }
 0x72a   :  { %2691 = vst.msk [vmem:[#allocation6 + $0x18] sm:$0x3] %vm10051_vm9, %v2682_v0  ;;  %v2738_v3 = vpop.permute.xlu0 %2737 }
 0x72b   :  { %2745 = vst.msk [vmem:[#allocation6 + $0x8] sm:$0xff] %vm10186_vm2, %v2738_v3  ;;  %vm10192_vm2 = vmmov %vm10191_vm5 }
 0x72d   :  { %v2748_v46 = vld [vmem:[#allocation6] sm:$0xff] }
 0x72e   :  { %v2740_v6 = vpop.permute.xlu0 %2739 }
 0x72f   :  { %2747 = vst.msk [vmem:[#allocation6 + $0x10] sm:$0x3f] %vm10050_vm1, %v2740_v6  ;;  %vm10234_vm1 = vcmask 523712  }
 0x731   :  { %v2751_v11 = vld [vmem:[#allocation6 + $0x18] sm:$0xff] }
 0x732   :  { %v2749_v7 = vld [vmem:[#allocation6 + $0x8] sm:$0xff] }
 0x733   :  { %v2752_v8 = vpack.c.bf16 %v2749_v7, %v2748_v46 }
 0x735   :  { %6264 = vmatprep.mubr.msk.bf16.mxu1 %vm10187_vm6, %v2752_v8  ;;  %vm10193_vm6 = vmmov %vm10192_vm2  ;;  %v6577_v8 = vld [vmem:[%s9980_s14] sm:$0xff]  }
 0x736   :  { %v2750_v10 = vld [vmem:[#allocation6 + $0x10] sm:$0xff] }
 0x737   :  { %v2753_v14 = vpack.c.bf16 %v2751_v11, %v2750_v10 }
 0x739   :  { %6265 = vmatmul.mubr.msk.bf16.vlgmr.msra.gmra.mrb[40].mxu1 %vm10188_vm7, %v2753_v14  ;;  %vm10194_vm7 = vmmov %vm10192_vm2 }
 0x73a   :  { %6480 = vmatpush1.bf16.msra.mxu1 %v9335_v51  ;;  %5996 = vmatprep.mubr.msk.f32.mxu1 %vm10189_vm8, %v4418_v9  ;;  %v4359_v51 = vmul.f32 %v9314_v34, %v9455_v31  ;;  %v4420_v34 = vld [vmem:[%s10081_s29 + $0x18] sm:$0xff]  ;;  %vm10195_vm8 = vmmov %vm10192_vm2 }
 0x73b   :  { %6481 = vmatprep.subr.bf16.mxu1 %v6597_v5 }
 0x73e   :  { %6483 = vmatpush1.bf16.msra.mxu1 %v9348_v4  ;;  %v4391_v4 = vadd.f32 %v9320_v37, %v4359_v51  ;;  %v4419_v37 = vld [vmem:[%s10081_s29 + $0x10] sm:$0xff] }
 0x73f   :  { %6484 = vmatprep.subr.bf16.mxu1 %v6597_v5 }
 0x742   :  { %6486 = vmatpush1.bf16.msra.mxu1 %v9361_v22  ;;  %v4416_v22 = vmax.f32 %v4391_v4, 0.0  ;;  %v6578_v4 = vld [vmem:[%s9980_s14 + $0x8] sm:$0xff]  }
 0x743   :  { %6487 = vmatprep.subr.bf16.mxu1 %v6597_v5 }
 0x746   :  { %6489 = vmatpush1.bf16.msra.mxu1 %v9374_v63  ;;  %v4417_v63 = vld [vmem:[%s10081_s29] sm:$0xff] }
 0x747   :  { %6490 = vmatprep.subr.bf16.mxu1 %v6597_v5 }
 0x74a   :  { %6492 = vmatpush1.bf16.msra.mxu1 %v9390_v55  ;;  %v4422_v55 = vld [vmem:[%s10081_s29 + $0x28] sm:$0xff] }
 0x74b   :  { %6493 = vmatprep.subr.bf16.mxu1 %v6597_v5 }
 0x74e   :  { %6495 = vmatpush1.bf16.msra.mxu1 %v9411_v12  ;;  %v4421_v12 = vld [vmem:[%s10081_s29 + $0x20] sm:$0xff] }
 0x74f   :  { %6496 = vmatprep.subr.bf16.mxu1 %v6597_v5 }
 0x752   :  { %6498 = vmatpush1.bf16.msra.mxu1 %v9421_v25  ;;  %v4424_v25 = vld [vmem:[%s10081_s29 + $0x38] sm:$0xff] }
 0x753   :  { %6499 = vmatprep.subr.bf16.mxu1 %v6597_v5 }
 0x756   :  { %6501 = vmatpush1.bf16.msra.mxu1 %v9427_v36  ;;  %v4423_v36 = vld [vmem:[%s10081_s29 + $0x30] sm:$0xff] }
 0x757   :  { %6502 = vmatprep.subr.bf16.mxu1 %v6597_v5 }
 0x75a   :  { %6504 = vmatpush1.bf16.msra.mxu1 %v9433_v47  ;;  %v4426_v47 = vld [vmem:[%s10081_s29 + $0x48] sm:$0xff] }
 0x75b   :  { %6505 = vmatprep.subr.bf16.mxu1 %v6597_v5 }
 0x75e   :  { %6507 = vmatpush1.bf16.msra.mxu1 %v9439_v59  ;;  %v4425_v59 = vld [vmem:[%s10081_s29 + $0x40] sm:$0xff] }
 0x75f   :  { %6508 = vmatprep.subr.bf16.mxu1 %v6597_v5 }
 0x762   :  { %6510 = vmatpush1.bf16.msra.mxu1 %v9445_v13  ;;  %v4428_v13 = vld [vmem:[%s10081_s29 + $0x58] sm:$0xff]  ;;  %s10305_s29 = sld [smem:[#allocation28_spill]] }
 0x763   :  { %6511 = vmatprep.subr.bf16.mxu1 %v6597_v5 }
 0x766   :  { %6513 = vmatpush1.bf16.msra.mxu1 %v9457_v32 }
 0x767   :  { %4510 = vmatprep.subr.mxu1 %v6587_v2 }
 0x76a   :  { %4511 = vmatpush1.msra.mxu1 %v4416_v22 }
 0x76b   :  { %4527 = vmatmul.mubr.f32.vlgmr.msra.gmra.mrb[18].mxu1 %v4417_v63  ;;  %6326 = vmatprep.subr.bf16.mxu1 %v6587_v2 }
 0x76c   :  { %5997 = vmatprep.mubr.msk.f32.mxu1 %vm10190_vm13, %v4420_v34  ;;  %vm10196_vm13 = vmmov %vm10192_vm2  ;;  %6327 = vmatpush3.bf16.msra.mxu1 %v6577_v8 }
 0x76d   :  { %6328 = vmatprep.subr.bf16.mxu1 %v6587_v2 }
 0x76f   :  { %4532 = vmatmul.mubr.f32.gmra.mrb[44].mxu1 %v4419_v37 }
 0x770   :  { %5998 = vmatprep.mubr.msk.f32.mxu1 %vm10191_vm5, %v4422_v55  ;;  %vm10197_vm5 = vmmov %vm10192_vm2  ;;  %6329 = vmatpush3.bf16.msra.mxu1 %v6578_v4  ;;  %v6579_v55 = vld [vmem:[%s9980_s14 + $0x10] sm:$0xff]  }
 0x771   :  { %6330 = vmatprep.subr.bf16.mxu1 %v6587_v2 }
 0x773   :  { %4537 = vmatmul.mubr.f32.gmra.mrb[46].mxu1 %v4421_v12 }
 0x774   :  { %5999 = vmatprep.mubr.msk.f32.mxu1 %vm10192_vm2, %v4424_v25  ;;  %vm10198_vm2 = vcmask 64512   ;;  %6331 = vmatpush3.bf16.msra.mxu1 %v6579_v55 }
 0x775   :  { %6332 = vmatprep.subr.bf16.mxu1 %v6587_v2 }
 0x777   :  { %4542 = vmatmul.mubr.f32.gmra.mrb[48].mxu1 %v4423_v36 }
 0x778   :  { %6000 = vmatprep.mubr.msk.f32.mxu1 %vm10193_vm6, %v4426_v47  ;;  %vm10199_vm6 = vmmov %vm10198_vm2 }
 0x77b   :  { %4547 = vmatmul.mubr.f32.gmra.mrb[50].mxu1 %v4425_v59  ;;  %v6580_v59 = vld [vmem:[%s9980_s14 + $0x18] sm:$0xff]  }
 0x77c   :  { %6001 = vmatprep.mubr.msk.f32.mxu1 %vm10194_vm7, %v4428_v13  ;;  %vm10200_vm7 = vmmov %vm10198_vm2  ;;  %6333 = vmatpush3.bf16.msra.mxu1 %v6580_v59 }
 0x77d   :  { %6334 = vmatprep.subr.bf16.mxu1 %v6587_v2 }
 0x77f   :  { %4552 = vmatmul.mubr.f32.gmra.mrb[52].mxu1 %v4427_v61 }
 0x780   :  { %6002 = vmatprep.mubr.msk.f32.mxu1 %vm10195_vm8, %v4430_v15  ;;  %vm10201_vm8 = vmmov %vm10198_vm2 }
 0x783   :  { %4557 = vmatmul.mubr.f32.gmra.mrb[54].mxu1 %v4429_v16  ;;  %v6581_v16 = vld [vmem:[%s9980_s14 + $0x20] ss:$0 sps:$4 sm:$0xff]  }
 0x784   :  { %6003 = vmatprep.mubr.msk.f32.mxu1 %vm10196_vm13, %v4432_v17  ;;  %vm10202_vm13 = vmmov %vm10198_vm2 }
 0x787   :  { %4562 = vmatmul.mubr.f32.gmra.mrb[56].mxu1 %v4431_v18 }
 0x788   :  { %6004 = vmatprep.mubr.msk.f32.mxu1 %vm10197_vm5, %v4434_v20  ;;  %vm10203_vm5 = vmmov %vm10198_vm2 }
 0x78b   :  { %4567 = vmatmul.mubr.f32.gmra.mrb[58].mxu1 %v4433_v21 }
 0x78c   :  { %6336 = vmatprep.mubr.msk.bf16.mxu1 %vm6595_vm3, %v6587_v2 }
 0x80c   :  { %v6266_v26 = vpop.f32.mrb[40].mxu1 }
 0x80d   :  { %v2857_v27 = vmul.f32 %v6266_v26, %v5976_v23  ;;  %v2833_v19 = vpop.f32.mrb[41].mxu1 }
 0x80e   :  { %v2855_v29 = vmul.f32 %v5976_v23, %v2833_v19  ;;  %v6267_v30 = vpop.f32.mrb[42].mxu1 }
 0x80f   :  { %v2858_v31 = vmul.f32 %v6267_v30, %v5976_v23  ;;  %v2836_v32 = vpop.f32.mrb[43].mxu1  ;;  %v9585_v35 = vadd.f32 %v5977_v28, %v2857_v27 }
 0x810   :  { %v2856_v33 = vmul.f32 %v5976_v23, %v2836_v32  ;;  %v9589_v38 = vadd.f32 %v5977_v28, %v2855_v29 }
 0x811   :  { %v9587_v24 = vadd.f32 %v5977_v28, %v2858_v31 }
 0x812   :  { %v9591_v39 = vadd.f32 %v5977_v28, %v2856_v33 }
 0x813   :  { %v6540_v40 = vpack.c.bf16 %v9587_v24, %v9585_v35  ;;  %v6032_v24 = vld [vmem:[%s10305_s29] ss:$0 sm:$0xff] }
 0x814   :  { %v6537_v1 = vpack.c.bf16 %v9591_v39, %v9589_v38 }
 0x83e   :  { %v4528_v41 = vpop.f32.mrb[18].mxu1 }
 0x83f   :  { %4572 = vst.msk [vmem:[#allocation8] sm:$0xff] %vm10198_vm2, %v4528_v41  ;;  %v4530_v42 = vpop.f32.mrb[19].mxu1 }
 0x842   :  { %v4533_v43 = vpop.f32.mrb[44].mxu1 }
 0x843   :  { %4573 = vst.msk [vmem:[#allocation8 + $0x8] sm:$0xff] %vm10199_vm6, %v4533_v43  ;;  %v4535_v44 = vpop.f32.mrb[45].mxu1  ;;  %vm10204_vm6 = vmmov %vm10198_vm2 }
 0x846   :  { %v4538_v45 = vpop.f32.mrb[46].mxu1  ;;  %v4590_v48 = vld [vmem:[#allocation8] sm:$0xff] }
 0x847   :  { %4574 = vst.msk [vmem:[#allocation8 + $0x10] sm:$0xff] %vm10200_vm7, %v4538_v45  ;;  %v4540_v49 = vpop.f32.mrb[47].mxu1  ;;  %vm10205_vm7 = vmmov %vm10198_vm2 }
 0x848   :  { %4599 = vst.msk [vmem:[#allocation9] sm:$0xff] %vm10201_vm8, %v4590_v48  ;;  %vm10206_vm8 = vmmov %vm10198_vm2 }
 0x84a   :  { %v4543_v50 = vpop.f32.mrb[48].mxu1  ;;  %v4608_v52 = vld [vmem:[#allocation8 + $0x1] sm:$0xff] }
 0x84b   :  { %4575 = vst.msk [vmem:[#allocation8 + $0x18] sm:$0xff] %vm10202_vm13, %v4543_v50  ;;  %4626 = vrot.lane.b32.xlu1 %v4608_v52, %s10074_s2  ;;  %v4545_v53 = vpop.f32.mrb[49].mxu1  ;;  %v4824_v54 = vld [vmem:[#allocation8 + $0x8] sm:$0xff]  ;;  %vm10207_vm13 = vmmov %vm10198_vm2 }
 0x84c   :  { %4600 = vst.msk [vmem:[#allocation9 + $0x8] sm:$0xff] %vm10203_vm5, %v4824_v54  ;;  %v4662_v56 = vld [vmem:[#allocation8 + $0x2] sm:$0xff]  ;;  %vm10208_vm5 = vmmov %vm10198_vm2 }
 0x84d   :  { %v4716_v0 = vld [vmem:[#allocation8 + $0x6] sm:$0xff] }
 0x84e   :  { %v4609_v57 = vld [vmem:[#allocation8 + $0x9] sm:$0xff]  ;;  %v4548_v58 = vpop.f32.mrb[50].mxu1 }
 0x84f   :  { %4680 = vrot.lane.b32.xlu1 %v4662_v56, %s10071_s12  ;;  %4628 = vrot.lane.b32.xlu0 %v4609_v57, %s10074_s2  ;;  %4576 = vst.msk [vmem:[#allocation8 + $0x20] sm:$0xff] %vm10198_vm2, %v4548_v58  ;;  %v4825_v60 = vld [vmem:[#allocation8 + $0x10] sm:$0xff]  ;;  %v4550_v62 = vpop.f32.mrb[51].mxu1  ;;  %v4770_v10 = vld [vmem:[#allocation8 + $0x7] sm:$0xff] }
 0x850   :  { %4601 = vst.msk [vmem:[#allocation9 + $0x10] sm:$0xff] %vm10204_vm6, %v4825_v60  ;;  %v4663_v3 = vld [vmem:[#allocation8 + $0xa] sm:$0xff]  ;;  %vm10209_vm6 = vmmov %vm10198_vm2 }
 0x851   :  { %v4717_v11 = vld [vmem:[#allocation8 + $0xe] sm:$0xff] }
 0x852   :  { %v4553_v6 = vpop.f32.mrb[52].mxu1  ;;  %v9611_v7 = vld [vmem:[#allocation8 + $0x18] sm:$0xff]  ;;  %v4771_v22 = vld [vmem:[#allocation8 + $0xf] sm:$0xff] }
 0x853   :  { %4734 = vrot.lane.b32.xlu1 %v4716_v0, %s10073_s11  ;;  %4682 = vrot.lane.b32.xlu0 %v4663_v3, %s10071_s12  ;;  %4577 = vst.msk [vmem:[#allocation8 + $0x28] sm:$0xff] %vm10205_vm7, %v4553_v6  ;;  %v4555_v46 = vpop.f32.mrb[53].mxu1  ;;  %v4872_v12 = vld [vmem:[#allocation8 + $0xc] sm:$0xff]  ;;  %vm10210_vm7 = vmmov %vm10198_vm2  ;;  %v4873_v61 = vld [vmem:[#allocation8 + $0x14] sm:$0xff] }
 0x854   :  { %4602 = vst.msk [vmem:[#allocation9 + $0x18] sm:$0xff] %vm10206_vm8, %v9611_v7  ;;  %vm10211_vm8 = vmmov %vm10198_vm2  ;;  %v4920_v13 = vld [vmem:[#allocation8 + $0xd] sm:$0xff]  ;;  %v4921_v17 = vld [vmem:[#allocation8 + $0x15] sm:$0xff] }
 0x855   :  { %v4969_v21 = vld [vmem:[#allocation8 + $0x16] sm:$0xff] }
 0x856   :  { %v4558_v14 = vpop.f32.mrb[54].mxu1  ;;  %v9621_v9 = vld [vmem:[#allocation8 + $0x20] sm:$0xff]  ;;  %v4610_v23 = vld [vmem:[#allocation8 + $0x11] sm:$0xff] }
 0x857   :  { %4788 = vrot.lane.b32.xlu1 %v4770_v10, %s10076_s27  ;;  %4736 = vrot.lane.b32.xlu0 %v4717_v11, %s10073_s11  ;;  %4578 = vst.msk [vmem:[#allocation8 + $0x30] sm:$0xff] %vm10207_vm13, %v4558_v14  ;;  %v4560_v51 = vpop.f32.mrb[55].mxu1  ;;  %vm10212_vm13 = vmmov %vm10198_vm2  ;;  %v4664_v26 = vld [vmem:[#allocation8 + $0x12] sm:$0xff]  ;;  %v4665_v19 = vld [vmem:[#allocation8 + $0x1a] sm:$0xff] }
 0x858   :  { %4603 = vst.msk [vmem:[#allocation9 + $0x20] sm:$0xff] %vm10208_vm5, %v9621_v9  ;;  %vm10213_vm5 = vcmask 1043456   ;;  %v4611_v27 = vld [vmem:[#allocation8 + $0x19] sm:$0xff] }
 0x859   :  { %v5082_v18 = vsel %vm10213_vm5, %v6581_v16, 0  ;;  %v4772_v28 = vld [vmem:[#allocation8 + $0x17] sm:$0xff]  ;;  %v4773_v30 = vld [vmem:[#allocation8 + $0x1f] sm:$0xff] }
 0x85a   :  { %v4563_v63 = vpop.f32.mrb[56].mxu1  ;;  %v9632_v37 = vld [vmem:[#allocation8 + $0x28] sm:$0xff]  ;;  %6335 = vmatpush3.bf16.msra.mxu1 %v5082_v18  ;;  %v4719_v29 = vld [vmem:[#allocation8 + $0x1e] sm:$0xff] }
 0x85b   :  { %4840 = vrot.lane.b32.xlu1 %v4824_v54, %s10166_s13  ;;  %4790 = vrot.lane.b32.xlu0 %v4771_v22, %s10076_s27  ;;  %4579 = vst.msk [vmem:[#allocation8 + $0x38] sm:$0xff] %vm10198_vm2, %v4563_v63  ;;  %v4565_v34 = vpop.f32.mrb[57].mxu1  ;;  %v4874_v31 = vld [vmem:[#allocation8 + $0x1c] sm:$0xff]  ;;  %v4875_v33 = vld [vmem:[#allocation8 + $0x24] sm:$0xff] }
 0x85c   :  { %4604 = vst.msk [vmem:[#allocation9 + $0x28] sm:$0xff] %vm10209_vm6, %v9632_v37  ;;  %6530 = vmatprep.subr.bf16.mxu1 %v6597_v5  ;;  %v4922_v32 = vld [vmem:[#allocation8 + $0x1d] sm:$0xff]  ;;  %v4923_v41 = vld [vmem:[#allocation8 + $0x25] sm:$0xff]  ;;  %vm10214_vm6 = vcmask 261312  }
 0x85d   :  { %v4971_v42 = vld [vmem:[#allocation8 + $0x26] sm:$0xff] }
 0x85e   :  { %v4568_v25 = vpop.f32.mrb[58].mxu1  ;;  %v9643_v36 = vld [vmem:[#allocation8 + $0x30] sm:$0xff]  ;;  %v4612_v43 = vld [vmem:[#allocation8 + $0x21] sm:$0xff] }
 0x85f   :  { %4888 = vrot.lane.b32.xlu1 %v4872_v12, %s10160_s28  ;;  %4842 = vrot.lane.b32.xlu0 %v4825_v60, %s10166_s13  ;;  %4580 = vst.msk [vmem:[#allocation8 + $0x40] sm:$0xff] %vm10210_vm7, %v4568_v25  ;;  %v4570_v47 = vpop.f32.mrb[59].mxu1  ;;  %v4666_v44 = vld [vmem:[#allocation8 + $0x22] sm:$0xff]  ;;  %v4667_v48 = vld [vmem:[#allocation8 + $0x2a] sm:$0xff]  ;;  %vm10215_vm7 = vcmask 326912  }
 0x860   :  { %4605 = vst.msk [vmem:[#allocation9 + $0x30] sm:$0xff] %vm10211_vm8, %v9643_v36  ;;  %v4613_v45 = vld [vmem:[#allocation8 + $0x29] sm:$0xff]  ;;  %vm10216_vm8 = vmmov %vm10214_vm6 }
 0x861   :  { %v4774_v49 = vld [vmem:[#allocation8 + $0x27] sm:$0xff]  ;;  %v4775_v52 = vld [vmem:[#allocation8 + $0x2f] sm:$0xff]  ;;  %vm10218_vm5 = vmmov %vm10215_vm7 }
 0x862   :  { %v9653_v15 = vld [vmem:[#allocation8 + $0x38] sm:$0xff]  ;;  %v4721_v50 = vld [vmem:[#allocation8 + $0x2e] sm:$0xff] }
 0x863   :  { %4936 = vrot.lane.b32.xlu1 %v4920_v13, %s10167_s26  ;;  %4890 = vrot.lane.b32.xlu0 %v4873_v61, %s10160_s28  ;;  %4606 = vst.msk [vmem:[#allocation9 + $0x38] sm:$0xff] %vm10212_vm13, %v9653_v15  ;;  %v4876_v53 = vld [vmem:[#allocation8 + $0x2c] sm:$0xff]  ;;  %v4877_v56 = vld [vmem:[#allocation8 + $0x34] sm:$0xff]  ;;  %vm10217_vm13 = vcmask 392512  }
 0x864   :  { %v4924_v54 = vld [vmem:[#allocation8 + $0x2d] sm:$0xff]  ;;  %v4925_v57 = vld [vmem:[#allocation8 + $0x35] sm:$0xff] }
 0x865   :  { %v4973_v58 = vld [vmem:[#allocation8 + $0x36] sm:$0xff] }
 0x866   :  { %v9664_v20 = vld [vmem:[#allocation8 + $0x40] sm:$0xff]  ;;  %v4614_v60 = vld [vmem:[#allocation8 + $0x31] sm:$0xff] }
 0x867   :  { %4984 = vrot.lane.b32.xlu1 %v4717_v11, %s10168_s1  ;;  %4938 = vrot.lane.b32.xlu0 %v4921_v17, %s10167_s26  ;;  %4607 = vst.msk [vmem:[#allocation9 + $0x40] sm:$0xff] %vm10198_vm2, %v9664_v20  ;;  %v4668_v62 = vld [vmem:[#allocation8 + $0x32] sm:$0xff]  ;;  %v4669_v3 = vld [vmem:[#allocation8 + $0x3a] sm:$0xff]  ;;  %v4879_v51 = vld [vmem:[#allocation8 + $0x44] sm:$0xf]  ;;  %vm10219_vm2 = vcmask 458112  }
 0x868   :  { %v4615_v0 = vld [vmem:[#allocation8 + $0x39] sm:$0xff]  ;;  %v4927_v63 = vld [vmem:[#allocation8 + $0x45] sm:$0x7] }
 0x869   :  { %v4776_v6 = vld [vmem:[#allocation8 + $0x37] sm:$0xff]  ;;  %v4616_v55 = vld [vmem:[#allocation8 + $0x41] sm:$0x7f] }
 0x86a   :  { %v4723_v46 = vld [vmem:[#allocation8 + $0x3e] sm:$0xff]  ;;  %v4975_v12 = vld [vmem:[#allocation8 + $0x46] sm:$0x3] }
 0x86b   :  { %4986 = vrot.lane.b32.xlu0 %v4969_v21, %s10168_s1  ;;  %4630 = vrot.lane.b32.xlu1 %v4610_v23, %s10074_s2  ;;  %v4878_v10 = vld [vmem:[#allocation8 + $0x3c] sm:$0xff]  ;;  %v4724_v47 = vld [vmem:[#allocation8 + $0x46] sm:$0x3] }
 0x86c   :  { %v4670_v59 = vld [vmem:[#allocation8 + $0x42] sm:$0x3f] }
 0x86f   :  { %4684 = vrot.lane.b32.xlu1 %v4664_v26, %s10071_s12  ;;  %4632 = vrot.lane.b32.xlu0 %v4611_v27, %s10074_s2 }
 0x873   :  { %4738 = vrot.lane.b32.xlu1 %v4969_v21, %s10073_s11  ;;  %4686 = vrot.lane.b32.xlu0 %v4665_v19, %s10071_s12 }
 0x877   :  { %4792 = vrot.lane.b32.xlu1 %v4772_v28, %s10076_s27  ;;  %4740 = vrot.lane.b32.xlu0 %v4719_v29, %s10073_s11 }
 0x87b   :  { %4844 = vrot.lane.b32.xlu1 %v9611_v7, %s10166_s13  ;;  %4794 = vrot.lane.b32.xlu0 %v4773_v30, %s10076_s27  ;;  %v4777_v7 = vld [vmem:[#allocation8 + $0x3f] sm:$0xff] }
 0x87f   :  { %4892 = vrot.lane.b32.xlu1 %v4874_v31, %s10160_s28  ;;  %4846 = vrot.lane.b32.xlu0 %v9621_v9, %s10166_s13  ;;  %v4926_v9 = vld [vmem:[#allocation8 + $0x3d] sm:$0xff] }
 0x883   :  { %4940 = vrot.lane.b32.xlu1 %v4922_v32, %s10167_s26  ;;  %4894 = vrot.lane.b32.xlu0 %v4875_v33, %s10160_s28 }
 0x887   :  { %4988 = vrot.lane.b32.xlu1 %v4719_v29, %s10168_s1  ;;  %4942 = vrot.lane.b32.xlu0 %v4923_v41, %s10167_s26 }
 0x88b   :  { %4990 = vrot.lane.b32.xlu0 %v4971_v42, %s10168_s1  ;;  %4634 = vrot.lane.b32.xlu1 %v4612_v43, %s10074_s2 }
 0x88f   :  { %4688 = vrot.lane.b32.xlu1 %v4666_v44, %s10071_s12  ;;  %4636 = vrot.lane.b32.xlu0 %v4613_v45, %s10074_s2 }
 0x893   :  { %4742 = vrot.lane.b32.xlu1 %v4971_v42, %s10073_s11  ;;  %4690 = vrot.lane.b32.xlu0 %v4667_v48, %s10071_s12 }
 0x897   :  { %4796 = vrot.lane.b32.xlu1 %v4774_v49, %s10076_s27  ;;  %4744 = vrot.lane.b32.xlu0 %v4721_v50, %s10073_s11 }
 0x89b   :  { %4848 = vrot.lane.b32.xlu1 %v9632_v37, %s10166_s13  ;;  %4798 = vrot.lane.b32.xlu0 %v4775_v52, %s10076_s27 }
 0x89f   :  { %4896 = vrot.lane.b32.xlu1 %v4876_v53, %s10160_s28  ;;  %4850 = vrot.lane.b32.xlu0 %v9643_v36, %s10166_s13 }
 0x8a3   :  { %4944 = vrot.lane.b32.xlu1 %v4924_v54, %s10167_s26  ;;  %4898 = vrot.lane.b32.xlu0 %v4877_v56, %s10160_s28 }
 0x8a7   :  { %4992 = vrot.lane.b32.xlu1 %v4721_v50, %s10168_s1  ;;  %4946 = vrot.lane.b32.xlu0 %v4925_v57, %s10167_s26 }
 0x8ab   :  { %4994 = vrot.lane.b32.xlu0 %v4973_v58, %s10168_s1  ;;  %4638 = vrot.lane.b32.xlu1 %v4614_v60, %s10074_s2 }
 0x8af   :  { %4692 = vrot.lane.b32.xlu1 %v4668_v62, %s10071_s12  ;;  %4640 = vrot.lane.b32.xlu0 %v4615_v0, %s10074_s2 }
 0x8b3   :  { %4746 = vrot.lane.b32.xlu1 %v4973_v58, %s10073_s11  ;;  %4694 = vrot.lane.b32.xlu0 %v4669_v3, %s10071_s12 }
 0x8b7   :  { %4800 = vrot.lane.b32.xlu1 %v4776_v6, %s10076_s27  ;;  %4748 = vrot.lane.b32.xlu0 %v4723_v46, %s10073_s11 }
 0x8bb   :  { %4852 = vrot.lane.b32.xlu1 %v9653_v15, %s10166_s13  ;;  %4802 = vrot.lane.b32.xlu0 %v4777_v7, %s10076_s27  ;;  %v4778_v15 = vld [vmem:[#allocation8 + $0x47] sm:$0x1] }
 0x8bd   :  { %v4627_v8 = vpop.permute.xlu1 %4626 }
 0x8be   :  { %4653 = vst.msk [vmem:[#allocation9] sm:$0xff] %vm1892_vm15, %v4627_v8 }
 0x8bf   :  { %4900 = vrot.lane.b32.xlu1 %v4878_v10, %s10160_s28  ;;  %4854 = vrot.lane.b32.xlu0 %v9664_v20, %s10166_s13 }
 0x8c1   :  { %v4681_v11 = vpop.permute.xlu1 %4680  ;;  %v4629_v14 = vpop.permute.xlu0 %4628 }
 0x8c2   :  { %4707 = vst.msk [vmem:[#allocation9] sm:$0xff] %vm1948_vm12, %v4681_v11 }
 0x8c3   :  { %4654 = vst.msk [vmem:[#allocation9 + $0x8] sm:$0xff] %vm1892_vm15, %v4629_v14  ;;  %4948 = vrot.lane.b32.xlu1 %v4926_v9, %s10167_s26  ;;  %4902 = vrot.lane.b32.xlu0 %v4879_v51, %s10160_s28 }
 0x8c5   :  { %v4735_v4 = vpop.permute.xlu1 %4734  ;;  %v4683_v22 = vpop.permute.xlu0 %4682 }
 0x8c6   :  { %4761 = vst.msk [vmem:[#allocation9] sm:$0xff] %vm10214_vm6, %v4735_v4  ;;  %vm10220_vm6 = vmmov %vm10217_vm13 }
 0x8c7   :  { %4708 = vst.msk [vmem:[#allocation9 + $0x8] sm:$0xff] %vm1948_vm12, %v4683_v22  ;;  %4996 = vrot.lane.b32.xlu1 %v4723_v46, %s10168_s1  ;;  %4950 = vrot.lane.b32.xlu0 %v4927_v63, %s10167_s26 }
 0x8c9   :  { %v4789_v34 = vpop.permute.xlu1 %4788  ;;  %v4737_v37 = vpop.permute.xlu0 %4736 }
 0x8ca   :  { %4815 = vst.msk [vmem:[#allocation9] sm:$0xff] %vm10215_vm7, %v4789_v34  ;;  %vm10221_vm7 = vcmask 523712  }
 0x8cb   :  { %4762 = vst.msk [vmem:[#allocation9 + $0x8] sm:$0xff] %vm10216_vm8, %v4737_v37  ;;  %4642 = vrot.lane.b32.xlu1 %v4616_v55, %s10074_s2  ;;  %4998 = vrot.lane.b32.xlu0 %v4975_v12, %s10168_s1  ;;  %vm10222_vm8 = vmmov %vm10219_vm2 }
 0x8cd   :  { %v4841_v25 = vpop.permute.xlu1 %4840  ;;  %v4791_v36 = vpop.permute.xlu0 %4790 }
 0x8ce   :  { %4864 = vst.msk [vmem:[#allocation9] sm:$0xff] %vm10217_vm13, %v4841_v25  ;;  %vm10223_vm13 = vcmask 589312  }
 0x8cf   :  { %4816 = vst.msk [vmem:[#allocation9 + $0x8] sm:$0xff] %vm10218_vm5, %v4791_v36  ;;  %4750 = vrot.lane.b32.xlu1 %v4724_v47, %s10073_s11  ;;  %4696 = vrot.lane.b32.xlu0 %v4670_v59, %s10071_s12  ;;  %vm10224_vm5 = vmmov %vm10221_vm7 }
 0x8d1   :  { %v4889_v13 = vpop.permute.xlu1 %4888  ;;  %v4843_v61 = vpop.permute.xlu0 %4842 }
 0x8d2   :  { %4912 = vst.msk [vmem:[#allocation9] sm:$0xff] %vm10219_vm2, %v4889_v13  ;;  %vm10225_vm2 = vmmov %vm10223_vm13 }
 0x8d3   :  { %4865 = vst.msk [vmem:[#allocation9 + $0x8] sm:$0xff] %vm10220_vm6, %v4843_v61  ;;  %4804 = vrot.lane.b32.xlu0 %v4778_v15, %s10076_s27  ;;  %vm10226_vm6 = vcmask 261312  }
 0x8d5   :  { %v4937_v16 = vpop.permute.xlu1 %4936  ;;  %v4891_v17 = vpop.permute.xlu0 %4890 }
 0x8d6   :  { %4960 = vst.msk [vmem:[#allocation9] sm:$0xff] %vm10221_vm7, %v4937_v16  ;;  %vm10227_vm7 = vcmask 588800  }
 0x8d7   :  { %4913 = vst.msk [vmem:[#allocation9 + $0x8] sm:$0xff] %vm10222_vm8, %v4891_v17  ;;  %vm10228_vm8 = vcmask 326912  }
 0x8d9   :  { %v4985_v18 = vpop.permute.xlu1 %4984  ;;  %v4939_v20 = vpop.permute.xlu0 %4938 }
 0x8da   :  { %5008 = vst.msk [vmem:[#allocation9] sm:$0xff] %vm10223_vm13, %v4985_v18  ;;  %vm10229_vm13 = vmmov %vm10226_vm6 }
 0x8db   :  { %4961 = vst.msk [vmem:[#allocation9 + $0x8] sm:$0xff] %vm10224_vm5, %v4939_v20  ;;  %vm10230_vm5 = vcmask 392512  }
 0x8dd   :  { %v4987_v21 = vpop.permute.xlu0 %4986  ;;  %v4631_v23 = vpop.permute.xlu1 %4630 }
 0x8de   :  { %5009 = vst.msk [vmem:[#allocation9 + $0x8] sm:$0xff] %vm10225_vm2, %v4987_v21  ;;  %vm10231_vm2 = vmmov %vm10228_vm8 }
 0x8df   :  { %4655 = vst.msk [vmem:[#allocation9 + $0x10] sm:$0xff] %vm1892_vm15, %v4631_v23 }
 0x8e1   :  { %v4685_v26 = vpop.permute.xlu1 %4684  ;;  %v4633_v27 = vpop.permute.xlu0 %4632  ;;  %v5016_v29 = vld [vmem:[#allocation9] sm:$0xff] }
 0x8e2   :  { %4709 = vst.msk [vmem:[#allocation9 + $0x10] sm:$0xff] %vm1948_vm12, %v4685_v26 }
 0x8e3   :  { %4656 = vst.msk [vmem:[#allocation9 + $0x18] sm:$0xff] %vm1892_vm15, %v4633_v27 }
 0x8e5   :  { %v4739_v19 = vpop.permute.xlu1 %4738  ;;  %v4687_v28 = vpop.permute.xlu0 %4686  ;;  %v5017_v30 = vld [vmem:[#allocation9 + $0x8] sm:$0xff] }
 0x8e6   :  { %4763 = vst.msk [vmem:[#allocation9 + $0x10] sm:$0xff] %vm10226_vm6, %v4739_v19  ;;  %v5025_v31 = vpack.c.bf16 %v5017_v30, %v5016_v29  ;;  %vm10232_vm6 = vcmask 458112  }
 0x8e7   :  { %4710 = vst.msk [vmem:[#allocation9 + $0x18] sm:$0xff] %vm1948_vm12, %v4687_v28  ;;  %vm10235_vm9 = vmmov %vm10232_vm6 }
 0x8e8   :  { %6337 = vmatmul.mubr.msk.bf16.vlgmr.msra.gmra.mrb[60].mxu1 %vm10227_vm7, %v5025_v31  ;;  %vm10233_vm7 = vmmov %vm10230_vm5 }
 0x8e9   :  { %v4793_v32 = vpop.permute.xlu1 %4792  ;;  %v4741_v33 = vpop.permute.xlu0 %4740  ;;  %6340 = vmatprep.mubr.msk.bf16.mxu1 %vm6595_vm3, %v6587_v2 }
 0x8ea   :  { %4817 = vst.msk [vmem:[#allocation9 + $0x10] sm:$0xff] %vm10228_vm8, %v4793_v32  ;;  %vm10236_vm8 = vcmask 589312  }
 0x8eb   :  { %4764 = vst.msk [vmem:[#allocation9 + $0x18] sm:$0xff] %vm10229_vm13, %v4741_v33  ;;  %vm10237_vm13 = vmmov %vm10234_vm1 }
 0x8ed   :  { %v4845_v41 = vpop.permute.xlu1 %4844  ;;  %v4795_v42 = vpop.permute.xlu0 %4794 }
 0x8ee   :  { %4866 = vst.msk [vmem:[#allocation9 + $0x10] sm:$0xff] %vm10230_vm5, %v4845_v41  ;;  %vm10238_vm5 = vmmov %vm10236_vm8  ;;  %v5197_v41 = vld [vmem:[%s10096_s4] sm:$0xff] }
 0x8ef   :  { %4818 = vst.msk [vmem:[#allocation9 + $0x18] sm:$0xff] %vm10231_vm2, %v4795_v42  ;;  %v6015_v42 = vld [vmem:[%s9981_s15] ss:$0 sm:$0xff] }
 0x8f1   :  { %v4893_v43 = vpop.permute.xlu1 %4892  ;;  %v4847_v44 = vpop.permute.xlu0 %4846 }
 0x8f2   :  { %4914 = vst.msk [vmem:[#allocation9 + $0x10] sm:$0xff] %vm10232_vm6, %v4893_v43 }
 0x8f3   :  { %4867 = vst.msk [vmem:[#allocation9 + $0x18] sm:$0xff] %vm10233_vm7, %v4847_v44  ;;  %v6016_v44 = vld [vmem:[%s9982_s16] ss:$0 sm:$0xff]  ;;  %s10304_s16 = sld [smem:[#allocation27_spill]] }
 0x8f5   :  { %v4941_v45 = vpop.permute.xlu1 %4940  ;;  %v4895_v48 = vpop.permute.xlu0 %4894 }
 0x8f6   :  { %4962 = vst.msk [vmem:[#allocation9 + $0x10] sm:$0xff] %vm10234_vm1, %v4941_v45  ;;  %vm10240_vm1 = vcmask 588800  }
 0x8f7   :  { %4915 = vst.msk [vmem:[#allocation9 + $0x18] sm:$0xff] %vm10235_vm9, %v4895_v48  ;;  %vm10239_vm9 = vcmask 261312  }
 0x8f8   :  { %vm10241_vm6 = vmmov %vm10239_vm9 }
 0x8f9   :  { %v4989_v49 = vpop.permute.xlu1 %4988  ;;  %v4943_v50 = vpop.permute.xlu0 %4942  ;;  %v32_v35 = vstv %s10304_s16 }
 0x8fa   :  { %5010 = vst.msk [vmem:[#allocation9 + $0x10] sm:$0xff] %vm10236_vm8, %v4989_v49  ;;  %vm10242_vm8 = vmmov %vm10231_vm2 }
 0x8fb   :  { %4963 = vst.msk [vmem:[#allocation9 + $0x18] sm:$0xff] %vm10237_vm13, %v4943_v50  ;;  %vm10243_vm13 = vcmask 458112   ;;  %33 = vst [vmem:[#allocation12] sm:$0x1] %v32_v35 }
 0x8fd   :  { %v4991_v52 = vpop.permute.xlu0 %4990  ;;  %v4635_v53 = vpop.permute.xlu1 %4634 }
 0x8fe   :  { %5011 = vst.msk [vmem:[#allocation9 + $0x18] sm:$0xff] %vm10238_vm5, %v4991_v52  ;;  %vm10244_vm5 = vmmov %vm10233_vm7 }
 0x8ff   :  { %4657 = vst.msk [vmem:[#allocation9 + $0x20] sm:$0xff] %vm1892_vm15, %v4635_v53 }
 0x901   :  { %v4689_v54 = vpop.permute.xlu1 %4688  ;;  %v4637_v56 = vpop.permute.xlu0 %4636  ;;  %v5018_v60 = vld [vmem:[#allocation9 + $0x10] sm:$0xff] }
 0x902   :  { %4711 = vst.msk [vmem:[#allocation9 + $0x20] sm:$0xff] %vm1948_vm12, %v4689_v54 }
 0x903   :  { %4658 = vst.msk [vmem:[#allocation9 + $0x28] sm:$0xff] %vm1892_vm15, %v4637_v56 }
 0x905   :  { %v4743_v57 = vpop.permute.xlu1 %4742  ;;  %v4691_v58 = vpop.permute.xlu0 %4690  ;;  %v5019_v62 = vld [vmem:[#allocation9 + $0x18] sm:$0xff] }
 0x906   :  { %4765 = vst.msk [vmem:[#allocation9 + $0x20] sm:$0xff] %vm10239_vm9, %v4743_v57  ;;  %v5026_v0 = vpack.c.bf16 %v5019_v62, %v5018_v60  ;;  %vm10245_vm9 = vcmask 523712  }
 0x907   :  { %4712 = vst.msk [vmem:[#allocation9 + $0x28] sm:$0xff] %vm1948_vm12, %v4691_v58 }
 0x908   :  { %6341 = vmatmul.mubr.msk.bf16.gmra.mrb[64].mxu1 %vm10240_vm1, %v5026_v0  ;;  %vm10246_vm1 = vmmov %vm10243_vm13 }
 0x909   :  { %v4797_v3 = vpop.permute.xlu1 %4796  ;;  %v4745_v6 = vpop.permute.xlu0 %4744  ;;  %6344 = vmatprep.mubr.msk.bf16.mxu1 %vm6595_vm3, %v6587_v2 }
 0x90a   :  { %4819 = vst.msk [vmem:[#allocation9 + $0x20] sm:$0xff] %vm10231_vm2, %v4797_v3  ;;  %vm10247_vm2 = vcmask 589312  }
 0x90b   :  { %4766 = vst.msk [vmem:[#allocation9 + $0x28] sm:$0xff] %vm10241_vm6, %v4745_v6  ;;  %vm10248_vm6 = vmmov %vm10245_vm9 }
 0x90d   :  { %v4849_v46 = vpop.permute.xlu1 %4848  ;;  %v4799_v7 = vpop.permute.xlu0 %4798 }
 0x90e   :  { %4868 = vst.msk [vmem:[#allocation9 + $0x20] sm:$0xff] %vm10233_vm7, %v4849_v46  ;;  %vm10249_vm7 = vmmov %vm10247_vm2 }
 0x90f   :  { %4820 = vst.msk [vmem:[#allocation9 + $0x28] sm:$0xff] %vm10242_vm8, %v4799_v7  ;;  %vm10250_vm8 = vcmask 261312  }
 0x911   :  { %v4897_v8 = vpop.permute.xlu1 %4896  ;;  %v4851_v10 = vpop.permute.xlu0 %4850 }
 0x912   :  { %4916 = vst.msk [vmem:[#allocation9 + $0x20] sm:$0xff] %vm10243_vm13, %v4897_v8  ;;  %vm10251_vm13 = vcmask 588800  }
 0x913   :  { %4869 = vst.msk [vmem:[#allocation9 + $0x28] sm:$0xff] %vm10244_vm5, %v4851_v10  ;;  %vm10252_vm5 = vcmask 326912  }
 0x915   :  { %v4945_v11 = vpop.permute.xlu1 %4944  ;;  %v4899_v14 = vpop.permute.xlu0 %4898 }
 0x916   :  { %4964 = vst.msk [vmem:[#allocation9 + $0x20] sm:$0xff] %vm10245_vm9, %v4945_v11  ;;  %vm10253_vm9 = vmmov %vm10250_vm8 }
 0x917   :  { %4917 = vst.msk [vmem:[#allocation9 + $0x28] sm:$0xff] %vm10246_vm1, %v4899_v14  ;;  %vm10254_vm1 = vcmask 392512  }
 0x919   :  { %v4993_v9 = vpop.permute.xlu1 %4992  ;;  %v4947_v51 = vpop.permute.xlu0 %4946 }
 0x91a   :  { %5012 = vst.msk [vmem:[#allocation9 + $0x20] sm:$0xff] %vm10247_vm2, %v4993_v9  ;;  %vm10255_vm2 = vmmov %vm10252_vm5 }
 0x91b   :  { %4965 = vst.msk [vmem:[#allocation9 + $0x28] sm:$0xff] %vm10248_vm6, %v4947_v51  ;;  %vm10256_vm6 = vcmask 458112  }
 0x91d   :  { %v4995_v4 = vpop.permute.xlu0 %4994  ;;  %v4639_v22 = vpop.permute.xlu1 %4638 }
 0x91e   :  { %5013 = vst.msk [vmem:[#allocation9 + $0x28] sm:$0xff] %vm10249_vm7, %v4995_v4  ;;  %vm10257_vm7 = vmmov %vm10254_vm1 }
 0x91f   :  { %4659 = vst.msk [vmem:[#allocation9 + $0x30] sm:$0xff] %vm1892_vm15, %v4639_v22 }
 0x921   :  { %v4693_v63 = vpop.permute.xlu1 %4692  ;;  %v4641_v34 = vpop.permute.xlu0 %4640  ;;  %v5020_v12 = vld [vmem:[#allocation9 + $0x20] sm:$0xff] }
 0x922   :  { %4713 = vst.msk [vmem:[#allocation9 + $0x30] sm:$0xff] %vm1948_vm12, %v4693_v63 }
 0x923   :  { %4660 = vst.msk [vmem:[#allocation9 + $0x38] sm:$0xff] %vm1892_vm15, %v4641_v34 }
 0x925   :  { %v4747_v37 = vpop.permute.xlu1 %4746  ;;  %v4695_v55 = vpop.permute.xlu0 %4694  ;;  %v5021_v25 = vld [vmem:[#allocation9 + $0x28] sm:$0xff] }
 0x926   :  { %4767 = vst.msk [vmem:[#allocation9 + $0x30] sm:$0xff] %vm10250_vm8, %v4747_v37  ;;  %v5027_v36 = vpack.c.bf16 %v5021_v25, %v5020_v12  ;;  %vm10258_vm8 = vcmask 523712  }
 0x927   :  { %4714 = vst.msk [vmem:[#allocation9 + $0x38] sm:$0xff] %vm1948_vm12, %v4695_v55 }
 0x928   :  { %6345 = vmatmul.mubr.msk.bf16.gmra.mrb[68].mxu1 %vm10251_vm13, %v5027_v36  ;;  %vm10259_vm13 = vcmask 454016  }
 0x929   :  { %v4801_v47 = vpop.permute.xlu1 %4800  ;;  %v4749_v59 = vpop.permute.xlu0 %4748  ;;  %6348 = vmatprep.mubr.msk.bf16.mxu1 %vm6595_vm3, %v6587_v2 }
 0x92a   :  { %4821 = vst.msk [vmem:[#allocation9 + $0x30] sm:$0xff] %vm10252_vm5, %v4801_v47  ;;  %vm10260_vm5 = vcmask 589312  }
 0x92b   :  { %4768 = vst.msk [vmem:[#allocation9 + $0x38] sm:$0xff] %vm10253_vm9, %v4749_v59  ;;  %vm10261_vm9 = vcmask 518592  }
 0x92d   :  { %v4853_v13 = vpop.permute.xlu1 %4852  ;;  %v4803_v61 = vpop.permute.xlu0 %4802 }
 0x92e   :  { %4870 = vst.msk [vmem:[#allocation9 + $0x30] sm:$0xff] %vm10254_vm1, %v4853_v13  ;;  %vm10262_vm1 = vcmask 583168  }
 0x92f   :  { %4822 = vst.msk [vmem:[#allocation9 + $0x38] sm:$0xff] %vm10255_vm2, %v4803_v61  ;;  %vm10263_vm2 = vcmask 255168  }
 0x931   :  { %v4901_v15 = vpop.permute.xlu1 %4900  ;;  %v4855_v16 = vpop.permute.xlu0 %4854 }
 0x932   :  { %4918 = vst.msk [vmem:[#allocation9 + $0x30] sm:$0xff] %vm10256_vm6, %v4901_v15  ;;  %vm10264_vm6 = vcmask 319744  }
 0x933   :  { %4871 = vst.msk [vmem:[#allocation9 + $0x38] sm:$0xff] %vm10257_vm7, %v4855_v16  ;;  %vm10265_vm7 = vcmask 588800  }
 0x935   :  { %v4949_v17 = vpop.permute.xlu1 %4948  ;;  %v4903_v18 = vpop.permute.xlu0 %4902 }
 0x936   :  { %4966 = vst.msk [vmem:[#allocation9 + $0x30] sm:$0xff] %vm10258_vm8, %v4949_v17  ;;  %vm10266_vm8 = vmmov %vm10265_vm7 }
 0x937   :  { %4919 = vst.msk [vmem:[#allocation9 + $0x38] sm:$0xf] %vm10259_vm13, %v4903_v18  ;;  %vm10267_vm13 = vmmov %vm10265_vm7 }
 0x938   :  { %6374 = vmatprep.mubr.msk.f32.mxu0 %vm10267_vm13, %v5197_v41  ;;  %v5200_v41 = vld [vmem:[%s10096_s4 + $0x18] sm:$0xff] }
 0x939   :  { %v4997_v20 = vpop.permute.xlu1 %4996  ;;  %v4951_v21 = vpop.permute.xlu0 %4950 }
 0x93a   :  { %5014 = vst.msk [vmem:[#allocation9 + $0x30] sm:$0xff] %vm10260_vm5, %v4997_v20  ;;  %vm10268_vm5 = vmmov %vm10265_vm7 }
 0x93b   :  { %4967 = vst.msk [vmem:[#allocation9 + $0x38] sm:$0x7] %vm10261_vm9, %v4951_v21  ;;  %vm10269_vm9 = vmmov %vm10268_vm5 }
 0x93d   :  { %v4643_v23 = vpop.permute.xlu1 %4642  ;;  %v4999_v26 = vpop.permute.xlu0 %4998 }
 0x93e   :  { %4661 = vst.msk [vmem:[#allocation9 + $0x40] sm:$0x7f] %vm1901_vm14, %v4643_v23 }
 0x93f   :  { %5015 = vst.msk [vmem:[#allocation9 + $0x38] sm:$0x3] %vm10262_vm1, %v4999_v26  ;;  %vm10270_vm1 = vmmov %vm10268_vm5 }
 0x941   :  { %v4751_v27 = vpop.permute.xlu1 %4750  ;;  %v4697_v19 = vpop.permute.xlu0 %4696  ;;  %v5022_v29 = vld [vmem:[#allocation9 + $0x30] sm:$0xff] }
 0x942   :  { %4715 = vst.msk [vmem:[#allocation9 + $0x40] sm:$0x3f] %vm1957_vm11, %v4697_v19 }
 0x943   :  { %4769 = vst.msk [vmem:[#allocation9 + $0x40] sm:$0x3] %vm10263_vm2, %v4751_v27  ;;  %vm10271_vm2 = vcmask 64512  }
 0x944   :  { %vm10275_vm13 = vmmov %vm10271_vm2 }
 0x945   :  { %v4805_v28 = vpop.permute.xlu0 %4804 }
 0x946   :  { %v5023_v30 = vld [vmem:[#allocation9 + $0x38] sm:$0xff]  ;;  %4823 = vst.msk [vmem:[#allocation9 + $0x40] sm:$0x1] %vm10264_vm6, %v4805_v28  ;;  %vm10272_vm6 = vmmov %vm10271_vm2 }
 0x947   :  { %v5028_v31 = vpack.c.bf16 %v5023_v30, %v5022_v29 }
 0x949   :  { %6349 = vmatmul.mubr.msk.bf16.gmra.mrb[72].mxu1 %vm10265_vm7, %v5028_v31  ;;  %vm10273_vm7 = vmmov %vm10271_vm2 }
 0x94a   :  { %6352 = vmatprep.mubr.msk.bf16.mxu1 %vm6595_vm3, %v6587_v2 }
 0x94d   :  { %v5024_v32 = vld [vmem:[#allocation9 + $0x40] sm:$0xff] }
 0x94e   :  { %v5029_v33 = vpack.c.bf16 %v5024_v32, %v5024_v32  ;;  %v5198_v32 = vld [vmem:[%s10096_s4 + $0x8] sm:$0xff] }
 0x951   :  { %6353 = vmatmul.mubr.msk.bf16.gmra.mrb[76].mxu1 %vm10266_vm8, %v5029_v33  ;;  %v5199_v33 = vld [vmem:[%s10096_s4 + $0x10] sm:$0xff]  ;;  %vm10274_vm8 = vmmov %vm10271_vm2 }
 0x952   :  { %6402 = vmatprep.mubr.msk.f32.mxu1 %vm6595_vm3, %v6587_v2 }
 0x9bb   :  { %v5118_v43 = vpop.f32.mrb[60].mxu1 }
 0x9bc   :  { %v5163_v45 = vmul.f32 %v6015_v42, %v5118_v43  ;;  %v6338_v48 = vpop.f32.mrb[61].mxu1 }
 0x9bd   :  { %v5121_v49 = vpop.f32.mrb[62].mxu1 }
 0x9be   :  { %v5179_v50 = vadd.f32 %v6016_v44, %v5163_v45  ;;  %v5164_v52 = vmul.f32 %v6015_v42, %v5121_v49  ;;  %v6339_v53 = vpop.f32.mrb[63].mxu1 }
 0x9c0   :  { %v5180_v54 = vadd.f32 %v6016_v44, %v5164_v52  ;;  %v5188_v56 = vmax.f32 %v5179_v50, 0.0 }
 0x9c2   :  { %v5189_v57 = vmax.f32 %v5180_v54, 0.0 }
 0x9c4   :  { %v6514_v58 = vpack.c.bf16 %v5189_v57, %v5188_v56 }
 0x9c6   :  { %6515 = vmatprep.subr.bf16.mxu0 %v6514_v58 }
 0x9c7   :  { %6517 = vmatpush3.bf16.msra.mxu0 %v6514_v58 }
 0x9db   :  { %v5126_v60 = vpop.f32.mrb[64].mxu1 }
 0x9dc   :  { %v5165_v62 = vmul.f32 %v6015_v42, %v5126_v60  ;;  %v6342_v0 = vpop.f32.mrb[65].mxu1 }
 0x9dd   :  { %v5129_v3 = vpop.f32.mrb[66].mxu1 }
 0x9de   :  { %v5181_v6 = vadd.f32 %v6016_v44, %v5165_v62  ;;  %v5166_v46 = vmul.f32 %v6015_v42, %v5129_v3  ;;  %v6343_v7 = vpop.f32.mrb[67].mxu1 }
 0x9e0   :  { %v5182_v8 = vadd.f32 %v6016_v44, %v5166_v46  ;;  %v5190_v10 = vmax.f32 %v5181_v6, 0.0 }
 0x9e2   :  { %v5191_v11 = vmax.f32 %v5182_v8, 0.0 }
 0x9e4   :  { %v6518_v14 = vpack.c.bf16 %v5191_v11, %v5190_v10 }
 0x9e6   :  { %6519 = vmatprep.subr.bf16.mxu0 %v6518_v14 }
 0x9e7   :  { %6521 = vmatpush3.bf16.msra.mxu0 %v6518_v14 }
 0x9fb   :  { %v5134_v9 = vpop.f32.mrb[68].mxu1 }
 0x9fc   :  { %v5167_v51 = vmul.f32 %v6015_v42, %v5134_v9  ;;  %v6346_v4 = vpop.f32.mrb[69].mxu1 }
 0x9fd   :  { %v5137_v22 = vpop.f32.mrb[70].mxu1 }
 0x9fe   :  { %v5183_v63 = vadd.f32 %v6016_v44, %v5167_v51  ;;  %v5168_v34 = vmul.f32 %v6015_v42, %v5137_v22  ;;  %v6347_v37 = vpop.f32.mrb[71].mxu1  ;;  %v6582_v51 = vld [vmem:[%s9983_s17] sm:$0xff]   ;;  %v6583_v22 = vld [vmem:[%s9983_s17 + $0x8] sm:$0xff]  }
 0x9ff   :  { %v6584_v37 = vld [vmem:[%s9983_s17 + $0x10] sm:$0xff]  }
 0xa00   :  { %v5184_v55 = vadd.f32 %v6016_v44, %v5168_v34  ;;  %v5192_v12 = vmax.f32 %v5183_v63, 0.0 }
 0xa02   :  { %v5193_v25 = vmax.f32 %v5184_v55, 0.0  ;;  %v6585_v55 = vld [vmem:[%s9983_s17 + $0x18] sm:$0xff]  }
 0xa04   :  { %v6522_v36 = vpack.c.bf16 %v5193_v25, %v5192_v12  ;;  %v6586_v12 = vld [vmem:[%s9983_s17 + $0x20] ss:$0 sps:$4 sm:$0xff]  }
 0xa06   :  { %6523 = vmatprep.subr.bf16.mxu0 %v6522_v36 }
 0xa07   :  { %6525 = vmatpush3.bf16.msra.mxu0 %v6522_v36 }
 0xa1c   :  { %v5142_v47 = vpop.f32.mrb[72].mxu1 }
 0xa1d   :  { %v5169_v59 = vmul.f32 %v6015_v42, %v5142_v47  ;;  %v6350_v13 = vpop.f32.mrb[73].mxu1 }
 0xa1e   :  { %v5145_v61 = vpop.f32.mrb[74].mxu1 }
 0xa1f   :  { %v5185_v15 = vadd.f32 %v6016_v44, %v5169_v59  ;;  %v5170_v16 = vmul.f32 %v6015_v42, %v5145_v61  ;;  %v6351_v17 = vpop.f32.mrb[75].mxu1 }
 0xa21   :  { %v5186_v18 = vadd.f32 %v6016_v44, %v5170_v16  ;;  %v5194_v20 = vmax.f32 %v5185_v15, 0.0 }
 0xa23   :  { %v5195_v21 = vmax.f32 %v5186_v18, 0.0 }
 0xa24   :  { %v5150_v23 = vpop.f32.mrb[76].mxu1 }
 0xa25   :  { %v5171_v26 = vmul.f32 %v6015_v42, %v5150_v23  ;;  %v6354_v27 = vpop.f32.mrb[77].mxu1  ;;  %v6526_v19 = vpack.c.bf16 %v5195_v21, %v5194_v20 }
 0xa26   :  { %v5153_v28 = vpop.f32.mrb[78].mxu1 }
 0xa27   :  { %v5187_v29 = vadd.f32 %v6016_v44, %v5171_v26  ;;  %v6355_v30 = vpop.f32.mrb[79].mxu1  ;;  %6527 = vmatprep.subr.bf16.mxu0 %v6526_v19 }
 0xa28   :  { %6529 = vmatpush3.bf16.msra.mxu0 %v6526_v19 }
 0xa29   :  { %v5196_v31 = vmax.f32 %v5187_v29, 0.0 }
 0xa2b   :  { %6372 = vmatprep.subr.mxu0 %v5196_v31 }
 0xa2c   :  { %6373 = vmatpush3.msra.mxu0 %v5196_v31 }
 0xa2d   :  { %6375 = vmatmul.mubr.msk.f32.vlgmr.msra.gmra.mrb[108].mxu0 %vm10268_vm5, %v5198_v32  ;;  %vm10276_vm5 = vmmov %vm10271_vm2  ;;  %6380 = vmatprep.subr.bf16.mxu0 %v6582_v51 }
 0xa2e   :  { %6377 = vmatprep.mubr.msk.f32.mxu0 %vm10269_vm9, %v5199_v33  ;;  %vm10277_vm9 = vmmov %vm10271_vm2  ;;  %6381 = vmatpush3.bf16.msra.mxu0 %v6582_v51 }
 0xa2f   :  { %6382 = vmatprep.subr.bf16.mxu0 %v6583_v22 }
 0xa31   :  { %6378 = vmatmul.mubr.msk.f32.gmra.mrb[110].mxu0 %vm10270_vm1, %v5200_v41  ;;  %vm10278_vm1 = vmmov %vm10271_vm2 }
 0xa32   :  { %6383 = vmatpush3.bf16.msra.mxu0 %v6583_v22 }
 0xa33   :  { %6384 = vmatprep.subr.bf16.mxu0 %v6584_v37 }
 0xa36   :  { %6385 = vmatpush3.bf16.msra.mxu0 %v6584_v37 }
 0xa37   :  { %6386 = vmatprep.subr.bf16.mxu0 %v6585_v55 }
 0xa3a   :  { %6387 = vmatpush3.bf16.msra.mxu0 %v6585_v55  ;;  %v5610_v55 = vld [vmem:[%s9986_s22] sm:$0x3] }
 0xb00   :  { %v6376_v42 = vpop.f32.mrb[108].mxu0 }
 0xb01   :  { %5299 = vst.msk [vmem:[#allocation10 + $0x8] sm:$0xff] %vm10271_vm2, %v6376_v42  ;;  %v5279_v43 = vpop.f32.mrb[109].mxu0  ;;  %vm10279_vm2 = vcmask 1043456  }
 0xb02   :  { %5298 = vst.msk [vmem:[#allocation10] sm:$0xff] %vm10272_vm6, %v5279_v43  ;;  %6545 = vmatprep.subr.msk.bf16.mxu0 %vm10279_vm2, %v6586_v12  ;;  %vm10280_vm6 = vmmov %vm10279_vm2 }
 0xb03   :  { %v5537_v25 = vsel %vm10280_vm6, %v6586_v12, 0  ;;  %vm10294_vm6 = vcmask 589312   ;;  %v2870_v12 = vld [vmem:[%s9986_s22] sm:$0x3] }
 0xb04   :  { %v6379_v44 = vpop.f32.mrb[110].mxu0  ;;  %6389 = vmatpush3.bf16.msra.mxu0 %v5537_v25  ;;  %v5758_v25 = vld [vmem:[%s10301_s8] sm:$0xff] }
 0xb05   :  { %5301 = vst.msk [vmem:[#allocation10 + $0x18] sm:$0xff] %vm10273_vm7, %v6379_v44  ;;  %v5289_v45 = vpop.f32.mrb[111].mxu0  ;;  %6416 = vmatprep.subr.mxu0 %v6587_v2  ;;  %vm10281_vm7 = vcmask 261312  }
 0xb06   :  { %5300 = vst.msk [vmem:[#allocation10 + $0x10] sm:$0xff] %vm10274_vm8, %v5289_v45  ;;  %vm10282_vm8 = vcmask 326912  }
 0xb08   :  { %v5434_v48 = vld [vmem:[#allocation10 + $0x8] sm:$0xff] }
 0xb09   :  { %5440 = vrot.lane.b32.xlu0 %v5434_v48, %s10160_s28  ;;  %v5314_v49 = vld [vmem:[#allocation10 + $0x1] sm:$0xff]  ;;  %5311 = vst.msk [vmem:[#allocation11 + $0x8] sm:$0xff] %vm10275_vm13, %v5434_v48  ;;  %vm10283_vm13 = vcmask 392512  }
 0xb0a   :  { %5322 = vrot.lane.b32.xlu1 %v5314_v49, %s10074_s2  ;;  %v5306_v50 = vld [vmem:[#allocation10] sm:$0xff] }
 0xb0b   :  { %5310 = vst.msk [vmem:[#allocation11] sm:$0xff] %vm10276_vm5, %v5306_v50  ;;  %v5338_v52 = vld [vmem:[#allocation10 + $0x2] sm:$0xff]  ;;  %vm10284_vm5 = vcmask 458112  }
 0xb0c   :  { %v5436_v53 = vld [vmem:[#allocation10 + $0x18] sm:$0xff]  ;;  %v5362_v54 = vld [vmem:[#allocation10 + $0x4] sm:$0xff] }
 0xb0d   :  { %5346 = vrot.lane.b32.xlu0 %v5338_v52, %s10071_s12  ;;  %5313 = vst.msk [vmem:[#allocation11 + $0x18] sm:$0xff] %vm10277_vm9, %v5436_v53  ;;  %v5386_v56 = vld [vmem:[#allocation10 + $0x5] sm:$0xff]  ;;  %v5435_v57 = vld [vmem:[#allocation10 + $0x10] sm:$0xff]  ;;  %v5454_v60 = vld [vmem:[#allocation10 + $0x19] sm:$0x7f] }
 0xb0e   :  { %5370 = vrot.lane.b32.xlu1 %v5362_v54, %s10073_s11  ;;  %5312 = vst.msk [vmem:[#allocation11 + $0x10] sm:$0xff] %vm10278_vm1, %v5435_v57  ;;  %v5410_v58 = vld [vmem:[#allocation10 + $0x6] sm:$0xff]  ;;  %v5317_v62 = vld [vmem:[#allocation10 + $0x19] sm:$0x7f]  ;;  %v5316_v0 = vld [vmem:[#allocation10 + $0x11] sm:$0xff] }
 0xb0f   :  { %v5341_v3 = vld [vmem:[#allocation10 + $0x1a] sm:$0x3f]  ;;  %v5339_v6 = vld [vmem:[#allocation10 + $0xa] sm:$0xff]  ;;  %v5340_v9 = vld [vmem:[#allocation10 + $0x12] sm:$0xff] }
 0xb10   :  { %v5365_v46 = vld [vmem:[#allocation10 + $0x1c] sm:$0xf]  ;;  %v5364_v7 = vld [vmem:[#allocation10 + $0x14] sm:$0xff]  ;;  %v5315_v11 = vld [vmem:[#allocation10 + $0x9] sm:$0xff] }
 0xb11   :  { %5394 = vrot.lane.b32.xlu0 %v5386_v56, %s10076_s27  ;;  %v5389_v8 = vld [vmem:[#allocation10 + $0x1d] sm:$0x7]  ;;  %v5387_v10 = vld [vmem:[#allocation10 + $0xd] sm:$0xff]  ;;  %v5388_v14 = vld [vmem:[#allocation10 + $0x15] sm:$0xff] }
 0xb12   :  { %5444 = vrot.lane.b32.xlu1 %v5436_v53, %s10160_s28  ;;  %v5411_v4 = vld [vmem:[#allocation10 + $0xe] sm:$0xff]  ;;  %v5412_v34 = vld [vmem:[#allocation10 + $0x16] sm:$0xff]  ;;  %v5413_v36 = vld [vmem:[#allocation10 + $0x1e] sm:$0x3] }
 0xb13   :  { %v5363_v63 = vld [vmem:[#allocation10 + $0xc] sm:$0xff]  ;;  %v5472_v47 = vld [vmem:[#allocation10 + $0x1a] sm:$0x3f]  ;;  %vm10289_vm9 = vmmov %vm10283_vm13 }
 0xb14   :  { %vm10291_vm1 = vmmov %vm10284_vm5 }
 0xb15   :  { %5418 = vrot.lane.b32.xlu0 %v5410_v58, %s10166_s13  ;;  %vm10293_vm2 = vmmov %vm10291_vm1 }
 0xb16   :  { %5462 = vrot.lane.b32.xlu1 %v5454_v60, %s10167_s26 }
 0xb19   :  { %5328 = vrot.lane.b32.xlu0 %v5317_v62, %s10074_s2 }
 0xb1a   :  { %5326 = vrot.lane.b32.xlu1 %v5316_v0, %s10074_s2 }
 0xb1d   :  { %5352 = vrot.lane.b32.xlu0 %v5341_v3, %s10071_s12 }
 0xb1e   :  { %5348 = vrot.lane.b32.xlu1 %v5339_v6, %s10071_s12 }
 0xb21   :  { %5376 = vrot.lane.b32.xlu0 %v5365_v46, %s10073_s11 }
 0xb22   :  { %5374 = vrot.lane.b32.xlu1 %v5364_v7, %s10073_s11  ;;  %v6029_v7 = vld [vmem:[%s9985_s19] ss:$0 sm:$0xff] }
 0xb25   :  { %5400 = vrot.lane.b32.xlu0 %v5389_v8, %s10076_s27 }
 0xb26   :  { %5396 = vrot.lane.b32.xlu1 %v5387_v10, %s10076_s27 }
 0xb29   :  { %5324 = vrot.lane.b32.xlu0 %v5315_v11, %s10074_s2 }
 0xb2a   :  { %5398 = vrot.lane.b32.xlu1 %v5388_v14, %s10076_s27 }
 0xb2d   :  { %5350 = vrot.lane.b32.xlu0 %v5340_v9, %s10071_s12 }
 0xb2e   :  { %5420 = vrot.lane.b32.xlu1 %v5411_v4, %s10166_s13 }
 0xb31   :  { %5372 = vrot.lane.b32.xlu0 %v5363_v63, %s10073_s11 }
 0xb32   :  { %5422 = vrot.lane.b32.xlu1 %v5412_v34, %s10166_s13 }
 0xb35   :  { %5458 = vrot.lane.b32.xlu0 %v5315_v11, %s10167_s26 }
 0xb36   :  { %5442 = vrot.lane.b32.xlu1 %v5435_v57, %s10160_s28 }
 0xb39   :  { %5476 = vrot.lane.b32.xlu0 %v5339_v6, %s10168_s1 }
 0xb3a   :  { %5460 = vrot.lane.b32.xlu1 %v5316_v0, %s10167_s26  ;;  %v6028_v0 = vld [vmem:[%s9984_s18] ss:$0 sm:$0xff] }
 0xb3d   :  { %5424 = vrot.lane.b32.xlu0 %v5413_v36, %s10166_s13 }
 0xb3e   :  { %5478 = vrot.lane.b32.xlu1 %v5340_v9, %s10168_s1 }
 0xb42   :  { %5480 = vrot.lane.b32.xlu1 %v5472_v47, %s10168_s1 }
 0xb7b   :  { %v5441_v59 = vpop.permute.xlu0 %5440 }
 0xb7c   :  { %v5323_v13 = vpop.permute.xlu1 %5322 }
 0xb7d   :  { %5334 = vst.msk [vmem:[#allocation11] sm:$0xff] %vm1892_vm15, %v5323_v13 }
 0xb7f   :  { %v5347_v61 = vpop.permute.xlu0 %5346 }
 0xb80   :  { %5358 = vst.msk [vmem:[#allocation11] sm:$0xff] %vm1948_vm12, %v5347_v61  ;;  %v5371_v15 = vpop.permute.xlu1 %5370 }
 0xb81   :  { %5382 = vst.msk [vmem:[#allocation11] sm:$0xff] %vm10281_vm7, %v5371_v15 }
 0xb83   :  { %v5395_v16 = vpop.permute.xlu0 %5394 }
 0xb84   :  { %5406 = vst.msk [vmem:[#allocation11] sm:$0xff] %vm10282_vm8, %v5395_v16  ;;  %v5445_v17 = vpop.permute.xlu1 %5444 }
 0xb87   :  { %v5419_v18 = vpop.permute.xlu0 %5418 }
 0xb88   :  { %5430 = vst.msk [vmem:[#allocation11] sm:$0xff] %vm10283_vm13, %v5419_v18  ;;  %v5463_v20 = vpop.permute.xlu1 %5462  ;;  %vm10297_vm13 = vmmov %vm10294_vm6 }
 0xb89   :  { %5449 = vst.msk [vmem:[#allocation11] sm:$0xff] %vm10284_vm5, %v5441_v59  ;;  %vm10299_vm5 = vcmask 588800  }
 0xb8b   :  { %v5329_v21 = vpop.permute.xlu0 %5328 }
 0xb8c   :  { %5337 = vst.msk [vmem:[#allocation11 + $0x18] sm:$0x7f] %vm1901_vm14, %v5329_v21  ;;  %v5327_v23 = vpop.permute.xlu1 %5326  ;;  %vm10286_vm14 = vmmov %vm10282_vm8 }
 0xb8d   :  { %5336 = vst.msk [vmem:[#allocation11 + $0x10] sm:$0xff] %vm1892_vm15, %v5327_v23 }
 0xb8f   :  { %v5353_v26 = vpop.permute.xlu0 %5352 }
 0xb90   :  { %5361 = vst.msk [vmem:[#allocation11 + $0x18] sm:$0x3f] %vm1957_vm11, %v5353_v26  ;;  %v5349_v27 = vpop.permute.xlu1 %5348  ;;  %vm10285_vm11 = vmmov %vm10281_vm7 }
 0xb93   :  { %v5377_v19 = vpop.permute.xlu0 %5376 }
 0xb94   :  { %5385 = vst.msk [vmem:[#allocation11 + $0x18] sm:$0xf] %vm2640_vm4, %v5377_v19  ;;  %v5375_v28 = vpop.permute.xlu1 %5374  ;;  %vm10287_vm4 = vmmov %vm10281_vm7 }
 0xb97   :  { %v5401_v29 = vpop.permute.xlu0 %5400 }
 0xb98   :  { %5409 = vst.msk [vmem:[#allocation11 + $0x18] sm:$0x7] %vm2665_vm10, %v5401_v29  ;;  %v5397_v30 = vpop.permute.xlu1 %5396  ;;  %vm10288_vm10 = vmmov %vm10282_vm8  ;;  %vm10296_vm8 = vcmask 386368  }
 0xb9b   :  { %v5325_v31 = vpop.permute.xlu0 %5324 }
 0xb9c   :  { %5335 = vst.msk [vmem:[#allocation11 + $0x8] sm:$0xff] %vm1892_vm15, %v5325_v31  ;;  %v5399_v32 = vpop.permute.xlu1 %5398  ;;  %vm10290_vm15 = vmmov %vm10289_vm9 }
 0xb9d   :  { %5359 = vst.msk [vmem:[#allocation11 + $0x8] sm:$0xff] %vm1948_vm12, %v5349_v27 }
 0xb9f   :  { %v5351_v33 = vpop.permute.xlu0 %5350 }
 0xba0   :  { %5360 = vst.msk [vmem:[#allocation11 + $0x10] sm:$0xff] %vm1948_vm12, %v5351_v33  ;;  %v5421_v41 = vpop.permute.xlu1 %5420  ;;  %vm10292_vm12 = vcmask 523712  }
 0xba1   :  { %5384 = vst.msk [vmem:[#allocation11 + $0x10] sm:$0xff] %vm10285_vm11, %v5375_v28  ;;  %vm10295_vm7 = vmmov %vm10292_vm12 }
 0xba2   :  { %5408 = vst.msk [vmem:[#allocation11 + $0x10] sm:$0xff] %vm10286_vm14, %v5399_v32  ;;  %vm10300_vm11 = vmmov %vm10299_vm5  ;;  %vm5611_vm14 = vcmask 261120  }
 0xba3   :  { %v5373_v42 = vpop.permute.xlu0 %5372 }
 0xba4   :  { %5383 = vst.msk [vmem:[#allocation11 + $0x8] sm:$0xff] %vm10287_vm4, %v5373_v42  ;;  %v5423_v43 = vpop.permute.xlu1 %5422  ;;  %vm10302_vm4 = vcmask 64512  }
 0xba5   :  { %5407 = vst.msk [vmem:[#allocation11 + $0x8] sm:$0xff] %vm10288_vm10, %v5397_v30  ;;  %vm10306_vm10 = vmmov %vm10302_vm4 }
 0xba6   :  { %5432 = vst.msk [vmem:[#allocation11 + $0x10] sm:$0xff] %vm10289_vm9, %v5423_v43 }
 0xba7   :  { %5431 = vst.msk [vmem:[#allocation11 + $0x8] sm:$0xff] %vm10290_vm15, %v5421_v41  ;;  %v5459_v44 = vpop.permute.xlu0 %5458 }
 0xba8   :  { %5451 = vst.msk [vmem:[#allocation11 + $0x10] sm:$0xff] %vm10291_vm1, %v5445_v17  ;;  %v5443_v45 = vpop.permute.xlu1 %5442 }
 0xba9   :  { %5469 = vst.msk [vmem:[#allocation11 + $0x10] sm:$0x7f] %vm2727_vm0, %v5463_v20  ;;  %vm10298_vm0 = vcmask 587264  }
 0xbaa   :  { %5467 = vst.msk [vmem:[#allocation11] sm:$0xff] %vm10292_vm12, %v5459_v44 }
 0xbab   :  { %5450 = vst.msk [vmem:[#allocation11 + $0x8] sm:$0xff] %vm10293_vm2, %v5443_v45  ;;  %v5477_v48 = vpop.permute.xlu0 %5476 }
 0xbac   :  { %5485 = vst.msk [vmem:[#allocation11] sm:$0xff] %vm10294_vm6, %v5477_v48  ;;  %v5461_v49 = vpop.permute.xlu1 %5460 }
 0xbad   :  { %5468 = vst.msk [vmem:[#allocation11 + $0x8] sm:$0xff] %vm10295_vm7, %v5461_v49 }
 0xbaf   :  { %v5425_v50 = vpop.permute.xlu0 %5424 }
 0xbb0   :  { %5433 = vst.msk [vmem:[#allocation11 + $0x18] sm:$0x3] %vm10296_vm8, %v5425_v50  ;;  %v5479_v52 = vpop.permute.xlu1 %5478 }
 0xbb1   :  { %5486 = vst.msk [vmem:[#allocation11 + $0x8] sm:$0xff] %vm10297_vm13, %v5479_v52 }
 0xbb3   :  { %v5488_v54 = vld [vmem:[#allocation11] sm:$0xff] }
 0xbb4   :  { %v5481_v53 = vpop.permute.xlu1 %5480 }
 0xbb5   :  { %5487 = vst.msk [vmem:[#allocation11 + $0x10] sm:$0x3f] %vm10298_vm0, %v5481_v53 }
 0xbb7   :  { %v5491_v60 = vld [vmem:[#allocation11 + $0x18] sm:$0xff] }
 0xbb8   :  { %v5489_v56 = vld [vmem:[#allocation11 + $0x8] sm:$0xff] }
 0xbb9   :  { %v5492_v57 = vpack.c.bf16 %v5489_v56, %v5488_v54 }
 0xbbb   :  { %6390 = vmatprep.mubr.msk.bf16.mxu0 %vm10299_vm5, %v5492_v57 }
 0xbbc   :  { %v5490_v58 = vld [vmem:[#allocation11 + $0x10] sm:$0xff] }
 0xbbd   :  { %v5493_v62 = vpack.c.bf16 %v5491_v60, %v5490_v58 }
 0xbbf   :  { %6391 = vmatmul.mubr.msk.bf16.vlgmr.msra.gmra.mrb[112].mxu0 %vm10300_vm11, %v5493_v62 }
 0xbc0   :  { %6418 = vmatprep.mubr.msk.f32.mxu0 %vm6595_vm3, %v6587_v2  ;;  %6417 = vmatpush3.msra.mxu0 %v5758_v25 }
 0xbc1   :  { %6421 = vmatprep.subr.mxu0 %v6587_v2 }
 0xc92   :  { %v6392_v3 = vpop.f32.mrb[112].mxu0 }
 0xc93   :  { %v5597_v6 = vmul.f32 %v6392_v3, %v6028_v0  ;;  %v5573_v46 = vpop.f32.mrb[113].mxu0 }
 0xc94   :  { %v5595_v8 = vmul.f32 %v6028_v0, %v5573_v46  ;;  %v6393_v10 = vpop.f32.mrb[114].mxu0 }
 0xc95   :  { %v5598_v11 = vmul.f32 %v6393_v10, %v6028_v0  ;;  %v5576_v14 = vpop.f32.mrb[115].mxu0  ;;  %v5608_v51 = vadd.f32 %v6029_v7, %v5597_v6 }
 0xc96   :  { %v5596_v9 = vmul.f32 %v6028_v0, %v5576_v14  ;;  %v5606_v22 = vadd.f32 %v6029_v7, %v5595_v8 }
 0xc97   :  { %v5609_v4 = vadd.f32 %v6029_v7, %v5598_v11 }
 0xc98   :  { %v5607_v63 = vadd.f32 %v6029_v7, %v5596_v9 }
 0xc99   :  { %v6534_v34 = vpack.c.bf16 %v5609_v4, %v5608_v51 }
 0xc9a   :  { %v6531_v37 = vpack.c.bf16 %v5607_v63, %v5606_v22 }
 0xc9c   :  { %6532 = vmatpush3.bf16.msra.mxu1 %v6531_v37 }
 0xc9d   :  { %6533 = vmatprep.subr.bf16.mxu1 %v6597_v5 }
 0xca0   :  { %6535 = vmatpush3.bf16.msra.mxu1 %v6534_v34 }
 0xca1   :  { %6536 = vmatprep.subr.bf16.mxu1 %v6597_v5 }
 0xca3   :  { %6403 = vmatmul.mubr.msk.f32.vlgmr.msra.gmra.mrb[80].mxu1 %vm5611_vm14, %v5610_v55 }
 0xca4   :  { %6538 = vmatpush3.bf16.msra.mxu1 %v6537_v1  ;;  %6413 = vmatprep.mubr.msk.f32.mxu1 %vm6595_vm3, %v6587_v2 }
 0xca5   :  { %6539 = vmatprep.subr.bf16.mxu1 %v6597_v5  ;;  %v5839_v5 = vld [vmem:[%s10303_s30] sm:$0xff] }
 0xca8   :  { %6541 = vmatpush3.bf16.msra.mxu1 %v6540_v40 }
 0xcab   :  { %6414 = vmatmul.mubr.msk.f32.vlgmr.msra.gmra.mrb[80].mxu1 %vm5611_vm14, %v2870_v12 }
 0xd7e   :  { %v5754_v38 = vpop.f32.mrb[80].mxu1 }
 0xd7f   :  { %v6415_v39 = vpop.f32.mrb[81].mxu1  ;;  %6419 = vmatmul.mubr.msk.f32.vlgmr.msra.gmra.mrb[116].mxu0 %vm10302_vm4, %v5754_v38 }
 0xd80   :  { %6423 = vmatprep.mubr.msk.f32.mxu0 %vm6595_vm3, %v6587_v2  ;;  %6422 = vmatpush3.msra.mxu0 %v5839_v5  ;;  %v6034_v2 = vld [vmem:[#allocation12] ss:$0 sm:$0xff]  ;;  %vm5920_vm3 = vcmask 1024  }
 0xe52   :  { %v5835_v40 = vpop.f32.mrb[116].mxu0 }
 0xe53   :  { %v5836_v1 = vadd.f32 %v6032_v24, %v5835_v40  ;;  %v6420_v36 = vpop.f32.mrb[117].mxu0 }
 0xe55   :  { %6424 = vmatmul.mubr.msk.f32.vlgmr.msra.gmra.mrb[118].mxu0 %vm10306_vm10, %v5836_v1 }
 0xf28   :  { %v5916_v47 = vpop.f32.mrb[118].mxu0 }
 0xf29   :  { %v5917_v59 = vadd.f32 %v6034_v2, %v5916_v47  ;;  %v6425_v13 = vpop.f32.mrb[119].mxu0 }
 0xf2b   :  { %5921 = vst.msk [vmem:[%s10307_s21] sm:$0x3] %vm5920_vm3, %v5917_v59 }

</bundles_post_ra>
